<compile_context>
chip_gen: v5e
topology: v5e:2x2
jax: 0.10.0
libtpu: 0.0.40
codegen_flags: <defaults>
</compile_context>

<pallas_src>
import jax
import jax.numpy as jnp
from jax import lax
from jax.experimental import pallas as pl
from jax.experimental.pallas import tpu as pltpu

_INV_SQRT2 = 0.7071067811865476


def residual_ff_kernel(x_ref, mean_ref, var_ref, w1_ref, b1_ref, w2_ref, b2_ref,
                       o_ref):
    x = x_ref[...]                                           # [TB, H] f32
    # RSNorm (eval): standardize with running statistics.
    # rsqrt over the [1, H] stats row goes to the EUP (free slot) instead of a
    # full-tile VALU divide.
    inv_std = lax.rsqrt(var_ref[...] + 1e-5)                 # [1, H] f32
    norm = (x - mean_ref[...]) * inv_std                     # [TB, H] f32

    # ff1: [TB, H] @ [H, 4H] (bf16 MXU inputs, f32 accumulation) + bias (f32)
    h = jnp.dot(norm.astype(w1_ref.dtype), w1_ref[...],
                preferred_element_type=jnp.float32)
    h = h + b1_ref[...]

    # exact GELU (matches torch nn.GELU default), kept in f32.
    h = 0.5 * h * (1.0 + lax.erf(h * _INV_SQRT2))

    # dropout: identity in eval mode.

    # ff2: [TB, 4H] @ [4H, H] (bf16 MXU inputs, f32 accumulation) + bias (f32)
    h2 = jnp.dot(h.astype(w2_ref.dtype), w2_ref[...],
                 preferred_element_type=jnp.float32)
    h2 = h2 + b2_ref[...]

    # second dropout: identity in eval mode; residual add in f32.
    o_ref[...] = (x + h2).astype(o_ref.dtype)


def residual_ff_block(x, running_mean, running_var, w1, b1, w2, b2, *, tb=256):
    B, H = x.shape
    H4 = w1.shape[1]
    tb = min(tb, B)
    grid = (pl.cdiv(B, tb),)

    itemsize = lambda a: a.size * a.dtype.itemsize
    # VMEM plan: resident weights/biases/stats + double-buffered x & out tiles
    # + the [TB, 4H] f32 intermediate + headroom. Never below the 32 MiB
    # default; capped at v7x's 64 MiB physical VMEM per TensorCore.
    resident = (itemsize(w1) + itemsize(w2) + itemsize(b1) + itemsize(b2)
                + itemsize(running_mean) + itemsize(running_var))
    streamed = 2 * 2 * tb * H * 4            # x and out, double-buffered
    intermediate = tb * H4 * 4
    vmem_bytes = resident + streamed + intermediate + (8 << 20)
    vmem_bytes = min(max(vmem_bytes, 32 << 20), 64 << 20)

    cost = pl.CostEstimate(
        flops=2 * 2 * B * H * H4,                      # two matmuls
        transcendentals=B * H4 + H,                    # erf on [B,4H] + rsqrt
        bytes_accessed=2 * B * H * 4 + resident,       # x in, out, params
    )

    return pl.pallas_call(
        residual_ff_kernel,
        out_shape=jax.ShapeDtypeStruct((B, H), x.dtype),
        grid=grid,
        in_specs=[
            pl.BlockSpec((tb, H), lambda i: (i, 0)),    # x: streamed per tile
            pl.BlockSpec((1, H), lambda i: (0, 0)),     # running_mean: resident
            pl.BlockSpec((1, H), lambda i: (0, 0)),     # running_var: resident
            pl.BlockSpec((H, H4), lambda i: (0, 0)),    # W1: resident
            pl.BlockSpec((1, H4), lambda i: (0, 0)),    # b1: resident
            pl.BlockSpec((H4, H), lambda i: (0, 0)),    # W2: resident
            pl.BlockSpec((1, H), lambda i: (0, 0)),     # b2: resident
        ],
        out_specs=pl.BlockSpec((tb, H), lambda i: (i, 0)),
        compiler_params=pltpu.CompilerParams(
            dimension_semantics=("parallel",),
            vmem_limit_bytes=vmem_bytes,
        ),
        cost_estimate=cost,
    )(x, running_mean, running_var, w1, b1, w2, b2)


def reference(x, running_mean, running_var, w1, b1, w2, b2):
    """Pure-JAX reference with the same numerics (bf16 MXU inputs, f32 acc)."""
    inv_std = lax.rsqrt(running_var + 1e-5)
    norm = (x - running_mean) * inv_std
    h = jnp.dot(norm.astype(w1.dtype), w1,
                preferred_element_type=jnp.float32) + b1
    h = 0.5 * h * (1.0 + lax.erf(h * _INV_SQRT2))
    h2 = jnp.dot(h.astype(w2.dtype), w2,
                 preferred_element_type=jnp.float32) + b2
    return x + h2


if __name__ == "__main__":
    B = 512          # batch (two TB=256 tiles -> exercises the pipeline)
    H = 128          # hidden_dim (lane-dense output, full MXU K)
    H4 = 4 * H       # hidden_dim * 4

    key = jax.random.PRNGKey(0)
    kx, k1, k2, k3, k4 = jax.random.split(key, 5)

    x = jax.random.normal(kx, (B, H), dtype=jnp.float32)

    # Deterministic parameter init (shapes per nn.Linear in the module).
    # nn.Linear(H, 4H): weight [4H, H] -> stored transposed [H, 4H]; bias [4H].
    w1 = (jax.random.uniform(k1, (H, H4), jnp.float32, -1.0, 1.0)
          / jnp.sqrt(jnp.float32(H))).astype(jnp.bfloat16)
    b1 = (jax.random.uniform(k2, (1, H4), jnp.float32, -1.0, 1.0)
          / jnp.sqrt(jnp.float32(H)))
    # nn.Linear(4H, H): weight [H, 4H] -> stored transposed [4H, H]; bias [H].
    w2 = (jax.random.uniform(k3, (H4, H), jnp.float32, -1.0, 1.0)
          / jnp.sqrt(jnp.float32(H4))).astype(jnp.bfloat16)
    b2 = (jax.random.uniform(k4, (1, H), jnp.float32, -1.0, 1.0)
          / jnp.sqrt(jnp.float32(H4)))

    # RSNorm running buffers: fresh module -> mean = 0, var = 1 (eval mode).
    running_mean = jnp.zeros((1, H), jnp.float32)
    running_var = jnp.ones((1, H), jnp.float32)

    out = residual_ff_block(x, running_mean, running_var, w1, b1, w2, b2)
    out = jax.block_until_ready(out)

    ref = reference(x, running_mean, running_var, w1, b1, w2, b2)
    assert out.shape == (B, H)
    assert jnp.allclose(out, ref, atol=1e-4, rtol=1e-4), "mismatch vs reference"

    print("KERNEL_OK")
</pallas_src>

<mosaic_0001>
module attributes {stable_mosaic.version = 11 : i64} {
  func.func @residual_ff_kernel(%arg0: i32, %arg1: memref<256x128xf32, #tpu.memory_space<vmem>>, %arg2: memref<1x128xf32, #tpu.memory_space<vmem>>, %arg3: memref<1x128xf32, #tpu.memory_space<vmem>>, %arg4: memref<128x512xbf16, #tpu.memory_space<vmem>>, %arg5: memref<1x512xf32, #tpu.memory_space<vmem>>, %arg6: memref<512x128xbf16, #tpu.memory_space<vmem>>, %arg7: memref<1x128xf32, #tpu.memory_space<vmem>>, %arg8: memref<256x128xf32, #tpu.memory_space<vmem>>) attributes {dimension_semantics = [#tpu.dimension_semantics<parallel>], iteration_bounds = array<i64: 2>, scalar_prefetch = 0 : i64, scratch_operands = 0 : i64, tpu.core_type = #tpu.core_type<tc>, window_params = [{transform_indices = @transform_0, window_bounds = array<i64: 256, 128>}, {pipeline_mode = #tpu.pipeline_mode<synchronous>, transform_indices = @transform_1, window_bounds = array<i64: 1, 128>}, {pipeline_mode = #tpu.pipeline_mode<synchronous>, transform_indices = @transform_2, window_bounds = array<i64: 1, 128>}, {pipeline_mode = #tpu.pipeline_mode<synchronous>, transform_indices = @transform_3, window_bounds = array<i64: 128, 512>}, {pipeline_mode = #tpu.pipeline_mode<synchronous>, transform_indices = @transform_4, window_bounds = array<i64: 1, 512>}, {pipeline_mode = #tpu.pipeline_mode<synchronous>, transform_indices = @transform_5, window_bounds = array<i64: 512, 128>}, {pipeline_mode = #tpu.pipeline_mode<synchronous>, transform_indices = @transform_6, window_bounds = array<i64: 1, 128>}, {transform_indices = @transform_7, window_bounds = array<i64: 256, 128>}]} {
    %c0 = arith.constant 0 : index
    %c0_0 = arith.constant 0 : index
    %0 = vector.load %arg1[%c0, %c0_0] : memref<256x128xf32, #tpu.memory_space<vmem>>, vector<256x128xf32>
    %c0_1 = arith.constant 0 : index
    %c0_2 = arith.constant 0 : index
    %1 = vector.load %arg3[%c0_1, %c0_2] : memref<1x128xf32, #tpu.memory_space<vmem>>, vector<1x128xf32>
    %cst = arith.constant 9.99999974E-6 : f32
    %2 = vector.broadcast %cst : f32 to vector<1x128xf32>
    %3 = arith.addf %1, %2 : vector<1x128xf32>
    %4 = math.rsqrt %3 : vector<1x128xf32>
    %c0_3 = arith.constant 0 : index
    %c0_4 = arith.constant 0 : index
    %5 = vector.load %arg2[%c0_3, %c0_4] : memref<1x128xf32, #tpu.memory_space<vmem>>, vector<1x128xf32>
    %6 = vector.broadcast %5 : vector<1x128xf32> to vector<256x128xf32>
    %7 = arith.subf %0, %6 : vector<256x128xf32>
    %8 = vector.broadcast %4 : vector<1x128xf32> to vector<256x128xf32>
    %9 = arith.mulf %7, %8 : vector<256x128xf32>
    %10 = arith.truncf %9 : vector<256x128xf32> to vector<256x128xbf16>
    %c0_5 = arith.constant 0 : index
    %c0_6 = arith.constant 0 : index
    %11 = vector.load %arg4[%c0_5, %c0_6] : memref<128x512xbf16, #tpu.memory_space<vmem>>, vector<128x512xbf16>
    %cst_7 = arith.constant dense<0.000000e+00> : vector<256x512xf32>
    %12 = tpu.matmul %10, %11, %cst_7 {dimension_numbers = #tpu.dot_dimension_numbers<[1], [0], [0], [1], [0, 0, 1, 1], [], []>} : vector<256x128xbf16>, vector<128x512xbf16>, vector<256x512xf32> -> vector<256x512xf32>
    %c0_8 = arith.constant 0 : index
    %c0_9 = arith.constant 0 : index
    %13 = vector.load %arg5[%c0_8, %c0_9] : memref<1x512xf32, #tpu.memory_space<vmem>>, vector<1x512xf32>
    %14 = vector.broadcast %13 : vector<1x512xf32> to vector<256x512xf32>
    %15 = arith.addf %12, %14 : vector<256x512xf32>
    %cst_10 = arith.constant 5.000000e-01 : f32
    %16 = vector.broadcast %cst_10 : f32 to vector<256x512xf32>
    %17 = arith.mulf %16, %15 : vector<256x512xf32>
    %cst_11 = arith.constant 0.707106769 : f32
    %18 = vector.broadcast %cst_11 : f32 to vector<256x512xf32>
    %19 = arith.mulf %15, %18 : vector<256x512xf32>
    %20 = math.erf %19 : vector<256x512xf32>
    %cst_12 = arith.constant 1.000000e+00 : f32
    %21 = vector.broadcast %cst_12 : f32 to vector<256x512xf32>
    %22 = arith.addf %21, %20 : vector<256x512xf32>
    %23 = arith.mulf %17, %22 : vector<256x512xf32>
    %24 = arith.truncf %23 : vector<256x512xf32> to vector<256x512xbf16>
    %c0_13 = arith.constant 0 : index
    %c0_14 = arith.constant 0 : index
    %25 = vector.load %arg6[%c0_13, %c0_14] : memref<512x128xbf16, #tpu.memory_space<vmem>>, vector<512x128xbf16>
    %cst_15 = arith.constant dense<0.000000e+00> : vector<256x128xf32>
    %26 = tpu.matmul %24, %25, %cst_15 {dimension_numbers = #tpu.dot_dimension_numbers<[1], [0], [0], [1], [0, 0, 1, 1], [], []>} : vector<256x512xbf16>, vector<512x128xbf16>, vector<256x128xf32> -> vector<256x128xf32>
    %c0_16 = arith.constant 0 : index
    %c0_17 = arith.constant 0 : index
    %27 = vector.load %arg7[%c0_16, %c0_17] : memref<1x128xf32, #tpu.memory_space<vmem>>, vector<1x128xf32>
    %28 = vector.broadcast %27 : vector<1x128xf32> to vector<256x128xf32>
    %29 = arith.addf %26, %28 : vector<256x128xf32>
    %30 = arith.addf %0, %29 : vector<256x128xf32>
    %c0_18 = arith.constant 0 : index
    %c0_19 = arith.constant 0 : index
    %31 = vector.load %arg8[%c0_18, %c0_19] : memref<256x128xf32, #tpu.memory_space<vmem>>, vector<256x128xf32>
    tpu.vector_store %arg8[%c0_18, %c0_19], %30 {strides = array<i32>} : memref<256x128xf32, #tpu.memory_space<vmem>>, vector<256x128xf32>,
    return
  }
  func.func @transform_0(%arg0: i32) -> (i32, i32) {
    %c0_i32 = arith.constant 0 : i32
    %c0_i32_0 = arith.constant 0 : i32
    return %arg0, %c0_i32 : i32, i32
  }
  func.func @transform_1(%arg0: i32) -> (i32, i32) {
    %c0_i32 = arith.constant 0 : i32
    %c0_i32_0 = arith.constant 0 : i32
    %c0_i32_1 = arith.constant 0 : i32
    return %c0_i32, %c0_i32_0 : i32, i32
  }
  func.func @transform_2(%arg0: i32) -> (i32, i32) {
    %c0_i32 = arith.constant 0 : i32
    %c0_i32_0 = arith.constant 0 : i32
    %c0_i32_1 = arith.constant 0 : i32
    return %c0_i32, %c0_i32_0 : i32, i32
  }
  func.func @transform_3(%arg0: i32) -> (i32, i32) {
    %c0_i32 = arith.constant 0 : i32
    %c0_i32_0 = arith.constant 0 : i32
    %c0_i32_1 = arith.constant 0 : i32
    return %c0_i32, %c0_i32_0 : i32, i32
  }
  func.func @transform_4(%arg0: i32) -> (i32, i32) {
    %c0_i32 = arith.constant 0 : i32
    %c0_i32_0 = arith.constant 0 : i32
    %c0_i32_1 = arith.constant 0 : i32
    return %c0_i32, %c0_i32_0 : i32, i32
  }
  func.func @transform_5(%arg0: i32) -> (i32, i32) {
    %c0_i32 = arith.constant 0 : i32
    %c0_i32_0 = arith.constant 0 : i32
    %c0_i32_1 = arith.constant 0 : i32
    return %c0_i32, %c0_i32_0 : i32, i32
  }
  func.func @transform_6(%arg0: i32) -> (i32, i32) {
    %c0_i32 = arith.constant 0 : i32
    %c0_i32_0 = arith.constant 0 : i32
    %c0_i32_1 = arith.constant 0 : i32
    return %c0_i32, %c0_i32_0 : i32, i32
  }
  func.func @transform_7(%arg0: i32) -> (i32, i32) {
    %c0_i32 = arith.constant 0 : i32
    %c0_i32_0 = arith.constant 0 : i32
    return %arg0, %c0_i32 : i32, i32
  }
}

</mosaic_0001>

<bundles_post_ra>
// kernel: tpu_custom_call.1
= control target key start
LH: loop header
LB: loop body
LE: loop exit
PB: predicated region body
PF: predicated region fallthrough
CT: control target
= control target key end

     0   :  { %s16155_s0 = inlined_call_operand.hbm [shape: f32[512,128], index: 0, kind: input, shape index: {}]   ;;  %s16156_s1 = inlined_call_operand.hbm [shape: f32[1,128], index: 1, kind: input, shape index: {}]   ;;  %s16157_s2 = inlined_call_operand.vmem [shape: f32[1,128], index: 2, kind: input, shape index: {}]   ;;  %s16158_s3 = inlined_call_operand.hbm [shape: bf16[128,512], index: 3, kind: input, shape index: {}]   ;;  %s16159_s4 = inlined_call_operand.hbm [shape: f32[1,512], index: 4, kind: input, shape index: {}]   ;;  %s16160_s5 = inlined_call_operand.hbm [shape: bf16[512,128], index: 5, kind: input, shape index: {}]   ;;  %s16161_s6 = inlined_call_operand.vmem [shape: f32[1,128], index: 6, kind: input, shape index: {}]   ;;  %s16162_s7 = inlined_call_operand.hbm [shape: f32[512,128], index: 7, kind: output, shape index: {}]  }
   0x1   :  { %16172 = sst [smem:[#allocation64_spill]] %s16156_s1 }
   0x2   :  { %12 = vsyncpa [#allocation3], 0 }
   0x3   :  { %14 = vsyncpa [#allocation3 + $0x1], 0 }
   0x4   :  { %15 = vsyncpa [#allocation6], 0 }
   0x5   :  { %16 = vsyncpa [#allocation9], 0 }
   0x6   :  { %17 = vsyncpa [#allocation4], 0 }
   0x7   :  { %19 = vsyncpa [#allocation4 + $0x1], 0  ;;  %s8696_s24 = smov 0   ;;  %s8698_s25 = smov 0  }
   0x8   :  { %s8700_s26 = smov 0   ;;  %s8702_s27 = smov 0  }
   0x9 LB: > { %s8717_s28 = sadd.s32 4294967295, %s8642_s27   ;;  %s7555_s29 = sadd.s32 4294967294, %s8642_s27   ;;  %s8642_s27 = sphi %s8702_s27, %s16816_s27   ;;  %s8638_s26 = sphi %s8700_s26, %s16815_s26   ;;  %s8634_s25 = sphi %s8698_s25, %s16814_s25   ;;  %s8630_s24 = sphi %s8696_s24, %s16813_s24  }
   0xa   : > { %p45_p0 = scmp.ne.s32.totalorder %s8634_s25, %s8630_s24  ;;  %p46_p1 = scmp.eq.s32.totalorder %s8717_s28, 0 }
   0xb   : > { %p195_p2 = scmp.eq.s32.totalorder %s8717_s28, 1  ;;  %p201_p3 = scmp.eq.s32.totalorder %s7555_s29, 1 }
   0xc   : > { %p8726_p4 = por %p46_p1, %p45_p0  ;;  %p7556_p5 = scmp.ge.s32.totalorder %s8642_s27, 1 }
   0xd   : > { %p8731_p6 = por %p201_p3, %p45_p0  ;;  %p208_p7 = scmp.lt.s32.totalorder %s8642_s27, 3 }
   0xe   : > { %s16175_s1 = sld [smem:[#allocation64_spill]]  ;;  %s8644_s13 = smov [#allocation5]  }
   0xf   : > { %p8739_p8 = pnand %p7556_p5, %p208_p7  ;;  %s222_s14 = sshll.u32 %s8644_s13, 4  ;;  %s223_s14 = int_to_ptr.vmem [resolvable:$true] %s222_s14 }
  0x10   : > { %s249_s17 = sshll.u32 %s16159_s4, 4  ;;  %s234_s21 = sshll.u32 %s16158_s3, 4  ;;  %s250_s17 = int_to_ptr.hbm [resolvable:$true] %s249_s17  ;;  %s235_s21 = int_to_ptr.hbm [resolvable:$true] %s234_s21 }
  0x11   : > { %p8047_p10 = pneg %p8739_p8  ;;  %s8645_s22 = smov [#allocation8]  }
  0x12   : > { %s251_s23 = sshll.u32 %s8645_s22, 4  ;;  %s8646_s29 = smov [#allocation7]   ;;  %s252_s23 = int_to_ptr.vmem [resolvable:$true] %s251_s23 }
  0x13   : > { %p8751_p11 = pnand %p8047_p10, %p46_p1  ;;  %s236_s9 = sshll.u32 %s8646_s29, 4  ;;  %s237_s9 = int_to_ptr.vmem [resolvable:$true] %s236_s9 }
  0x14   : > { %s220_s11 = sshll.u32 %s16175_s1, 4  ;;  %s260_s15 = sshll.u32 %s16160_s5, 4  ;;  %s221_s11 = int_to_ptr.hbm [resolvable:$true] %s220_s11  ;;  %s261_s15 = int_to_ptr.hbm [resolvable:$true] %s260_s15 }
  0x15   : > { %8050 = dma.hbm_to_vmem [thread:$0]  (!%p8751_p11), %s221_s11, 16, %s223_s14, [#allocation6]  }
  0x16   : > { %8056 = dma.hbm_to_vmem [thread:$0]  (!%p8751_p11), %s250_s17, 64, %s252_s23, [#allocation9]  }
  0x17   : > { %s8647_s16 = smov 256   ;;  %s8648_s11 = smov 16  }
  0x18   : > { %8053 = dma.hbm_to_vmem [thread:$0]  (!%p8751_p11), %s235_s21, 4096, %s237_s9, [#allocation6], %s8647_s16, %s8647_s16, %s8648_s11  }
  0x19   : > { %s8649_s14 = smov [#allocation10]   ;;  %s8650_s19 = smov 64  }
  0x1a   : > { %s262_s17 = sshll.u32 %s8649_s14, 4  ;;  %s8651_s20 = smov 4   ;;  %s263_s17 = int_to_ptr.vmem [resolvable:$true] %s262_s17 }
  0x1b   : > { %8059 = dma.hbm_to_vmem [thread:$0]  (!%p8751_p11), %s261_s15, 4096, %s263_s17, [#allocation9], %s8650_s19, %s8650_s19, %s8651_s20  }
  0x1c   : > { %s8770_s22 = sadd.s32 1, %s8642_s27   ;;  %s32_s29 = sadd.s32 1, %s8638_s26 }
  0x1d   : > { %s29_s23 = ssub.s32 %s8642_s27, %s8770_s22  ;;  %p39_p13 = scmp.ne.s32.totalorder %s8638_s26, %s8634_s25 }
  0x1e   : > { %p30_p12 = scmp.eq.s32.totalorder %s29_s23, 0  ;;  %p40_p0 = scmp.eq.s32.totalorder %s8642_s27, 0 }
  0x1f   : > { %p8783_p5 = por %p195_p2, %p39_p13  ;;  %p8072_p7 = scmp.lt.s32.totalorder %s8642_s27, 2 }
  0x20   : > { %s8779_s21 = scalar_select %p30_p12, %s8638_s26, %s32_s29  }
  0x21   : > { %p41_p3 = por %p40_p0, %p39_p13  ;;  %s279_s10 = sand.u32 1, %s8638_s26  }
  0x22   : > { %s7562_s18 = sshll.u32 %s279_s10, 8  ;;  %s7961_s13 = sshll.u32 %s8642_s27, 8 }
  0x23   : > { %s288_s11 = scalar_lea.hbm %s16155_s0, %s7961_s13  ;;  %s283_s14 = scalar_lea.vmem [#allocation2], %s7562_s18 }
  0x24   : > { %s291_s17 = sshll.u32 %s283_s14, 4  ;;  %s289_s19 = sshll.u32 %s288_s11, 4  ;;  %s292_s17 = int_to_ptr.vmem [resolvable:$true] %s291_s17  ;;  %s290_s19 = int_to_ptr.hbm [resolvable:$true] %s289_s19 }
  0x25   : > { %p8793_p10 = pnand %p8072_p7, %p41_p3  ;;  %s280_s23 = scalar_lea.sflag [#allocation3], %s279_s10 }
  0x26   : > { %s8538_s29 = sshra.s32 %s290_s19, 4  ;;  %s8545_s15 = scalar_lea.hbm %s16155_s0, 512  ;;  %s8539_s29 = int_to_ptr.hbm [resolvable:$true] %s8538_s29 }
  0x27   : > { %s8540_s1 = scalar_lea.hbm %s8539_s29, 256  ;;  %p8542_p11 = pneg %p8793_p10 }
  0x28   : > { %p8541_p2 = scmp.ne.s32.totalorder %s8539_s29, %s8540_s1  ;;  %p8546_p0 = scmp.lt.s32.totalorder %s8539_s29, %s16155_s0 }
  0x29   : > { %p8547_p3 = scmp.lt.s32.totalorder %s8545_s15, %s8540_s1 }
  0x2a   : > { %p8543_p12 = pnand %p8542_p11, %p8541_p2 }
  0x2b   : > { %p8548_p7 = por %p8547_p3, %p8546_p0 }
  0x2c   : > { %p8544_p13 = pneg %p8543_p12 }
  0x2e   : > { %p8549_p9 = pnand %p8548_p7, %p8544_p13 }
  0x30   : > { %8552 = shalt.err (!%p8549_p9)
}
  0x31   : > { %s8652_s10 = smov 128   ;;  %s8653_s14 = smov 8  }
  0x32   : > { %8063 = dma.hbm_to_vmem [thread:$0]  (!%p8793_p10), %s290_s19, 4096, %s292_s17, %s280_s23, %s8652_s10, %s8652_s10, %s8653_s14  }
  0x33   : > { %303 = sbr.rel (%p8739_p8) target bundleno = 1816 (0x718), region = 48 }
  0x38   : > { %s8810_s13 = sand.u32 1, %s8634_s25  }
  0x39   : > { %s7566_s29 = sshll.u32 %s8810_s13, 8  ;;  %s306_s1 = scalar_lea.sflag [#allocation3], %s8810_s13 }
  0x3a   : > { %s8816_s18 = scalar_lea.vmem [#allocation2], %s7566_s29 }
  0x3b   : > { %8613 = dma.done.wait (%p8726_p4), %s306_s1, 4096  }
  0x3c   : > { %8615 = vsyncadd (%p8726_p4), %s306_s1, 4294963200 }
  0x3d   : > { %8617 = dma.done.wait (%p46_p1), [#allocation6], 4112  }
  0x3e   : > { %8619 = vsyncadd (%p46_p1), [#allocation6], 4294963184 }
  0x3f   : > { %8621 = dma.done.wait (%p46_p1), [#allocation9], 4160  }
  0x40   : > { %8623 = vsyncadd (%p46_p1), [#allocation9], 4294963136  ;;  %v7686_v0 = vld [vmem:[#allocation7 + $0xe0] sm:$0xf]  ;;  %v7992_v1 = vld [vmem:[#allocation7 + $0xec] sm:$0xf0] }
  0x41   : > { %v7990_v2 = vld [vmem:[#allocation7 + $0xe4] sm:$0xf]  ;;  %v7687_v3 = vor.u32 %v7992_v1, %v7686_v0  ;;  %v7688_v4 = vld [vmem:[#allocation7 + $0xf0] sm:$0xf0]  ;;  %v7694_v5 = vld [vmem:[#allocation7 + $0xe8] sm:$0xf] }
  0x42   : > { %v7993_v6 = vld [vmem:[#allocation7 + $0xf4] sm:$0xf0]  ;;  %v7691_v7 = vor.u32 %v7990_v2, %v7688_v4  ;;  %v7991_v9 = vld [vmem:[#allocation7 + $0xec] sm:$0xf]  ;;  %v7696_v10 = vld [vmem:[#allocation7 + $0xf8] sm:$0xf0] }
  0x43   : > { %v7695_v8 = vor.u32 %v7993_v6, %v7694_v5  ;;  %v7670_v11 = vld [vmem:[#allocation7 + $0xc0] sm:$0xf]  ;;  %696 = vmatpush.bf16.msra.mxu0 %v7687_v3  ;;  %v7699_v12 = vor.u32 %v7991_v9, %v7696_v10  ;;  %v7988_v13 = vld [vmem:[#allocation7 + $0xcc] sm:$0xf0]  ;;  %v7986_v14 = vld [vmem:[#allocation7 + $0xc4] sm:$0xf] }
  0x44   : > { %v7672_v15 = vld [vmem:[#allocation7 + $0xd0] sm:$0xf0]  ;;  %785 = vmatpush.bf16.msra.mxu1 %v7691_v7  ;;  %v7671_v16 = vor.u32 %v7988_v13, %v7670_v11  ;;  %v7678_v18 = vld [vmem:[#allocation7 + $0xc8] sm:$0xf]  ;;  %v7989_v19 = vld [vmem:[#allocation7 + $0xd4] sm:$0xf0] }
  0x45   : > { %874 = vmatpush.bf16.msra.mxu2 %v7695_v8  ;;  %v7675_v17 = vor.u32 %v7986_v14, %v7672_v15  ;;  %v7987_v20 = vld [vmem:[#allocation7 + $0xcc] sm:$0xf]  ;;  %963 = vmatpush.bf16.msra.mxu3 %v7699_v12  ;;  %v7679_v21 = vor.u32 %v7989_v19, %v7678_v18  ;;  %v7680_v22 = vld [vmem:[#allocation7 + $0xd8] sm:$0xf0]  ;;  %v7654_v23 = vld [vmem:[#allocation7 + $0xa0] sm:$0xf] }
  0x46   : > { %v7984_v24 = vld [vmem:[#allocation7 + $0xac] sm:$0xf0]  ;;  %v7683_v25 = vor.u32 %v7987_v20, %v7680_v22  ;;  %v7982_v26 = vld [vmem:[#allocation7 + $0xa4] sm:$0xf]  ;;  %v7656_v27 = vld [vmem:[#allocation7 + $0xb0] sm:$0xf0] }
  0x47   : > { %v7662_v28 = vld [vmem:[#allocation7 + $0xa8] sm:$0xf]  ;;  %697 = vmatpush.bf16.msra.mxu0 %v7671_v16  ;;  %v7655_v29 = vor.u32 %v7984_v24, %v7654_v23  ;;  %v7985_v30 = vld [vmem:[#allocation7 + $0xb4] sm:$0xf0]  ;;  %v7983_v31 = vld [vmem:[#allocation7 + $0xac] sm:$0xf]  ;;  %v7659_v33 = vor.u32 %v7982_v26, %v7656_v27 }
  0x48   : > { %v7664_v32 = vld [vmem:[#allocation7 + $0xb8] sm:$0xf0]  ;;  %786 = vmatpush.bf16.msra.mxu1 %v7675_v17  ;;  %v7663_v34 = vor.u32 %v7985_v30, %v7662_v28  ;;  %v7638_v35 = vld [vmem:[#allocation7 + $0x80] sm:$0xf]  ;;  %v7980_v36 = vld [vmem:[#allocation7 + $0x8c] sm:$0xf0] }
  0x49   : > { %875 = vmatpush.bf16.msra.mxu2 %v7679_v21  ;;  %v7978_v37 = vld [vmem:[#allocation7 + $0x84] sm:$0xf]  ;;  %964 = vmatpush.bf16.msra.mxu3 %v7683_v25  ;;  %v7667_v38 = vor.u32 %v7983_v31, %v7664_v32  ;;  %v7640_v39 = vld [vmem:[#allocation7 + $0x90] sm:$0xf0]  ;;  %v7646_v40 = vld [vmem:[#allocation7 + $0x88] sm:$0xf]  ;;  %v7639_v44 = vor.u32 %v7980_v36, %v7638_v35 }
  0x4a   : > { %v7981_v41 = vld [vmem:[#allocation7 + $0x94] sm:$0xf0]  ;;  %v7979_v42 = vld [vmem:[#allocation7 + $0x8c] sm:$0xf]  ;;  %v7648_v43 = vld [vmem:[#allocation7 + $0x98] sm:$0xf0]  ;;  %v7643_v45 = vor.u32 %v7978_v37, %v7640_v39 }
  0x4b   : > { %698 = vmatpush.bf16.msra.mxu0 %v7655_v29  ;;  %v7647_v46 = vor.u32 %v7981_v41, %v7646_v40  ;;  %v7622_v47 = vld [vmem:[#allocation7 + $0x60] sm:$0xf]  ;;  %v7976_v48 = vld [vmem:[#allocation7 + $0x6c] sm:$0xf0]  ;;  %v7974_v49 = vld [vmem:[#allocation7 + $0x64] sm:$0xf]  ;;  %v7651_v50 = vor.u32 %v7979_v42, %v7648_v43 }
  0x4c   : > { %787 = vmatpush.bf16.msra.mxu1 %v7659_v33  ;;  %v7624_v51 = vld [vmem:[#allocation7 + $0x70] sm:$0xf0]  ;;  %v7630_v52 = vld [vmem:[#allocation7 + $0x68] sm:$0xf]  ;;  %v7977_v53 = vld [vmem:[#allocation7 + $0x74] sm:$0xf0]  ;;  %v7623_v56 = vor.u32 %v7976_v48, %v7622_v47 }
  0x4d   : > { %876 = vmatpush.bf16.msra.mxu2 %v7663_v34  ;;  %965 = vmatpush.bf16.msra.mxu3 %v7667_v38  ;;  %v7975_v54 = vld [vmem:[#allocation7 + $0x6c] sm:$0xf]  ;;  %v7632_v55 = vld [vmem:[#allocation7 + $0x78] sm:$0xf0]  ;;  %v7627_v57 = vor.u32 %v7974_v49, %v7624_v51  ;;  %v7631_v58 = vor.u32 %v7977_v53, %v7630_v52  ;;  %v7606_v59 = vld [vmem:[#allocation7 + $0x40] sm:$0xf] }
  0x4e   : > { %v7972_v60 = vld [vmem:[#allocation7 + $0x4c] sm:$0xf0]  ;;  %v7970_v61 = vld [vmem:[#allocation7 + $0x44] sm:$0xf]  ;;  %v7635_v62 = vor.u32 %v7975_v54, %v7632_v55  ;;  %v7608_v63 = vld [vmem:[#allocation7 + $0x50] sm:$0xf0] }
  0x4f   : > { %699 = vmatpush.bf16.msra.mxu0 %v7639_v44  ;;  %v7614_v0 = vld [vmem:[#allocation7 + $0x48] sm:$0xf]  ;;  %v7973_v1 = vld [vmem:[#allocation7 + $0x54] sm:$0xf0]  ;;  %v7971_v2 = vld [vmem:[#allocation7 + $0x4c] sm:$0xf]  ;;  %v7607_v4 = vor.u32 %v7972_v60, %v7606_v59  ;;  %v7611_v6 = vor.u32 %v7970_v61, %v7608_v63 }
  0x50   : > { %788 = vmatpush.bf16.msra.mxu1 %v7643_v45  ;;  %v7616_v3 = vld [vmem:[#allocation7 + $0x58] sm:$0xf0]  ;;  %v7590_v5 = vld [vmem:[#allocation7 + $0x20] sm:$0xf]  ;;  %v7615_v7 = vor.u32 %v7973_v1, %v7614_v0  ;;  %v7968_v8 = vld [vmem:[#allocation7 + $0x2c] sm:$0xf0] }
  0x51   : > { %877 = vmatpush.bf16.msra.mxu2 %v7647_v46  ;;  %966 = vmatpush.bf16.msra.mxu3 %v7651_v50  ;;  %v7966_v9 = vld [vmem:[#allocation7 + $0x24] sm:$0xf]  ;;  %v7592_v10 = vld [vmem:[#allocation7 + $0x30] sm:$0xf0]  ;;  %v7619_v11 = vor.u32 %v7971_v2, %v7616_v3  ;;  %v7598_v12 = vld [vmem:[#allocation7 + $0x28] sm:$0xf]  ;;  %v7591_v17 = vor.u32 %v7968_v8, %v7590_v5 }
  0x52   : > { %v7969_v13 = vld [vmem:[#allocation7 + $0x34] sm:$0xf0]  ;;  %v7967_v14 = vld [vmem:[#allocation7 + $0x2c] sm:$0xf]  ;;  %v7600_v15 = vld [vmem:[#allocation7 + $0x38] sm:$0xf0]  ;;  %v7595_v20 = vor.u32 %v7966_v9, %v7592_v10 }
  0x53   : > { %700 = vmatpush.bf16.msra.mxu0 %v7623_v56  ;;  %v395_v16 = vld [vmem:[%s16157_s2] sm:$0x1]  ;;  %v7574_v18 = vld [vmem:[#allocation7] sm:$0xf]  ;;  %v7599_v21 = vor.u32 %v7969_v13, %v7598_v12  ;;  %v7964_v22 = vld [vmem:[#allocation7 + $0xc] sm:$0xf0]  ;;  %v7603_v25 = vor.u32 %v7967_v14, %v7600_v15 }
  0x54   : > { %789 = vmatpush.bf16.msra.mxu1 %v7627_v57  ;;  %v396_v19 = vadd.f32 1e-05, %v395_v16  ;;  %v7962_v23 = vld [vmem:[#allocation7 + $0x4] sm:$0xf]  ;;  %v7576_v24 = vld [vmem:[#allocation7 + $0x10] sm:$0xf0]  ;;  %v7575_v30 = vor.u32 %v7964_v22, %v7574_v18 }
  0x55   : > { %878 = vmatpush.bf16.msra.mxu2 %v7631_v58  ;;  %967 = vmatpush.bf16.msra.mxu3 %v7635_v62  ;;  %v7582_v26 = vld [vmem:[#allocation7 + $0x8] sm:$0xf]  ;;  %v7965_v27 = vld [vmem:[#allocation7 + $0x14] sm:$0xf0]  ;;  %v7963_v28 = vld [vmem:[#allocation7 + $0xc] sm:$0xf]  ;;  %v7579_v31 = vor.u32 %v7962_v23, %v7576_v24 }
  0x56   : > { %8124 = vrsqrt.f32 %v396_v19  ;;  %v7584_v29 = vld [vmem:[#allocation7 + $0x18] sm:$0xf0]  ;;  %v7583_v32 = vor.u32 %v7965_v27, %v7582_v26  ;;  %vm403_vm0 = vweird.f32 %v396_v19  ;;  %v364_v44 = vld [vmem:[%s8816_s18 + $0x8] sm:$0xff]  ;;  %v365_v54 = vld [vmem:[%s8816_s18 + $0x10] sm:$0xff]  ;;  %s15621_s20 = scalar_lea.vmem [#allocation11], %s7566_s29  ;;  %s8026_s16 = sshll.u32 %s8717_s28, 8 }
  0x57   : > { %701 = vmatpush.bf16.msra.mxu0 %v7607_v4  ;;  %v7587_v33 = vor.u32 %v7963_v28, %v7584_v29  ;;  %v8017_v34 = vld [vmem:[#allocation10 + $0xb8] sm:$0xff]  ;;  %v8016_v56 = vld [vmem:[#allocation10 + $0xb0] sm:$0xff]  ;;  %v368_v2 = vld [vmem:[%s8816_s18 + $0x28] sm:$0xff]  ;;  %s7440_s14 = scalar_lea.hbm %s16162_s7, %s8026_s16  ;;  %s7441_s29 = sshll.u32 %s15621_s20, 4  ;;  %s7442_s29 = int_to_ptr.vmem [resolvable:$true] %s7441_s29 }
  0x58   : > { %790 = vmatpush.bf16.msra.mxu1 %v7611_v6  ;;  %v8001_v35 = vld [vmem:[#allocation10 + $0x38] sm:$0xff]  ;;  %v8000_v57 = vld [vmem:[#allocation10 + $0x30] sm:$0xff]  ;;  %v8015_v10 = vld [vmem:[#allocation10 + $0xa8] sm:$0xff]  ;;  %s7443_s1 = sshll.u32 %s7440_s14, 4  ;;  %s7429_s28 = scalar_lea.sflag [#allocation4], %s8810_s13  ;;  %s7444_s1 = int_to_ptr.hbm [resolvable:$true] %s7443_s1 }
  0x59   : > { %879 = vmatpush.bf16.msra.mxu2 %v7615_v7  ;;  %968 = vmatpush.bf16.msra.mxu3 %v7619_v11  ;;  %v8025_v36 = vld [vmem:[#allocation10 + $0xf8] sm:$0xff]  ;;  %v8024_v58 = vld [vmem:[#allocation10 + $0xf0] sm:$0xff]  ;;  %v7999_v11 = vld [vmem:[#allocation10 + $0x28] sm:$0xff]  ;;  %s8582_s30 = sshra.s32 %s7444_s1, 4  ;;  %s8588_s23 = scalar_lea.hbm %s16162_s7, 512  ;;  %s8583_s30 = int_to_ptr.hbm [resolvable:$true] %s8582_s30 }
  0x5a   : > { %v8009_v38 = vld [vmem:[#allocation10 + $0x78] sm:$0xff]  ;;  %v8008_v59 = vld [vmem:[#allocation10 + $0x70] sm:$0xff]  ;;  %v8023_v12 = vld [vmem:[#allocation10 + $0xe8] sm:$0xff]  ;;  %s8584_s12 = scalar_lea.hbm %s8583_s30, 256  ;;  %p8589_p9 = scmp.lt.s32.totalorder %s8583_s30, %s16162_s7 }
  0x5b   : > { %702 = vmatpush.bf16.msra.mxu0 %v7591_v17  ;;  %v8833_v42 = vld [vmem:[#allocation5] ss:$0 sm:$0xff]  ;;  %v366_v55 = vld [vmem:[%s8816_s18 + $0x18] sm:$0xff]  ;;  %v369_v8 = vld [vmem:[%s8816_s18 + $0x30] sm:$0xff]  ;;  %p8585_p1 = scmp.ne.s32.totalorder %s8583_s30, %s8584_s12  ;;  %p8590_p10 = scmp.lt.s32.totalorder %s8588_s23, %s8584_s12 }
  0x5c   : > { %791 = vmatpush.bf16.msra.mxu1 %v7595_v20  ;;  %v8125_v37 = vpop.eup %8124  ;;  %v363_v43 = vld [vmem:[%s8816_s18] sm:$0xff]  ;;  %v412_v48 = vsub.f32 %v364_v44, %v8833_v42  ;;  %v413_v60 = vsub.f32 %v365_v54, %v8833_v42  ;;  %v414_v61 = vsub.f32 %v366_v55, %v8833_v42  ;;  %v416_v4 = vsub.f32 %v368_v2, %v8833_v42  ;;  %v370_v9 = vld [vmem:[%s8816_s18 + $0x38] sm:$0xff]  ;;  %v8007_v13 = vld [vmem:[#allocation10 + $0x68] sm:$0xff] }
  0x5d   : > { %880 = vmatpush.bf16.msra.mxu2 %v7599_v21  ;;  %969 = vmatpush.bf16.msra.mxu3 %v7603_v25  ;;  %v398_v39 = vmul.f32 %v8125_v37, %v396_v19  ;;  %vm404_vm1 = vweird.f32 %v8125_v37  ;;  %v411_v47 = vsub.f32 %v363_v43, %v8833_v42  ;;  %v367_v1 = vld [vmem:[%s8816_s18 + $0x20] sm:$0xff]  ;;  %v417_v14 = vsub.f32 %v369_v8, %v8833_v42  ;;  %v372_v20 = vld [vmem:[%s8816_s18 + $0x48] sm:$0xff]  ;;  %v373_v26 = vld [vmem:[%s8816_s18 + $0x50] sm:$0xff]  ;;  %p8586_p4 = pnand %p8585_p1, %p8783_p5  ;;  %p8591_p2 = por %p8590_p10, %p8589_p9 }
  0x5e   : > { %vm405_vm2 = vmor %vm403_vm0, %vm404_vm1  ;;  %v415_v3 = vsub.f32 %v367_v1, %v8833_v42  ;;  %v418_v15 = vsub.f32 %v370_v9, %v8833_v42  ;;  %v371_v19 = vld [vmem:[%s8816_s18 + $0x40] sm:$0xff]  ;;  %v420_v22 = vsub.f32 %v372_v20, %v8833_v42  ;;  %v374_v27 = vld [vmem:[%s8816_s18 + $0x58] sm:$0xff] }
  0x5f   : > { %703 = vmatpush.bf16.msra.mxu0 %v7575_v30  ;;  %v399_v40 = vmul.f32 %v8125_v37, %v398_v39  ;;  %v419_v21 = vsub.f32 %v371_v19, %v8833_v42  ;;  %v8014_v28 = vld [vmem:[#allocation10 + $0xa0] sm:$0xff]  ;;  %v382_v8 = vld [vmem:[%s8816_s18 + $0x98] sm:$0xff]  ;;  %p8587_p8 = pneg %p8586_p4 }
  0x60   : > { %792 = vmatpush.bf16.msra.mxu1 %v7579_v31  ;;  %v7998_v29 = vld [vmem:[#allocation10 + $0x20] sm:$0xff] }
  0x61   : > { %881 = vmatpush.bf16.msra.mxu2 %v7583_v32  ;;  %970 = vmatpush.bf16.msra.mxu3 %v7587_v33  ;;  %v400_v41 = vmul.f32 0.5, %v399_v40  ;;  %v8022_v30 = vld [vmem:[#allocation10 + $0xe0] sm:$0xff]  ;;  %v421_v32 = vsub.f32 %v373_v26, %v8833_v42  ;;  %v422_v33 = vsub.f32 %v374_v27, %v8833_v42  ;;  %p8592_p11 = pnand %p8591_p2, %p8587_p8 }
  0x62   : > { %v8006_v31 = vld [vmem:[#allocation10 + $0x60] sm:$0xff] }
  0x63   : > { %7008 = vmatpush.bf16.msrb.mxu0 %v8001_v35  ;;  %v401_v45 = vsub.f32 1.5, %v400_v41  ;;  %v380_v54 = vld [vmem:[%s8816_s18 + $0x88] sm:$0xff] }
  0x64   : > { %7097 = vmatpush.bf16.msrb.mxu1 %v8009_v38  ;;  %v376_v38 = vld [vmem:[%s8816_s18 + $0x68] sm:$0xff] }
  0x65   : > { %7186 = vmatpush.bf16.msrb.mxu2 %v8017_v34  ;;  %7275 = vmatpush.bf16.msrb.mxu3 %v8025_v36  ;;  %v402_v46 = vmul.f32 %v8125_v37, %v401_v45  ;;  %v424_v40 = vsub.f32 %v376_v38, %v8833_v42  ;;  %v377_v45 = vld [vmem:[%s8816_s18 + $0x70] sm:$0xff] }
  0x67   : > { %v406_v49 = vsel %vm405_vm2, %v8125_v37, %v402_v46  ;;  %7009 = vmatpush.bf16.msrb.mxu0 %v8000_v57  ;;  %v375_v37 = vld [vmem:[%s8816_s18 + $0x60] sm:$0xff]  ;;  %v378_v46 = vld [vmem:[%s8816_s18 + $0x78] sm:$0xff] }
  0x68   : > { %v8839_v50 = vperm.slane %v406_v49, 0  ;;  %7098 = vmatpush.bf16.msrb.mxu1 %v8008_v59  ;;  %v423_v39 = vsub.f32 %v375_v37, %v8833_v42 }
  0x69   : > { %7187 = vmatpush.bf16.msrb.mxu2 %v8016_v56  ;;  %7276 = vmatpush.bf16.msrb.mxu3 %v8024_v58  ;;  %v428_v56 = vsub.f32 %v380_v54, %v8833_v42 }
  0x6a   : > { %v446_v51 = vmul.f32 %v8839_v50, %v411_v47  ;;  %v447_v52 = vmul.f32 %v8839_v50, %v412_v48  ;;  %v448_v62 = vmul.f32 %v8839_v50, %v413_v60  ;;  %v449_v63 = vmul.f32 %v8839_v50, %v414_v61  ;;  %v8013_v60 = vld [vmem:[#allocation10 + $0x98] sm:$0xff] }
  0x6b   : > { %v450_v5 = vmul.f32 %v8839_v50, %v415_v3  ;;  %v451_v6 = vmul.f32 %v8839_v50, %v416_v4  ;;  %7010 = vmatpush.bf16.msrb.mxu0 %v7999_v11  ;;  %v452_v16 = vmul.f32 %v8839_v50, %v417_v14  ;;  %v453_v17 = vmul.f32 %v8839_v50, %v418_v15  ;;  %v7997_v61 = vld [vmem:[#allocation10 + $0x18] sm:$0xff] }
  0x6c   : > { %v478_v53 = vpack.c.bf16 %v447_v52, %v446_v51  ;;  %v479_v0 = vpack.c.bf16 %v449_v63, %v448_v62  ;;  %7099 = vmatpush.bf16.msrb.mxu1 %v8007_v13  ;;  %v454_v23 = vmul.f32 %v8839_v50, %v419_v21  ;;  %v455_v24 = vmul.f32 %v8839_v50, %v420_v22  ;;  %v8021_v62 = vld [vmem:[#allocation10 + $0xd8] sm:$0xff] }
  0x6d   : > { %v480_v7 = vpack.c.bf16 %v451_v6, %v450_v5  ;;  %7188 = vmatpush.bf16.msrb.mxu2 %v8015_v10  ;;  %7277 = vmatpush.bf16.msrb.mxu3 %v8023_v12  ;;  %v481_v18 = vpack.c.bf16 %v453_v17, %v452_v16  ;;  %v456_v34 = vmul.f32 %v8839_v50, %v421_v32  ;;  %v8005_v63 = vld [vmem:[#allocation10 + $0x58] sm:$0xff] }
  0x6e   : > { %704 = vmatmul.bf16.vlgmr.msra.gmra.mxu0 %v478_v53  ;;  %793 = vmatmul.bf16.vlgmr.msra.gmra.mxu1 %v478_v53  ;;  %v482_v25 = vpack.c.bf16 %v455_v24, %v454_v23  ;;  %v457_v35 = vmul.f32 %v8839_v50, %v422_v33  ;;  %v458_v41 = vmul.f32 %v8839_v50, %v423_v39 }
  0x6f   : > { %882 = vmatmul.bf16.vlgmr.msra.gmra.mxu2 %v478_v53  ;;  %971 = vmatmul.bf16.vlgmr.msra.gmra.mxu3 %v478_v53  ;;  %v459_v43 = vmul.f32 %v8839_v50, %v424_v40  ;;  %v425_v47 = vsub.f32 %v377_v45, %v8833_v42  ;;  %v426_v48 = vsub.f32 %v378_v46, %v8833_v42  ;;  %v379_v53 = vld [vmem:[%s8816_s18 + $0x80] sm:$0xff] }
  0x70   : > { %7011 = vmatpush.bf16.msrb.mxu0 %v7998_v29  ;;  %7100 = vmatpush.bf16.msrb.mxu1 %v8006_v31  ;;  %v483_v36 = vpack.c.bf16 %v457_v35, %v456_v34  ;;  %v427_v55 = vsub.f32 %v379_v53, %v8833_v42  ;;  %v463_v58 = vmul.f32 %v8839_v50, %v428_v56 }
  0x71   : > { %7189 = vmatpush.bf16.msrb.mxu2 %v8014_v28  ;;  %7278 = vmatpush.bf16.msrb.mxu3 %v8022_v30  ;;  %v484_v44 = vpack.c.bf16 %v459_v43, %v458_v41  ;;  %v460_v49 = vmul.f32 %v8839_v50, %v425_v47  ;;  %v461_v51 = vmul.f32 %v8839_v50, %v426_v48 }
  0x72   : > { %v462_v57 = vmul.f32 %v8839_v50, %v427_v55  ;;  %v430_v13 = vsub.f32 %v382_v8, %v8833_v42 }
  0x73   : > { %v485_v52 = vpack.c.bf16 %v461_v51, %v460_v49 }
  0x74   : > { %v486_v59 = vpack.c.bf16 %v463_v58, %v462_v57  ;;  %7012 = vmatpush.bf16.msrb.mxu0 %v7997_v61  ;;  %7101 = vmatpush.bf16.msrb.mxu1 %v8005_v63  ;;  %v465_v19 = vmul.f32 %v8839_v50, %v430_v13 }
  0x75   : > { %7190 = vmatpush.bf16.msrb.mxu2 %v8013_v60  ;;  %7279 = vmatpush.bf16.msrb.mxu3 %v8021_v62 }
  0x7e   : > { %709 = vmatmul.bf16.gmra.mxu0 %v479_v0  ;;  %798 = vmatmul.bf16.gmra.mxu1 %v479_v0 }
  0x7f   : > { %887 = vmatmul.bf16.gmra.mxu2 %v479_v0  ;;  %976 = vmatmul.bf16.gmra.mxu3 %v479_v0  ;;  %v526_v0 = vld [vmem:[#allocation8] sm:$0xf] }
  0x80   : > { %v8891_v1 = vperm.slane %v526_v0, 0  ;;  %v8893_v3 = vperm.slane %v526_v0, 1  ;;  %v8910_v12 = vperm.slane %v526_v0, 2 }
  0x8e   : > { %714 = vmatmul.bf16.gmra.mxu0 %v480_v7  ;;  %803 = vmatmul.bf16.gmra.mxu1 %v480_v7 }
  0x8f   : > { %892 = vmatmul.bf16.gmra.mxu2 %v480_v7  ;;  %981 = vmatmul.bf16.gmra.mxu3 %v480_v7  ;;  %v381_v7 = vld [vmem:[%s8816_s18 + $0x90] sm:$0xff] }
  0x90   : > { %v429_v11 = vsub.f32 %v381_v7, %v8833_v42 }
  0x92   : > { %v464_v17 = vmul.f32 %v8839_v50, %v429_v11 }
  0x94   : > { %v487_v22 = vpack.c.bf16 %v465_v19, %v464_v17 }
  0x9e   : > { %719 = vmatmul.bf16.gmra.mxu0 %v481_v18  ;;  %808 = vmatmul.bf16.gmra.mxu1 %v481_v18 }
  0x9f   : > { %897 = vmatmul.bf16.gmra.mxu2 %v481_v18  ;;  %986 = vmatmul.bf16.gmra.mxu3 %v481_v18 }
  0xae   : > { %724 = vmatmul.bf16.gmra.mxu0 %v482_v25  ;;  %813 = vmatmul.bf16.gmra.mxu1 %v482_v25 }
  0xaf   : > { %902 = vmatmul.bf16.gmra.mxu2 %v482_v25  ;;  %991 = vmatmul.bf16.gmra.mxu3 %v482_v25  ;;  %v8930_v25 = vperm.slane %v526_v0, 3 }
  0xbe   : > { %729 = vmatmul.bf16.gmra.mxu0 %v483_v36  ;;  %818 = vmatmul.bf16.gmra.mxu1 %v483_v36 }
  0xbf   : > { %907 = vmatmul.bf16.gmra.mxu2 %v483_v36  ;;  %996 = vmatmul.bf16.gmra.mxu3 %v483_v36 }
  0xce   : > { %734 = vmatmul.bf16.gmra.mxu0 %v484_v44  ;;  %823 = vmatmul.bf16.gmra.mxu1 %v484_v44 }
  0xcf   : > { %912 = vmatmul.bf16.gmra.mxu2 %v484_v44  ;;  %1001 = vmatmul.bf16.gmra.mxu3 %v484_v44 }
  0xde   : > { %739 = vmatmul.bf16.gmra.mxu0 %v485_v52  ;;  %828 = vmatmul.bf16.gmra.mxu1 %v485_v52 }
  0xdf   : > { %917 = vmatmul.bf16.gmra.mxu2 %v485_v52  ;;  %1006 = vmatmul.bf16.gmra.mxu3 %v485_v52 }
  0xeb   : > { %v705_v2 = vpop.f32.mrf.mxu0  ;;  %v794_v4 = vpop.f32.mrf.mxu1 }
  0xec   : > { %v8896_v5 = vadd.f32 %v705_v2, %v8891_v1  ;;  %v8899_v6 = vadd.f32 %v794_v4, %v8893_v3 }
  0xee   : > { %744 = vmatmul.bf16.gmra.mxu0 %v486_v59  ;;  %833 = vmatmul.bf16.gmra.mxu1 %v486_v59  ;;  %v8904_v9 = vmul.f32 0.70710677, %v8896_v5  ;;  %v8907_v10 = vmul.f32 0.70710677, %v8899_v6 }
  0xef   : > { %922 = vmatmul.bf16.gmra.mxu2 %v486_v59  ;;  %1011 = vmatmul.bf16.gmra.mxu3 %v486_v59 }
  0xf0   : > { %v1308_v15 = vmul.f32 %v8904_v9, %v8904_v9  ;;  %v1348_v16 = vmul.f32 %v8907_v10, %v8907_v10 }
  0xf2   : > { %v883_v14 = vpop.f32.mrf.mxu2  ;;  %v8922_v20 = vmin.f32 %v1308_v15, 16.0  ;;  %v8924_v21 = vmin.f32 %v1348_v16, 16.0  ;;  %v972_v27 = vpop.f32.mrf.mxu3 }
  0xf3   : > { %v8919_v18 = vadd.f32 %v883_v14, %v8910_v12  ;;  %v8936_v30 = vadd.f32 %v972_v27, %v8930_v25  ;;  %v707_v49 = vpop.f32.mrf.mxu0  ;;  %v796_v58 = vpop.f32.mrf.mxu1 }
  0xf4   : > { %v1321_v24 = vmul.f32 3.8918573e-05, %v8922_v20  ;;  %v1361_v26 = vmul.f32 3.8918573e-05, %v8924_v21  ;;  %v1310_v39 = vmul.f32 2.1237322e-06, %v8922_v20  ;;  %v8958_v56 = vadd.f32 %v707_v49, %v8891_v1 }
  0xf5   : > { %v8927_v23 = vmul.f32 0.70710677, %v8919_v18  ;;  %v8942_v34 = vmul.f32 0.70710677, %v8936_v30  ;;  %v1350_v43 = vmul.f32 2.1237322e-06, %v8924_v21  ;;  %v8967_v2 = vadd.f32 %v796_v58, %v8893_v3 }
  0xf6   : > { %v1322_v29 = vadd.f32 0.001143296, %v1321_v24  ;;  %v1362_v31 = vadd.f32 0.001143296, %v1361_v26  ;;  %v1311_v46 = vadd.f32 0.00028619796, %v1310_v39 }
  0xf7   : > { %v1388_v28 = vmul.f32 %v8927_v23, %v8927_v23  ;;  %v1428_v38 = vmul.f32 %v8942_v34, %v8942_v34  ;;  %v1351_v51 = vadd.f32 0.00028619796, %v1350_v43  ;;  %v8964_v0 = vmul.f32 0.70710677, %v8958_v56 }
  0xf8   : > { %v1323_v33 = vmul.f32 %v1322_v29, %v8922_v20  ;;  %v1363_v35 = vmul.f32 %v1362_v31, %v8924_v21  ;;  %v1312_v54 = vmul.f32 %v1311_v46, %v8922_v20  ;;  %v8976_v17 = vmul.f32 0.70710677, %v8967_v2 }
  0xf9   : > { %v8938_v32 = vmin.f32 %v1388_v28, 16.0  ;;  %v8951_v45 = vmin.f32 %v1428_v38, 16.0  ;;  %v1352_v59 = vmul.f32 %v1351_v51, %v8924_v21  ;;  %v1468_v16 = vmul.f32 %v8964_v0, %v8964_v0 }
  0xfa   : > { %v1324_v37 = vadd.f32 0.014752088, %v1323_v33  ;;  %v1364_v40 = vadd.f32 0.014752088, %v1363_v35  ;;  %v1313_v62 = vadd.f32 0.0036580483, %v1312_v54  ;;  %v885_v28 = vpop.f32.mrf.mxu2  ;;  %v1508_v35 = vmul.f32 %v8976_v17, %v8976_v17 }
  0xfb   : > { %v1401_v36 = vmul.f32 3.8918573e-05, %v8938_v32  ;;  %v1441_v53 = vmul.f32 3.8918573e-05, %v8951_v45  ;;  %v1353_v7 = vadd.f32 0.0036580483, %v1352_v59  ;;  %v8987_v38 = vadd.f32 %v885_v28, %v8910_v12  ;;  %v974_v28 = vpop.f32.mrf.mxu3 }
  0xfc   : > { %v1325_v44 = vmul.f32 %v1324_v37, %v8922_v20  ;;  %v1365_v47 = vmul.f32 %v1364_v40, %v8924_v21  ;;  %v1390_v11 = vmul.f32 2.1237322e-06, %v8938_v32  ;;  %v1314_v14 = vmul.f32 %v1313_v62, %v8922_v20 }
  0xfd   : > { %v1402_v41 = vadd.f32 0.001143296, %v1401_v36  ;;  %v1442_v61 = vadd.f32 0.001143296, %v1441_v53  ;;  %v8981_v33 = vmin.f32 %v1468_v16, 16.0 }
  0xfe   : > { %749 = vmatmul.bf16.gmra.mxu0 %v487_v22  ;;  %838 = vmatmul.bf16.gmra.mxu1 %v487_v22  ;;  %v1326_v52 = vadd.f32 0.112945676, %v1325_v44  ;;  %v1366_v55 = vadd.f32 0.112945676, %v1365_v47  ;;  %v1391_v26 = vadd.f32 0.00028619796, %v1390_v11 }
  0xff   : > { %927 = vmatmul.bf16.gmra.mxu2 %v487_v22  ;;  %1016 = vmatmul.bf16.gmra.mxu3 %v487_v22  ;;  %v1403_v48 = vmul.f32 %v1402_v41, %v8938_v32  ;;  %v1443_v13 = vmul.f32 %v1442_v61, %v8951_v45  ;;  %v1354_v22 = vmul.f32 %v1353_v7, %v8924_v21  ;;  %v1315_v29 = vadd.f32 0.05243302, %v1314_v14 }
 0x100   : > { %v1327_v60 = vmul.f32 %v1326_v52, %v8922_v20  ;;  %v1367_v63 = vmul.f32 %v1366_v55, %v8924_v21  ;;  %v1392_v40 = vmul.f32 %v1391_v26, %v8938_v32  ;;  %v1430_v41 = vmul.f32 2.1237322e-06, %v8951_v45 }
 0x101   : > { %v1404_v57 = vadd.f32 0.014752088, %v1403_v48  ;;  %v1444_v27 = vadd.f32 0.014752088, %v1443_v13  ;;  %v1355_v37 = vadd.f32 0.05243302, %v1354_v22  ;;  %v1316_v44 = vmul.f32 %v1315_v29, %v8922_v20 }
 0x102   : > { %v1328_v8 = vadd.f32 0.4994258, %v1327_v60  ;;  %v1368_v15 = vadd.f32 0.4994258, %v1367_v63  ;;  %v1481_v47 = vmul.f32 3.8918573e-05, %v8981_v33 }
 0x103   : > { %v1405_v4 = vmul.f32 %v1404_v57, %v8938_v32  ;;  %v1445_v43 = vmul.f32 %v1444_v27, %v8951_v45  ;;  %v8998_v48 = vmin.f32 %v1508_v35, 16.0  ;;  %v1356_v51 = vmul.f32 %v1355_v37, %v8924_v21 }
 0x104   : > { %v1329_v24 = vmul.f32 %v1328_v8, %v8922_v20  ;;  %v1369_v31 = vmul.f32 %v1368_v15, %v8924_v21  ;;  %v9002_v52 = vmul.f32 0.70710677, %v8987_v38  ;;  %v1393_v53 = vadd.f32 0.0036580483, %v1392_v40 }
 0x105   : > { %v1406_v19 = vadd.f32 0.112945676, %v1405_v4  ;;  %v1431_v54 = vadd.f32 0.00028619796, %v1430_v41  ;;  %v1446_v55 = vadd.f32 0.112945676, %v1445_v43  ;;  %v9045_v43 = vadd.f32 %v974_v28, %v8930_v25 }
 0x106   : > { %v8989_v39 = vadd.f32 1.0, %v1329_v24  ;;  %v8995_v46 = vadd.f32 1.0, %v1369_v31  ;;  %v1317_v57 = vadd.f32 0.18741608, %v1316_v44  ;;  %v1482_v58 = vadd.f32 0.001143296, %v1481_v47 }
 0x107   : > { %v1407_v36 = vmul.f32 %v1406_v19, %v8938_v32  ;;  %v1521_v59 = vmul.f32 3.8918573e-05, %v8998_v48  ;;  %v1548_v61 = vmul.f32 %v9002_v52, %v9002_v52  ;;  %v1357_v62 = vadd.f32 0.18741608, %v1356_v51 }
 0x108   : > { %8126 = vrcp.f32 %v8989_v39  ;;  %v1394_v63 = vmul.f32 %v1393_v53, %v8938_v32  ;;  %v1447_v4 = vmul.f32 %v1446_v55, %v8951_v45  ;;  %v1318_v7 = vmul.f32 %v1317_v57, %v8922_v20  ;;  %v710_v55 = vpop.f32.mrf.mxu0 }
 0x109   : > { %v1408_v49 = vadd.f32 0.4994258, %v1407_v36  ;;  %8128 = vrcp.f32 %v8995_v46  ;;  %v1432_v8 = vmul.f32 %v1431_v54, %v8951_v45  ;;  %v1483_v11 = vmul.f32 %v1482_v58, %v8981_v33 }
 0x10a   : > { %v1522_v13 = vadd.f32 0.001143296, %v1521_v59  ;;  %v9022_v19 = vmul.f32 0.5, %v8896_v5  ;;  %v9024_v22 = vmin.f32 %v1548_v61, 16.0  ;;  %v9027_v24 = vmul.f32 0.5, %v8899_v6 }
 0x10b   : > { %v1409_v60 = vmul.f32 %v1408_v49, %v8938_v32  ;;  %v1358_v20 = vmul.f32 %v1357_v62, %v8924_v21  ;;  %v1395_v26 = vadd.f32 0.05243302, %v1394_v63  ;;  %v1448_v27 = vadd.f32 0.4994258, %v1447_v4 }
 0x10c   : > { %v1319_v29 = vadd.f32 1.1283791, %v1318_v7  ;;  %v1433_v31 = vadd.f32 0.0036580483, %v1432_v8  ;;  %v1484_v35 = vadd.f32 0.014752088, %v1483_v11  ;;  %v1523_v36 = vmul.f32 %v1522_v13, %v8998_v48 }
 0x10d   : > { %v9017_v15 = vadd.f32 1.0, %v1409_v60  ;;  %v1470_v6 = vmul.f32 2.1237322e-06, %v8981_v33  ;;  %v9038_v21 = vmul.f32 0.5, %v8919_v18  ;;  %v9041_v40 = vmul.f32 0.5, %v8936_v30 }
 0x10e   : > { %v9015_v14 = vpop.eup %8126  ;;  %v1561_v41 = vmul.f32 3.8918573e-05, %v9024_v22  ;;  %v1396_v44 = vmul.f32 %v1395_v26, %v8938_v32  ;;  %v1449_v47 = vmul.f32 %v1448_v27, %v8951_v45  ;;  %v9050_v49 = vmul.f32 0.5, %v8958_v56 }
 0x10f   : > { %v9019_v16 = vpop.eup %8128  ;;  %v1332_v37 = vmul.f32 %v9015_v14, %v8989_v39  ;;  %8130 = vrcp.f32 %v9017_v15  ;;  %v9053_v51 = vmul.f32 0.5, %v8967_v2  ;;  %v1359_v18 = vadd.f32 1.1283791, %v1358_v20 }
 0x110   : > { %v1372_v5 = vmul.f32 %v9019_v16, %v8995_v46  ;;  %v1434_v53 = vmul.f32 %v1433_v31, %v8951_v45  ;;  %v1485_v30 = vmul.f32 %v1484_v35, %v8981_v33  ;;  %v1524_v54 = vadd.f32 0.014752088, %v1523_v36 }
 0x111   : > { %v9058_v57 = vmul.f32 %v1319_v29, %v8904_v9  ;;  %v1333_v58 = vsub.f32 1.0, %v1332_v37  ;;  %v1471_v60 = vadd.f32 0.00028619796, %v1470_v6  ;;  %vm1336_vm3 = vweird.f32 %v8989_v39 }
 0x112   : > { %v1373_v59 = vsub.f32 1.0, %v1372_v5  ;;  %v1340_v56 = vand.u32 2147483647, %v8989_v39  ;;  %v1562_v61 = vadd.f32 0.001143296, %v1561_v41  ;;  %v1342_v63 = vand.u32 2147483648, %v8989_v39 }
 0x113   : > { %v9063_v2 = vmul.f32 0.70710677, %v9045_v43  ;;  %v1397_v4 = vadd.f32 0.18741608, %v1396_v44  ;;  %v9068_v7 = vadd.f32 1.0, %v1449_v47  ;;  %v9071_v9 = vadd.f32 %v710_v55, %v8891_v1 }
 0x114   : > { %v9074_v8 = vmul.f32 %v1359_v18, %v8907_v10  ;;  %vm1376_vm4 = vweird.f32 %v8995_v46  ;;  %v1486_v11 = vadd.f32 0.112945676, %v1485_v30  ;;  %v1525_v13 = vmul.f32 %v1524_v54, %v8998_v48 }
 0x115   : > { %v9065_v62 = vpop.eup %8130  ;;  %v1334_v20 = vmul.f32 %v9015_v14, %v1333_v58  ;;  %v1374_v26 = vmul.f32 %v9019_v16, %v1373_v59  ;;  %v1380_v27 = vand.u32 2147483647, %v8995_v46  ;;  %v1472_v28 = vmul.f32 %v1471_v60, %v8981_v33 }
 0x116   : > { %v1412_v29 = vmul.f32 %v9065_v62, %v9017_v15  ;;  %v1510_v31 = vmul.f32 2.1237322e-06, %v8998_v48  ;;  %v1563_v10 = vmul.f32 %v1562_v61, %v9024_v22  ;;  %v1588_v35 = vmul.f32 %v9063_v2, %v9063_v2 }
 0x117   : > { %v1398_v36 = vmul.f32 %v1397_v4, %v8938_v32  ;;  %v1435_v37 = vadd.f32 0.05243302, %v1434_v53  ;;  %8132 = vrcp.f32 %v9068_v7  ;;  %v9091_v5 = vmul.f32 0.70710677, %v9071_v9 }
 0x118   : > { %vm1337_vm5 = vweird.f32 %v9015_v14  ;;  %vm9094_vm6 = vcmp.eq.f32.partialorder %v1340_v56, 8.507059e+37  ;;  %v1382_v41 = vand.u32 2147483648, %v8995_v46  ;;  %v1487_v44 = vmul.f32 %v1486_v11, %v8981_v33 }
 0x119   : > { %v1526_v47 = vadd.f32 0.112945676, %v1525_v13  ;;  %v1335_v18 = vadd.f32 %v9015_v14, %v1334_v20  ;;  %v1375_v32 = vadd.f32 %v9019_v16, %v1374_v26  ;;  %vm1377_vm7 = vweird.f32 %v9019_v16  ;;  %vm9107_vm8 = vmor %vm1336_vm3, %vm1337_vm5 }
 0x11a   : > { %v1473_v53 = vadd.f32 0.0036580483, %v1472_v28  ;;  %v1413_v30 = vsub.f32 1.0, %v1412_v29  ;;  %v1511_v54 = vadd.f32 0.00028619796, %v1510_v31  ;;  %v9103_v58 = vmin.f32 %v1588_v35, 16.0  ;;  %vm9116_vm9 = vmor %vm1376_vm4, %vm1377_vm7  ;;  %v799_v31 = vpop.f32.mrf.mxu1 }
 0x11b   : > { %v1564_v55 = vadd.f32 0.014752088, %v1563_v10  ;;  %v1343_v60 = vor.u32 1.1754944e-38, %v1342_v63  ;;  %v1399_v56 = vadd.f32 1.1283791, %v1398_v36  ;;  %v1436_v61 = vmul.f32 %v1435_v37, %v8951_v45 }
 0x11c   : > { %v1628_v4 = vmul.f32 %v9091_v5, %v9091_v5  ;;  %vm9120_vm10 = vcmp.eq.f32.partialorder %v1380_v27, 8.507059e+37  ;;  %v1488_v39 = vadd.f32 0.4994258, %v1487_v44  ;;  %v1527_v20 = vmul.f32 %v1526_v47, %v8998_v48 }
 0x11d   : > { %v9126_v63 = vmul.f32 0.5, %v8987_v38  ;;  %v9128_v26 = vpop.eup %8132  ;;  %v1339_v46 = vsel %vm9107_vm8, %v9015_v14, %v1335_v18  ;;  %v1379_v28 = vsel %vm9116_vm9, %v9019_v16, %v1375_v32  ;;  %v1383_v27 = vor.u32 1.1754944e-38, %v1382_v41 }
 0x11e   : > { %v1474_v29 = vmul.f32 %v1473_v53, %v8981_v33  ;;  %v1414_v10 = vmul.f32 %v9065_v62, %v1413_v30  ;;  %v1512_v35 = vmul.f32 %v1511_v54, %v8998_v48  ;;  %v1565_v38 = vmul.f32 %v1564_v55, %v9024_v22 }
 0x11f   : > { %v1601_v36 = vmul.f32 3.8918573e-05, %v9103_v58  ;;  %v1400_v37 = vmul.f32 %v1399_v56, %v8927_v23  ;;  %v1422_v14 = vand.u32 2147483648, %v9017_v15  ;;  %v1437_v44 = vadd.f32 0.18741608, %v1436_v61 }
 0x120   : > { %v9143_v47 = vmin.f32 %v1628_v4, 16.0  ;;  %v1452_v16 = vmul.f32 %v9128_v26, %v9068_v7  ;;  %v1489_v41 = vmul.f32 %v1488_v39, %v8981_v33  ;;  %v1528_v18 = vadd.f32 0.4994258, %v1527_v20  ;;  %v383_v20 = vld [vmem:[%s8816_s18 + $0xa0] sm:$0xff] }
 0x121   : > { %v9149_v32 = vadd.f32 %v799_v31, %v8893_v3  ;;  %v1344_v53 = vsel %vm9094_vm6, %v1343_v60, %v1339_v46  ;;  %v1384_v23 = vsel %vm9120_vm10, %v1383_v27, %v1379_v28  ;;  %vm1417_vm11 = vweird.f32 %v9065_v62  ;;  %v384_v46 = vld [vmem:[%s8816_s18 + $0xa8] sm:$0xff] }
 0x122   : > { %v1475_v30 = vadd.f32 0.05243302, %v1474_v29  ;;  %v1415_v54 = vadd.f32 %v9065_v62, %v1414_v10  ;;  %v1513_v55 = vadd.f32 0.0036580483, %v1512_v35  ;;  %v1566_v59 = vadd.f32 0.112945676, %v1565_v38 }
 0x123   : > { %v1602_v56 = vadd.f32 0.001143296, %v1601_v36  ;;  %vm1416_vm12 = vweird.f32 %v9017_v15  ;;  %v1420_v61 = vand.u32 2147483647, %v9017_v15  ;;  %v1438_v6 = vmul.f32 %v1437_v44, %v8951_v45 }
 0x124   : > { %v1641_v60 = vmul.f32 3.8918573e-05, %v9143_v47  ;;  %v1453_v4 = vsub.f32 1.0, %v1452_v16  ;;  %v9161_v11 = vadd.f32 1.0, %v1489_v41  ;;  %v1529_v13 = vmul.f32 %v1528_v18, %v8998_v48  ;;  %vm9173_vm13 = vmor %vm1416_vm12, %vm1417_vm11 }
 0x125   : > { %v9165_v39 = vmul.f32 0.70710677, %v9149_v32  ;;  %v1345_v28 = vmul.f32 %v1344_v53, %v9058_v57  ;;  %v1385_v27 = vmul.f32 %v1384_v23, %v9074_v8  ;;  %v1423_v15 = vor.u32 1.1754944e-38, %v1422_v14 }
 0x126   : > { %v1476_v29 = vmul.f32 %v1475_v30, %v8981_v33  ;;  %v1419_v31 = vsel %vm9173_vm13, %v9065_v62, %v1415_v54  ;;  %v1514_v10 = vmul.f32 %v1513_v55, %v8998_v48  ;;  %v1567_v35 = vmul.f32 %v1566_v59, %v9024_v22 }
 0x127   : > { %v1603_v57 = vmul.f32 %v1602_v56, %v9103_v58  ;;  %v1550_v8 = vmul.f32 2.1237322e-06, %v9024_v22  ;;  %v1642_v38 = vadd.f32 0.001143296, %v1641_v60  ;;  %v431_v36 = vsub.f32 %v383_v20, %v8833_v42 }
 0x128   : > { %v432_v44 = vsub.f32 %v384_v46, %v8833_v42  ;;  %v1454_v14 = vmul.f32 %v9128_v26, %v1453_v4  ;;  %8134 = vrcp.f32 %v9161_v11  ;;  %v9189_v16 = vadd.f32 1.0, %v1529_v13 }
 0x129   : > { %v1668_v62 = vmul.f32 %v9165_v39, %v9165_v39  ;;  %v7700_v41 = vclamps-f32 %v1345_v28, 1.0  ;;  %v7701_v18 = vclamps-f32 %v1385_v27, 1.0  ;;  %vm1421_vm14 = vcmp.eq.f32.partialorder %v1420_v61, 8.507059e+37 }
 0x12a   : > { %v1477_v53 = vadd.f32 0.18741608, %v1476_v29  ;;  %v1424_v23 = vsel %vm1421_vm14, %v1423_v15, %v1419_v31  ;;  %vm1457_vm15 = vweird.f32 %v9128_v26  ;;  %v1568_v30 = vadd.f32 0.4994258, %v1567_v35 }
 0x12b   : > { %v1604_v54 = vadd.f32 0.014752088, %v1603_v57  ;;  %v1515_v55 = vadd.f32 0.05243302, %v1514_v10  ;;  %v1643_v42 = vmul.f32 %v1642_v38, %v9143_v47  ;;  %v466_v59 = vmul.f32 %v8839_v50, %v431_v36  ;;  %v8012_v57 = vld [vmem:[#allocation10 + $0x90] sm:$0xff] }
 0x12c   : > { %v467_v56 = vmul.f32 %v8839_v50, %v432_v44  ;;  %v1455_v60 = vadd.f32 %v9128_v26, %v1454_v14  ;;  %8136 = vrcp.f32 %v9189_v16  ;;  %v1551_v4 = vadd.f32 0.00028619796, %v1550_v8  ;;  %v7996_v8 = vld [vmem:[#allocation10 + $0x10] sm:$0xff]  ;;  %7191 = vmatpush.bf16.msrb.mxu2 %v8012_v57 }
 0x12d   : > { %v9199_v13 = vmin.f32 %v1668_v62, 16.0  ;;  %v1425_v61 = vmul.f32 %v1424_v23, %v1400_v37  ;;  %v1439_v20 = vadd.f32 1.1283791, %v1438_v6  ;;  %v1462_v46 = vand.u32 2147483648, %v9068_v7  ;;  %v8020_v14 = vld [vmem:[#allocation10 + $0xd0] sm:$0xff]  ;;  %7013 = vmatpush.bf16.msrb.mxu0 %v7996_v8 }
 0x12e   : > { %v488_v28 = vpack.c.bf16 %v467_v56, %v466_v59  ;;  %v9202_v27 = vpop.eup %8134  ;;  %vm1456_vm0 = vweird.f32 %v9068_v7  ;;  %v1460_v45 = vand.u32 2147483647, %v9068_v7  ;;  %v1569_v15 = vmul.f32 %v1568_v30, %v9024_v22  ;;  %7280 = vmatpush.bf16.msrb.mxu3 %v8020_v14 }
 0x12f   : > { %v1605_v29 = vmul.f32 %v1604_v54, %v9103_v58  ;;  %v6428_v31 = vadd.f32 1.0, %v7700_v41  ;;  %v6429_v10 = vadd.f32 1.0, %v7701_v18  ;;  %vm9210_vm1 = vmor %vm1456_vm0, %vm1457_vm15  ;;  %v1478_v6 = vmul.f32 %v1477_v53, %v8981_v33 }
 0x130   : > { %v1644_v35 = vadd.f32 0.014752088, %v1643_v42  ;;  %754 = vmatmul.bf16.gmra.mxu0 %v488_v28  ;;  %843 = vmatmul.bf16.gmra.mxu1 %v488_v28  ;;  %v1459_v7 = vsel %vm9210_vm1, %v9128_v26, %v1455_v60  ;;  %v1516_v38 = vmul.f32 %v1515_v55, %v8998_v48  ;;  %v1552_v36 = vmul.f32 %v1551_v4, %v9024_v22 }
 0x131   : > { %v1681_v44 = vmul.f32 3.8918573e-05, %v9199_v13  ;;  %932 = vmatmul.bf16.gmra.mxu2 %v488_v28  ;;  %1021 = vmatmul.bf16.gmra.mxu3 %v488_v28  ;;  %v7702_v62 = vclamps-f32 %v1425_v61, 1.0  ;;  %v1463_v33 = vor.u32 1.1754944e-38, %v1462_v46  ;;  %v1492_v41 = vmul.f32 %v9202_v27, %v9161_v11  ;;  %v888_v46 = vpop.f32.mrf.mxu2 }
 0x132   : > { %v1590_v18 = vmul.f32 2.1237322e-06, %v9103_v58  ;;  %v9224_v53 = vpop.eup %8136  ;;  %v1440_v26 = vmul.f32 %v1439_v20, %v8942_v34  ;;  %vm1461_vm2 = vcmp.eq.f32.partialorder %v1460_v45, 8.507059e+37  ;;  %v9227_v23 = vadd.f32 1.0, %v1569_v15 }
 0x133   : > { %v1606_v30 = vadd.f32 0.112945676, %v1605_v29  ;;  %v9230_v54 = vmul.f32 %v6428_v31, %v9022_v19  ;;  %v1464_v55 = vsel %vm1461_vm2, %v1463_v33, %v1459_v7  ;;  %v1479_v42 = vadd.f32 1.1283791, %v1478_v6  ;;  %v977_v6 = vpop.f32.mrf.mxu3 }
 0x134   : > { %v1645_v59 = vmul.f32 %v1644_v35, %v9143_v47  ;;  %v9234_v56 = vmul.f32 %v6429_v10, %v9027_v24  ;;  %v1517_v60 = vadd.f32 0.18741608, %v1516_v38  ;;  %v1553_v4 = vadd.f32 0.0036580483, %v1552_v36 }
 0x135   : > { %16192 = vst [vmem:[#allocation16_spill] sm:$0xff] %v9230_v54  ;;  %v1682_v61 = vadd.f32 0.001143296, %v1681_v44  ;;  %v6430_v34 = vadd.f32 1.0, %v7702_v62  ;;  %v1493_v20 = vsub.f32 1.0, %v1492_v41  ;;  %v1532_v28 = vmul.f32 %v9224_v53, %v9189_v16 }
 0x136   : > { %16193 = vst [vmem:[#allocation17_spill] sm:$0xff] %v9234_v56  ;;  %v1591_v45 = vadd.f32 0.00028619796, %v1590_v18  ;;  %v1465_v15 = vmul.f32 %v1464_v55, %v1440_v26  ;;  %8138 = vrcp.f32 %v9227_v23  ;;  %v1607_v19 = vmul.f32 %v1606_v30, %v9103_v58 }
 0x137   : > { %v1630_v29 = vmul.f32 2.1237322e-06, %v9143_v47  ;;  %v9242_v24 = vmul.f32 %v1479_v42, %v8964_v0  ;;  %v1502_v31 = vand.u32 2147483648, %v9161_v11  ;;  %v1646_v10 = vadd.f32 0.112945676, %v1645_v59 }
 0x138   : > { %v9246_v37 = vadd.f32 %v888_v46, %v8910_v12  ;;  %v1500_v35 = vand.u32 2147483647, %v9161_v11  ;;  %v1518_v57 = vmul.f32 %v1517_v60, %v8998_v48  ;;  %v1554_v8 = vmul.f32 %v1553_v4, %v9024_v22 }
 0x139   : > { %v1683_v7 = vmul.f32 %v1682_v61, %v9199_v13  ;;  %v1494_v38 = vmul.f32 %v9202_v27, %v1493_v20  ;;  %vm1496_vm3 = vweird.f32 %v9161_v11  ;;  %v1533_v0 = vsub.f32 1.0, %v1532_v28  ;;  %v712_v61 = vpop.f32.mrf.mxu0 }
 0x13a   : > { %v1592_v36 = vmul.f32 %v1591_v45, %v9103_v58  ;;  %v7703_v44 = vclamps-f32 %v1465_v15, 1.0  ;;  %v1608_v14 = vadd.f32 0.4994258, %v1607_v19  ;;  %v1631_v62 = vadd.f32 0.00028619796, %v1630_v29 }
 0x13b   : > { %v9256_v33 = vadd.f32 %v977_v6, %v8930_v25  ;;  %v1503_v41 = vor.u32 1.1754944e-38, %v1502_v31  ;;  %v9259_v48 = vmul.f32 0.5, %v9045_v43  ;;  %v1647_v18 = vmul.f32 %v1646_v10, %v9143_v47 }
 0x13c   : > { %v9263_v26 = vmul.f32 0.70710677, %v9246_v37  ;;  %v9265_v30 = vpop.eup %8138  ;;  %v9268_v55 = vmul.f32 %v6430_v34, %v9038_v21  ;;  %vm9270_vm4 = vcmp.eq.f32.partialorder %v1500_v35, 8.507059e+37  ;;  %v1519_v59 = vadd.f32 1.1283791, %v1518_v57 }
 0x13d   : > { %v1555_v60 = vadd.f32 0.05243302, %v1554_v8  ;;  %v1684_v4 = vadd.f32 0.014752088, %v1683_v7  ;;  %v1495_v43 = vadd.f32 %v9202_v27, %v1494_v38  ;;  %vm1497_vm5 = vweird.f32 %v9202_v27 }
 0x13e   : > { %16194 = vst [vmem:[#allocation18_spill] sm:$0xff] %v9268_v55  ;;  %v1534_v46 = vmul.f32 %v9224_v53, %v1533_v0  ;;  %v1593_v20 = vadd.f32 0.0036580483, %v1592_v36  ;;  %v6431_v28 = vadd.f32 1.0, %v7703_v44  ;;  %v1609_v45 = vmul.f32 %v1608_v14, %v9103_v58  ;;  %vm9291_vm6 = vmor %vm1496_vm3, %vm1497_vm5 }
 0x13f   : > { %v1632_v21 = vmul.f32 %v1631_v62, %v9143_v47  ;;  %v9280_v34 = vmul.f32 0.70710677, %v9256_v33  ;;  %v1572_v15 = vmul.f32 %v9265_v30, %v9227_v23  ;;  %v1648_v19 = vadd.f32 0.4994258, %v1647_v18 }
 0x140   : > { %v1708_v29 = vmul.f32 %v9263_v26, %v9263_v26  ;;  %v9287_v31 = vadd.f32 %v712_v61, %v8891_v1  ;;  %v1520_v6 = vmul.f32 %v1519_v59, %v8976_v17  ;;  %vm1536_vm7 = vweird.f32 %v9189_v16 }
 0x141   : > { %v1556_v35 = vmul.f32 %v1555_v60, %v9024_v22  ;;  %v1685_v57 = vmul.f32 %v1684_v4, %v9199_v13  ;;  %v1499_v8 = vsel %vm9291_vm6, %v9202_v27, %v1495_v43  ;;  %v1535_v7 = vadd.f32 %v9224_v53, %v1534_v46 }
 0x142   : > { %vm1537_vm8 = vweird.f32 %v9224_v53  ;;  %v1594_v11 = vmul.f32 %v1593_v20, %v9103_v58  ;;  %v9305_v38 = vadd.f32 1.0, %v1609_v45  ;;  %v1633_v0 = vadd.f32 0.0036580483, %v1632_v21 }
 0x143   : > { %v1670_v17 = vmul.f32 2.1237322e-06, %v9199_v13  ;;  %v1748_v36 = vmul.f32 %v9280_v34, %v9280_v34  ;;  %v1573_v44 = vsub.f32 1.0, %v1572_v15  ;;  %v1649_v14 = vmul.f32 %v1648_v19, %v9143_v47  ;;  %vm9318_vm9 = vmor %vm1536_vm7, %vm1537_vm8 }
 0x144   : > { %v9311_v62 = vmin.f32 %v1708_v29, 16.0  ;;  %v9314_v27 = vmul.f32 0.70710677, %v9287_v31  ;;  %v1542_v59 = vand.u32 2147483648, %v9189_v16  ;;  %v1557_v60 = vadd.f32 0.18741608, %v1556_v35 }
 0x145   : > { %v9324_v4 = vmul.f32 0.5, %v9071_v9  ;;  %v1686_v61 = vadd.f32 0.112945676, %v1685_v57  ;;  %v1504_v43 = vsel %vm9270_vm4, %v1503_v41, %v1499_v8  ;;  %v1539_v46 = vsel %vm9318_vm9, %v9224_v53, %v1535_v7 }
 0x146   : > { %v1540_v20 = vand.u32 2147483647, %v9189_v16  ;;  %v1595_v45 = vadd.f32 0.05243302, %v1594_v11  ;;  %8140 = vrcp.f32 %v9305_v38  ;;  %v1634_v21 = vmul.f32 %v1633_v0, %v9143_v47 }
 0x147   : > { %v1671_v15 = vadd.f32 0.00028619796, %v1670_v17  ;;  %v9334_v19 = vmin.f32 %v1748_v36, 16.0  ;;  %v1574_v9 = vmul.f32 %v9265_v30, %v1573_v44  ;;  %v9337_v29 = vadd.f32 1.0, %v1649_v14 }
 0x148   : > { %v1721_v41 = vmul.f32 3.8918573e-05, %v9311_v62  ;;  %v1788_v42 = vmul.f32 %v9314_v27, %v9314_v27  ;;  %v9343_v53 = vmul.f32 %v6431_v28, %v9041_v40  ;;  %v1505_v16 = vmul.f32 %v1504_v43, %v9242_v24  ;;  %v8004_v40 = vld [vmem:[#allocation10 + $0x50] sm:$0xff] }
 0x149   : > { %v1543_v10 = vor.u32 1.1754944e-38, %v1542_v59  ;;  %v1687_v35 = vmul.f32 %v1686_v61, %v9199_v13  ;;  %vm1541_vm10 = vcmp.eq.f32.partialorder %v1540_v20, 8.507059e+37  ;;  %v1558_v57 = vmul.f32 %v1557_v60, %v9024_v22  ;;  %7102 = vmatpush.bf16.msrb.mxu1 %v8004_v40 }
 0x14a   : > { %16201 = vst [vmem:[#allocation19_spill] sm:$0xff] %v9343_v53  ;;  %vm1577_vm11 = vweird.f32 %v9265_v30  ;;  %v1596_v8 = vmul.f32 %v1595_v45, %v9103_v58  ;;  %v1635_v11 = vadd.f32 0.05243302, %v1634_v21  ;;  %v1672_v0 = vmul.f32 %v1671_v15, %v9199_v13  ;;  %v801_v15 = vpop.f32.mrf.mxu1 }
 0x14b   : > { %v1544_v7 = vsel %vm1541_vm10, %v1543_v10, %v1539_v46  ;;  %v1761_v17 = vmul.f32 3.8918573e-05, %v9334_v19  ;;  %v1575_v28 = vadd.f32 %v9265_v30, %v1574_v9  ;;  %8142 = vrcp.f32 %v9337_v29 }
 0x14c   : > { %v1722_v24 = vadd.f32 0.001143296, %v1721_v41  ;;  %v9354_v36 = vmin.f32 %v1788_v42, 16.0  ;;  %v9356_v44 = vpop.eup %8140  ;;  %v7704_v22 = vclamps-f32 %v1505_v16, 1.0  ;;  %v1582_v14 = vand.u32 2147483648, %v9227_v23 }
 0x14d   : > { %v9360_v18 = vmul.f32 0.5, %v9149_v32  ;;  %v1688_v59 = vadd.f32 0.4994258, %v1687_v35  ;;  %v1559_v60 = vadd.f32 1.1283791, %v1558_v57  ;;  %vm1576_vm12 = vweird.f32 %v9227_v23 }
 0x14e   : > { %v1580_v61 = vand.u32 2147483647, %v9227_v23  ;;  %v1597_v43 = vadd.f32 0.18741608, %v1596_v8  ;;  %v1545_v46 = vmul.f32 %v1544_v7, %v1520_v6  ;;  %vm9366_vm13 = vmor %vm1576_vm12, %vm1577_vm11  ;;  %v1636_v45 = vmul.f32 %v1635_v11, %v9143_v47 }
 0x14f   : > { %v1673_v21 = vadd.f32 0.0036580483, %v1672_v0  ;;  %v1762_v32 = vadd.f32 0.001143296, %v1761_v17  ;;  %v1579_v9 = vsel %vm9366_vm13, %v9265_v30, %v1575_v28  ;;  %v1612_v23 = vmul.f32 %v9356_v44, %v9305_v38 }
 0x150   : > { %v1723_v6 = vmul.f32 %v1722_v24, %v9311_v62  ;;  %v1801_v41 = vmul.f32 3.8918573e-05, %v9354_v36  ;;  %v6432_v42 = vadd.f32 1.0, %v7704_v22  ;;  %v1583_v16 = vor.u32 1.1754944e-38, %v1582_v14 }
 0x151   : > { %v1689_v10 = vmul.f32 %v1688_v59, %v9199_v13  ;;  %v1710_v35 = vmul.f32 2.1237322e-06, %v9311_v62  ;;  %v9380_v57 = vpop.eup %8142  ;;  %v1560_v8 = vmul.f32 %v1559_v60, %v9002_v52  ;;  %vm1581_vm14 = vcmp.eq.f32.partialorder %v1580_v61, 8.507059e+37 }
 0x152   : > { %v1598_v30 = vmul.f32 %v1597_v43, %v9103_v58  ;;  %v9385_v7 = vadd.f32 %v801_v15, %v8893_v3  ;;  %v1584_v11 = vsel %vm1581_vm14, %v1583_v16, %v1579_v9  ;;  %v1637_v0 = vadd.f32 0.18741608, %v1636_v45 }
 0x153   : > { %v1674_v17 = vmul.f32 %v1673_v21, %v9199_v13  ;;  %v1763_v40 = vmul.f32 %v1762_v32, %v9334_v19  ;;  %v7705_v28 = vclamps-f32 %v1545_v46, 1.0  ;;  %v1613_v24 = vsub.f32 1.0, %v1612_v23 }
 0x154   : > { %v1724_v22 = vadd.f32 0.014752088, %v1723_v6  ;;  %v1802_v14 = vadd.f32 0.001143296, %v1801_v41  ;;  %v9390_v59 = vmul.f32 %v6432_v42, %v9050_v49  ;;  %v1652_v52 = vmul.f32 %v9380_v57, %v9337_v29 }
 0x155   : > { %v9394_v58 = vadd.f32 1.0, %v1689_v10  ;;  %v1711_v60 = vadd.f32 0.00028619796, %v1710_v35  ;;  %v1585_v61 = vmul.f32 %v1584_v11, %v1560_v8  ;;  %v1599_v43 = vadd.f32 1.1283791, %v1598_v30 }
 0x156   : > { %16204 = vst [vmem:[#allocation20_spill] sm:$0xff] %v9390_v59  ;;  %v1620_v20 = vand.u32 2147483647, %v9305_v38  ;;  %v9398_v45 = vmul.f32 0.70710677, %v9385_v7  ;;  %v1622_v46 = vand.u32 2147483648, %v9305_v38  ;;  %v1638_v21 = vmul.f32 %v1637_v0, %v9143_v47 }
 0x157   : > { %v1675_v32 = vadd.f32 0.05243302, %v1674_v17  ;;  %v1764_v49 = vadd.f32 0.014752088, %v1763_v40  ;;  %v6433_v15 = vadd.f32 1.0, %v7705_v28  ;;  %v1614_v9 = vmul.f32 %v9356_v44, %v1613_v24  ;;  %v890_v40 = vpop.f32.mrf.mxu2 }
 0x158   : > { %v1725_v23 = vmul.f32 %v1724_v22, %v9311_v62  ;;  %v1803_v6 = vmul.f32 %v1802_v14, %v9354_v36  ;;  %v1653_v41 = vsub.f32 1.0, %v1652_v52  ;;  %8144 = vrcp.f32 %v9394_v58 }
 0x159   : > { %v1712_v42 = vmul.f32 %v1711_v60, %v9311_v62  ;;  %v1750_v16 = vmul.f32 2.1237322e-06, %v9334_v19  ;;  %v7706_v10 = vclamps-f32 %v1585_v61, 1.0  ;;  %v1600_v35 = vmul.f32 %v1599_v43, %v9063_v2 }
 0x15a   : > { %vm1616_vm15 = vweird.f32 %v9305_v38  ;;  %v1828_v47 = vmul.f32 %v9398_v45, %v9398_v45  ;;  %vm9412_vm0 = vcmp.eq.f32.partialorder %v1620_v20, 8.507059e+37  ;;  %v1623_v30 = vor.u32 1.1754944e-38, %v1622_v46 }
 0x15b   : > { %v1639_v11 = vadd.f32 1.1283791, %v1638_v21  ;;  %v1676_v0 = vmul.f32 %v1675_v32, %v9199_v13  ;;  %v1765_v17 = vmul.f32 %v1764_v49, %v9334_v19  ;;  %v1615_v28 = vadd.f32 %v9356_v44, %v1614_v9 }
 0x15c   : > { %vm1617_vm1 = vweird.f32 %v9356_v44  ;;  %v1726_v2 = vadd.f32 0.112945676, %v1725_v23  ;;  %v1804_v24 = vadd.f32 0.014752088, %v1803_v6  ;;  %v9421_v22 = vmul.f32 %v6433_v15, %v9053_v51 }
 0x15d   : > { %v1654_v14 = vmul.f32 %v9380_v57, %v1653_v41  ;;  %v1713_v52 = vadd.f32 0.0036580483, %v1712_v42  ;;  %v1751_v60 = vadd.f32 0.00028619796, %v1750_v16  ;;  %v6434_v61 = vadd.f32 1.0, %v7706_v10  ;;  %vm9436_vm2 = vmor %vm1616_vm15, %vm1617_vm1 }
 0x15e   : > { %16207 = vst [vmem:[#allocation21_spill] sm:$0xff] %v9421_v22  ;;  %v9425_v43 = vmul.f32 0.5, %v9246_v37  ;;  %v9427_v20 = vmin.f32 %v1828_v47, 16.0  ;;  %v9430_v46 = vadd.f32 %v890_v40, %v8910_v12  ;;  %v9432_v21 = vpop.eup %8144  ;;  %v1640_v32 = vmul.f32 %v1639_v11, %v9091_v5  ;;  %v979_v40 = vpop.f32.mrf.mxu3 }
 0x15f   : > { %v1660_v49 = vand.u32 2147483647, %v9337_v29  ;;  %v1677_v15 = vadd.f32 0.18741608, %v1676_v0  ;;  %v1766_v37 = vadd.f32 0.112945676, %v1765_v17  ;;  %v1619_v9 = vsel %vm9436_vm2, %v9356_v44, %v1615_v28 }
 0x160   : > { %vm1657_vm3 = vweird.f32 %v9380_v57  ;;  %v1727_v23 = vmul.f32 %v1726_v2, %v9311_v62  ;;  %v1805_v38 = vmul.f32 %v1804_v24, %v9354_v36  ;;  %v1655_v6 = vadd.f32 %v9380_v57, %v1654_v14 }
 0x161   : > { %v1714_v41 = vmul.f32 %v1713_v52, %v9311_v62  ;;  %v1752_v5 = vmul.f32 %v1751_v60, %v9334_v19  ;;  %v1790_v42 = vmul.f32 2.1237322e-06, %v9354_v36  ;;  %vm1656_vm4 = vweird.f32 %v9337_v29 }
 0x162   : > { %v1692_v16 = vmul.f32 %v9432_v21, %v9394_v58  ;;  %v1841_v44 = vmul.f32 3.8918573e-05, %v9427_v20  ;;  %v9457_v10 = vmul.f32 0.70710677, %v9430_v46  ;;  %v9460_v47 = vmul.f32 %v6434_v61, %v9126_v63  ;;  %vm9472_vm6 = vmor %vm1656_vm4, %vm1657_vm3 }
 0x163   : > { %vm9462_vm5 = vcmp.eq.f32.partialorder %v1660_v49, 8.507059e+37  ;;  %v1662_v0 = vand.u32 2147483648, %v9337_v29  ;;  %v1767_v17 = vmul.f32 %v1766_v37, %v9334_v19  ;;  %v1624_v28 = vsel %vm9412_vm0, %v1623_v30, %v1619_v9 }
 0x164   : > { %16210 = vst [vmem:[#allocation22_spill] sm:$0xff] %v9460_v47  ;;  %v1678_v63 = vmul.f32 %v1677_v15, %v9199_v13  ;;  %v1728_v24 = vadd.f32 0.4994258, %v1727_v23  ;;  %v1806_v14 = vadd.f32 0.112945676, %v1805_v38  ;;  %v1659_v29 = vsel %vm9472_vm6, %v9380_v57, %v1655_v6 }
 0x165   : > { %v1715_v52 = vadd.f32 0.05243302, %v1714_v41  ;;  %v1753_v60 = vadd.f32 0.0036580483, %v1752_v5  ;;  %v1791_v61 = vadd.f32 0.00028619796, %v1790_v42  ;;  %v1868_v30 = vmul.f32 %v9457_v10, %v9457_v10  ;;  %v715_v41 = vpop.f32.mrf.mxu0 }
 0x166   : > { %v1693_v51 = vsub.f32 1.0, %v1692_v16  ;;  %v1842_v8 = vadd.f32 0.001143296, %v1841_v44  ;;  %v9483_v49 = vadd.f32 %v979_v40, %v8930_v25  ;;  %v1625_v37 = vmul.f32 %v1624_v28, %v1600_v35 }
 0x167   : > { %v1663_v9 = vor.u32 1.1754944e-38, %v1662_v0  ;;  %v9486_v13 = vmul.f32 0.5, %v9256_v33  ;;  %v1768_v15 = vadd.f32 0.4994258, %v1767_v17  ;;  %v1679_v23 = vadd.f32 1.1283791, %v1678_v63 }
 0x168   : > { %v1729_v57 = vmul.f32 %v1728_v24, %v9311_v62  ;;  %v9490_v38 = vmul.f32 0.5, %v9287_v31  ;;  %v1807_v6 = vmul.f32 %v1806_v14, %v9354_v36  ;;  %v1716_v42 = vmul.f32 %v1715_v52, %v9311_v62 }
 0x169   : > { %v1664_v5 = vsel %vm9462_vm5, %v1663_v9, %v1659_v29  ;;  %v1754_v35 = vmul.f32 %v1753_v60, %v9334_v19  ;;  %v1792_v33 = vmul.f32 %v1791_v61, %v9354_v36  ;;  %v1694_v16 = vmul.f32 %v9432_v21, %v1693_v51  ;;  %v804_v60 = vpop.f32.mrf.mxu1 }
 0x16a   : > { %v1843_v44 = vmul.f32 %v1842_v8, %v9427_v20  ;;  %v9500_v0 = vmin.f32 %v1868_v30, 16.0  ;;  %v9503_v31 = vmul.f32 0.70710677, %v9483_v49  ;;  %v7707_v17 = vclamps-f32 %v1625_v37, 1.0 }
 0x16b   : > { %vm1696_vm7 = vweird.f32 %v9394_v58  ;;  %v1769_v11 = vmul.f32 %v1768_v15, %v9334_v19  ;;  %v9508_v40 = vadd.f32 %v715_v41, %v8891_v1  ;;  %v1665_v28 = vmul.f32 %v1664_v5, %v1640_v32 }
 0x16c   : > { %v1700_v2 = vand.u32 2147483647, %v9394_v58  ;;  %v9511_v63 = vadd.f32 1.0, %v1729_v57  ;;  %v1808_v24 = vadd.f32 0.4994258, %v1807_v6  ;;  %vm1697_vm8 = vweird.f32 %v9432_v21 }
 0x16d   : > { %v1717_v14 = vadd.f32 0.18741608, %v1716_v42  ;;  %v1755_v29 = vadd.f32 0.05243302, %v1754_v35  ;;  %v1793_v52 = vadd.f32 0.0036580483, %v1792_v33  ;;  %v1695_v61 = vadd.f32 %v9432_v21, %v1694_v16  ;;  %vm9534_vm9 = vmor %vm1696_vm7, %vm1697_vm8 }
 0x16e   : > { %v1844_v51 = vadd.f32 0.014752088, %v1843_v44  ;;  %v1881_v8 = vmul.f32 3.8918573e-05, %v9500_v0  ;;  %v1908_v30 = vmul.f32 %v9503_v31, %v9503_v31  ;;  %v1702_v32 = vand.u32 2147483648, %v9394_v58 }
 0x16f   : > { %v9519_v37 = vadd.f32 1.0, %v1769_v11  ;;  %v1830_v9 = vmul.f32 2.1237322e-06, %v9427_v20  ;;  %v9523_v15 = vmul.f32 0.70710677, %v9508_v40  ;;  %v7708_v57 = vclamps-f32 %v1665_v28, 1.0 }
 0x170   : > { %8146 = vrcp.f32 %v9511_v63  ;;  %v1809_v6 = vmul.f32 %v1808_v24, %v9354_v36  ;;  %v9528_v41 = vadd.f32 %v804_v60, %v8893_v3  ;;  %v6435_v5 = vadd.f32 1.0, %v7707_v17 }
 0x171   : > { %v1718_v35 = vmul.f32 %v1717_v14, %v9311_v62  ;;  %v1756_v33 = vmul.f32 %v1755_v29, %v9334_v19  ;;  %v1794_v16 = vmul.f32 %v1793_v52, %v9354_v36  ;;  %v1699_v44 = vsel %vm9534_vm9, %v9432_v21, %v1695_v61 }
 0x172   : > { %v1845_v17 = vmul.f32 %v1844_v51, %v9427_v20  ;;  %v1882_v11 = vadd.f32 0.001143296, %v1881_v8  ;;  %v9545_v28 = vmin.f32 %v1908_v30, 16.0  ;;  %v1703_v58 = vor.u32 1.1754944e-38, %v1702_v32 }
 0x173   : > { %8148 = vrcp.f32 %v9519_v37  ;;  %v1831_v24 = vadd.f32 0.00028619796, %v1830_v9  ;;  %v1948_v62 = vmul.f32 %v9523_v15, %v9523_v15  ;;  %v6436_v14 = vadd.f32 1.0, %v7708_v57 }
 0x174   : > { %vm1701_vm10 = vcmp.eq.f32.partialorder %v1700_v2, 8.507059e+37  ;;  %v9550_v29 = vadd.f32 1.0, %v1809_v6  ;;  %v9553_v52 = vmul.f32 0.70710677, %v9528_v41  ;;  %v1680_v21 = vmul.f32 %v1679_v23, %v9165_v39 }
 0x175   : > { %v1704_v60 = vsel %vm1701_vm10, %v1703_v58, %v1699_v44  ;;  %v1719_v61 = vadd.f32 1.1283791, %v1718_v35  ;;  %v1757_v51 = vadd.f32 0.18741608, %v1756_v33  ;;  %v1795_v30 = vadd.f32 0.05243302, %v1794_v16 }
 0x176   : > { %v9556_v8 = vpop.eup %8146  ;;  %v1846_v32 = vadd.f32 0.112945676, %v1845_v17  ;;  %v1883_v9 = vmul.f32 %v1882_v11, %v9500_v0  ;;  %v1921_v2 = vmul.f32 3.8918573e-05, %v9545_v28  ;;  %v9561_v57 = vmul.f32 0.5, %v9385_v7  ;;  %v385_v7 = vld [vmem:[%s8816_s18 + $0xb0] sm:$0xff] }
 0x177   : > { %v1832_v6 = vmul.f32 %v1831_v24, %v9427_v20  ;;  %v9565_v39 = vmul.f32 0.5, %v9430_v46  ;;  %v9567_v23 = vmin.f32 %v1948_v62, 16.0  ;;  %v9570_v42 = vmul.f32 %v6435_v5, %v9259_v48  ;;  %v386_v16 = vld [vmem:[%s8816_s18 + $0xb8] sm:$0xff] }
 0x178   : > { %v9573_v35 = vmul.f32 %v6436_v14, %v9324_v4  ;;  %8150 = vrcp.f32 %v9550_v29  ;;  %v1988_v33 = vmul.f32 %v9553_v52, %v9553_v52  ;;  %v1705_v17 = vmul.f32 %v1704_v60, %v1680_v21 }
 0x179   : > { %16217 = vst [vmem:[#allocation23_spill] sm:$0xff] %v9570_v42  ;;  %v9580_v44 = vpop.eup %8148  ;;  %v9583_v46 = vmul.f32 %v1719_v61, %v9263_v26  ;;  %v1732_v48 = vmul.f32 %v9556_v8, %v9511_v63  ;;  %v1758_v5 = vmul.f32 %v1757_v51, %v9334_v19  ;;  %v1796_v4 = vmul.f32 %v1795_v30, %v9354_v36 }
 0x17a   : > { %16218 = vst [vmem:[#allocation24_spill] sm:$0xff] %v9573_v35  ;;  %v1847_v11 = vmul.f32 %v1846_v32, %v9427_v20  ;;  %v1884_v58 = vadd.f32 0.014752088, %v1883_v9  ;;  %v1922_v24 = vadd.f32 0.001143296, %v1921_v2  ;;  %v1742_v60 = vand.u32 2147483648, %v9511_v63 }
 0x17b   : > { %v1833_v62 = vadd.f32 0.0036580483, %v1832_v6  ;;  %v1961_v14 = vmul.f32 3.8918573e-05, %v9567_v23  ;;  %v9591_v35 = vld [vmem:[#allocation5] ss:$0 sm:$0xff]  ;;  %v1772_v19 = vmul.f32 %v9580_v44, %v9519_v37  ;;  %vm1736_vm11 = vweird.f32 %v9511_v63 }
 0x17c   : > { %v433_v21 = vsub.f32 %v385_v7, %v9591_v35  ;;  %v434_v26 = vsub.f32 %v386_v16, %v9591_v35  ;;  %v1870_v61 = vmul.f32 2.1237322e-06, %v9500_v0  ;;  %v9599_v51 = vmin.f32 %v1988_v33, 16.0 }
 0x17d   : > { %v7709_v30 = vclamps-f32 %v1705_v17, 1.0  ;;  %v1733_v32 = vsub.f32 1.0, %v1732_v48  ;;  %v1740_v9 = vand.u32 2147483647, %v9511_v63  ;;  %v1759_v2 = vadd.f32 1.1283791, %v1758_v5 }
 0x17e   : > { %v9602_v6 = vpop.eup %8150  ;;  %v1797_v42 = vadd.f32 0.18741608, %v1796_v4  ;;  %v1848_v7 = vadd.f32 0.4994258, %v1847_v11  ;;  %v1885_v16 = vmul.f32 %v1884_v58, %v9500_v0  ;;  %v1923_v53 = vmul.f32 %v1922_v24, %v9545_v28 }
 0x17f   : > { %v1834_v47 = vmul.f32 %v1833_v62, %v9427_v20  ;;  %v1962_v55 = vadd.f32 0.001143296, %v1961_v14  ;;  %v468_v33 = vmul.f32 %v8839_v50, %v433_v21  ;;  %v469_v17 = vmul.f32 %v8839_v50, %v434_v26 }
 0x180   : > { %v1743_v48 = vor.u32 1.1754944e-38, %v1742_v60  ;;  %v1773_v22 = vsub.f32 1.0, %v1772_v19  ;;  %v1871_v5 = vadd.f32 0.00028619796, %v1870_v61  ;;  %v2001_v56 = vmul.f32 3.8918573e-05, %v9599_v51 }
 0x181   : > { %v6437_v4 = vadd.f32 1.0, %v7709_v30  ;;  %v1734_v11 = vmul.f32 %v9556_v8, %v1733_v32  ;;  %v9613_v58 = vmul.f32 %v1759_v2, %v9280_v34  ;;  %v1812_v24 = vmul.f32 %v9602_v6, %v9550_v29 }
 0x182   : > { %vm1776_vm12 = vweird.f32 %v9519_v37  ;;  %v1780_v62 = vand.u32 2147483647, %v9519_v37  ;;  %v1849_v14 = vmul.f32 %v1848_v7, %v9427_v20  ;;  %v1886_v21 = vadd.f32 0.112945676, %v1885_v16 }
 0x183   : > { %v1924_v26 = vadd.f32 0.014752088, %v1923_v53  ;;  %vm9620_vm13 = vcmp.eq.f32.partialorder %v1740_v9, 8.507059e+37  ;;  %v1798_v19 = vmul.f32 %v1797_v42, %v9354_v36  ;;  %v1835_v61 = vadd.f32 0.05243302, %v1834_v47 }
 0x184   : > { %v1963_v34 = vmul.f32 %v1962_v55, %v9567_v23  ;;  %v489_v30 = vpack.c.bf16 %v469_v17, %v468_v33  ;;  %v1774_v32 = vmul.f32 %v9580_v44, %v1773_v22  ;;  %v1782_v2 = vand.u32 2147483648, %v9519_v37  ;;  %v893_v17 = vpop.f32.mrf.mxu2 }
 0x185   : > { %v1872_v59 = vmul.f32 %v1871_v5, %v9500_v0  ;;  %v2002_v54 = vadd.f32 0.001143296, %v2001_v56  ;;  %v1735_v7 = vadd.f32 %v9556_v8, %v1734_v11  ;;  %vm1737_vm14 = vweird.f32 %v9556_v8 }
 0x186   : > { %v1813_v53 = vsub.f32 1.0, %v1812_v24  ;;  %v1910_v9 = vmul.f32 2.1237322e-06, %v9545_v28  ;;  %759 = vmatmul.bf16.gmra.mxu0 %v489_v30  ;;  %848 = vmatmul.bf16.gmra.mxu1 %v489_v30  ;;  %v9633_v36 = vmul.f32 %v6437_v4, %v9360_v18  ;;  %v9635_v55 = vadd.f32 1.0, %v1849_v14  ;;  %vm9648_vm0 = vmor %vm1736_vm11, %vm1737_vm14 }
 0x187   : > { %v1887_v22 = vmul.f32 %v1886_v21, %v9500_v0  ;;  %v1925_v47 = vmul.f32 %v1924_v26, %v9545_v28  ;;  %937 = vmatmul.bf16.gmra.mxu2 %v489_v30  ;;  %1026 = vmatmul.bf16.gmra.mxu3 %v489_v30  ;;  %vm9639_vm15 = vcmp.eq.f32.partialorder %v1780_v62, 8.507059e+37  ;;  %v1799_v42 = vadd.f32 1.1283791, %v1798_v19 }
 0x188   : > { %16221 = vst [vmem:[#allocation25_spill] sm:$0xff] %v9633_v36  ;;  %v1836_v16 = vmul.f32 %v1835_v61, %v9427_v20  ;;  %v1964_v33 = vadd.f32 0.014752088, %v1963_v34  ;;  %v1775_v5 = vadd.f32 %v9580_v44, %v1774_v32  ;;  %vm1777_vm1 = vweird.f32 %v9580_v44 }
 0x189   : > { %v1873_v4 = vadd.f32 0.0036580483, %v1872_v59  ;;  %v2003_v11 = vmul.f32 %v2002_v54, %v9599_v51  ;;  %v1739_v24 = vsel %vm9648_vm0, %v9556_v8, %v1735_v7  ;;  %v1783_v62 = vor.u32 1.1754944e-38, %v1782_v2  ;;  %vm9665_vm2 = vmor %vm1776_vm12, %vm1777_vm1 }
 0x18a   : > { %v1814_v14 = vmul.f32 %v9602_v6, %v1813_v53  ;;  %v1911_v21 = vadd.f32 0.00028619796, %v1910_v9  ;;  %8152 = vrcp.f32 %v9635_v55  ;;  %v1888_v63 = vadd.f32 0.4994258, %v1887_v22 }
 0x18b   : > { %v1926_v26 = vadd.f32 0.112945676, %v1925_v47  ;;  %v9661_v19 = vadd.f32 %v893_v17, %v8910_v12  ;;  %v1800_v54 = vmul.f32 %v1799_v42, %v9314_v27  ;;  %v1820_v8 = vand.u32 2147483647, %v9550_v29 }
 0x18c   : > { %v1837_v61 = vadd.f32 0.18741608, %v1836_v16  ;;  %v1965_v34 = vmul.f32 %v1964_v33, %v9567_v23  ;;  %v1744_v30 = vsel %vm9620_vm13, %v1743_v48, %v1739_v24  ;;  %v1779_v32 = vsel %vm9665_vm2, %v9580_v44, %v1775_v5  ;;  %v982_v44 = vpop.f32.mrf.mxu3 }
 0x18d   : > { %v1874_v37 = vmul.f32 %v1873_v4, %v9500_v0  ;;  %v2004_v2 = vadd.f32 0.014752088, %v2003_v11  ;;  %v1815_v7 = vadd.f32 %v9602_v6, %v1814_v14  ;;  %vm1817_vm3 = vweird.f32 %v9602_v6 }
 0x18e   : > { %v1912_v27 = vmul.f32 %v1911_v21, %v9545_v28  ;;  %v1950_v53 = vmul.f32 2.1237322e-06, %v9567_v23  ;;  %v1822_v9 = vand.u32 2147483648, %v9550_v29  ;;  %v1889_v60 = vmul.f32 %v1888_v63, %v9500_v0 }
 0x18f   : > { %v1927_v48 = vmul.f32 %v1926_v26, %v9545_v28  ;;  %v9686_v22 = vmul.f32 0.70710677, %v9661_v19  ;;  %v1745_v47 = vmul.f32 %v1744_v30, %v9583_v46  ;;  %vm1816_vm4 = vweird.f32 %v9550_v29 }
 0x190   : > { %vm9690_vm5 = vcmp.eq.f32.partialorder %v1820_v8, 8.507059e+37  ;;  %v1966_v16 = vadd.f32 0.112945676, %v1965_v34  ;;  %v9694_v33 = vpop.eup %8152  ;;  %v1784_v17 = vsel %vm9639_vm15, %v1783_v62, %v1779_v32  ;;  %vm9698_vm6 = vmor %vm1816_vm4, %vm1817_vm3  ;;  %v1838_v5 = vmul.f32 %v1837_v61, %v9427_v20  ;;  %v717_v8 = vpop.f32.mrf.mxu0 }
 0x191   : > { %v1875_v4 = vadd.f32 0.05243302, %v1874_v37  ;;  %v2005_v46 = vmul.f32 %v2004_v2, %v9599_v51  ;;  %v1819_v29 = vsel %vm9698_vm6, %v9602_v6, %v1815_v7  ;;  %v1913_v11 = vadd.f32 0.0036580483, %v1912_v27 }
 0x192   : > { %v1951_v24 = vadd.f32 0.00028619796, %v1950_v53  ;;  %v9708_v14 = vadd.f32 %v982_v44, %v8930_v25  ;;  %v1823_v56 = vor.u32 1.1754944e-38, %v1822_v9  ;;  %v9710_v62 = vadd.f32 1.0, %v1889_v60 }
 0x193   : > { %v1928_v21 = vadd.f32 0.4994258, %v1927_v48  ;;  %v2028_v63 = vmul.f32 %v9686_v22, %v9686_v22  ;;  %v7710_v20 = vclamps-f32 %v1745_v47, 1.0  ;;  %v1852_v26 = vmul.f32 %v9694_v33, %v9635_v55 }
 0x194   : > { %v9717_v59 = vmul.f32 0.5, %v9483_v49  ;;  %v1967_v6 = vmul.f32 %v1966_v16, %v9567_v23  ;;  %v1785_v61 = vmul.f32 %v1784_v17, %v9613_v58  ;;  %v1824_v34 = vsel %vm9690_vm5, %v1823_v56, %v1819_v29 }
 0x195   : > { %v1839_v30 = vadd.f32 1.1283791, %v1838_v5  ;;  %v2006_v32 = vadd.f32 0.112945676, %v2005_v46  ;;  %v1876_v37 = vmul.f32 %v1875_v4, %v9500_v0  ;;  %v1914_v2 = vmul.f32 %v1913_v11, %v9545_v28 }
 0x196   : > { %v1952_v7 = vmul.f32 %v1951_v24, %v9567_v23  ;;  %v9727_v27 = vmul.f32 0.70710677, %v9708_v14  ;;  %8154 = vrcp.f32 %v9710_v62  ;;  %v1929_v49 = vmul.f32 %v1928_v21, %v9545_v28 }
 0x197   : > { %v9731_v53 = vmin.f32 %v2028_v63, 16.0  ;;  %v9734_v58 = vadd.f32 %v717_v8, %v8891_v1  ;;  %v6438_v9 = vadd.f32 1.0, %v7710_v20  ;;  %v1853_v60 = vsub.f32 1.0, %v1852_v26 }
 0x198   : > { %v1968_v48 = vadd.f32 0.4994258, %v1967_v6  ;;  %v1990_v44 = vmul.f32 2.1237322e-06, %v9599_v51  ;;  %v7711_v47 = vclamps-f32 %v1785_v61, 1.0  ;;  %v1825_v42 = vmul.f32 %v1824_v34, %v1800_v54 }
 0x199   : > { %v9738_v16 = vmul.f32 %v1839_v30, %v9398_v45  ;;  %v2007_v17 = vmul.f32 %v2006_v32, %v9599_v51  ;;  %v1877_v18 = vadd.f32 0.18741608, %v1876_v37  ;;  %v1915_v5 = vadd.f32 0.05243302, %v1914_v2 }
 0x19a   : > { %v1953_v4 = vadd.f32 0.0036580483, %v1952_v7  ;;  %v2068_v46 = vmul.f32 %v9727_v27, %v9727_v27  ;;  %v9743_v29 = vadd.f32 1.0, %v1929_v49  ;;  %v9746_v11 = vmul.f32 0.5, %v9508_v40 }
 0x19b   : > { %v2041_v24 = vmul.f32 3.8918573e-05, %v9731_v53  ;;  %v9750_v54 = vmul.f32 0.70710677, %v9734_v58  ;;  %v9753_v45 = vmul.f32 %v6438_v9, %v9425_v43  ;;  %v1854_v56 = vmul.f32 %v9694_v33, %v1853_v60 }
 0x19c   : > { %v1969_v21 = vmul.f32 %v1968_v48, %v9567_v23  ;;  %v1991_v63 = vadd.f32 0.00028619796, %v1990_v44  ;;  %v9757_v20 = vpop.eup %8154  ;;  %v6439_v26 = vadd.f32 1.0, %v7711_v47  ;;  %v7712_v6 = vclamps-f32 %v1825_v42, 1.0 }
 0x19d   : > { %16232 = vst [vmem:[#allocation26_spill] sm:$0xff] %v9753_v45  ;;  %v1860_v40 = vand.u32 2147483647, %v9635_v55  ;;  %v2008_v8 = vadd.f32 0.4994258, %v2007_v17  ;;  %vm1857_vm7 = vweird.f32 %v9694_v33  ;;  %v1878_v61 = vmul.f32 %v1877_v18, %v9500_v0  ;;  %v806_v18 = vpop.f32.mrf.mxu1 }
 0x19e   : > { %v1916_v34 = vmul.f32 %v1915_v5, %v9545_v28  ;;  %v9763_v43 = vmin.f32 %v2068_v46, 16.0  ;;  %8156 = vrcp.f32 %v9743_v29  ;;  %v1954_v30 = vmul.f32 %v1953_v4, %v9567_v23 }
 0x19f   : > { %v2042_v32 = vadd.f32 0.001143296, %v2041_v24  ;;  %v2108_v37 = vmul.f32 %v9750_v54, %v9750_v54  ;;  %v1855_v2 = vadd.f32 %v9694_v33, %v1854_v56  ;;  %v1892_v7 = vmul.f32 %v9757_v20, %v9710_v62 }
 0x1a0   : > { %v9772_v49 = vadd.f32 1.0, %v1969_v21  ;;  %v1992_v0 = vmul.f32 %v1991_v63, %v9599_v51  ;;  %v9776_v9 = vmul.f32 %v6439_v26, %v9486_v13  ;;  %vm1856_vm8 = vweird.f32 %v9635_v55 }
 0x1a1   : > { %v1862_v60 = vand.u32 2147483648, %v9635_v55  ;;  %v2009_v48 = vmul.f32 %v2008_v8, %v9599_v51  ;;  %v6440_v44 = vadd.f32 1.0, %v7712_v6  ;;  %vm9781_vm9 = vcmp.eq.f32.partialorder %v1860_v40, 8.507059e+37  ;;  %vm9788_vm10 = vmor %vm1856_vm8, %vm1857_vm7 }
 0x1a2   : > { %16233 = vst [vmem:[#allocation27_spill] sm:$0xff] %v9776_v9  ;;  %v1917_v42 = vadd.f32 0.18741608, %v1916_v34  ;;  %v2081_v17 = vmul.f32 3.8918573e-05, %v9763_v43  ;;  %v2043_v55 = vmul.f32 %v2042_v32, %v9731_v53  ;;  %v9793_v46 = vmin.f32 %v2108_v37, 16.0 }
 0x1a3   : > { %v1879_v5 = vadd.f32 1.1283791, %v1878_v61  ;;  %v1955_v4 = vadd.f32 0.05243302, %v1954_v30  ;;  %v1859_v24 = vsel %vm9788_vm10, %v9694_v33, %v1855_v2  ;;  %v1893_v56 = vsub.f32 1.0, %v1892_v7 }
 0x1a4   : > { %8158 = vrcp.f32 %v9772_v49  ;;  %v1993_v21 = vadd.f32 0.0036580483, %v1992_v0  ;;  %v9799_v63 = vpop.eup %8156  ;;  %v1863_v26 = vor.u32 1.1754944e-38, %v1862_v60  ;;  %v9802_v6 = vmul.f32 0.5, %v9528_v41 }
 0x1a5   : > { %v9804_v40 = vadd.f32 1.0, %v2009_v48  ;;  %v9807_v8 = vadd.f32 %v806_v18, %v8893_v3  ;;  %v9810_v61 = vmul.f32 %v6440_v44, %v9490_v38  ;;  %v1900_v33 = vand.u32 2147483647, %v9710_v62 }
 0x1a6   : > { %v1918_v34 = vmul.f32 %v1917_v42, %v9545_v28  ;;  %v2082_v30 = vadd.f32 0.001143296, %v2081_v17  ;;  %v1864_v32 = vsel %vm9781_vm9, %v1863_v26, %v1859_v24  ;;  %v1956_v37 = vmul.f32 %v1955_v4, %v9567_v23 }
 0x1a7   : > { %16238 = vst [vmem:[#allocation28_spill] sm:$0xff] %v9810_v61  ;;  %v2044_v41 = vadd.f32 0.014752088, %v2043_v55  ;;  %v2121_v2 = vmul.f32 3.8918573e-05, %v9793_v46  ;;  %v9819_v7 = vmul.f32 %v1879_v5, %v9457_v10  ;;  %v1894_v0 = vmul.f32 %v9757_v20, %v1893_v56 }
 0x1a8   : > { %v1932_v38 = vmul.f32 %v9799_v63, %v9743_v29  ;;  %v1994_v60 = vmul.f32 %v1993_v21, %v9599_v51  ;;  %v1902_v28 = vand.u32 2147483648, %v9710_v62  ;;  %8160 = vrcp.f32 %v9804_v40 }
 0x1a9   : > { %v2030_v48 = vmul.f32 2.1237322e-06, %v9731_v53  ;;  %v9829_v44 = vmul.f32 0.70710677, %v9807_v8  ;;  %v1865_v10 = vmul.f32 %v1864_v32, %v9738_v16  ;;  %vm1896_vm11 = vweird.f32 %v9710_v62 }
 0x1aa   : > { %v9831_v47 = vpop.eup %8158  ;;  %v1919_v42 = vadd.f32 1.1283791, %v1918_v34  ;;  %v2083_v17 = vmul.f32 %v2082_v30, %v9763_v43  ;;  %vm9836_vm12 = vcmp.eq.f32.partialorder %v1900_v33, 8.507059e+37  ;;  %v1957_v13 = vadd.f32 0.18741608, %v1956_v37 }
 0x1ab   : > { %v2045_v5 = vmul.f32 %v2044_v41, %v9731_v53  ;;  %v2122_v4 = vadd.f32 0.001143296, %v2121_v2  ;;  %v1895_v55 = vadd.f32 %v9757_v20, %v1894_v0  ;;  %vm1897_vm13 = vweird.f32 %v9757_v20 }
 0x1ac   : > { %v1933_v24 = vsub.f32 1.0, %v1932_v38  ;;  %v1995_v56 = vadd.f32 0.05243302, %v1994_v60  ;;  %v1903_v16 = vor.u32 1.1754944e-38, %v1902_v28  ;;  %v1972_v21 = vmul.f32 %v9831_v47, %v9772_v49  ;;  %vm9855_vm14 = vmor %vm1896_vm11, %vm1897_vm13 }
 0x1ad   : > { %v2031_v26 = vadd.f32 0.00028619796, %v2030_v48  ;;  %v2148_v33 = vmul.f32 %v9829_v44, %v9829_v44  ;;  %v7713_v34 = vclamps-f32 %v1865_v10, 1.0  ;;  %v9848_v30 = vmul.f32 %v1919_v42, %v9503_v31  ;;  %v895_v31 = vpop.f32.mrf.mxu2 }
 0x1ae   : > { %v1940_v32 = vand.u32 2147483647, %v9743_v29  ;;  %v2084_v37 = vadd.f32 0.014752088, %v2083_v17  ;;  %v9851_v41 = vpop.eup %8160  ;;  %v1942_v0 = vand.u32 2147483648, %v9743_v29  ;;  %v1958_v38 = vmul.f32 %v1957_v13, %v9567_v23 }
 0x1af   : > { %v2046_v60 = vadd.f32 0.112945676, %v2045_v5  ;;  %v2123_v28 = vmul.f32 %v2122_v4, %v9793_v46  ;;  %v1899_v48 = vsel %vm9855_vm14, %v9757_v20, %v1895_v55  ;;  %v1934_v10 = vmul.f32 %v9799_v63, %v1933_v24 }
 0x1b0   : > { %vm1936_vm15 = vweird.f32 %v9743_v29  ;;  %v1996_v62 = vmul.f32 %v1995_v56, %v9599_v51  ;;  %v1973_v42 = vsub.f32 1.0, %v1972_v21  ;;  %v2032_v17 = vmul.f32 %v2031_v26, %v9731_v53 }
 0x1b1   : > { %v2070_v9 = vmul.f32 2.1237322e-06, %v9763_v43  ;;  %v9870_v23 = vmin.f32 %v2148_v33, 16.0  ;;  %v6441_v13 = vadd.f32 1.0, %v7713_v34  ;;  %v2012_v5 = vmul.f32 %v9851_v41, %v9804_v40 }
 0x1b2   : > { %v2085_v4 = vmul.f32 %v2084_v37, %v9763_v43  ;;  %v9876_v20 = vadd.f32 %v895_v31, %v8910_v12  ;;  %vm9878_vm0 = vcmp.eq.f32.partialorder %v1940_v32, 8.507059e+37  ;;  %v1943_v24 = vor.u32 1.1754944e-38, %v1942_v0 }
 0x1b3   : > { %v1959_v56 = vadd.f32 1.1283791, %v1958_v38  ;;  %v2047_v21 = vmul.f32 %v2046_v60, %v9731_v53  ;;  %v2124_v26 = vadd.f32 0.014752088, %v2123_v28  ;;  %v1904_v33 = vsel %vm9836_vm12, %v1903_v16, %v1899_v48  ;;  %v720_v16 = vpop.f32.mrf.mxu0 }
 0x1b4   : > { %v1935_v34 = vadd.f32 %v9799_v63, %v1934_v10  ;;  %vm1937_vm1 = vweird.f32 %v9799_v63  ;;  %v1997_v37 = vadd.f32 0.18741608, %v1996_v62  ;;  %v1974_v2 = vmul.f32 %v9831_v47, %v1973_v42 }
 0x1b5   : > { %v2033_v31 = vadd.f32 0.0036580483, %v2032_v17  ;;  %v2071_v32 = vadd.f32 0.00028619796, %v2070_v9  ;;  %v2161_v45 = vmul.f32 3.8918573e-05, %v9870_v23  ;;  %v9890_v0 = vmul.f32 %v6441_v13, %v9561_v57  ;;  %vm9900_vm2 = vmor %vm1936_vm15, %vm1937_vm1 }
 0x1b6   : > { %v2013_v38 = vsub.f32 1.0, %v2012_v5  ;;  %v2086_v60 = vadd.f32 0.112945676, %v2085_v4  ;;  %v9893_v28 = vmul.f32 0.70710677, %v9876_v20  ;;  %v9896_v18 = vmul.f32 %v1904_v33, %v9819_v7 }
 0x1b7   : > { %16245 = vst [vmem:[#allocation29_spill] sm:$0xff] %v9890_v0  ;;  %v1960_v9 = vmul.f32 %v1959_v56, %v9523_v15  ;;  %v2048_v48 = vadd.f32 0.4994258, %v2047_v21  ;;  %v2125_v57 = vmul.f32 %v2124_v26, %v9793_v46  ;;  %v1939_v10 = vsel %vm9900_vm2, %v9799_v63, %v1935_v34 }
 0x1b8   : > { %v1980_v62 = vand.u32 2147483647, %v9772_v49  ;;  %v1982_v7 = vand.u32 2147483648, %v9772_v49  ;;  %v1998_v42 = vmul.f32 %v1997_v37, %v9599_v51  ;;  %v1975_v29 = vadd.f32 %v9831_v47, %v1974_v2 }
 0x1b9   : > { %vm1977_vm3 = vweird.f32 %v9831_v47  ;;  %v2034_v17 = vmul.f32 %v2033_v31, %v9731_v53  ;;  %v2162_v15 = vadd.f32 0.001143296, %v2161_v45  ;;  %v2014_v13 = vmul.f32 %v9851_v41, %v2013_v38 }
 0x1ba   : > { %v2072_v5 = vmul.f32 %v2071_v32, %v9763_v43  ;;  %v2087_v4 = vmul.f32 %v2086_v60, %v9763_v43  ;;  %v2188_v63 = vmul.f32 %v9893_v28, %v9893_v28  ;;  %vm1976_vm4 = vweird.f32 %v9772_v49 }
 0x1bb   : > { %v2049_v51 = vmul.f32 %v2048_v48, %v9731_v53  ;;  %v2110_v56 = vmul.f32 2.1237322e-06, %v9793_v46  ;;  %v2126_v21 = vadd.f32 0.112945676, %v2125_v57  ;;  %v1944_v26 = vsel %vm9878_vm0, %v1943_v24, %v1939_v10  ;;  %vm9925_vm5 = vmor %vm1976_vm4, %vm1977_vm3  ;;  %v984_v24 = vpop.f32.mrf.mxu3 }
 0x1bc   : > { %vm9929_vm6 = vcmp.eq.f32.partialorder %v1980_v62, 8.507059e+37  ;;  %v1983_v34 = vor.u32 1.1754944e-38, %v1982_v7  ;;  %v1999_v37 = vadd.f32 1.1283791, %v1998_v42  ;;  %v1979_v49 = vsel %vm9925_vm5, %v9831_v47, %v1975_v29 }
 0x1bd   : > { %vm2017_vm7 = vweird.f32 %v9851_v41  ;;  %v2035_v2 = vadd.f32 0.05243302, %v2034_v17  ;;  %v2163_v55 = vmul.f32 %v2162_v15, %v9870_v23  ;;  %v2015_v31 = vadd.f32 %v9851_v41, %v2014_v13 }
 0x1be   : > { %v2073_v32 = vadd.f32 0.0036580483, %v2072_v5  ;;  %v2088_v38 = vadd.f32 0.4994258, %v2087_v4  ;;  %v9939_v60 = vmin.f32 %v2188_v63, 16.0  ;;  %v2022_v48 = vand.u32 2147483648, %v9804_v40 }
 0x1bf   : > { %v9942_v57 = vadd.f32 1.0, %v2049_v51  ;;  %v2111_v10 = vadd.f32 0.00028619796, %v2110_v56  ;;  %v2127_v47 = vmul.f32 %v2126_v21, %v9793_v46  ;;  %v1945_v62 = vmul.f32 %v1944_v26, %v9848_v30 }
 0x1c0   : > { %vm2016_vm8 = vweird.f32 %v9804_v40  ;;  %v2020_v7 = vand.u32 2147483647, %v9804_v40  ;;  %v9949_v42 = vadd.f32 %v984_v24, %v8930_v25  ;;  %v1984_v29 = vsel %vm9929_vm6, %v1983_v34, %v1979_v49 }
 0x1c1   : > { %vm9955_vm9 = vmor %vm2016_vm8, %vm2017_vm7  ;;  %v2036_v15 = vmul.f32 %v2035_v2, %v9731_v53  ;;  %v2164_v13 = vadd.f32 0.014752088, %v2163_v55  ;;  %v9961_v30 = vadd.f32 %v720_v16, %v8891_v1  ;;  %v2074_v5 = vmul.f32 %v2073_v32, %v9763_v43 }
 0x1c2   : > { %v2019_v40 = vsel %vm9955_vm9, %v9851_v41, %v2015_v31  ;;  %v2089_v4 = vmul.f32 %v2088_v38, %v9763_v43  ;;  %v2201_v63 = vmul.f32 3.8918573e-05, %v9939_v60  ;;  %v2023_v51 = vor.u32 1.1754944e-38, %v2022_v48 }
 0x1c3   : > { %8162 = vrcp.f32 %v9942_v57  ;;  %v2112_v56 = vmul.f32 %v2111_v10, %v9793_v46  ;;  %v2128_v21 = vadd.f32 0.4994258, %v2127_v47  ;;  %v7714_v26 = vclamps-f32 %v9896_v18, 1.0 }
 0x1c4   : > { %v1985_v45 = vmul.f32 %v1984_v29, %v1960_v9  ;;  %vm2021_vm10 = vcmp.eq.f32.partialorder %v2020_v7, 8.507059e+37  ;;  %v9973_v33 = vmul.f32 0.70710677, %v9949_v42  ;;  %v2037_v34 = vadd.f32 0.18741608, %v2036_v15 }
 0x1c5   : > { %v2024_v41 = vsel %vm2021_vm10, %v2023_v51, %v2019_v40  ;;  %v2165_v49 = vmul.f32 %v2164_v13, %v9870_v23  ;;  %v9977_v2 = vmul.f32 0.70710677, %v9961_v30  ;;  %v2000_v55 = vmul.f32 %v1999_v37, %v9553_v52  ;;  %v809_v40 = vpop.f32.mrf.mxu1 }
 0x1c6   : > { %v2075_v24 = vadd.f32 0.05243302, %v2074_v5  ;;  %v9980_v31 = vadd.f32 1.0, %v2089_v4  ;;  %v2202_v32 = vadd.f32 0.001143296, %v2201_v63  ;;  %v7715_v38 = vclamps-f32 %v1945_v62, 1.0 }
 0x1c7   : > { %v9983_v18 = vmul.f32 0.5, %v9661_v19  ;;  %v2113_v9 = vadd.f32 0.0036580483, %v2112_v56  ;;  %v2129_v16 = vmul.f32 %v2128_v21, %v9793_v46  ;;  %v6442_v48 = vadd.f32 1.0, %v7714_v26 }
 0x1c8   : > { %v7716_v10 = vclamps-f32 %v1985_v45, 1.0  ;;  %v2025_v47 = vmul.f32 %v2024_v41, %v2000_v55  ;;  %v2228_v7 = vmul.f32 %v9973_v33, %v9973_v33  ;;  %v2038_v52 = vmul.f32 %v2037_v34, %v9731_v53 }
 0x1c9   : > { %v9988_v29 = vpop.eup %8162  ;;  %v9992_v37 = vmul.f32 0.5, %v9708_v14  ;;  %v2166_v62 = vadd.f32 0.112945676, %v2165_v49  ;;  %v2268_v19 = vmul.f32 %v9977_v2, %v9977_v2  ;;  %v2076_v17 = vmul.f32 %v2075_v24, %v9763_v43 }
 0x1ca   : > { %8164 = vrcp.f32 %v9980_v31  ;;  %v2150_v15 = vmul.f32 2.1237322e-06, %v9870_v23  ;;  %v2203_v13 = vmul.f32 %v2202_v32, %v9939_v60  ;;  %v6443_v5 = vadd.f32 1.0, %v7715_v38 }
 0x1cb   : > { %v10001_v4 = vmul.f32 0.5, %v9734_v58  ;;  %v2114_v14 = vmul.f32 %v2113_v9, %v9793_v46  ;;  %v10004_v53 = vadd.f32 1.0, %v2129_v16  ;;  %v6444_v63 = vadd.f32 1.0, %v7716_v10 }
 0x1cc   : > { %v7717_v51 = vclamps-f32 %v2025_v47, 1.0  ;;  %v2052_v56 = vmul.f32 %v9988_v29, %v9942_v57  ;;  %v10008_v21 = vmin.f32 %v2228_v7, 16.0  ;;  %v2039_v26 = vadd.f32 1.1283791, %v2038_v52  ;;  %v387_v7 = vld [vmem:[%s8816_s18 + $0xc0] sm:$0xff]  ;;  %v388_v52 = vld [vmem:[%s8816_s18 + $0xc8] sm:$0xff] }
 0x1cd   : > { %v2167_v45 = vmul.f32 %v2166_v62, %v9870_v23  ;;  %v10011_v41 = vmin.f32 %v2268_v19, 16.0  ;;  %v10014_v58 = vadd.f32 %v809_v40, %v8893_v3  ;;  %v10017_v34 = vmul.f32 %v6442_v48, %v9565_v39 }
 0x1ce   : > { %v2077_v49 = vadd.f32 0.18741608, %v2076_v17  ;;  %v2151_v55 = vadd.f32 0.00028619796, %v2150_v15  ;;  %v2204_v24 = vadd.f32 0.014752088, %v2203_v13  ;;  %v10020_v32 = vmul.f32 %v6443_v5, %v9717_v59 }
 0x1cf   : > { %16254 = vst [vmem:[#allocation30_spill] sm:$0xff] %v10017_v34  ;;  %v2115_v38 = vadd.f32 0.05243302, %v2114_v14  ;;  %8166 = vrcp.f32 %v10004_v53  ;;  %v10024_v9 = vmul.f32 0.5, %v9807_v8  ;;  %v10029_v10 = vmul.f32 %v6444_v63, %v9746_v11 }
 0x1d0   : > { %16255 = vst [vmem:[#allocation31_spill] sm:$0xff] %v10020_v32  ;;  %v10026_v16 = vpop.eup %8164  ;;  %v6445_v47 = vadd.f32 1.0, %v7717_v51  ;;  %v2053_v39 = vsub.f32 1.0, %v2052_v56  ;;  %v2241_v48 = vmul.f32 3.8918573e-05, %v10008_v21  ;;  %v10035_v59 = vmul.f32 %v2039_v26, %v9686_v22 }
 0x1d1   : > { %16256 = vst [vmem:[#allocation32_spill] sm:$0xff] %v10029_v10  ;;  %v2168_v62 = vadd.f32 0.4994258, %v2167_v45  ;;  %v2281_v19 = vmul.f32 3.8918573e-05, %v10011_v41  ;;  %vm2056_vm11 = vweird.f32 %v9942_v57  ;;  %v2078_v11 = vmul.f32 %v2077_v49, %v9763_v43 }
 0x1d2   : > { %v10039_v8 = vmul.f32 0.70710677, %v10014_v58  ;;  %v2152_v17 = vmul.f32 %v2151_v55, %v9870_v23  ;;  %v2205_v15 = vmul.f32 %v2204_v24, %v9939_v60  ;;  %v2092_v13 = vmul.f32 %v10026_v16, %v9980_v31 }
 0x1d3   : > { %v2190_v22 = vmul.f32 2.1237322e-06, %v9939_v60  ;;  %v435_v40 = vsub.f32 %v387_v7, %v9591_v35  ;;  %v436_v5 = vsub.f32 %v388_v52, %v9591_v35  ;;  %v2054_v14 = vmul.f32 %v9988_v29, %v2053_v39 }
 0x1d4   : > { %v2060_v63 = vand.u32 2147483647, %v9942_v57  ;;  %v2062_v51 = vand.u32 2147483648, %v9942_v57  ;;  %v2242_v43 = vadd.f32 0.001143296, %v2241_v48  ;;  %v2116_v26 = vmul.f32 %v2115_v38, %v9793_v46 }
 0x1d5   : > { %v10053_v56 = vpop.eup %8166  ;;  %v2169_v45 = vmul.f32 %v2168_v62, %v9870_v23  ;;  %v2282_v49 = vadd.f32 0.001143296, %v2281_v19  ;;  %v2308_v55 = vmul.f32 %v10039_v8, %v10039_v8  ;;  %v10060_v24 = vmul.f32 %v6445_v47, %v9802_v6 }
 0x1d6   : > { %v2079_v35 = vadd.f32 1.1283791, %v2078_v11  ;;  %v2153_v39 = vadd.f32 0.0036580483, %v2152_v17  ;;  %v2206_v7 = vadd.f32 0.112945676, %v2205_v15  ;;  %v470_v48 = vmul.f32 %v8839_v50, %v435_v40 }
 0x1d7   : > { %16257 = vst [vmem:[#allocation33_spill] sm:$0xff] %v10060_v24  ;;  %v2093_v52 = vsub.f32 1.0, %v2092_v13  ;;  %v2191_v10 = vadd.f32 0.00028619796, %v2190_v22  ;;  %v471_v32 = vmul.f32 %v8839_v50, %v436_v5  ;;  %v2055_v38 = vadd.f32 %v9988_v29, %v2054_v14 }
 0x1d8   : > { %vm2057_vm12 = vweird.f32 %v9988_v29  ;;  %v2132_v62 = vmul.f32 %v10053_v56, %v10004_v53  ;;  %v2243_v19 = vmul.f32 %v2242_v43, %v10008_v21  ;;  %v2117_v6 = vadd.f32 0.18741608, %v2116_v26 }
 0x1d9   : > { %v10069_v47 = vadd.f32 1.0, %v2169_v45  ;;  %v2283_v11 = vmul.f32 %v2282_v49, %v10011_v41  ;;  %v10072_v17 = vmin.f32 %v2308_v55, 16.0  ;;  %vm10074_vm13 = vcmp.eq.f32.partialorder %v2060_v63, 8.507059e+37  ;;  %vm10082_vm14 = vmor %vm2056_vm11, %vm2057_vm12 }
 0x1da   : > { %v2063_v13 = vor.u32 1.1754944e-38, %v2062_v51  ;;  %v2102_v22 = vand.u32 2147483648, %v9980_v31  ;;  %v2207_v40 = vmul.f32 %v2206_v7, %v9939_v60  ;;  %v2094_v14 = vmul.f32 %v10026_v16, %v2093_v52 }
 0x1db   : > { %v2154_v43 = vmul.f32 %v2153_v39, %v9870_v23  ;;  %v2192_v63 = vmul.f32 %v2191_v10, %v9939_v60  ;;  %v490_v26 = vpack.c.bf16 %v471_v32, %v470_v48  ;;  %v2059_v51 = vsel %vm10082_vm14, %v9988_v29, %v2055_v38 }
 0x1dc   : > { %v2133_v45 = vsub.f32 1.0, %v2132_v62  ;;  %v2230_v49 = vmul.f32 2.1237322e-06, %v10008_v21  ;;  %v2244_v55 = vadd.f32 0.014752088, %v2243_v19  ;;  %v2118_v57 = vmul.f32 %v2117_v6, %v9793_v46 }
 0x1dd   : > { %8168 = vrcp.f32 %v10069_v47  ;;  %v2284_v7 = vadd.f32 0.014752088, %v2283_v11  ;;  %v2321_v52 = vmul.f32 3.8918573e-05, %v10072_v17  ;;  %764 = vmatmul.bf16.gmra.mxu0 %v490_v26  ;;  %853 = vmatmul.bf16.gmra.mxu1 %v490_v26  ;;  %v2080_v10 = vmul.f32 %v2079_v35, %v9727_v27  ;;  %v898_v35 = vpop.f32.mrf.mxu2 }
 0x1de   : > { %vm2096_vm15 = vweird.f32 %v9980_v31  ;;  %vm2097_vm0 = vweird.f32 %v10026_v16  ;;  %v2208_v29 = vadd.f32 0.4994258, %v2207_v40  ;;  %942 = vmatmul.bf16.gmra.mxu2 %v490_v26  ;;  %1031 = vmatmul.bf16.gmra.mxu3 %v490_v26  ;;  %v2064_v32 = vsel %vm10074_vm13, %v2063_v13, %v2059_v51 }
 0x1df   : > { %v2095_v46 = vadd.f32 %v10026_v16, %v2094_v14  ;;  %v2155_v39 = vadd.f32 0.05243302, %v2154_v43  ;;  %v2193_v48 = vadd.f32 0.0036580483, %v2192_v63  ;;  %v2100_v38 = vand.u32 2147483647, %v9980_v31  ;;  %vm10111_vm1 = vmor %vm2096_vm15, %vm2097_vm0 }
 0x1e0   : > { %v2134_v62 = vmul.f32 %v10053_v56, %v2133_v45  ;;  %v2231_v19 = vadd.f32 0.00028619796, %v2230_v49  ;;  %v2245_v27 = vmul.f32 %v2244_v55, %v10008_v21  ;;  %v2103_v6 = vor.u32 1.1754944e-38, %v2102_v22 }
 0x1e1   : > { %v2119_v11 = vadd.f32 1.1283791, %v2118_v57  ;;  %v2285_v40 = vmul.f32 %v2284_v7, %v10011_v41  ;;  %v2322_v5 = vadd.f32 0.001143296, %v2321_v52  ;;  %v2065_v15 = vmul.f32 %v2064_v32, %v10035_v59  ;;  %v8011_v7 = vld [vmem:[#allocation10 + $0x88] sm:$0xff] }
 0x1e2   : > { %vm2137_vm2 = vweird.f32 %v10053_v56  ;;  %v2142_v14 = vand.u32 2147483648, %v10004_v53  ;;  %v2209_v22 = vmul.f32 %v2208_v29, %v9939_v60  ;;  %v2099_v59 = vsel %vm10111_vm1, %v10026_v16, %v2095_v46  ;;  %v7995_v52 = vld [vmem:[#allocation10 + $0x8] sm:$0xff]  ;;  %7192 = vmatpush.bf16.msrb.mxu2 %v8011_v7 }
 0x1e3   : > { %v10118_v43 = vpop.eup %8168  ;;  %v2156_v63 = vmul.f32 %v2155_v39, %v9870_v23  ;;  %v2194_v31 = vmul.f32 %v2193_v48, %v9939_v60  ;;  %v10126_v26 = vadd.f32 %v898_v35, %v8910_v12  ;;  %v2135_v51 = vadd.f32 %v10053_v56, %v2134_v62  ;;  %v8019_v29 = vld [vmem:[#allocation10 + $0xc8] sm:$0xff]  ;;  %7014 = vmatpush.bf16.msrb.mxu0 %v7995_v52 }
 0x1e4   : > { %v2232_v45 = vmul.f32 %v2231_v19, %v10008_v21  ;;  %v2246_v49 = vadd.f32 0.112945676, %v2245_v27  ;;  %v2270_v55 = vmul.f32 2.1237322e-06, %v10011_v41  ;;  %vm2101_vm3 = vcmp.eq.f32.partialorder %v2100_v38, 8.507059e+37  ;;  %7281 = vmatpush.bf16.msrb.mxu3 %v8019_v29 }
 0x1e5   : > { %vm2136_vm4 = vweird.f32 %v10004_v53  ;;  %v2286_v57 = vadd.f32 0.112945676, %v2285_v40  ;;  %v2323_v16 = vmul.f32 %v2322_v5, %v10072_v17  ;;  %v2104_v32 = vsel %vm2101_vm3, %v2103_v6, %v2099_v59 }
 0x1e6   : > { %v2140_v46 = vand.u32 2147483647, %v10004_v53  ;;  %v2172_v39 = vmul.f32 %v10118_v43, %v10069_v47  ;;  %v10136_v48 = vadd.f32 1.0, %v2209_v22  ;;  %v7718_v62 = vclamps-f32 %v2065_v15, 1.0  ;;  %vm10140_vm5 = vmor %vm2136_vm4, %vm2137_vm2  ;;  %v987_v15 = vpop.f32.mrf.mxu3 }
 0x1e7   : > { %v2143_v19 = vor.u32 1.1754944e-38, %v2142_v14  ;;  %v2157_v27 = vadd.f32 0.18741608, %v2156_v63  ;;  %v10145_v35 = vmul.f32 0.70710677, %v10126_v26  ;;  %v2139_v53 = vsel %vm10140_vm5, %v10053_v56, %v2135_v51 }
 0x1e8   : > { %v2195_v6 = vadd.f32 0.05243302, %v2194_v31  ;;  %v2233_v40 = vadd.f32 0.0036580483, %v2232_v45  ;;  %v2247_v5 = vmul.f32 %v2246_v49, %v10008_v21  ;;  %v2105_v13 = vmul.f32 %v2104_v32, %v2080_v10 }
 0x1e9   : > { %v2271_v22 = vadd.f32 0.00028619796, %v2270_v55  ;;  %v2287_v14 = vmul.f32 %v2286_v57, %v10011_v41  ;;  %v2324_v59 = vadd.f32 0.014752088, %v2323_v16  ;;  %v2120_v63 = vmul.f32 %v2119_v11, %v9750_v54 }
 0x1ea   : > { %vm2141_vm6 = vcmp.eq.f32.partialorder %v2140_v46, 8.507059e+37  ;;  %v2173_v7 = vsub.f32 1.0, %v2172_v39  ;;  %8170 = vrcp.f32 %v10136_v48  ;;  %v2158_v56 = vmul.f32 %v2157_v27, %v9870_v23 }
 0x1eb   : > { %v2144_v52 = vsel %vm2141_vm6, %v2143_v19, %v2139_v53  ;;  %v2348_v31 = vmul.f32 %v10145_v35, %v10145_v35  ;;  %v10158_v51 = vadd.f32 %v987_v15, %v8930_v25  ;;  %v6446_v10 = vadd.f32 1.0, %v7718_v62 }
 0x1ec   : > { %v2196_v45 = vmul.f32 %v2195_v6, %v9939_v60  ;;  %v2234_v49 = vmul.f32 %v2233_v40, %v10008_v21  ;;  %v2248_v55 = vadd.f32 0.4994258, %v2247_v5  ;;  %v7719_v54 = vclamps-f32 %v2105_v13, 1.0 }
 0x1ed   : > { %v2272_v11 = vmul.f32 %v2271_v22, %v10011_v41  ;;  %v2288_v57 = vadd.f32 0.4994258, %v2287_v14  ;;  %v2325_v16 = vmul.f32 %v2324_v59, %v10072_v17  ;;  %v2145_v29 = vmul.f32 %v2144_v52, %v2120_v63 }
 0x1ee   : > { %v2174_v23 = vmul.f32 %v10118_v43, %v2173_v7  ;;  %v10166_v32 = vmul.f32 0.5, %v9876_v20  ;;  %v10169_v46 = vmul.f32 0.5, %v9949_v42  ;;  %v2159_v39 = vadd.f32 1.1283791, %v2158_v56 }
 0x1ef   : > { %v10172_v62 = vmul.f32 0.5, %v9961_v30  ;;  %v10174_v38 = vmin.f32 %v2348_v31, 16.0  ;;  %v10177_v19 = vmul.f32 0.70710677, %v10158_v51  ;;  %v10182_v53 = vmul.f32 %v6446_v10, %v9983_v18  ;;  %v722_v10 = vpop.f32.mrf.mxu0 }
 0x1f0   : > { %v10179_v27 = vpop.eup %8170  ;;  %v2197_v6 = vadd.f32 0.18741608, %v2196_v45  ;;  %v2235_v20 = vadd.f32 0.05243302, %v2234_v49  ;;  %v2249_v40 = vmul.f32 %v2248_v55, %v10008_v21  ;;  %v6447_v42 = vadd.f32 1.0, %v7719_v54 }
 0x1f1   : > { %16266 = vst [vmem:[#allocation34_spill] sm:$0xff] %v10182_v53  ;;  %v2273_v5 = vadd.f32 0.0036580483, %v2272_v11  ;;  %v2289_v15 = vmul.f32 %v2288_v57, %v10011_v41  ;;  %v2326_v30 = vadd.f32 0.112945676, %v2325_v16  ;;  %v7720_v13 = vclamps-f32 %v2145_v29, 1.0  ;;  %v811_v11 = vpop.f32.mrf.mxu1 }
 0x1f2   : > { %v2175_v22 = vadd.f32 %v10118_v43, %v2174_v23  ;;  %vm2177_vm7 = vweird.f32 %v10118_v43  ;;  %v2182_v14 = vand.u32 2147483648, %v10069_v47  ;;  %v2160_v59 = vmul.f32 %v2159_v39, %v9829_v44 }
 0x1f3   : > { %v2212_v18 = vmul.f32 %v10179_v27, %v10136_v48  ;;  %v2361_v63 = vmul.f32 3.8918573e-05, %v10174_v38  ;;  %v2388_v7 = vmul.f32 %v10177_v19, %v10177_v19  ;;  %vm2176_vm8 = vweird.f32 %v10069_v47 }
 0x1f4   : > { %v2198_v52 = vmul.f32 %v2197_v6, %v9939_v60  ;;  %v2236_v56 = vmul.f32 %v2235_v20, %v10008_v21  ;;  %v10198_v31 = vadd.f32 1.0, %v2249_v40  ;;  %vm10200_vm9 = vmor %vm2176_vm8, %vm2177_vm7  ;;  %v2180_v44 = vand.u32 2147483647, %v10069_v47 }
 0x1f5   : > { %v2274_v49 = vmul.f32 %v2273_v5, %v10011_v41  ;;  %v10206_v55 = vadd.f32 1.0, %v2289_v15  ;;  %v2327_v54 = vmul.f32 %v2326_v30, %v10072_v17  ;;  %v6448_v57 = vadd.f32 1.0, %v7720_v13 }
 0x1f6   : > { %v2179_v60 = vsel %vm10200_vm9, %v10118_v43, %v2175_v22  ;;  %v2183_v16 = vor.u32 1.1754944e-38, %v2182_v14  ;;  %v2310_v29 = vmul.f32 2.1237322e-06, %v10072_v17  ;;  %v2213_v23 = vsub.f32 1.0, %v2212_v18  ;;  %v8003_v18 = vld [vmem:[#allocation10 + $0x48] sm:$0xff] }
 0x1f7   : > { %v2362_v39 = vadd.f32 0.001143296, %v2361_v63  ;;  %v10213_v6 = vmin.f32 %v2388_v7, 16.0  ;;  %v10216_v47 = vadd.f32 %v722_v10, %v8891_v1  ;;  %v2199_v20 = vadd.f32 1.1283791, %v2198_v52  ;;  %7103 = vmatpush.bf16.msrb.mxu1 %v8003_v18 }
 0x1f8   : > { %v2237_v40 = vadd.f32 0.18741608, %v2236_v56  ;;  %8172 = vrcp.f32 %v10198_v31  ;;  %v10220_v5 = vadd.f32 %v811_v11, %v8893_v3  ;;  %vm2181_vm10 = vcmp.eq.f32.partialorder %v2180_v44, 8.507059e+37 }
 0x1f9   : > { %v2275_v15 = vadd.f32 0.05243302, %v2274_v49  ;;  %8174 = vrcp.f32 %v10206_v55  ;;  %v2328_v43 = vadd.f32 0.4994258, %v2327_v54  ;;  %v10224_v30 = vmul.f32 %v6447_v42, %v9992_v37 }
 0x1fa   : > { %v10227_v13 = vmul.f32 %v6448_v57, %v10001_v4  ;;  %v2184_v22 = vsel %vm2181_vm10, %v2183_v16, %v2179_v60  ;;  %v2311_v14 = vadd.f32 0.00028619796, %v2310_v29  ;;  %v2214_v63 = vmul.f32 %v10179_v27, %v2213_v23 }
 0x1fb   : > { %16269 = vst [vmem:[#allocation35_spill] sm:$0xff] %v10224_v30  ;;  %v2363_v7 = vmul.f32 %v2362_v39, %v10174_v38  ;;  %v2401_v52 = vmul.f32 3.8918573e-05, %v10213_v6  ;;  %v10233_v56 = vmul.f32 0.70710677, %v10216_v47  ;;  %v2200_v10 = vmul.f32 %v2199_v20, %v9893_v28 }
 0x1fc   : > { %16270 = vst [vmem:[#allocation36_spill] sm:$0xff] %v10227_v13  ;;  %v2220_v37 = vand.u32 2147483647, %v10136_v48  ;;  %v2238_v42 = vmul.f32 %v2237_v40, %v10008_v21  ;;  %v10239_v4 = vmul.f32 0.70710677, %v10220_v5  ;;  %v2185_v45 = vmul.f32 %v2184_v22, %v2160_v59 }
 0x1fd   : > { %v2276_v44 = vmul.f32 %v2275_v15, %v10011_v41  ;;  %v10243_v49 = vmul.f32 0.5, %v10014_v58  ;;  %v2329_v54 = vmul.f32 %v2328_v43, %v10072_v17  ;;  %vm2216_vm11 = vweird.f32 %v10136_v48 }
 0x1fe   : > { %v10246_v11 = vpop.eup %8172  ;;  %vm2217_vm12 = vweird.f32 %v10179_v27  ;;  %v2222_v28 = vand.u32 2147483648, %v10136_v48  ;;  %v2312_v21 = vmul.f32 %v2311_v14, %v10072_v17  ;;  %v2215_v59 = vadd.f32 %v10179_v27, %v2214_v63 }
 0x1ff   : > { %v10252_v57 = vpop.eup %8174  ;;  %v2364_v60 = vadd.f32 0.014752088, %v2363_v7  ;;  %v2402_v16 = vadd.f32 0.001143296, %v2401_v52  ;;  %v2428_v58 = vmul.f32 %v10233_v56, %v10233_v56  ;;  %vm10257_vm13 = vcmp.eq.f32.partialorder %v2220_v37, 8.507059e+37  ;;  %vm10272_vm14 = vmor %vm2216_vm11, %vm2217_vm12 }
 0x200   : > { %v2239_v23 = vadd.f32 1.1283791, %v2238_v42  ;;  %v2350_v39 = vmul.f32 2.1237322e-06, %v10174_v38  ;;  %v2468_v20 = vmul.f32 %v10239_v4, %v10239_v4  ;;  %v7721_v40 = vclamps-f32 %v2185_v45, 1.0 }
 0x201   : > { %v2252_v15 = vmul.f32 %v10246_v11, %v10198_v31  ;;  %v2277_v43 = vadd.f32 0.18741608, %v2276_v44  ;;  %v10266_v22 = vadd.f32 1.0, %v2329_v54  ;;  %v2223_v18 = vor.u32 1.1754944e-38, %v2222_v28 }
 0x202   : > { %v2292_v63 = vmul.f32 %v10252_v57, %v10206_v55  ;;  %v2313_v7 = vadd.f32 0.0036580483, %v2312_v21  ;;  %v2390_v52 = vmul.f32 2.1237322e-06, %v10213_v6  ;;  %v2219_v37 = vsel %vm10272_vm14, %v10179_v27, %v2215_v59  ;;  %v900_v21 = vpop.f32.mrf.mxu2 }
 0x203   : > { %v2365_v42 = vmul.f32 %v2364_v60, %v10174_v38  ;;  %v2403_v45 = vmul.f32 %v2402_v16, %v10213_v6  ;;  %v10284_v48 = vmin.f32 %v2428_v58, 16.0  ;;  %v10287_v44 = vmul.f32 %v2239_v23, %v9973_v33 }
 0x204   : > { %v2262_v54 = vand.u32 2147483648, %v10198_v31  ;;  %v2351_v28 = vadd.f32 0.00028619796, %v2350_v39  ;;  %v10290_v30 = vmin.f32 %v2468_v20, 16.0  ;;  %v6449_v53 = vadd.f32 1.0, %v7721_v40 }
 0x205   : > { %v2253_v24 = vsub.f32 1.0, %v2252_v15  ;;  %v2278_v14 = vmul.f32 %v2277_v43, %v10011_v41  ;;  %8176 = vrcp.f32 %v10266_v22  ;;  %v2224_v27 = vsel %vm10257_vm13, %v2223_v18, %v2219_v37 }
 0x206   : > { %v2293_v59 = vsub.f32 1.0, %v2292_v63  ;;  %v2314_v60 = vmul.f32 %v2313_v7, %v10072_v17  ;;  %v2391_v33 = vadd.f32 0.00028619796, %v2390_v52  ;;  %vm2256_vm15 = vweird.f32 %v10198_v31 }
 0x207   : > { %v2366_v16 = vadd.f32 0.112945676, %v2365_v42  ;;  %v2404_v58 = vadd.f32 0.014752088, %v2403_v45  ;;  %v2441_v23 = vmul.f32 3.8918573e-05, %v10284_v48  ;;  %v10300_v39 = vadd.f32 %v900_v21, %v8910_v12 }
 0x208   : > { %v2260_v41 = vand.u32 2147483647, %v10198_v31  ;;  %v2263_v20 = vor.u32 1.1754944e-38, %v2262_v54  ;;  %v2352_v40 = vmul.f32 %v2351_v28, %v10174_v38  ;;  %v2481_v29 = vmul.f32 3.8918573e-05, %v10290_v30 }
 0x209   : > { %v10306_v15 = vmul.f32 %v6449_v53, %v10024_v9  ;;  %v2225_v43 = vmul.f32 %v2224_v27, %v2200_v10  ;;  %v2254_v18 = vmul.f32 %v10246_v11, %v2253_v24  ;;  %vm2257_vm0 = vweird.f32 %v10246_v11 }
 0x20a   : > { %v2279_v63 = vadd.f32 1.1283791, %v2278_v14  ;;  %v2294_v7 = vmul.f32 %v10252_v57, %v2293_v59  ;;  %v2315_v52 = vadd.f32 0.05243302, %v2314_v60  ;;  %v2392_v37 = vmul.f32 %v2391_v33, %v10213_v6  ;;  %vm10343_vm4 = vmor %vm2256_vm15, %vm2257_vm0 }
 0x20b   : > { %16275 = vst [vmem:[#allocation37_spill] sm:$0xff] %v10306_v15  ;;  %v10312_v42 = vpop.eup %8176  ;;  %v2367_v45 = vmul.f32 %v2366_v16, %v10174_v38  ;;  %v2405_v54 = vmul.f32 %v2404_v58, %v10213_v6  ;;  %v2442_v28 = vadd.f32 0.001143296, %v2441_v23  ;;  %v10317_v9 = vmul.f32 0.70710677, %v10300_v39  ;;  %v989_v58 = vpop.f32.mrf.mxu3 }
 0x20c   : > { %vm10319_vm1 = vcmp.eq.f32.partialorder %v2260_v41, 8.507059e+37  ;;  %v10324_v53 = vmul.f32 0.5, %v10126_v26  ;;  %v2353_v10 = vadd.f32 0.0036580483, %v2352_v40  ;;  %v10327_v21 = vmul.f32 0.5, %v10158_v51 }
 0x20d   : > { %v2482_v14 = vadd.f32 0.001143296, %v2481_v29  ;;  %v7722_v27 = vclamps-f32 %v2225_v43, 1.0  ;;  %v2255_v59 = vadd.f32 %v10246_v11, %v2254_v18  ;;  %vm2296_vm2 = vweird.f32 %v10206_v55 }
 0x20e   : > { %v2302_v60 = vand.u32 2147483648, %v10206_v55  ;;  %v2295_v33 = vadd.f32 %v10252_v57, %v2294_v7  ;;  %vm2297_vm3 = vweird.f32 %v10252_v57  ;;  %v2332_v26 = vmul.f32 %v10312_v42, %v10266_v22 }
 0x20f   : > { %v2393_v16 = vadd.f32 0.0036580483, %v2392_v37  ;;  %v2368_v23 = vadd.f32 0.4994258, %v2367_v45  ;;  %v2406_v51 = vadd.f32 0.112945676, %v2405_v54  ;;  %v2443_v41 = vmul.f32 %v2442_v28, %v10284_v48  ;;  %vm10358_vm5 = vmor %vm2296_vm2, %vm2297_vm3 }
 0x210   : > { %v2508_v40 = vmul.f32 %v10317_v9, %v10317_v9  ;;  %v2300_v43 = vand.u32 2147483647, %v10206_v55  ;;  %v2316_v18 = vmul.f32 %v2315_v52, %v10072_v17  ;;  %v2354_v7 = vmul.f32 %v2353_v10, %v10174_v38 }
 0x211   : > { %v2483_v37 = vmul.f32 %v2482_v14, %v10290_v30  ;;  %v6450_v45 = vadd.f32 1.0, %v7722_v27  ;;  %v2259_v54 = vsel %vm10343_vm4, %v10246_v11, %v2255_v59  ;;  %v2303_v28 = vor.u32 1.1754944e-38, %v2302_v60 }
 0x212   : > { %v10363_v52 = vadd.f32 %v989_v58, %v8930_v25  ;;  %v2299_v10 = vsel %vm10358_vm5, %v10252_v57, %v2295_v33  ;;  %v2333_v14 = vsub.f32 1.0, %v2332_v26  ;;  %v2394_v27 = vmul.f32 %v2393_v16, %v10213_v6 }
 0x213   : > { %v2430_v11 = vmul.f32 2.1237322e-06, %v10284_v48  ;;  %v2369_v59 = vmul.f32 %v2368_v23, %v10174_v38  ;;  %v2407_v55 = vmul.f32 %v2406_v51, %v10213_v6  ;;  %v2444_v29 = vadd.f32 0.014752088, %v2443_v41  ;;  %v725_v41 = vpop.f32.mrf.mxu0 }
 0x214   : > { %v10372_v15 = vmin.f32 %v2508_v40, 16.0  ;;  %v2280_v60 = vmul.f32 %v2279_v63, %v9977_v2  ;;  %v2317_v58 = vadd.f32 0.18741608, %v2316_v18  ;;  %v2355_v13 = vadd.f32 0.05243302, %v2354_v7 }
 0x215   : > { %v2484_v34 = vadd.f32 0.014752088, %v2483_v37  ;;  %v10376_v31 = vmul.f32 %v6450_v45, %v10166_v32  ;;  %v2264_v57 = vsel %vm10319_vm1, %v2263_v20, %v2259_v54  ;;  %vm2301_vm6 = vcmp.eq.f32.partialorder %v2300_v43, 8.507059e+37 }
 0x216   : > { %v10381_v33 = vmul.f32 0.70710677, %v10363_v52  ;;  %v2304_v26 = vsel %vm2301_vm6, %v2303_v28, %v2299_v10  ;;  %v2334_v16 = vmul.f32 %v10312_v42, %v2333_v14  ;;  %v2395_v23 = vadd.f32 0.05243302, %v2394_v27 }
 0x217   : > { %16282 = vst [vmem:[#allocation38_spill] sm:$0xff] %v10376_v31  ;;  %v2431_v51 = vadd.f32 0.00028619796, %v2430_v11  ;;  %v10384_v2 = vadd.f32 1.0, %v2369_v59  ;;  %v2408_v63 = vadd.f32 0.4994258, %v2407_v55  ;;  %v2445_v40 = vmul.f32 %v2444_v29, %v10284_v48 }
 0x218   : > { %v2521_v32 = vmul.f32 3.8918573e-05, %v10372_v15  ;;  %v2265_v24 = vmul.f32 %v2264_v57, %v10287_v44  ;;  %v2318_v20 = vmul.f32 %v2317_v58, %v10072_v17  ;;  %v2356_v43 = vmul.f32 %v2355_v13, %v10174_v38 }
 0x219   : > { %v2485_v18 = vmul.f32 %v2484_v34, %v10290_v30  ;;  %v2305_v7 = vmul.f32 %v2304_v26, %v2280_v60  ;;  %v2342_v37 = vand.u32 2147483648, %v10266_v22  ;;  %v2548_v45 = vmul.f32 %v10381_v33, %v10381_v33 }
 0x21a   : > { %v10396_v54 = vadd.f32 %v725_v41, %v8891_v1  ;;  %v2335_v28 = vadd.f32 %v10312_v42, %v2334_v16  ;;  %vm2337_vm7 = vweird.f32 %v10312_v42  ;;  %v2396_v44 = vmul.f32 %v2395_v23, %v10213_v6 }
 0x21b   : > { %v2432_v17 = vmul.f32 %v2431_v51, %v10284_v48  ;;  %8178 = vrcp.f32 %v10384_v2  ;;  %v2409_v34 = vmul.f32 %v2408_v63, %v10213_v6  ;;  %v2446_v13 = vadd.f32 0.112945676, %v2445_v40 }
 0x21c   : > { %v2522_v10 = vadd.f32 0.001143296, %v2521_v32  ;;  %vm2336_vm8 = vweird.f32 %v10266_v22  ;;  %v2357_v14 = vadd.f32 0.18741608, %v2356_v43  ;;  %v2470_v27 = vmul.f32 2.1237322e-06, %v10290_v30 }
 0x21d   : > { %v2486_v11 = vadd.f32 0.112945676, %v2485_v18  ;;  %v7723_v59 = vclamps-f32 %v2265_v24, 1.0  ;;  %vm10406_vm9 = vmor %vm2336_vm8, %vm2337_vm7  ;;  %v2340_v29 = vand.u32 2147483647, %v10266_v22  ;;  %v10411_v60 = vmin.f32 %v2548_v45, 16.0 }
 0x21e   : > { %v10414_v58 = vmul.f32 0.70710677, %v10396_v54  ;;  %v7724_v57 = vclamps-f32 %v2305_v7, 1.0  ;;  %v2319_v26 = vadd.f32 1.1283791, %v2318_v20  ;;  %v2339_v16 = vsel %vm10406_vm9, %v10312_v42, %v2335_v28 }
 0x21f   : > { %v2397_v23 = vadd.f32 0.18741608, %v2396_v44  ;;  %v10419_v51 = vadd.f32 1.0, %v2409_v34  ;;  %v2433_v41 = vadd.f32 0.0036580483, %v2432_v17  ;;  %v2447_v63 = vmul.f32 %v2446_v13, %v10284_v48  ;;  %v814_v17 = vpop.f32.mrf.mxu1 }
 0x220   : > { %v2523_v40 = vmul.f32 %v2522_v10, %v10372_v15  ;;  %v2343_v22 = vor.u32 1.1754944e-38, %v2342_v37  ;;  %v2358_v32 = vmul.f32 %v2357_v14, %v10174_v38  ;;  %v2471_v24 = vadd.f32 0.00028619796, %v2470_v27 }
 0x221   : > { %v2487_v43 = vmul.f32 %v2486_v11, %v10290_v30  ;;  %v10425_v18 = vpop.eup %8178  ;;  %v6451_v20 = vadd.f32 1.0, %v7723_v59  ;;  %vm2341_vm10 = vcmp.eq.f32.partialorder %v2340_v29, 8.507059e+37  ;;  %v2561_v42 = vmul.f32 3.8918573e-05, %v10411_v60 }
 0x222   : > { %v2588_v7 = vmul.f32 %v10414_v58, %v10414_v58  ;;  %v6452_v45 = vadd.f32 1.0, %v7724_v57  ;;  %v2320_v28 = vmul.f32 %v2319_v26, %v10039_v8  ;;  %v2344_v44 = vsel %vm2341_vm10, %v2343_v22, %v2339_v16 }
 0x223   : > { %v2398_v37 = vmul.f32 %v2397_v23, %v10213_v6  ;;  %8180 = vrcp.f32 %v10419_v51  ;;  %v2434_v38 = vmul.f32 %v2433_v41, %v10284_v48  ;;  %v2448_v34 = vadd.f32 0.4994258, %v2447_v63  ;;  %v389_v23 = vld [vmem:[%s8816_s18 + $0xd0] sm:$0xff] }
 0x224   : > { %v2524_v13 = vadd.f32 0.014752088, %v2523_v40  ;;  %v2359_v10 = vadd.f32 1.1283791, %v2358_v32  ;;  %v2372_v14 = vmul.f32 %v10425_v18, %v10384_v2  ;;  %v2472_v27 = vmul.f32 %v2471_v24, %v10290_v30 }
 0x225   : > { %v2488_v11 = vadd.f32 0.4994258, %v2487_v43  ;;  %v10438_v8 = vmul.f32 0.5, %v10216_v47  ;;  %v2562_v59 = vadd.f32 0.001143296, %v2561_v42  ;;  %v10440_v6 = vmin.f32 %v2588_v7, 16.0 }
 0x226   : > { %v10443_v55 = vadd.f32 %v814_v17, %v8893_v3  ;;  %v10446_v29 = vmul.f32 %v6451_v20, %v10169_v46  ;;  %v10449_v57 = vmul.f32 %v6452_v45, %v10172_v62  ;;  %v2345_v26 = vmul.f32 %v2344_v44, %v2320_v28  ;;  %v390_v62 = vld [vmem:[%s8816_s18 + $0xd8] sm:$0xff]  ;;  %v10469_v7 = vld [vmem:[#allocation5] ss:$0 sm:$0xff] }
 0x227   : > { %v10452_v16 = vmul.f32 0.5, %v10220_v5  ;;  %v2399_v47 = vadd.f32 1.1283791, %v2398_v37  ;;  %v2435_v41 = vadd.f32 0.05243302, %v2434_v38  ;;  %v2449_v63 = vmul.f32 %v2448_v34, %v10284_v48 }
 0x228   : > { %16285 = vst [vmem:[#allocation39_spill] sm:$0xff] %v10446_v29  ;;  %v2525_v40 = vmul.f32 %v2524_v13, %v10372_v15  ;;  %v10458_v22 = vmul.f32 %v2359_v10, %v10145_v35  ;;  %v2373_v32 = vsub.f32 1.0, %v2372_v14  ;;  %v2473_v46 = vadd.f32 0.0036580483, %v2472_v27 }
 0x229   : > { %16286 = vst [vmem:[#allocation40_spill] sm:$0xff] %v10449_v57  ;;  %v2489_v24 = vmul.f32 %v2488_v11, %v10290_v30  ;;  %v10462_v43 = vpop.eup %8180  ;;  %v2563_v5 = vmul.f32 %v2562_v59, %v10411_v60  ;;  %v2601_v20 = vmul.f32 3.8918573e-05, %v10440_v6  ;;  %v10467_v42 = vmul.f32 0.70710677, %v10443_v55 }
 0x22a   : > { %v437_v45 = vsub.f32 %v389_v23, %v10469_v7  ;;  %v7725_v35 = vclamps-f32 %v2345_v26, 1.0  ;;  %vm2376_vm11 = vweird.f32 %v10384_v2  ;;  %v2380_v28 = vand.u32 2147483647, %v10384_v2 }
 0x22b   : > { %v2510_v44 = vmul.f32 2.1237322e-06, %v10372_v15  ;;  %v2436_v37 = vmul.f32 %v2435_v41, %v10284_v48  ;;  %v10476_v17 = vadd.f32 1.0, %v2449_v63  ;;  %v2526_v38 = vadd.f32 0.112945676, %v2525_v40 }
 0x22c   : > { %v438_v34 = vsub.f32 %v390_v62, %v10469_v7  ;;  %v2374_v13 = vmul.f32 %v10425_v18, %v2373_v32  ;;  %v2412_v10 = vmul.f32 %v10462_v43, %v10419_v51  ;;  %v2474_v14 = vmul.f32 %v2473_v46, %v10290_v30 }
 0x22d   : > { %v10483_v27 = vadd.f32 1.0, %v2489_v24  ;;  %v2564_v11 = vadd.f32 0.014752088, %v2563_v5  ;;  %v2602_v59 = vadd.f32 0.001143296, %v2601_v20  ;;  %v2628_v26 = vmul.f32 %v10467_v42, %v10467_v42 }
 0x22e   : > { %v472_v23 = vmul.f32 %v8839_v50, %v437_v45  ;;  %v6453_v41 = vadd.f32 1.0, %v7725_v35  ;;  %vm2377_vm12 = vweird.f32 %v10425_v18  ;;  %v2382_v63 = vand.u32 2147483648, %v10384_v2 }
 0x22f   : > { %v2511_v40 = vadd.f32 0.00028619796, %v2510_v44  ;;  %v2437_v32 = vadd.f32 0.18741608, %v2436_v37  ;;  %8182 = vrcp.f32 %v10476_v17  ;;  %v2527_v46 = vmul.f32 %v2526_v38, %v10372_v15  ;;  %vm10512_vm14 = vmor %vm2376_vm11, %vm2377_vm12 }
 0x230   : > { %v473_v24 = vmul.f32 %v8839_v50, %v438_v34  ;;  %v2375_v62 = vadd.f32 %v10425_v18, %v2374_v13  ;;  %v2413_v5 = vsub.f32 1.0, %v2412_v10  ;;  %v2475_v20 = vadd.f32 0.05243302, %v2474_v14 }
 0x231   : > { %8184 = vrcp.f32 %v10483_v27  ;;  %v2565_v45 = vmul.f32 %v2564_v11, %v10411_v60  ;;  %v2603_v35 = vmul.f32 %v2602_v59, %v10440_v6  ;;  %v10497_v57 = vmin.f32 %v2628_v26, 16.0 }
 0x232   : > { %v491_v44 = vpack.c.bf16 %v473_v24, %v472_v23  ;;  %vm10499_vm13 = vcmp.eq.f32.partialorder %v2380_v28, 8.507059e+37  ;;  %v10504_v38 = vmul.f32 %v2399_v47, %v10177_v19  ;;  %v2422_v34 = vand.u32 2147483648, %v10419_v51  ;;  %v903_v19 = vpop.f32.mrf.mxu2 }
 0x233   : > { %v2512_v13 = vmul.f32 %v2511_v40, %v10372_v15  ;;  %v2383_v14 = vor.u32 1.1754944e-38, %v2382_v63  ;;  %v2420_v28 = vand.u32 2147483647, %v10419_v51  ;;  %v2438_v11 = vmul.f32 %v2437_v32, %v10284_v48 }
 0x234   : > { %v2528_v59 = vadd.f32 0.4994258, %v2527_v46  ;;  %769 = vmatmul.bf16.gmra.mxu0 %v491_v44  ;;  %858 = vmatmul.bf16.gmra.mxu1 %v491_v44  ;;  %v2379_v47 = vsel %vm10512_vm14, %v10425_v18, %v2375_v62  ;;  %v2414_v26 = vmul.f32 %v10462_v43, %v2413_v5  ;;  %v2476_v2 = vmul.f32 %v2475_v20, %v10290_v30 }
 0x235   : > { %v10524_v23 = vmul.f32 0.5, %v10300_v39  ;;  %947 = vmatmul.bf16.gmra.mxu2 %v491_v44  ;;  %1036 = vmatmul.bf16.gmra.mxu3 %v491_v44  ;;  %v10526_v63 = vpop.eup %8182  ;;  %v10529_v48 = vmul.f32 %v6453_v41, %v10243_v49  ;;  %v2566_v40 = vadd.f32 0.112945676, %v2565_v45  ;;  %v2604_v32 = vadd.f32 0.014752088, %v2603_v35 }
 0x236   : > { %v2641_v46 = vmul.f32 3.8918573e-05, %v10497_v57  ;;  %vm2416_vm15 = vweird.f32 %v10419_v51  ;;  %v2423_v18 = vor.u32 1.1754944e-38, %v2422_v34  ;;  %v2513_v62 = vadd.f32 0.0036580483, %v2512_v13 }
 0x237   : > { %16291 = vst [vmem:[#allocation41_spill] sm:$0xff] %v10529_v48  ;;  %v10532_v24 = vpop.eup %8184  ;;  %v10536_v39 = vadd.f32 %v903_v19, %v8910_v12  ;;  %v2384_v5 = vsel %vm10499_vm13, %v2383_v14, %v2379_v47  ;;  %vm10540_vm0 = vcmp.eq.f32.partialorder %v2420_v28, 8.507059e+37  ;;  %v2439_v49 = vadd.f32 1.1283791, %v2438_v11 }
 0x238   : > { %v2529_v41 = vmul.f32 %v2528_v59, %v10372_v15  ;;  %v2550_v45 = vmul.f32 2.1237322e-06, %v10411_v60  ;;  %v2415_v35 = vadd.f32 %v10462_v43, %v2414_v26  ;;  %vm2417_vm1 = vweird.f32 %v10462_v43 }
 0x239   : > { %v2452_v44 = vmul.f32 %v10526_v63, %v10476_v17  ;;  %v2477_v34 = vadd.f32 0.18741608, %v2476_v2  ;;  %v2492_v37 = vmul.f32 %v10532_v24, %v10483_v27  ;;  %v2567_v13 = vmul.f32 %v2566_v40, %v10411_v60  ;;  %vm10564_vm2 = vmor %vm2416_vm15, %vm2417_vm1 }
 0x23a   : > { %v2605_v10 = vmul.f32 %v2604_v32, %v10440_v6  ;;  %v2642_v14 = vadd.f32 0.001143296, %v2641_v46  ;;  %v2385_v28 = vmul.f32 %v2384_v5, %v10458_v22  ;;  %v2514_v11 = vmul.f32 %v2513_v62, %v10372_v15 }
 0x23b   : > { %v10557_v59 = vmul.f32 0.5, %v10363_v52  ;;  %v10560_v19 = vmul.f32 0.70710677, %v10536_v39  ;;  %v10569_v26 = vmul.f32 %v2439_v49, %v10233_v56  ;;  %v10571_v2 = vadd.f32 1.0, %v2529_v41  ;;  %v992_v49 = vpop.f32.mrf.mxu3 }
 0x23c   : > { %v2551_v22 = vadd.f32 0.00028619796, %v2550_v45  ;;  %v2590_v40 = vmul.f32 2.1237322e-06, %v10440_v6  ;;  %v2419_v52 = vsel %vm10564_vm2, %v10462_v43, %v2415_v35  ;;  %v2453_v32 = vsub.f32 1.0, %v2452_v44 }
 0x23d   : > { %v2460_v46 = vand.u32 2147483647, %v10476_v17  ;;  %v2478_v51 = vmul.f32 %v2477_v34, %v10290_v30  ;;  %v2493_v62 = vsub.f32 1.0, %v2492_v37  ;;  %v2568_v5 = vadd.f32 0.4994258, %v2567_v13 }
 0x23e   : > { %v2606_v48 = vadd.f32 0.112945676, %v2605_v10  ;;  %v2643_v56 = vmul.f32 %v2642_v14, %v10497_v57  ;;  %v7726_v41 = vclamps-f32 %v2385_v28, 1.0  ;;  %v2462_v45 = vand.u32 2147483648, %v10476_v17 }
 0x23f   : > { %v2515_v29 = vadd.f32 0.05243302, %v2514_v11  ;;  %v2668_v31 = vmul.f32 %v10560_v19, %v10560_v19  ;;  %vm2456_vm3 = vweird.f32 %v10476_v17  ;;  %8186 = vrcp.f32 %v10571_v2 }
 0x240   : > { %v2552_v43 = vmul.f32 %v2551_v22, %v10411_v60  ;;  %v2591_v30 = vadd.f32 0.00028619796, %v2590_v40  ;;  %v2424_v35 = vsel %vm10540_vm0, %v2423_v18, %v2419_v52  ;;  %v2454_v44 = vmul.f32 %v10526_v63, %v2453_v32 }
 0x241   : > { %v2479_v34 = vadd.f32 1.1283791, %v2478_v51  ;;  %v10590_v37 = vadd.f32 %v992_v49, %v8930_v25  ;;  %v2494_v13 = vmul.f32 %v10532_v24, %v2493_v62  ;;  %v2569_v10 = vmul.f32 %v2568_v5, %v10411_v60 }
 0x242   : > { %v2607_v14 = vmul.f32 %v2606_v48, %v10440_v6  ;;  %v2644_v28 = vadd.f32 0.014752088, %v2643_v56  ;;  %v6454_v11 = vadd.f32 1.0, %v7726_v41  ;;  %vm10595_vm4 = vcmp.eq.f32.partialorder %v2460_v46, 8.507059e+37 }
 0x243   : > { %v2463_v20 = vor.u32 1.1754944e-38, %v2462_v45  ;;  %v2516_v18 = vmul.f32 %v2515_v29, %v10372_v15  ;;  %v10600_v22 = vmin.f32 %v2668_v31, 16.0  ;;  %v2425_v40 = vmul.f32 %v2424_v35, %v10504_v38 }
 0x244   : > { %vm2457_vm5 = vweird.f32 %v10526_v63  ;;  %v2553_v52 = vadd.f32 0.0036580483, %v2552_v43  ;;  %v2592_v32 = vmul.f32 %v2591_v30, %v10440_v6  ;;  %v2455_v48 = vadd.f32 %v10526_v63, %v2454_v44 }
 0x245   : > { %vm2497_vm6 = vweird.f32 %v10532_v24  ;;  %v2500_v46 = vand.u32 2147483647, %v10483_v27  ;;  %v10609_v51 = vmul.f32 0.70710677, %v10590_v37  ;;  %v10611_v62 = vpop.eup %8186  ;;  %v2495_v31 = vadd.f32 %v10532_v24, %v2494_v13  ;;  %vm10624_vm7 = vmor %vm2456_vm3, %vm2457_vm5 }
 0x246   : > { %v10614_v29 = vadd.f32 1.0, %v2569_v10  ;;  %v2608_v38 = vadd.f32 0.4994258, %v2607_v14  ;;  %v2645_v5 = vmul.f32 %v2644_v28, %v10497_v57  ;;  %v2480_v56 = vmul.f32 %v2479_v34, %v10239_v4 }
 0x247   : > { %v2502_v49 = vand.u32 2147483648, %v10483_v27  ;;  %v2517_v41 = vadd.f32 0.18741608, %v2516_v18  ;;  %v2681_v45 = vmul.f32 3.8918573e-05, %v10600_v22  ;;  %vm2496_vm8 = vweird.f32 %v10483_v27 }
 0x248   : > { %v2554_v30 = vmul.f32 %v2553_v52, %v10411_v60  ;;  %v2593_v35 = vadd.f32 0.0036580483, %v2592_v32  ;;  %v2630_v4 = vmul.f32 2.1237322e-06, %v10497_v57  ;;  %v7727_v44 = vclamps-f32 %v2425_v40, 1.0  ;;  %vm10636_vm9 = vmor %vm2496_vm8, %vm2497_vm6  ;;  %v727_v52 = vpop.f32.mrf.mxu0  ;;  %v816_v32 = vpop.f32.mrf.mxu1 }
 0x249   : > { %v2459_v34 = vsel %vm10624_vm7, %v10526_v63, %v2455_v48  ;;  %v2532_v13 = vmul.f32 %v10611_v62, %v10571_v2  ;;  %v2708_v27 = vmul.f32 %v10609_v51, %v10609_v51  ;;  %v2499_v10 = vsel %vm10636_vm9, %v10532_v24, %v2495_v31 }
 0x24a   : > { %8188 = vrcp.f32 %v10614_v29  ;;  %v2609_v63 = vmul.f32 %v2608_v38, %v10440_v6  ;;  %v2646_v14 = vadd.f32 0.112945676, %v2645_v5  ;;  %vm2501_vm10 = vcmp.eq.f32.partialorder %v2500_v46, 8.507059e+37 }
 0x24b   : > { %v2503_v28 = vor.u32 1.1754944e-38, %v2502_v49  ;;  %v2518_v18 = vmul.f32 %v2517_v41, %v10372_v15  ;;  %v2682_v40 = vadd.f32 0.001143296, %v2681_v45  ;;  %v2464_v48 = vsel %vm10595_vm4, %v2463_v20, %v2459_v34 }
 0x24c   : > { %v2555_v43 = vadd.f32 0.05243302, %v2554_v30  ;;  %v2594_v0 = vmul.f32 %v2593_v35, %v10440_v6  ;;  %v2631_v17 = vadd.f32 0.00028619796, %v2630_v4  ;;  %v6455_v24 = vadd.f32 1.0, %v7727_v44 }
 0x24d   : > { %v2504_v31 = vsel %vm2501_vm10, %v2503_v28, %v2499_v10  ;;  %v2533_v36 = vsub.f32 1.0, %v2532_v13  ;;  %v10653_v61 = vmin.f32 %v2708_v27, 16.0  ;;  %v10655_v38 = vadd.f32 1.0, %v2609_v63 }
 0x24e   : > { %v2647_v46 = vmul.f32 %v2646_v14, %v10497_v57  ;;  %v10659_v15 = vadd.f32 %v727_v52, %v8891_v1  ;;  %v10662_v5 = vadd.f32 %v816_v32, %v8893_v3  ;;  %v10665_v47 = vmul.f32 %v6454_v11, %v10324_v53 }
 0x24f   : > { %v2465_v20 = vmul.f32 %v2464_v48, %v10569_v26  ;;  %v2519_v49 = vadd.f32 1.1283791, %v2518_v18  ;;  %v2683_v41 = vmul.f32 %v2682_v40, %v10600_v22  ;;  %v2556_v30 = vmul.f32 %v2555_v43, %v10411_v60 }
 0x250   : > { %16302 = vst [vmem:[#allocation42_spill] sm:$0xff] %v10665_v47  ;;  %v10669_v45 = vpop.eup %8188  ;;  %v10673_v35 = vmul.f32 0.5, %v10396_v54  ;;  %v2595_v4 = vadd.f32 0.05243302, %v2594_v0  ;;  %v2632_v44 = vmul.f32 %v2631_v17, %v10497_v57  ;;  %v10677_v34 = vmul.f32 %v6455_v24, %v10327_v21 }
 0x251   : > { %v2505_v53 = vmul.f32 %v2504_v31, %v2480_v56  ;;  %v2534_v11 = vmul.f32 %v10611_v62, %v2533_v36  ;;  %v2721_v26 = vmul.f32 3.8918573e-05, %v10653_v61  ;;  %8190 = vrcp.f32 %v10655_v38 }
 0x252   : > { %16303 = vst [vmem:[#allocation43_spill] sm:$0xff] %v10677_v34  ;;  %v2648_v13 = vadd.f32 0.4994258, %v2647_v46  ;;  %v10683_v27 = vmul.f32 0.70710677, %v10659_v15  ;;  %v7728_v0 = vclamps-f32 %v2465_v20, 1.0  ;;  %v2520_v10 = vmul.f32 %v2519_v49, %v10317_v9 }
 0x253   : > { %v10686_v54 = vmul.f32 0.70710677, %v10662_v5  ;;  %v2572_v21 = vmul.f32 %v10669_v45, %v10614_v29  ;;  %v2684_v56 = vadd.f32 0.014752088, %v2683_v41  ;;  %v2540_v36 = vand.u32 2147483647, %v10571_v2 }
 0x254   : > { %v2557_v63 = vadd.f32 0.18741608, %v2556_v30  ;;  %v2596_v14 = vmul.f32 %v2595_v4, %v10440_v6  ;;  %v2633_v28 = vadd.f32 0.0036580483, %v2632_v44  ;;  %v7729_v18 = vclamps-f32 %v2505_v53, 1.0 }
 0x255   : > { %v2535_v40 = vadd.f32 %v10611_v62, %v2534_v11  ;;  %vm2537_vm11 = vweird.f32 %v10611_v62  ;;  %v2722_v52 = vadd.f32 0.001143296, %v2721_v26  ;;  %v10696_v32 = vmul.f32 0.5, %v10443_v55 }
 0x256   : > { %v2649_v9 = vmul.f32 %v2648_v13, %v10497_v57  ;;  %v2748_v48 = vmul.f32 %v10683_v27, %v10683_v27  ;;  %v2788_v43 = vmul.f32 %v10686_v54, %v10686_v54  ;;  %vm2536_vm12 = vweird.f32 %v10571_v2 }
 0x257   : > { %v2542_v17 = vand.u32 2147483648, %v10571_v2  ;;  %v2573_v24 = vsub.f32 1.0, %v2572_v21  ;;  %v2685_v31 = vmul.f32 %v2684_v56, %v10600_v22  ;;  %v10706_v46 = vpop.eup %8190  ;;  %v6456_v20 = vadd.f32 1.0, %v7728_v0  ;;  %vm10708_vm13 = vmor %vm2536_vm12, %vm2537_vm11 }
 0x258   : > { %v2558_v49 = vmul.f32 %v2557_v63, %v10411_v60  ;;  %v2597_v41 = vadd.f32 0.18741608, %v2596_v14  ;;  %v2634_v30 = vmul.f32 %v2633_v28, %v10497_v57  ;;  %v6457_v4 = vadd.f32 1.0, %v7729_v18  ;;  %v905_v18 = vpop.f32.mrf.mxu2 }
 0x259   : > { %v2539_v2 = vsel %vm10708_vm13, %v10611_v62, %v2535_v40  ;;  %vm10717_vm14 = vcmp.eq.f32.partialorder %v2540_v36, 8.507059e+37  ;;  %v2723_v53 = vmul.f32 %v2722_v52, %v10653_v61  ;;  %v10722_v11 = vadd.f32 1.0, %v2649_v9 }
 0x25a   : > { %v2670_v26 = vmul.f32 2.1237322e-06, %v10600_v22  ;;  %v10725_v13 = vmin.f32 %v2748_v48, 16.0  ;;  %v10727_v60 = vmin.f32 %v2788_v43, 16.0  ;;  %v2543_v0 = vor.u32 1.1754944e-38, %v2542_v17 }
 0x25b   : > { %v2574_v21 = vmul.f32 %v10669_v45, %v2573_v24  ;;  %v2612_v62 = vmul.f32 %v10706_v46, %v10655_v38  ;;  %v2686_v56 = vadd.f32 0.112945676, %v2685_v31  ;;  %v10733_v36 = vmul.f32 %v6456_v20, %v10438_v8 }
 0x25c   : > { %v2559_v63 = vadd.f32 1.1283791, %v2558_v49  ;;  %v2598_v14 = vmul.f32 %v2597_v41, %v10440_v6  ;;  %v2635_v28 = vadd.f32 0.05243302, %v2634_v30  ;;  %v10737_v40 = vmul.f32 %v6457_v4, %v10452_v16 }
 0x25d   : > { %16308 = vst [vmem:[#allocation44_spill] sm:$0xff] %v10733_v36  ;;  %v2544_v52 = vsel %vm10717_vm14, %v2543_v0, %v2539_v2  ;;  %vm2577_vm15 = vweird.f32 %v10669_v45  ;;  %v2724_v9 = vadd.f32 0.014752088, %v2723_v53  ;;  %8192 = vrcp.f32 %v10722_v11 }
 0x25e   : > { %16309 = vst [vmem:[#allocation45_spill] sm:$0xff] %v10737_v40  ;;  %v2671_v48 = vadd.f32 0.00028619796, %v2670_v26  ;;  %v2761_v8 = vmul.f32 3.8918573e-05, %v10725_v13  ;;  %v2575_v6 = vadd.f32 %v10669_v45, %v2574_v21  ;;  %v2613_v17 = vsub.f32 1.0, %v2612_v62 }
 0x25f   : > { %v2801_v43 = vmul.f32 3.8918573e-05, %v10727_v60  ;;  %v2687_v24 = vmul.f32 %v2686_v56, %v10600_v22  ;;  %v10748_v16 = vadd.f32 %v905_v18, %v8910_v12  ;;  %v2580_v31 = vand.u32 2147483647, %v10614_v29 }
 0x260   : > { %v2582_v20 = vand.u32 2147483648, %v10614_v29  ;;  %v2599_v55 = vadd.f32 1.1283791, %v2598_v14  ;;  %v2636_v49 = vmul.f32 %v2635_v28, %v10497_v57  ;;  %v2545_v41 = vmul.f32 %v2544_v52, %v2520_v10 }
 0x261   : > { %vm2576_vm0 = vweird.f32 %v10614_v29  ;;  %v2710_v30 = vmul.f32 2.1237322e-06, %v10653_v61  ;;  %v2725_v4 = vmul.f32 %v2724_v9, %v10653_v61  ;;  %v2560_v2 = vmul.f32 %v2559_v63, %v10381_v33 }
 0x262   : > { %vm10759_vm1 = vmor %vm2576_vm0, %vm2577_vm15  ;;  %v2672_v53 = vmul.f32 %v2671_v48, %v10600_v22  ;;  %v2762_v26 = vadd.f32 0.001143296, %v2761_v8  ;;  %v2802_v0 = vadd.f32 0.001143296, %v2801_v43  ;;  %v2614_v10 = vmul.f32 %v10706_v46, %v2613_v17 }
 0x263   : > { %v2579_v29 = vsel %vm10759_vm1, %v10669_v45, %v2575_v6  ;;  %v2688_v21 = vadd.f32 0.4994258, %v2687_v24  ;;  %v10769_v62 = vmul.f32 0.70710677, %v10748_v16  ;;  %v10771_v33 = vpop.eup %8192  ;;  %vm2581_vm2 = vcmp.eq.f32.partialorder %v2580_v31, 8.507059e+37 }
 0x264   : > { %v2583_v56 = vor.u32 1.1754944e-38, %v2582_v20  ;;  %v2600_v63 = vmul.f32 %v2599_v55, %v10414_v58  ;;  %v2637_v14 = vadd.f32 0.18741608, %v2636_v49  ;;  %v7730_v28 = vclamps-f32 %v2545_v41, 1.0 }
 0x265   : > { %vm2617_vm3 = vweird.f32 %v10706_v46  ;;  %v2711_v18 = vadd.f32 0.00028619796, %v2710_v30  ;;  %v2726_v52 = vadd.f32 0.112945676, %v2725_v4  ;;  %v2673_v45 = vadd.f32 0.0036580483, %v2672_v53 }
 0x266   : > { %v2584_v9 = vsel %vm2581_vm2, %v2583_v56, %v2579_v29  ;;  %v2763_v48 = vmul.f32 %v2762_v26, %v10725_v13  ;;  %v2803_v8 = vmul.f32 %v2802_v0, %v10727_v60  ;;  %v2615_v43 = vadd.f32 %v10706_v46, %v2614_v10  ;;  %v994_v56 = vpop.f32.mrf.mxu3 }
 0x267   : > { %v2652_v6 = vmul.f32 %v10771_v33, %v10722_v11  ;;  %v2689_v17 = vmul.f32 %v2688_v21, %v10600_v22  ;;  %v2828_v58 = vmul.f32 %v10769_v62, %v10769_v62  ;;  %v2620_v24 = vand.u32 2147483647, %v10655_v38 }
 0x268   : > { %v2622_v31 = vand.u32 2147483648, %v10655_v38  ;;  %v2638_v20 = vmul.f32 %v2637_v14, %v10497_v57  ;;  %v10787_v55 = vmul.f32 0.5, %v10536_v39  ;;  %v2585_v49 = vmul.f32 %v2584_v9, %v2560_v2  ;;  %v730_v9 = vpop.f32.mrf.mxu0 }
 0x269   : > { %vm2616_vm4 = vweird.f32 %v10655_v38  ;;  %v2712_v41 = vmul.f32 %v2711_v18, %v10653_v61  ;;  %v2727_v30 = vmul.f32 %v2726_v52, %v10653_v61  ;;  %v6458_v4 = vadd.f32 1.0, %v7730_v28 }
 0x26a   : > { %vm10794_vm5 = vmor %vm2616_vm4, %vm2617_vm3  ;;  %v2674_v53 = vmul.f32 %v2673_v45, %v10600_v22  ;;  %v2764_v57 = vadd.f32 0.014752088, %v2763_v48  ;;  %v2804_v26 = vadd.f32 0.014752088, %v2803_v8  ;;  %v2653_v38 = vsub.f32 1.0, %v2652_v6 }
 0x26b   : > { %v2619_v39 = vsel %vm10794_vm5, %v10706_v46, %v2615_v43  ;;  %v10802_v2 = vadd.f32 1.0, %v2689_v17  ;;  %v10804_v0 = vmin.f32 %v2828_v58, 16.0  ;;  %vm2621_vm6 = vcmp.eq.f32.partialorder %v2620_v24, 8.507059e+37 }
 0x26c   : > { %v2623_v29 = vor.u32 1.1754944e-38, %v2622_v31  ;;  %v2639_v10 = vadd.f32 1.1283791, %v2638_v20  ;;  %v2750_v21 = vmul.f32 2.1237322e-06, %v10725_v13  ;;  %v7731_v14 = vclamps-f32 %v2585_v49, 1.0 }
 0x26d   : > { %v10808_v28 = vmul.f32 0.5, %v10590_v37  ;;  %v2713_v18 = vadd.f32 0.0036580483, %v2712_v41  ;;  %v2728_v52 = vadd.f32 0.4994258, %v2727_v30  ;;  %v2765_v48 = vmul.f32 %v2764_v57, %v10725_v13 }
 0x26e   : > { %v2624_v45 = vsel %vm2621_vm6, %v2623_v29, %v2619_v39  ;;  %v2675_v46 = vadd.f32 0.05243302, %v2674_v53  ;;  %v2805_v8 = vmul.f32 %v2804_v26, %v10727_v60  ;;  %v2654_v43 = vmul.f32 %v10771_v33, %v2653_v38 }
 0x26f   : > { %8194 = vrcp.f32 %v10802_v2  ;;  %v2841_v6 = vmul.f32 3.8918573e-05, %v10804_v0  ;;  %v10816_v17 = vadd.f32 %v994_v56, %v8930_v25  ;;  %v10819_v37 = vmul.f32 %v6458_v4, %v10524_v23 }
 0x270   : > { %v2640_v58 = vmul.f32 %v2639_v10, %v10467_v42  ;;  %v2751_v24 = vadd.f32 0.00028619796, %v2750_v21  ;;  %v10823_v31 = vadd.f32 %v730_v9, %v8891_v1  ;;  %v6459_v20 = vadd.f32 1.0, %v7731_v14 }
 0x271   : > { %16314 = vst [vmem:[#allocation46_spill] sm:$0xff] %v10819_v37  ;;  %v2660_v49 = vand.u32 2147483647, %v10722_v11  ;;  %v2714_v41 = vmul.f32 %v2713_v18, %v10653_v61  ;;  %v2729_v30 = vmul.f32 %v2728_v52, %v10653_v61  ;;  %v2625_v44 = vmul.f32 %v2624_v45, %v2600_v63  ;;  %v392_v52 = vld [vmem:[%s8816_s18 + $0xe8] sm:$0xff] }
 0x272   : > { %v2676_v53 = vmul.f32 %v2675_v46, %v10600_v22  ;;  %v2766_v57 = vadd.f32 0.112945676, %v2765_v48  ;;  %v2806_v26 = vadd.f32 0.112945676, %v2805_v8  ;;  %v2655_v23 = vadd.f32 %v10771_v33, %v2654_v43 }
 0x273   : > { %vm2657_vm7 = vweird.f32 %v10771_v33  ;;  %v2842_v42 = vadd.f32 0.001143296, %v2841_v6  ;;  %v10832_v4 = vmul.f32 0.70710677, %v10816_v17  ;;  %vm2656_vm8 = vweird.f32 %v10722_v11 }
 0x274   : > { %v2662_v39 = vand.u32 2147483648, %v10722_v11  ;;  %v2752_v38 = vmul.f32 %v2751_v24, %v10725_v13  ;;  %v10838_v63 = vmul.f32 0.70710677, %v10823_v31  ;;  %v10843_v10 = vmul.f32 %v6459_v20, %v10557_v59  ;;  %vm10848_vm9 = vmor %vm2656_vm8, %vm2657_vm7  ;;  %v819_v59 = vpop.f32.mrf.mxu1 }
 0x275   : > { %v10840_v29 = vpop.eup %8194  ;;  %v2715_v21 = vadd.f32 0.05243302, %v2714_v41  ;;  %v10845_v56 = vadd.f32 1.0, %v2729_v30  ;;  %v2790_v14 = vmul.f32 2.1237322e-06, %v10727_v60  ;;  %v7732_v18 = vclamps-f32 %v2625_v44, 1.0 }
 0x276   : > { %16315 = vst [vmem:[#allocation47_spill] sm:$0xff] %v10843_v10  ;;  %vm10852_vm10 = vcmp.eq.f32.partialorder %v2660_v49, 8.507059e+37  ;;  %v2767_v9 = vmul.f32 %v2766_v57, %v10725_v13  ;;  %v2807_v45 = vmul.f32 %v2806_v26, %v10727_v60  ;;  %v2659_v46 = vsel %vm10848_vm9, %v10771_v33, %v2655_v23 }
 0x277   : > { %v2677_v48 = vadd.f32 0.18741608, %v2676_v53  ;;  %v2843_v8 = vmul.f32 %v2842_v42, %v10804_v0  ;;  %v2868_v43 = vmul.f32 %v10832_v4, %v10832_v4  ;;  %v2663_v6 = vor.u32 1.1754944e-38, %v2662_v39 }
 0x278   : > { %v2692_v24 = vmul.f32 %v10840_v29, %v10802_v2  ;;  %v2753_v20 = vadd.f32 0.0036580483, %v2752_v38  ;;  %v2908_v49 = vmul.f32 %v10838_v63, %v10838_v63  ;;  %v2716_v41 = vmul.f32 %v2715_v21, %v10653_v61  ;;  %v391_v21 = vld [vmem:[%s8816_s18 + $0xe0] sm:$0xff] }
 0x279   : > { %8196 = vrcp.f32 %v10845_v56  ;;  %v2791_v33 = vadd.f32 0.00028619796, %v2790_v14  ;;  %v10871_v30 = vadd.f32 %v819_v59, %v8893_v3  ;;  %v6460_v44 = vadd.f32 1.0, %v7732_v18 }
 0x27a   : > { %v2664_v53 = vsel %vm10852_vm10, %v2663_v6, %v2659_v46  ;;  %v2768_v57 = vadd.f32 0.4994258, %v2767_v9  ;;  %v2808_v26 = vadd.f32 0.4994258, %v2807_v45  ;;  %v2678_v23 = vmul.f32 %v2677_v48, %v10600_v22 }
 0x27b   : > { %v10877_v42 = vmul.f32 0.5, %v10659_v15  ;;  %v2844_v39 = vadd.f32 0.014752088, %v2843_v8  ;;  %v10879_v38 = vmin.f32 %v2868_v43, 16.0  ;;  %v2693_v14 = vsub.f32 1.0, %v2692_v24 }
 0x27c   : > { %v2754_v59 = vmul.f32 %v2753_v20, %v10725_v13  ;;  %v10885_v18 = vmul.f32 0.5, %v10662_v5  ;;  %v10887_v11 = vmin.f32 %v2908_v49, 16.0  ;;  %v2665_v9 = vmul.f32 %v2664_v53, %v2640_v58 }
 0x27d   : > { %v2717_v45 = vadd.f32 0.18741608, %v2716_v41  ;;  %v2792_v22 = vmul.f32 %v2791_v33, %v10727_v60  ;;  %v10891_v15 = vmul.f32 0.70710677, %v10871_v30  ;;  %v10894_v46 = vmul.f32 %v6460_v44, %v10673_v35 }
 0x27e   : > { %v2769_v48 = vmul.f32 %v2768_v57, %v10725_v13  ;;  %v439_v8 = vsub.f32 %v391_v21, %v10469_v7  ;;  %v440_v43 = vsub.f32 %v392_v52, %v10469_v7  ;;  %v2679_v6 = vadd.f32 1.1283791, %v2678_v23  ;;  %v8010_v52 = vld [vmem:[#allocation10 + $0x80] sm:$0xff] }
 0x27f   : > { %16320 = vst [vmem:[#allocation48_spill] sm:$0xff] %v10894_v46  ;;  %v10899_v5 = vpop.eup %8196  ;;  %v2809_v58 = vmul.f32 %v2808_v26, %v10727_v60  ;;  %v2845_v24 = vmul.f32 %v2844_v39, %v10804_v0  ;;  %v2881_v20 = vmul.f32 3.8918573e-05, %v10879_v38  ;;  %v2694_v49 = vmul.f32 %v10840_v29, %v2693_v14  ;;  %v7994_v14 = vld [vmem:[#allocation10] sm:$0xff]  ;;  %7193 = vmatpush.bf16.msrb.mxu2 %v8010_v52 }
 0x280   : > { %v2702_v35 = vand.u32 2147483648, %v10802_v2  ;;  %v2755_v41 = vadd.f32 0.05243302, %v2754_v59  ;;  %v2921_v33 = vmul.f32 3.8918573e-05, %v10887_v11  ;;  %v7733_v44 = vclamps-f32 %v2665_v9, 1.0  ;;  %7015 = vmatpush.bf16.msrb.mxu0 %v7994_v14 }
 0x281   : > { %v2718_v53 = vmul.f32 %v2717_v45, %v10653_v61  ;;  %v2793_v7 = vadd.f32 0.0036580483, %v2792_v22  ;;  %v2948_v57 = vmul.f32 %v10891_v15, %v10891_v15  ;;  %v2732_v26 = vmul.f32 %v10899_v5, %v10845_v56  ;;  %v8018_v59 = vld [vmem:[#allocation10 + $0xc0] sm:$0xff] }
 0x282   : > { %v10912_v23 = vadd.f32 1.0, %v2769_v48  ;;  %v474_v39 = vmul.f32 %v8839_v50, %v439_v8  ;;  %v475_v21 = vmul.f32 %v8839_v50, %v440_v43  ;;  %vm2697_vm11 = vweird.f32 %v10840_v29  ;;  %7282 = vmatpush.bf16.msrb.mxu3 %v8018_v59 }
 0x283   : > { %v10917_v9 = vadd.f32 1.0, %v2809_v58  ;;  %v2846_v61 = vadd.f32 0.112945676, %v2845_v24  ;;  %v2882_v45 = vadd.f32 0.001143296, %v2881_v20  ;;  %v2695_v22 = vadd.f32 %v10840_v29, %v2694_v49 }
 0x284   : > { %v2756_v46 = vmul.f32 %v2755_v41, %v10725_v13  ;;  %v2922_v10 = vadd.f32 0.001143296, %v2921_v33  ;;  %v492_v48 = vpack.c.bf16 %v475_v21, %v474_v39  ;;  %vm2696_vm12 = vweird.f32 %v10802_v2 }
 0x285   : > { %v2794_v8 = vmul.f32 %v2793_v7, %v10727_v60  ;;  %v2830_v43 = vmul.f32 2.1237322e-06, %v10804_v0  ;;  %v10924_v34 = vmin.f32 %v2948_v57, 16.0  ;;  %v2700_v58 = vand.u32 2147483647, %v10802_v2  ;;  %vm10930_vm13 = vmor %vm2696_vm12, %vm2697_vm11 }
 0x286   : > { %v2719_v24 = vadd.f32 1.1283791, %v2718_v53  ;;  %v2733_v20 = vsub.f32 1.0, %v2732_v26  ;;  %8198 = vrcp.f32 %v10912_v23  ;;  %774 = vmatmul.bf16.gmra.mxu0 %v492_v48  ;;  %863 = vmatmul.bf16.gmra.mxu1 %v492_v48  ;;  %v2703_v41 = vor.u32 1.1754944e-38, %v2702_v35 }
 0x287   : > { %8200 = vrcp.f32 %v10917_v9  ;;  %v2847_v33 = vmul.f32 %v2846_v61, %v10804_v0  ;;  %v2883_v7 = vmul.f32 %v2882_v45, %v10879_v38  ;;  %952 = vmatmul.bf16.gmra.mxu2 %v492_v48  ;;  %1041 = vmatmul.bf16.gmra.mxu3 %v492_v48  ;;  %v6461_v2 = vadd.f32 1.0, %v7733_v44 }
 0x288   : > { %v2699_v53 = vsel %vm10930_vm13, %v10840_v29, %v2695_v22  ;;  %v2757_v57 = vadd.f32 0.18741608, %v2756_v46  ;;  %v2923_v26 = vmul.f32 %v2922_v10, %v10887_v11  ;;  %v2680_v39 = vmul.f32 %v2679_v6, %v10560_v19 }
 0x289   : > { %v2795_v21 = vadd.f32 0.05243302, %v2794_v8  ;;  %v2831_v35 = vadd.f32 0.00028619796, %v2830_v43  ;;  %v2961_v52 = vmul.f32 3.8918573e-05, %v10924_v34  ;;  %v10944_v14 = vmul.f32 %v2719_v24, %v10609_v51 }
 0x28a   : > { %vm2701_vm14 = vcmp.eq.f32.partialorder %v2700_v58, 8.507059e+37  ;;  %v2734_v59 = vmul.f32 %v10899_v5, %v2733_v20  ;;  %v10948_v44 = vmul.f32 0.5, %v10748_v16  ;;  %v2740_v29 = vand.u32 2147483647, %v10845_v56  ;;  %v908_v58 = vpop.f32.mrf.mxu2 }
 0x28b   : > { %v2704_v61 = vsel %vm2701_vm14, %v2703_v41, %v2699_v53  ;;  %v2848_v46 = vadd.f32 0.4994258, %v2847_v33  ;;  %v2884_v10 = vadd.f32 0.014752088, %v2883_v7  ;;  %vm2736_vm15 = vweird.f32 %v10845_v56  ;;  %v8002_v7 = vld [vmem:[#allocation10 + $0x40] sm:$0xff] }
 0x28c   : > { %v10951_v45 = vpop.eup %8198  ;;  %v2742_v19 = vand.u32 2147483648, %v10845_v56  ;;  %v2758_v6 = vmul.f32 %v2757_v57, %v10725_v13  ;;  %v2924_v51 = vadd.f32 0.014752088, %v2923_v26  ;;  %v10959_v48 = vmul.f32 %v6461_v2, %v10696_v32  ;;  %7104 = vmatpush.bf16.msrb.mxu1 %v8002_v7 }
 0x28d   : > { %v10956_v22 = vpop.eup %8200  ;;  %v2796_v16 = vmul.f32 %v2795_v21, %v10727_v60  ;;  %v2832_v8 = vmul.f32 %v2831_v35, %v10804_v0  ;;  %v2962_v43 = vadd.f32 0.001143296, %v2961_v52  ;;  %v2705_v24 = vmul.f32 %v2704_v61, %v2680_v39 }
 0x28e   : > { %16323 = vst [vmem:[#allocation49_spill] sm:$0xff] %v10959_v48  ;;  %v2735_v20 = vadd.f32 %v10899_v5, %v2734_v59  ;;  %vm2737_vm0 = vweird.f32 %v10899_v5  ;;  %v2870_v49 = vmul.f32 2.1237322e-06, %v10879_v38  ;;  %vm10966_vm1 = vcmp.eq.f32.partialorder %v2740_v29, 8.507059e+37 }
 0x28f   : > { %v2772_v32 = vmul.f32 %v10951_v45, %v10912_v23  ;;  %v2849_v41 = vmul.f32 %v2848_v46, %v10804_v0  ;;  %v2885_v33 = vmul.f32 %v2884_v10, %v10879_v38  ;;  %v2759_v2 = vadd.f32 1.1283791, %v2758_v6  ;;  %vm10982_vm2 = vmor %vm2736_vm15, %vm2737_vm0  ;;  %v997_v6 = vpop.f32.mrf.mxu3 }
 0x290   : > { %v2812_v53 = vmul.f32 %v10956_v22, %v10917_v9  ;;  %v2925_v57 = vmul.f32 %v2924_v51, %v10887_v11  ;;  %v10978_v26 = vadd.f32 %v908_v58, %v8910_v12  ;;  %v2743_v21 = vor.u32 1.1754944e-38, %v2742_v19 }
 0x291   : > { %v2797_v35 = vadd.f32 0.18741608, %v2796_v16  ;;  %v2833_v52 = vadd.f32 0.0036580483, %v2832_v8  ;;  %v2963_v59 = vmul.f32 %v2962_v43, %v10924_v34  ;;  %v7734_v61 = vclamps-f32 %v2705_v24, 1.0 }
 0x292   : > { %v2739_v29 = vsel %vm10982_vm2, %v10899_v5, %v2735_v20  ;;  %v2780_v46 = vand.u32 2147483647, %v10912_v23  ;;  %v2871_v10 = vadd.f32 0.00028619796, %v2870_v49  ;;  %v2773_v56 = vsub.f32 1.0, %v2772_v32 }
 0x293   : > { %v10991_v51 = vadd.f32 1.0, %v2849_v41  ;;  %v2886_v58 = vadd.f32 0.112945676, %v2885_v33  ;;  %v2910_v19 = vmul.f32 2.1237322e-06, %v10887_v11  ;;  %v10995_v16 = vmul.f32 %v2759_v2, %v10683_v27 }
 0x294   : > { %v2813_v8 = vsub.f32 1.0, %v2812_v53  ;;  %v2926_v43 = vadd.f32 0.112945676, %v2925_v57  ;;  %v10998_v24 = vmul.f32 0.70710677, %v10978_v26  ;;  %v2782_v5 = vand.u32 2147483648, %v10912_v23 }
 0x295   : > { %v2834_v20 = vmul.f32 %v2833_v52, %v10804_v0  ;;  %v2964_v49 = vadd.f32 0.014752088, %v2963_v59  ;;  %v11003_v32 = vadd.f32 %v997_v6, %v8930_v25  ;;  %v6462_v41 = vadd.f32 1.0, %v7734_v61 }
 0x296   : > { %v2744_v33 = vsel %vm10966_vm1, %v2743_v21, %v2739_v29  ;;  %v2798_v27 = vmul.f32 %v2797_v35, %v10727_v60  ;;  %v2872_v7 = vmul.f32 %v2871_v10, %v10879_v38  ;;  %v2774_v2 = vmul.f32 %v10951_v45, %v2773_v56 }
 0x297   : > { %8202 = vrcp.f32 %v10991_v51  ;;  %v2887_v53 = vmul.f32 %v2886_v58, %v10879_v38  ;;  %v2911_v57 = vadd.f32 0.00028619796, %v2910_v19  ;;  %vm2776_vm3 = vweird.f32 %v10912_v23 }
 0x298   : > { %v2814_v39 = vmul.f32 %v10956_v22, %v2813_v8  ;;  %v2927_v52 = vmul.f32 %v2926_v43, %v10887_v11  ;;  %v2988_v13 = vmul.f32 %v10998_v24, %v10998_v24  ;;  %vm11017_vm4 = vcmp.eq.f32.partialorder %v2780_v46, 8.507059e+37 }
 0x299   : > { %v2783_v21 = vor.u32 1.1754944e-38, %v2782_v5  ;;  %v2835_v35 = vadd.f32 0.05243302, %v2834_v20  ;;  %v2965_v59 = vmul.f32 %v2964_v49, %v10924_v34  ;;  %v11023_v61 = vmul.f32 0.70710677, %v11003_v32 }
 0x29a   : > { %v11026_v29 = vmul.f32 %v6462_v41, %v10787_v55  ;;  %v2745_v10 = vmul.f32 %v2744_v33, %v10944_v14  ;;  %v2799_v6 = vadd.f32 1.1283791, %v2798_v27  ;;  %v2873_v56 = vadd.f32 0.0036580483, %v2872_v7 }
 0x29b   : > { %v2775_v58 = vadd.f32 %v10951_v45, %v2774_v2  ;;  %vm2777_vm5 = vweird.f32 %v10951_v45  ;;  %v2888_v46 = vadd.f32 0.4994258, %v2887_v53  ;;  %v2912_v19 = vmul.f32 %v2911_v57, %v10887_v11 }
 0x29c   : > { %16330 = vst [vmem:[#allocation50_spill] sm:$0xff] %v11026_v29  ;;  %v2815_v8 = vadd.f32 %v10956_v22, %v2814_v39  ;;  %vm2817_vm6 = vweird.f32 %v10956_v22  ;;  %v2928_v43 = vadd.f32 0.4994258, %v2927_v52  ;;  %v11034_v5 = vmin.f32 %v2988_v13, 16.0  ;;  %vm11044_vm7 = vmor %vm2776_vm3, %vm2777_vm5  ;;  %v732_v52 = vpop.f32.mrf.mxu0 }
 0x29d   : > { %v11036_v55 = vpop.eup %8202  ;;  %v2822_v14 = vand.u32 2147483648, %v10917_v9  ;;  %v2836_v20 = vmul.f32 %v2835_v35, %v10804_v0  ;;  %v2966_v49 = vadd.f32 0.112945676, %v2965_v59  ;;  %v3028_v41 = vmul.f32 %v11023_v61, %v11023_v61 }
 0x29e   : > { %v2800_v27 = vmul.f32 %v2799_v6, %v10686_v54  ;;  %vm2816_vm8 = vweird.f32 %v10917_v9  ;;  %v2820_v7 = vand.u32 2147483647, %v10917_v9  ;;  %v2874_v2 = vmul.f32 %v2873_v56, %v10879_v38 }
 0x29f   : > { %v7735_v53 = vclamps-f32 %v2745_v10, 1.0  ;;  %v2779_v57 = vsel %vm11044_vm7, %v10951_v45, %v2775_v58  ;;  %vm11057_vm9 = vmor %vm2816_vm8, %vm2817_vm6  ;;  %v2889_v39 = vmul.f32 %v2888_v46, %v10879_v38  ;;  %v2913_v54 = vadd.f32 0.0036580483, %v2912_v19 }
 0x2a0   : > { %v2819_v9 = vsel %vm11057_vm9, %v10956_v22, %v2815_v8  ;;  %v2852_v13 = vmul.f32 %v11036_v55, %v10991_v51  ;;  %v2929_v35 = vmul.f32 %v2928_v43, %v10887_v11  ;;  %v3001_v45 = vmul.f32 3.8918573e-05, %v11034_v5 }
 0x2a1   : > { %v2823_v59 = vor.u32 1.1754944e-38, %v2822_v14  ;;  %v2837_v10 = vadd.f32 0.18741608, %v2836_v20  ;;  %v2967_v6 = vmul.f32 %v2966_v49, %v10924_v34  ;;  %v11070_v56 = vmin.f32 %v3028_v41, 16.0 }
 0x2a2   : > { %v2784_v58 = vsel %vm11017_vm4, %v2783_v21, %v2779_v57  ;;  %vm2821_vm10 = vcmp.eq.f32.partialorder %v2820_v7, 8.507059e+37  ;;  %v2875_v46 = vadd.f32 0.05243302, %v2874_v2  ;;  %v11075_v22 = vadd.f32 %v732_v52, %v8891_v1  ;;  %v821_v21 = vpop.f32.mrf.mxu1 }
 0x2a3   : > { %v2824_v19 = vsel %vm2821_vm10, %v2823_v59, %v2819_v9  ;;  %v11078_v8 = vmul.f32 0.5, %v10816_v17  ;;  %v11080_v43 = vadd.f32 1.0, %v2889_v39  ;;  %v2914_v14 = vmul.f32 %v2913_v54, %v10887_v11 }
 0x2a4   : > { %v2853_v20 = vsub.f32 1.0, %v2852_v13  ;;  %v11083_v49 = vadd.f32 1.0, %v2929_v35  ;;  %v2950_v41 = vmul.f32 2.1237322e-06, %v10924_v34  ;;  %v3002_v60 = vadd.f32 0.001143296, %v3001_v45 }
 0x2a5   : > { %v2785_v33 = vmul.f32 %v2784_v58, %v10995_v16  ;;  %v2838_v7 = vmul.f32 %v2837_v10, %v10804_v0  ;;  %v2968_v2 = vadd.f32 0.4994258, %v2967_v6  ;;  %v3041_v57 = vmul.f32 3.8918573e-05, %v11070_v56 }
 0x2a6   : > { %v6463_v17 = vadd.f32 1.0, %v7735_v53  ;;  %v2876_v23 = vmul.f32 %v2875_v46, %v10879_v38  ;;  %v11091_v39 = vmul.f32 0.5, %v10823_v31  ;;  %v11094_v54 = vmul.f32 0.70710677, %v11075_v22 }
 0x2a7   : > { %v2825_v52 = vmul.f32 %v2824_v19, %v2800_v27  ;;  %8204 = vrcp.f32 %v11080_v43  ;;  %v2915_v9 = vadd.f32 0.05243302, %v2914_v14  ;;  %v11098_v16 = vadd.f32 %v821_v21, %v8893_v3 }
 0x2a8   : > { %v2854_v0 = vmul.f32 %v11036_v55, %v2853_v20  ;;  %8206 = vrcp.f32 %v11083_v49  ;;  %v2951_v53 = vadd.f32 0.00028619796, %v2950_v41  ;;  %v3003_v13 = vmul.f32 %v3002_v60, %v11034_v5 }
 0x2a9   : > { %v7736_v35 = vclamps-f32 %v2785_v33, 1.0  ;;  %v2839_v31 = vadd.f32 1.1283791, %v2838_v7  ;;  %v2969_v45 = vmul.f32 %v2968_v2, %v10924_v34  ;;  %v3042_v59 = vadd.f32 0.001143296, %v3041_v57 }
 0x2aa   : > { %v11105_v27 = vmul.f32 %v6463_v17, %v10808_v28  ;;  %v2877_v10 = vadd.f32 0.18741608, %v2876_v23  ;;  %v11108_v6 = vmul.f32 0.5, %v10871_v30  ;;  %v3068_v58 = vmul.f32 %v11094_v54, %v11094_v54 }
 0x2ab   : > { %v7737_v46 = vclamps-f32 %v2825_v52, 1.0  ;;  %v2862_v19 = vand.u32 2147483648, %v10991_v51  ;;  %v2916_v14 = vmul.f32 %v2915_v9, %v10887_v11  ;;  %v11115_v20 = vmul.f32 0.70710677, %v11098_v16 }
 0x2ac   : > { %16335 = vst [vmem:[#allocation51_spill] sm:$0xff] %v11105_v27  ;;  %v2855_v41 = vadd.f32 %v11036_v55, %v2854_v0  ;;  %vm2857_vm11 = vweird.f32 %v11036_v55  ;;  %v2952_v28 = vmul.f32 %v2951_v53, %v10924_v34  ;;  %v3004_v60 = vadd.f32 0.014752088, %v3003_v13 }
 0x2ad   : > { %v11120_v30 = vpop.eup %8204  ;;  %v6464_v21 = vadd.f32 1.0, %v7736_v35  ;;  %v2840_v33 = vmul.f32 %v2839_v31, %v10769_v62  ;;  %v11123_v7 = vadd.f32 1.0, %v2969_v45  ;;  %v3043_v2 = vmul.f32 %v3042_v59, %v11070_v56  ;;  %v910_v59 = vpop.f32.mrf.mxu2 }
 0x2ae   : > { %v11126_v57 = vpop.eup %8206  ;;  %vm2856_vm12 = vweird.f32 %v10991_v51  ;;  %v2878_v17 = vmul.f32 %v2877_v10, %v10879_v38  ;;  %v2990_v23 = vmul.f32 2.1237322e-06, %v11034_v5  ;;  %v11131_v52 = vmin.f32 %v3068_v58, 16.0 }
 0x2af   : > { %vm11133_vm13 = vmor %vm2856_vm12, %vm2857_vm11  ;;  %v2860_v62 = vand.u32 2147483647, %v10991_v51  ;;  %v2863_v0 = vor.u32 1.1754944e-38, %v2862_v19  ;;  %v2917_v53 = vadd.f32 0.18741608, %v2916_v14  ;;  %v3108_v13 = vmul.f32 %v11115_v20, %v11115_v20 }
 0x2b0   : > { %v6465_v35 = vadd.f32 1.0, %v7737_v46  ;;  %v2859_v38 = vsel %vm11133_vm13, %v11036_v55, %v2855_v41  ;;  %v2953_v31 = vadd.f32 0.0036580483, %v2952_v28  ;;  %v3005_v45 = vmul.f32 %v3004_v60, %v11034_v5 }
 0x2b1   : > { %v2892_v10 = vmul.f32 %v11120_v30, %v11080_v43  ;;  %v2932_v51 = vmul.f32 %v11126_v57, %v11083_v49  ;;  %8208 = vrcp.f32 %v11123_v7  ;;  %v3044_v58 = vadd.f32 0.014752088, %v3043_v2 }
 0x2b2   : > { %v11150_v19 = vmul.f32 %v6464_v21, %v10877_v42  ;;  %v2879_v46 = vadd.f32 1.1283791, %v2878_v17  ;;  %v2991_v14 = vadd.f32 0.00028619796, %v2990_v23  ;;  %v3081_v55 = vmul.f32 3.8918573e-05, %v11131_v52 }
 0x2b3   : > { %vm2861_vm14 = vcmp.eq.f32.partialorder %v2860_v62, 8.507059e+37  ;;  %v2918_v41 = vmul.f32 %v2917_v53, %v10887_v11  ;;  %v11154_v28 = vmin.f32 %v3108_v13, 16.0  ;;  %v11157_v60 = vadd.f32 %v910_v59, %v8910_v12 }
 0x2b4   : > { %16338 = vst [vmem:[#allocation52_spill] sm:$0xff] %v11150_v19  ;;  %v2864_v9 = vsel %vm2861_vm14, %v2863_v0, %v2859_v38  ;;  %v2954_v27 = vmul.f32 %v2953_v31, %v10924_v34  ;;  %v3006_v29 = vadd.f32 0.112945676, %v3005_v45  ;;  %v3030_v2 = vmul.f32 2.1237322e-06, %v11070_v56 }
 0x2b5   : > { %v11162_v42 = vmul.f32 %v6465_v35, %v10885_v18  ;;  %v2893_v21 = vsub.f32 1.0, %v2892_v10  ;;  %v2933_v17 = vsub.f32 1.0, %v2932_v51  ;;  %v3045_v23 = vmul.f32 %v3044_v58, %v11070_v56 }
 0x2b6   : > { %v11166_v11 = vmul.f32 %v2879_v46, %v10832_v4  ;;  %v2902_v62 = vand.u32 2147483648, %v11080_v43  ;;  %v2992_v53 = vmul.f32 %v2991_v14, %v11034_v5  ;;  %v3082_v0 = vadd.f32 0.001143296, %v3081_v55 }
 0x2b7   : > { %16339 = vst [vmem:[#allocation53_spill] sm:$0xff] %v11162_v42  ;;  %v11170_v13 = vpop.eup %8208  ;;  %v11172_v38 = vmul.f32 %v2864_v9, %v2840_v33  ;;  %v2919_v31 = vadd.f32 1.1283791, %v2918_v41  ;;  %v3121_v18 = vmul.f32 3.8918573e-05, %v11154_v28  ;;  %v3007_v4 = vmul.f32 %v3006_v29, %v11034_v5 }
 0x2b8   : > { %v11176_v35 = vmul.f32 0.70710677, %v11157_v60  ;;  %v2900_v45 = vand.u32 2147483647, %v11080_v43  ;;  %v2955_v59 = vadd.f32 0.05243302, %v2954_v27  ;;  %v2894_v51 = vmul.f32 %v11120_v30, %v2893_v21 }
 0x2b9   : > { %v3031_v10 = vadd.f32 0.00028619796, %v3030_v2  ;;  %vm2896_vm15 = vweird.f32 %v11080_v43  ;;  %v2934_v58 = vmul.f32 %v11126_v57, %v2933_v17  ;;  %v3046_v33 = vadd.f32 0.112945676, %v3045_v23 }
 0x2ba   : > { %v2903_v46 = vor.u32 1.1754944e-38, %v2902_v62  ;;  %v2972_v14 = vmul.f32 %v11170_v13, %v11123_v7  ;;  %v2993_v55 = vadd.f32 0.0036580483, %v2992_v53  ;;  %v3083_v41 = vmul.f32 %v3082_v0, %v11131_v52 }
 0x2bb   : > { %v2920_v27 = vmul.f32 %v2919_v31, %v10838_v63  ;;  %v3122_v29 = vadd.f32 0.001143296, %v3121_v18  ;;  %v3148_v2 = vmul.f32 %v11176_v35, %v11176_v35  ;;  %vm2897_vm0 = vweird.f32 %v11120_v30 }
 0x2bc   : > { %vm11191_vm1 = vcmp.eq.f32.partialorder %v2900_v45, 8.507059e+37  ;;  %v2956_v17 = vmul.f32 %v2955_v59, %v10924_v34  ;;  %v3008_v23 = vadd.f32 0.4994258, %v3007_v4  ;;  %v3032_v62 = vmul.f32 %v3031_v10, %v11070_v56  ;;  %vm11205_vm4 = vmor %vm2896_vm15, %vm2897_vm0 }
 0x2bd   : > { %v2895_v53 = vadd.f32 %v11120_v30, %v2894_v51  ;;  %v2935_v0 = vadd.f32 %v11126_v57, %v2934_v58  ;;  %vm2937_vm2 = vweird.f32 %v11126_v57  ;;  %v3047_v63 = vmul.f32 %v3046_v33, %v11070_v56  ;;  %v999_v33 = vpop.f32.mrf.mxu3 }
 0x2be   : > { %vm2936_vm3 = vweird.f32 %v11083_v49  ;;  %v2973_v31 = vsub.f32 1.0, %v2972_v14  ;;  %v2994_v18 = vmul.f32 %v2993_v55, %v11034_v5  ;;  %v3084_v45 = vadd.f32 0.014752088, %v3083_v41 }
 0x2bf   : > { %v2940_v4 = vand.u32 2147483647, %v11083_v49  ;;  %v2942_v10 = vand.u32 2147483648, %v11083_v49  ;;  %v3123_v51 = vmul.f32 %v3122_v29, %v11154_v28  ;;  %v11212_v58 = vmin.f32 %v3148_v2, 16.0  ;;  %vm11214_vm5 = vmor %vm2936_vm3, %vm2937_vm2 }
 0x2c0   : > { %v2957_v55 = vadd.f32 0.18741608, %v2956_v17  ;;  %v3009_v43 = vmul.f32 %v3008_v23, %v11034_v5  ;;  %v3033_v41 = vadd.f32 0.0036580483, %v3032_v62  ;;  %v3070_v9 = vmul.f32 2.1237322e-06, %v11131_v52 }
 0x2c1   : > { %v2899_v42 = vsel %vm11205_vm4, %v11120_v30, %v2895_v53  ;;  %v2939_v49 = vsel %vm11214_vm5, %v11126_v57, %v2935_v0  ;;  %v11227_v29 = vmul.f32 0.5, %v10978_v26  ;;  %v3048_v2 = vadd.f32 0.4994258, %v3047_v63 }
 0x2c2   : > { %v2974_v48 = vmul.f32 %v11170_v13, %v2973_v31  ;;  %v2995_v17 = vadd.f32 0.05243302, %v2994_v18  ;;  %v3085_v23 = vmul.f32 %v3084_v45, %v11131_v52  ;;  %v11232_v62 = vadd.f32 %v999_v33, %v8930_v25 }
 0x2c3   : > { %vm2941_vm6 = vcmp.eq.f32.partialorder %v2940_v4, 8.507059e+37  ;;  %v2943_v19 = vor.u32 1.1754944e-38, %v2942_v10  ;;  %v3124_v59 = vadd.f32 0.014752088, %v3123_v51  ;;  %v3161_v30 = vmul.f32 3.8918573e-05, %v11212_v58  ;;  %v735_v51 = vpop.f32.mrf.mxu0 }
 0x2c4   : > { %v2958_v53 = vmul.f32 %v2957_v55, %v10924_v34  ;;  %v11236_v57 = vadd.f32 1.0, %v3009_v43  ;;  %v3034_v26 = vmul.f32 %v3033_v41, %v11070_v56  ;;  %v3071_v0 = vadd.f32 0.00028619796, %v3070_v9 }
 0x2c5   : > { %v2904_v63 = vsel %vm11191_vm1, %v2903_v46, %v2899_v42  ;;  %v2944_v31 = vsel %vm2941_vm6, %v2943_v19, %v2939_v49  ;;  %vm2977_vm7 = vweird.f32 %v11170_v13  ;;  %v3049_v18 = vmul.f32 %v3048_v2, %v11070_v56 }
 0x2c6   : > { %v2975_v45 = vadd.f32 %v11170_v13, %v2974_v48  ;;  %v2996_v4 = vmul.f32 %v2995_v17, %v11034_v5  ;;  %v3086_v10 = vadd.f32 0.112945676, %v3085_v23  ;;  %v11246_v34 = vmul.f32 0.70710677, %v11232_v62 }
 0x2c7   : > { %vm2976_vm8 = vweird.f32 %v11123_v7  ;;  %v2982_v9 = vand.u32 2147483648, %v11123_v7  ;;  %v3125_v21 = vmul.f32 %v3124_v59, %v11154_v28  ;;  %v3162_v42 = vadd.f32 0.001143296, %v3161_v30 }
 0x2c8   : > { %v2980_v19 = vand.u32 2147483647, %v11123_v7  ;;  %8210 = vrcp.f32 %v11236_v57  ;;  %v3035_v46 = vadd.f32 0.05243302, %v3034_v26  ;;  %v3072_v48 = vmul.f32 %v3071_v0, %v11131_v52  ;;  %vm11257_vm9 = vmor %vm2976_vm8, %vm2977_vm7 }
 0x2c9   : > { %v2905_v33 = vmul.f32 %v2904_v63, %v11166_v11  ;;  %v2945_v14 = vmul.f32 %v2944_v31, %v2920_v27  ;;  %v2959_v55 = vadd.f32 1.1283791, %v2958_v53  ;;  %v11261_v41 = vadd.f32 1.0, %v3049_v18 }
 0x2ca   : > { %v2979_v7 = vsel %vm11257_vm9, %v11170_v13, %v2975_v45  ;;  %v2997_v49 = vadd.f32 0.18741608, %v2996_v4  ;;  %v3087_v2 = vmul.f32 %v3086_v10, %v11131_v52  ;;  %v3188_v11 = vmul.f32 %v11246_v34, %v11246_v34 }
 0x2cb   : > { %v2983_v27 = vor.u32 1.1754944e-38, %v2982_v9  ;;  %v3126_v17 = vadd.f32 0.112945676, %v3125_v21  ;;  %v3163_v23 = vmul.f32 %v3162_v42, %v11212_v58  ;;  %v11271_v59 = vadd.f32 %v735_v51, %v8891_v1 }
 0x2cc   : > { %v16348_v30 = vclamps-f32 %v11172_v38, 1.0  ;;  %vm2981_vm10 = vcmp.eq.f32.partialorder %v2980_v19, 8.507059e+37  ;;  %v3036_v26 = vmul.f32 %v3035_v46, %v11070_v56  ;;  %v3073_v13 = vadd.f32 0.0036580483, %v3072_v48 }
 0x2cd   : > { %v7739_v0 = vclamps-f32 %v2905_v33, 1.0  ;;  %v7740_v63 = vclamps-f32 %v2945_v14, 1.0  ;;  %v2984_v31 = vsel %vm2981_vm10, %v2983_v27, %v2979_v7  ;;  %8212 = vrcp.f32 %v11261_v41 }
 0x2ce   : > { %v6466_v53 = vadd.f32 1.0, %v16348_v30  ;;  %v11277_v18 = vpop.eup %8210  ;;  %v2960_v45 = vmul.f32 %v2959_v55, %v10891_v15  ;;  %v2998_v4 = vmul.f32 %v2997_v49, %v11034_v5  ;;  %v3088_v10 = vadd.f32 0.4994258, %v3087_v2  ;;  %v824_v5 = vpop.f32.mrf.mxu1 }
 0x2cf   : > { %v11281_v9 = vmin.f32 %v3188_v11, 16.0  ;;  %v11284_v38 = vmul.f32 0.5, %v11003_v32  ;;  %v3127_v21 = vmul.f32 %v3126_v17, %v11154_v28  ;;  %v3164_v42 = vadd.f32 0.014752088, %v3163_v23 }
 0x2d0   : > { %v11288_v19 = vmul.f32 0.70710677, %v11271_v59  ;;  %v11291_v46 = vmul.f32 %v6466_v53, %v10948_v44  ;;  %v2985_v48 = vmul.f32 %v2984_v31, %v2960_v45  ;;  %v3037_v51 = vadd.f32 0.18741608, %v3036_v26 }
 0x2d1   : > { %v3074_v15 = vmul.f32 %v3073_v13, %v11131_v52  ;;  %v6467_v33 = vadd.f32 1.0, %v7739_v0  ;;  %v6468_v14 = vadd.f32 1.0, %v7740_v63  ;;  %v3012_v32 = vmul.f32 %v11277_v18, %v11236_v57 }
 0x2d2   : > { %16349 = vst [vmem:[#allocation54_spill] sm:$0xff] %v11291_v46  ;;  %v3110_v55 = vmul.f32 2.1237322e-06, %v11154_v28  ;;  %v2999_v43 = vadd.f32 1.1283791, %v2998_v4  ;;  %v11298_v7 = vmul.f32 0.5, %v11075_v22  ;;  %v3089_v49 = vmul.f32 %v3088_v10, %v11131_v52 }
 0x2d3   : > { %v3201_v44 = vmul.f32 3.8918573e-05, %v11281_v9  ;;  %v11302_v2 = vpop.eup %8212  ;;  %v3128_v11 = vadd.f32 0.4994258, %v3127_v21  ;;  %v3165_v27 = vmul.f32 %v3164_v42, %v11212_v58  ;;  %v3228_v17 = vmul.f32 %v11288_v19, %v11288_v19 }
 0x2d4   : > { %v11308_v23 = vadd.f32 %v824_v5, %v8893_v3  ;;  %v7741_v30 = vclamps-f32 %v2985_v48, 1.0  ;;  %v3038_v22 = vmul.f32 %v3037_v51, %v11070_v56  ;;  %v3075_v53 = vadd.f32 0.05243302, %v3074_v15 }
 0x2d5   : > { %v11312_v26 = vmul.f32 0.5, %v11098_v16  ;;  %v11315_v13 = vmul.f32 %v6467_v33, %v11078_v8  ;;  %v11318_v0 = vmul.f32 %v6468_v14, %v11091_v39  ;;  %v3013_v63 = vsub.f32 1.0, %v3012_v32  ;;  %v393_v39 = vld [vmem:[%s8816_s18 + $0xf0] sm:$0xff] }
 0x2d6   : > { %v3111_v31 = vadd.f32 0.00028619796, %v3110_v55  ;;  %v11321_v45 = vmul.f32 %v2999_v43, %v10998_v24  ;;  %v3052_v4 = vmul.f32 %v11302_v2, %v11261_v41  ;;  %v11325_v10 = vadd.f32 1.0, %v3089_v49  ;;  %v8384_v43 = vld [vmem:[#allocation5] ss:$0 sm:$0xff] }
 0x2d7   : > { %16350 = vst [vmem:[#allocation55_spill] sm:$0xff] %v11315_v13  ;;  %v3202_v56 = vadd.f32 0.001143296, %v3201_v44  ;;  %v3129_v16 = vmul.f32 %v3128_v11, %v11154_v28  ;;  %v3166_v21 = vadd.f32 0.112945676, %v3165_v27  ;;  %v11328_v42 = vmin.f32 %v3228_v17, 16.0 }
 0x2d8   : > { %16351 = vst [vmem:[#allocation56_spill] sm:$0xff] %v11318_v0  ;;  %v11331_v8 = vmul.f32 0.70710677, %v11308_v23  ;;  %v6469_v48 = vadd.f32 1.0, %v7741_v30  ;;  %v3022_v51 = vand.u32 2147483648, %v11236_v57  ;;  %v3076_v15 = vmul.f32 %v3075_v53, %v11131_v52  ;;  %v394_v30 = vld [vmem:[%s8816_s18 + $0xf8] sm:$0xff] }
 0x2d9   : > { %v3039_v24 = vadd.f32 1.1283791, %v3038_v22  ;;  %v3014_v5 = vmul.f32 %v11277_v18, %v3013_v63  ;;  %vm3016_vm11 = vweird.f32 %v11236_v57  ;;  %v3020_v33 = vand.u32 2147483647, %v11236_v57 }
 0x2da   : > { %v3112_v14 = vmul.f32 %v3111_v31, %v11154_v28  ;;  %v3053_v32 = vsub.f32 1.0, %v3052_v4  ;;  %8214 = vrcp.f32 %v11325_v10  ;;  %v3203_v55 = vmul.f32 %v3202_v56, %v11281_v9 }
 0x2db   : > { %v441_v49 = vsub.f32 %v393_v39, %v8384_v43  ;;  %v11342_v44 = vadd.f32 1.0, %v3129_v16  ;;  %v3167_v11 = vmul.f32 %v3166_v21, %v11212_v58  ;;  %v3241_v27 = vmul.f32 3.8918573e-05, %v11328_v42  ;;  %v913_v39 = vpop.f32.mrf.mxu2 }
 0x2dc   : > { %v3268_v17 = vmul.f32 %v11331_v8, %v11331_v8  ;;  %v11350_v22 = vmul.f32 %v6469_v48, %v11108_v6  ;;  %v3023_v53 = vor.u32 1.1754944e-38, %v3022_v51  ;;  %v11353_v63 = vmul.f32 %v3039_v24, %v11023_v61 }
 0x2dd   : > { %v3077_v31 = vadd.f32 0.18741608, %v3076_v15  ;;  %v3015_v4 = vadd.f32 %v11277_v18, %v3014_v5  ;;  %vm3017_vm12 = vweird.f32 %v11277_v18  ;;  %vm11357_vm13 = vcmp.eq.f32.partialorder %v3020_v33, 8.507059e+37 }
 0x2de   : > { %16352 = vst [vmem:[#allocation57_spill] sm:$0xff] %v11350_v22  ;;  %v3113_v16 = vadd.f32 0.0036580483, %v3112_v14  ;;  %v3150_v21 = vmul.f32 2.1237322e-06, %v11212_v58  ;;  %v3054_v6 = vmul.f32 %v11302_v2, %v3053_v32  ;;  %v442_v51 = vsub.f32 %v394_v30, %v8384_v43  ;;  %vm11379_vm14 = vmor %vm3016_vm11, %vm3017_vm12 }
 0x2df   : > { %v3204_v48 = vadd.f32 0.014752088, %v3203_v55  ;;  %v476_v61 = vmul.f32 %v8839_v50, %v441_v49  ;;  %8216 = vrcp.f32 %v11342_v44  ;;  %v3168_v24 = vadd.f32 0.4994258, %v3167_v11 }
 0x2e0   : > { %v3242_v15 = vadd.f32 0.001143296, %v3241_v27  ;;  %v11365_v5 = vmin.f32 %v3268_v17, 16.0  ;;  %v11367_v33 = vpop.eup %8214  ;;  %v3060_v22 = vand.u32 2147483647, %v11261_v41  ;;  %v3078_v14 = vmul.f32 %v3077_v31, %v11131_v52 }
 0x2e1   : > { %v11372_v0 = vadd.f32 %v913_v39, %v8910_v12  ;;  %v477_v32 = vmul.f32 %v8839_v50, %v442_v51  ;;  %vm3057_vm15 = vweird.f32 %v11302_v2  ;;  %v3062_v43 = vand.u32 2147483648, %v11261_v41 }
 0x2e2   : > { %v3114_v49 = vmul.f32 %v3113_v16, %v11154_v28  ;;  %v3151_v52 = vadd.f32 0.00028619796, %v3150_v21  ;;  %v3019_v11 = vsel %vm11379_vm14, %v11277_v18, %v3015_v4  ;;  %v3055_v50 = vadd.f32 %v11302_v2, %v3054_v6 }
 0x2e3   : > { %v3205_v27 = vmul.f32 %v3204_v48, %v11281_v9  ;;  %v493_v57 = vpack.c.bf16 %v477_v32, %v476_v61  ;;  %v3092_v17 = vmul.f32 %v11367_v33, %v11325_v10  ;;  %v3169_v30 = vmul.f32 %v3168_v24, %v11212_v58 }
 0x2e4   : > { %v3243_v31 = vmul.f32 %v3242_v15, %v11328_v42  ;;  %v3281_v39 = vmul.f32 3.8918573e-05, %v11365_v5  ;;  %vm3056_vm0 = vweird.f32 %v11261_v41  ;;  %v3079_v16 = vadd.f32 1.1283791, %v3078_v14 }
 0x2e5   : > { %v3190_v21 = vmul.f32 2.1237322e-06, %v11281_v9  ;;  %v11399_v18 = vmul.f32 0.70710677, %v11372_v0  ;;  %779 = vmatmul.bf16.gmra.mxu0 %v493_v57  ;;  %868 = vmatmul.bf16.gmra.mxu1 %v493_v57  ;;  %v11401_v4 = vpop.eup %8216  ;;  %vm11405_vm1 = vmor %vm3056_vm0, %vm3057_vm15  ;;  %vm11409_vm2 = vcmp.eq.f32.partialorder %v3060_v22, 8.507059e+37  ;;  %v3063_v41 = vor.u32 1.1754944e-38, %v3062_v43 }
 0x2e6   : > { %v3115_v51 = vadd.f32 0.05243302, %v3114_v49  ;;  %v3152_v61 = vmul.f32 %v3151_v52, %v11212_v58  ;;  %957 = vmatmul.bf16.gmra.mxu2 %v493_v57  ;;  %1046 = vmatmul.bf16.gmra.mxu3 %v493_v57  ;;  %v3024_v24 = vsel %vm11357_vm13, %v3023_v53, %v3019_v11  ;;  %v3059_v15 = vsel %vm11405_vm1, %v11302_v2, %v3055_v50 }
 0x2e7   : > { %v11420_v14 = vmul.f32 0.5, %v11157_v60  ;;  %v3206_v22 = vadd.f32 0.112945676, %v3205_v27  ;;  %v3093_v32 = vsub.f32 1.0, %v3092_v17  ;;  %v11422_v55 = vadd.f32 1.0, %v3169_v30 }
 0x2e8   : > { %v3244_v43 = vadd.f32 0.014752088, %v3243_v31  ;;  %v3282_v49 = vadd.f32 0.001143296, %v3281_v39  ;;  %v11425_v52 = vmul.f32 %v3079_v16, %v11094_v54  ;;  %v3132_v56 = vmul.f32 %v11401_v4, %v11342_v44  ;;  %v1002_v31 = vpop.f32.mrf.mxu3 }
 0x2e9   : > { %v3191_v53 = vadd.f32 0.00028619796, %v3190_v21  ;;  %v3308_v11 = vmul.f32 %v11399_v18, %v11399_v18  ;;  %v3025_v2 = vmul.f32 %v3024_v24, %v11321_v45  ;;  %v3100_v60 = vand.u32 2147483647, %v11325_v10 }
 0x2ea   : > { %v3116_v50 = vmul.f32 %v3115_v51, %v11154_v28  ;;  %v3153_v27 = vadd.f32 0.0036580483, %v3152_v61  ;;  %v3064_v57 = vsel %vm11409_vm2, %v3063_v41, %v3059_v15  ;;  %v3102_v54 = vand.u32 2147483648, %v11325_v10 }
 0x2eb   : > { %v3207_v17 = vmul.f32 %v3206_v22, %v11281_v9  ;;  %v3230_v30 = vmul.f32 2.1237322e-06, %v11328_v42  ;;  %v3094_v39 = vmul.f32 %v11367_v33, %v3093_v32  ;;  %8218 = vrcp.f32 %v11422_v55 }
 0x2ec   : > { %v3245_v45 = vmul.f32 %v3244_v43, %v11328_v42  ;;  %v3283_v16 = vmul.f32 %v3282_v49, %v11365_v5  ;;  %vm3096_vm3 = vweird.f32 %v11325_v10  ;;  %v3133_v21 = vsub.f32 1.0, %v3132_v56 }
 0x2ed   : > { %v3192_v6 = vmul.f32 %v3191_v53, %v11281_v9  ;;  %v11445_v48 = vmin.f32 %v3308_v11, 16.0  ;;  %v7742_v41 = vclamps-f32 %v3025_v2, 1.0  ;;  %vm11447_vm4 = vcmp.eq.f32.partialorder %v3100_v60, 8.507059e+37 }
 0x2ee   : > { %v3117_v61 = vadd.f32 0.18741608, %v3116_v50  ;;  %v3154_v24 = vmul.f32 %v3153_v27, %v11212_v58  ;;  %v11453_v15 = vadd.f32 %v1002_v31, %v8930_v25  ;;  %v11456_v22 = vmul.f32 %v3064_v57, %v11353_v63 }
 0x2ef   : > { %v3103_v32 = vor.u32 1.1754944e-38, %v3102_v54  ;;  %v3208_v43 = vadd.f32 0.4994258, %v3207_v17  ;;  %v3231_v49 = vadd.f32 0.00028619796, %v3230_v30  ;;  %v3095_v56 = vadd.f32 %v11367_v33, %v3094_v39 }
 0x2f0   : > { %vm3097_vm5 = vweird.f32 %v11367_v33  ;;  %v3246_v53 = vadd.f32 0.112945676, %v3245_v45  ;;  %v3284_v11 = vadd.f32 0.014752088, %v3283_v16  ;;  %v3134_v2 = vmul.f32 %v11401_v4, %v3133_v21 }
 0x2f1   : > { %v11462_v60 = vmul.f32 0.5, %v11232_v62  ;;  %v3193_v50 = vadd.f32 0.0036580483, %v3192_v6  ;;  %v3321_v27 = vmul.f32 3.8918573e-05, %v11445_v48  ;;  %v11465_v31 = vpop.eup %8218  ;;  %v6470_v63 = vadd.f32 1.0, %v7742_v41  ;;  %vm11474_vm6 = vmor %vm3096_vm3, %vm3097_vm5 }
 0x2f2   : > { %v3118_v57 = vmul.f32 %v3117_v61, %v11154_v28  ;;  %v3155_v54 = vadd.f32 0.05243302, %v3154_v24  ;;  %v11469_v17 = vmul.f32 0.70710677, %v11453_v15  ;;  %v7743_v30 = vclamps-f32 %v11456_v22, 1.0 }
 0x2f3   : > { %vm3136_vm7 = vweird.f32 %v11342_v44  ;;  %v3209_v62 = vmul.f32 %v3208_v43, %v11281_v9  ;;  %v3232_v45 = vmul.f32 %v3231_v49, %v11328_v42  ;;  %v3099_v28 = vsel %vm11474_vm6, %v11367_v33, %v3095_v56 }
 0x2f4   : > { %vm3137_vm8 = vweird.f32 %v11401_v4  ;;  %v3247_v16 = vmul.f32 %v3246_v53, %v11328_v42  ;;  %v3285_v10 = vmul.f32 %v3284_v11, %v11365_v5  ;;  %v3135_v21 = vadd.f32 %v11401_v4, %v3134_v2 }
 0x2f5   : > { %v3172_v6 = vmul.f32 %v11465_v31, %v11422_v55  ;;  %v3194_v41 = vmul.f32 %v3193_v50, %v11281_v9  ;;  %v3322_v61 = vadd.f32 0.001143296, %v3321_v27  ;;  %v3140_v24 = vand.u32 2147483647, %v11342_v44  ;;  %vm11508_vm9 = vmor %vm3136_vm7, %vm3137_vm8 }
 0x2f6   : > { %v3142_v22 = vand.u32 2147483648, %v11342_v44  ;;  %v3156_v33 = vmul.f32 %v3155_v54, %v11212_v58  ;;  %v3348_v43 = vmul.f32 %v11469_v17, %v11469_v17  ;;  %v3104_v49 = vsel %vm11447_vm4, %v3103_v32, %v3099_v28 }
 0x2f7   : > { %v11498_v56 = vadd.f32 1.0, %v3209_v62  ;;  %v3233_v53 = vadd.f32 0.0036580483, %v3232_v45  ;;  %v3270_v11 = vmul.f32 2.1237322e-06, %v11365_v5  ;;  %v11502_v2 = vmul.f32 %v6470_v63, %v11227_v29 }
 0x2f8   : > { %v3119_v50 = vadd.f32 1.1283791, %v3118_v57  ;;  %v3248_v54 = vadd.f32 0.4994258, %v3247_v16  ;;  %v3286_v51 = vadd.f32 0.112945676, %v3285_v10  ;;  %v3139_v32 = vsel %vm11508_vm9, %v11401_v4, %v3135_v21  ;;  %v737_v10 = vpop.f32.mrf.mxu0 }
 0x2f9   : > { %16365 = vst [vmem:[#allocation58_spill] sm:$0xff] %v11502_v2  ;;  %v3173_v39 = vsub.f32 1.0, %v3172_v6  ;;  %v3195_v62 = vadd.f32 0.05243302, %v3194_v41  ;;  %v3323_v29 = vmul.f32 %v3322_v61, %v11445_v48  ;;  %v3105_v63 = vmul.f32 %v3104_v49, %v11425_v52 }
 0x2fa   : > { %vm3141_vm10 = vcmp.eq.f32.partialorder %v3140_v24, 8.507059e+37  ;;  %v3143_v57 = vor.u32 1.1754944e-38, %v3142_v22  ;;  %v11517_v45 = vmin.f32 %v3348_v43, 16.0  ;;  %v3157_v44 = vadd.f32 0.18741608, %v3156_v33  ;;  %v826_v22 = vpop.f32.mrf.mxu1 }
 0x2fb   : > { %8220 = vrcp.f32 %v11498_v56  ;;  %v3234_v28 = vmul.f32 %v3233_v53, %v11328_v42  ;;  %v3271_v16 = vadd.f32 0.00028619796, %v3270_v11  ;;  %v11522_v4 = vmul.f32 0.5, %v11271_v59 }
 0x2fc   : > { %v3144_v2 = vsel %vm3141_vm10, %v3143_v57, %v3139_v32  ;;  %v3249_v21 = vmul.f32 %v3248_v54, %v11328_v42  ;;  %v3287_v6 = vmul.f32 %v3286_v51, %v11365_v5  ;;  %v3120_v52 = vmul.f32 %v3119_v50, %v11115_v20 }
 0x2fd   : > { %v3174_v41 = vmul.f32 %v11465_v31, %v3173_v39  ;;  %v3196_v61 = vmul.f32 %v3195_v62, %v11281_v9  ;;  %v3324_v24 = vadd.f32 0.014752088, %v3323_v29  ;;  %v6471_v33 = vadd.f32 1.0, %v7743_v30 }
 0x2fe   : > { %v7744_v43 = vclamps-f32 %v3105_v63, 1.0  ;;  %v3361_v49 = vmul.f32 3.8918573e-05, %v11517_v45  ;;  %v11531_v53 = vadd.f32 %v737_v10, %v8891_v1  ;;  %v3145_v59 = vmul.f32 %v3144_v2, %v3120_v52 }
 0x2ff   : > { %v3158_v11 = vmul.f32 %v3157_v44, %v11212_v58  ;;  %v3235_v27 = vadd.f32 0.05243302, %v3234_v28  ;;  %v3272_v54 = vmul.f32 %v3271_v16, %v11365_v5  ;;  %v3180_v20 = vand.u32 2147483647, %v11422_v55 }
 0x300   : > { %v11536_v50 = vadd.f32 1.0, %v3249_v21  ;;  %v3288_v51 = vadd.f32 0.4994258, %v3287_v6  ;;  %v11539_v32 = vadd.f32 %v826_v22, %v8893_v3  ;;  %v3175_v39 = vadd.f32 %v11465_v31, %v3174_v41 }
 0x301   : > { %v11541_v30 = vpop.eup %8220  ;;  %vm3177_vm11 = vweird.f32 %v11465_v31  ;;  %v3197_v2 = vadd.f32 0.18741608, %v3196_v61  ;;  %v3325_v58 = vmul.f32 %v3324_v24, %v11445_v48  ;;  %v6472_v62 = vadd.f32 1.0, %v7744_v43 }
 0x302   : > { %v3182_v29 = vand.u32 2147483648, %v11422_v55  ;;  %v3362_v63 = vadd.f32 0.001143296, %v3361_v49  ;;  %v11548_v57 = vmul.f32 0.70710677, %v11531_v53  ;;  %v7745_v44 = vclamps-f32 %v3145_v59, 1.0 }
 0x303   : > { %vm3176_vm12 = vweird.f32 %v11422_v55  ;;  %v3236_v28 = vmul.f32 %v3235_v27, %v11328_v42  ;;  %v3273_v16 = vadd.f32 0.0036580483, %v3272_v54  ;;  %v3212_v21 = vmul.f32 %v11541_v30, %v11498_v56 }
 0x304   : > { %vm11552_vm13 = vmor %vm3176_vm12, %vm3177_vm11  ;;  %8222 = vrcp.f32 %v11536_v50  ;;  %v3289_v6 = vmul.f32 %v3288_v51, %v11365_v5  ;;  %v11561_v52 = vmul.f32 0.70710677, %v11539_v32  ;;  %v3159_v41 = vadd.f32 1.1283791, %v3158_v11 }
 0x305   : > { %v3179_v55 = vsel %vm11552_vm13, %v11465_v31, %v3175_v39  ;;  %v3198_v61 = vmul.f32 %v3197_v2, %v11281_v9  ;;  %v3326_v24 = vadd.f32 0.112945676, %v3325_v58  ;;  %vm3181_vm14 = vcmp.eq.f32.partialorder %v3180_v20, 8.507059e+37 }
 0x306   : > { %v3183_v22 = vor.u32 1.1754944e-38, %v3182_v29  ;;  %v3363_v43 = vmul.f32 %v3362_v63, %v11517_v45  ;;  %v3388_v49 = vmul.f32 %v11548_v57, %v11548_v57  ;;  %v6473_v59 = vadd.f32 1.0, %v7745_v44 }
 0x307   : > { %v3237_v27 = vadd.f32 0.18741608, %v3236_v28  ;;  %v3274_v54 = vmul.f32 %v3273_v16, %v11365_v5  ;;  %v3310_v11 = vmul.f32 2.1237322e-06, %v11445_v48  ;;  %v3213_v13 = vsub.f32 1.0, %v3212_v21 }
 0x308   : > { %v3184_v51 = vsel %vm3181_vm14, %v3183_v22, %v3179_v55  ;;  %v11572_v10 = vadd.f32 1.0, %v3289_v6  ;;  %v3428_v9 = vmul.f32 %v11561_v52, %v11561_v52  ;;  %v11577_v31 = vmul.f32 %v6471_v33, %v11284_v38  ;;  %v915_v55 = vpop.f32.mrf.mxu2 }
 0x309   : > { %v3160_v20 = vmul.f32 %v3159_v41, %v11176_v35  ;;  %v3199_v39 = vadd.f32 1.1283791, %v3198_v61  ;;  %v3327_v2 = vmul.f32 %v3326_v24, %v11445_v48  ;;  %v11584_v29 = vmul.f32 %v6472_v62, %v11298_v7 }
 0x30a   : > { %16370 = vst [vmem:[#allocation59_spill] sm:$0xff] %v11577_v31  ;;  %v11581_v58 = vpop.eup %8222  ;;  %v11587_v63 = vmul.f32 0.5, %v11308_v23  ;;  %v3364_v44 = vadd.f32 0.014752088, %v3363_v43  ;;  %v11589_v28 = vmin.f32 %v3388_v49, 16.0  ;;  %v11592_v16 = vmul.f32 %v6473_v59, %v11312_v26 }
 0x30b   : > { %16371 = vst [vmem:[#allocation60_spill] sm:$0xff] %v11584_v29  ;;  %v3185_v38 = vmul.f32 %v3184_v51, %v3160_v20  ;;  %v3238_v35 = vmul.f32 %v3237_v27, %v11328_v42  ;;  %v3311_v33 = vadd.f32 0.00028619796, %v3310_v11  ;;  %v3214_v21 = vmul.f32 %v11541_v30, %v3213_v13 }
 0x30c   : > { %16372 = vst [vmem:[#allocation61_spill] sm:$0xff] %v11592_v16  ;;  %v3275_v6 = vadd.f32 0.05243302, %v3274_v54  ;;  %8224 = vrcp.f32 %v11572_v10  ;;  %v11597_v7 = vmin.f32 %v3428_v9, 16.0  ;;  %v3200_v23 = vmul.f32 %v3199_v39, %v11246_v34 }
 0x30d   : > { %v3220_v62 = vand.u32 2147483647, %v11498_v56  ;;  %v3252_v41 = vmul.f32 %v11581_v58, %v11536_v50  ;;  %v3328_v26 = vadd.f32 0.4994258, %v3327_v2  ;;  %vm3216_vm15 = vweird.f32 %v11498_v56 }
 0x30e   : > { %v3222_v42 = vand.u32 2147483648, %v11498_v56  ;;  %v3365_v13 = vmul.f32 %v3364_v44, %v11517_v45  ;;  %v3401_v61 = vmul.f32 3.8918573e-05, %v11589_v28  ;;  %v7746_v24 = vclamps-f32 %v3185_v38, 1.0 }
 0x30f   : > { %vm3217_vm0 = vweird.f32 %v11541_v30  ;;  %v3239_v22 = vadd.f32 1.1283791, %v3238_v35  ;;  %v3312_v34 = vmul.f32 %v3311_v33, %v11445_v48  ;;  %v3215_v43 = vadd.f32 %v11541_v30, %v3214_v21 }
 0x310   : > { %v3276_v49 = vmul.f32 %v3275_v6, %v11365_v5  ;;  %v3441_v59 = vmul.f32 3.8918573e-05, %v11597_v7  ;;  %v11613_v27 = vadd.f32 %v915_v55, %v8910_v12  ;;  %vm11615_vm1 = vcmp.eq.f32.partialorder %v3220_v62, 8.507059e+37  ;;  %vm11630_vm2 = vmor %vm3216_vm15, %vm3217_vm0 }
 0x311   : > { %v3253_v11 = vsub.f32 1.0, %v3252_v41  ;;  %v3329_v51 = vmul.f32 %v3328_v26, %v11445_v48  ;;  %v3350_v9 = vmul.f32 2.1237322e-06, %v11517_v45  ;;  %v3223_v39 = vor.u32 1.1754944e-38, %v3222_v42 }
 0x312   : > { %v11621_v20 = vpop.eup %8224  ;;  %v11624_v2 = vmul.f32 0.5, %v11372_v0  ;;  %v3366_v44 = vadd.f32 0.112945676, %v3365_v13  ;;  %v3402_v38 = vadd.f32 0.001143296, %v3401_v61  ;;  %v6474_v35 = vadd.f32 1.0, %v7746_v24  ;;  %v1004_v0 = vpop.f32.mrf.mxu3 }
 0x313   : > { %v11635_v21 = vmul.f32 %v3239_v22, %v11288_v19  ;;  %v3313_v6 = vadd.f32 0.0036580483, %v3312_v34  ;;  %v11638_v62 = vmul.f32 0.5, %v11453_v15  ;;  %v3219_v41 = vsel %vm11630_vm2, %v11541_v30, %v3215_v43 }
 0x314   : > { %v3277_v26 = vadd.f32 0.18741608, %v3276_v49  ;;  %v3442_v55 = vadd.f32 0.001143296, %v3441_v59  ;;  %v11644_v56 = vmul.f32 0.70710677, %v11613_v27  ;;  %v3254_v42 = vmul.f32 %v11581_v58, %v3253_v11 }
 0x315   : > { %v3292_v19 = vmul.f32 %v11621_v20, %v11572_v10  ;;  %v11649_v13 = vadd.f32 1.0, %v3329_v51  ;;  %v3351_v61 = vadd.f32 0.00028619796, %v3350_v9  ;;  %vm3256_vm3 = vweird.f32 %v11536_v50 }
 0x316   : > { %v3367_v15 = vmul.f32 %v3366_v44, %v11517_v45  ;;  %v3403_v24 = vmul.f32 %v3402_v38, %v11589_v28  ;;  %v11655_v30 = vadd.f32 %v1004_v0, %v8930_v25  ;;  %v3224_v22 = vsel %vm11615_vm1, %v3223_v39, %v3219_v41 }
 0x317   : > { %v3260_v34 = vand.u32 2147483647, %v11536_v50  ;;  %v3262_v43 = vand.u32 2147483648, %v11536_v50  ;;  %v3314_v49 = vmul.f32 %v3313_v6, %v11445_v48  ;;  %vm3257_vm4 = vweird.f32 %v11581_v58 }
 0x318   : > { %v3278_v59 = vmul.f32 %v3277_v26, %v11365_v5  ;;  %v3443_v11 = vmul.f32 %v3442_v55, %v11597_v7  ;;  %v3468_v51 = vmul.f32 %v11644_v56, %v11644_v56  ;;  %v3255_v9 = vadd.f32 %v11581_v58, %v3254_v42  ;;  %vm11685_vm6 = vmor %vm3256_vm3, %vm3257_vm4 }
 0x319   : > { %v3293_v44 = vsub.f32 1.0, %v3292_v19  ;;  %8226 = vrcp.f32 %v11649_v13  ;;  %v3352_v54 = vmul.f32 %v3351_v61, %v11517_v45  ;;  %v3225_v39 = vmul.f32 %v3224_v22, %v3200_v23 }
 0x31a   : > { %v3368_v38 = vadd.f32 0.4994258, %v3367_v15  ;;  %v3404_v33 = vadd.f32 0.014752088, %v3403_v24  ;;  %v11671_v6 = vmul.f32 0.70710677, %v11655_v30  ;;  %v11674_v5 = vmul.f32 %v6474_v35, %v11420_v14 }
 0x31b   : > { %vm11676_vm5 = vcmp.eq.f32.partialorder %v3260_v34, 8.507059e+37  ;;  %v3315_v41 = vadd.f32 0.05243302, %v3314_v49  ;;  %v3390_v26 = vmul.f32 2.1237322e-06, %v11589_v28  ;;  %v3263_v55 = vor.u32 1.1754944e-38, %v3262_v43  ;;  %v740_v49 = vpop.f32.mrf.mxu0 }
 0x31c   : > { %16377 = vst [vmem:[#allocation62_spill] sm:$0xff] %v11674_v5  ;;  %v3279_v42 = vadd.f32 1.1283791, %v3278_v59  ;;  %v3444_v19 = vadd.f32 0.014752088, %v3443_v11  ;;  %v11689_v14 = vmin.f32 %v3468_v51, 16.0  ;;  %v3259_v35 = vsel %vm11685_vm6, %v11581_v58, %v3255_v9 }
 0x31d   : > { %v3294_v61 = vmul.f32 %v11621_v20, %v3293_v44  ;;  %v3353_v15 = vadd.f32 0.0036580483, %v3352_v54  ;;  %v11696_v24 = vmul.f32 0.5, %v11531_v53  ;;  %v7747_v50 = vclamps-f32 %v3225_v39, 1.0 }
 0x31e   : > { %v3369_v22 = vmul.f32 %v3368_v38, %v11517_v45  ;;  %v3405_v34 = vmul.f32 %v3404_v33, %v11589_v28  ;;  %v3508_v43 = vmul.f32 %v11671_v6, %v11671_v6  ;;  %vm3296_vm7 = vweird.f32 %v11572_v10 }
 0x31f   : > { %v11702_v59 = vpop.eup %8226  ;;  %v3302_v58 = vand.u32 2147483648, %v11572_v10  ;;  %v3316_v11 = vmul.f32 %v3315_v41, %v11445_v48  ;;  %v3391_v51 = vadd.f32 0.00028619796, %v3390_v26  ;;  %v3264_v53 = vsel %vm11676_vm5, %v3263_v55, %v3259_v35 }
 0x320   : > { %vm3297_vm8 = vweird.f32 %v11621_v20  ;;  %v3445_v9 = vmul.f32 %v3444_v19, %v11597_v7  ;;  %v3481_v44 = vmul.f32 3.8918573e-05, %v11689_v14  ;;  %v3295_v54 = vadd.f32 %v11621_v20, %v3294_v61 }
 0x321   : > { %v3354_v39 = vmul.f32 %v3353_v15, %v11517_v45  ;;  %v3430_v38 = vmul.f32 2.1237322e-06, %v11597_v7  ;;  %v11716_v33 = vadd.f32 %v740_v49, %v8891_v1  ;;  %v3332_v41 = vmul.f32 %v11702_v59, %v11649_v13  ;;  %vm11731_vm9 = vmor %vm3296_vm7, %vm3297_vm8 }
 0x322   : > { %v11720_v0 = vadd.f32 1.0, %v3369_v22  ;;  %v3406_v26 = vadd.f32 0.112945676, %v3405_v34  ;;  %v11722_v23 = vmin.f32 %v3508_v43, 16.0  ;;  %v3265_v55 = vmul.f32 %v3264_v53, %v11635_v21 }
 0x323   : > { %v3300_v19 = vand.u32 2147483647, %v11572_v10  ;;  %v3317_v35 = vadd.f32 0.18741608, %v3316_v11  ;;  %v3392_v61 = vmul.f32 %v3391_v51, %v11589_v28  ;;  %v6475_v15 = vadd.f32 1.0, %v7747_v50 }
 0x324   : > { %v3303_v22 = vor.u32 1.1754944e-38, %v3302_v58  ;;  %v3446_v34 = vadd.f32 0.112945676, %v3445_v9  ;;  %v3482_v43 = vadd.f32 0.001143296, %v3481_v44  ;;  %v3299_v21 = vsel %vm11731_vm9, %v11621_v20, %v3295_v54 }
 0x325   : > { %v3355_v53 = vadd.f32 0.05243302, %v3354_v39  ;;  %v3431_v11 = vadd.f32 0.00028619796, %v3430_v38  ;;  %v11739_v51 = vmul.f32 0.70710677, %v11716_v33  ;;  %8228 = vrcp.f32 %v11720_v0 }
 0x326   : > { %v3333_v50 = vsub.f32 1.0, %v3332_v41  ;;  %v3407_v10 = vmul.f32 %v3406_v26, %v11589_v28  ;;  %v3521_v31 = vmul.f32 3.8918573e-05, %v11722_v23  ;;  %v7748_v5 = vclamps-f32 %v3265_v55, 1.0 }
 0x327   : > { %vm3301_vm10 = vcmp.eq.f32.partialorder %v3300_v19, 8.507059e+37  ;;  %v3318_v58 = vmul.f32 %v3317_v35, %v11445_v48  ;;  %v3393_v9 = vadd.f32 0.0036580483, %v3392_v61  ;;  %v3280_v44 = vmul.f32 %v3279_v42, %v11331_v8 }
 0x328   : > { %v3304_v20 = vsel %vm3301_vm10, %v3303_v22, %v3299_v21  ;;  %v3447_v54 = vmul.f32 %v3446_v34, %v11597_v7  ;;  %v3483_v39 = vmul.f32 %v3482_v43, %v11689_v14  ;;  %v11749_v38 = vmul.f32 %v6475_v15, %v11462_v60  ;;  %v829_v15 = vpop.f32.mrf.mxu1 }
 0x329   : > { %v3356_v41 = vmul.f32 %v3355_v53, %v11517_v45  ;;  %v3432_v26 = vmul.f32 %v3431_v11, %v11597_v7  ;;  %v3548_v55 = vmul.f32 %v11739_v51, %v11739_v51  ;;  %v3334_v48 = vmul.f32 %v11702_v59, %v3333_v50 }
 0x32a   : > { %16384 = vst [vmem:[#allocation63_spill] sm:$0xff] %v11749_v38  ;;  %v3408_v19 = vadd.f32 0.4994258, %v3407_v10  ;;  %v11757_v8 = vmul.f32 0.5, %v11539_v32  ;;  %v3522_v42 = vadd.f32 0.001143296, %v3521_v31  ;;  %v3305_v61 = vmul.f32 %v3304_v20, %v3280_v44 }
 0x32b   : > { %v6476_v35 = vadd.f32 1.0, %v7748_v5  ;;  %v3319_v49 = vadd.f32 1.1283791, %v3318_v58  ;;  %v3394_v60 = vmul.f32 %v3393_v9, %v11589_v28  ;;  %v11760_v22 = vpop.eup %8228  ;;  %vm3336_vm11 = vweird.f32 %v11649_v13 }
 0x32c   : > { %v3340_v34 = vand.u32 2147483647, %v11649_v13  ;;  %v3448_v43 = vadd.f32 0.4994258, %v3447_v54  ;;  %v3484_v21 = vadd.f32 0.014752088, %v3483_v39  ;;  %vm3337_vm12 = vweird.f32 %v11702_v59 }
 0x32d   : > { %v3357_v53 = vadd.f32 0.18741608, %v3356_v41  ;;  %v3433_v32 = vadd.f32 0.0036580483, %v3432_v26  ;;  %v11765_v11 = vmin.f32 %v3548_v55, 16.0  ;;  %v3335_v31 = vadd.f32 %v11702_v59, %v3334_v48  ;;  %v16385_v41 = vld [vmem:[#allocation16_spill] sm:$0xff]  ;;  %vm11786_vm13 = vmor %vm3336_vm11, %vm3337_vm12 }
 0x32e   : > { %v3409_v5 = vmul.f32 %v3408_v19, %v11589_v28  ;;  %v3523_v50 = vmul.f32 %v3522_v42, %v11722_v23  ;;  %v11771_v10 = vadd.f32 %v829_v15, %v8893_v3  ;;  %v7749_v58 = vclamps-f32 %v3305_v61, 1.0  ;;  %v16386_v26 = vld [vmem:[#allocation20_spill] sm:$0xff]  ;;  %v16387_v48 = vld [vmem:[#allocation17_spill] sm:$0xff] }
 0x32f   : > { %v3342_v9 = vand.u32 2147483648, %v11649_v13  ;;  %v3372_v44 = vmul.f32 %v11760_v22, %v11720_v0  ;;  %v3395_v20 = vadd.f32 0.05243302, %v3394_v60  ;;  %v3449_v54 = vmul.f32 %v3448_v43, %v11597_v7  ;;  %v16388_v19 = vld [vmem:[#allocation21_spill] sm:$0xff] }
 0x330   : > { %v3485_v39 = vmul.f32 %v3484_v21, %v11689_v14  ;;  %v6684_v55 = vpack.c.bf16 %v16386_v26, %v16385_v41  ;;  %v6685_v42 = vpack.c.bf16 %v16388_v19, %v16387_v48  ;;  %v3358_v60 = vmul.f32 %v3357_v53, %v11517_v45 }
 0x331   : > { %v3434_v15 = vmul.f32 %v3433_v32, %v11597_v7  ;;  %v3470_v43 = vmul.f32 2.1237322e-06, %v11689_v14  ;;  %v3561_v21 = vmul.f32 3.8918573e-05, %v11765_v11  ;;  %v3339_v41 = vsel %vm11786_vm13, %v11702_v59, %v3335_v31 }
 0x332   : > { %v11797_v26 = vadd.f32 1.0, %v3409_v5  ;;  %v3524_v48 = vadd.f32 0.014752088, %v3523_v50  ;;  %v11800_v13 = vmul.f32 0.70710677, %v11771_v10  ;;  %7016 = vmatmul.bf16.vlgmr.msrb.gmra.mxu0 %v6684_v55  ;;  %7105 = vmatmul.bf16.vlgmr.msrb.gmra.mxu1 %v6685_v42  ;;  %v3320_v45 = vmul.f32 %v3319_v49, %v11399_v18 }
 0x333   : > { %vm3341_vm14 = vcmp.eq.f32.partialorder %v3340_v34, 8.507059e+37  ;;  %v3343_v53 = vor.u32 1.1754944e-38, %v3342_v9  ;;  %v3396_v32 = vmul.f32 %v3395_v20, %v11589_v28  ;;  %v6477_v19 = vadd.f32 1.0, %v7749_v58 }
 0x334   : > { %v3373_v38 = vsub.f32 1.0, %v3372_v44  ;;  %v11804_v16 = vadd.f32 1.0, %v3449_v54  ;;  %v3486_v61 = vadd.f32 0.112945676, %v3485_v39  ;;  %v3359_v31 = vadd.f32 1.1283791, %v3358_v60 }
 0x335   : > { %v3344_v59 = vsel %vm3341_vm14, %v3343_v53, %v3339_v41  ;;  %v3435_v5 = vadd.f32 0.05243302, %v3434_v15  ;;  %v3562_v50 = vadd.f32 0.001143296, %v3561_v21  ;;  %8230 = vrcp.f32 %v11797_v26  ;;  %v16396_v53 = vld [vmem:[#allocation22_spill] sm:$0xff] }
 0x336   : > { %v3471_v29 = vadd.f32 0.00028619796, %v3470_v43  ;;  %v3525_v55 = vmul.f32 %v3524_v48, %v11722_v23  ;;  %v3588_v18 = vmul.f32 %v11800_v13, %v11800_v13  ;;  %v11811_v49 = vmul.f32 %v6476_v35, %v11522_v4  ;;  %v918_v48 = vpop.f32.mrf.mxu2 }
 0x337   : > { %v3380_v34 = vand.u32 2147483647, %v11720_v0  ;;  %v3397_v58 = vadd.f32 0.18741608, %v3396_v32  ;;  %v11815_v9 = vmul.f32 0.5, %v11613_v27  ;;  %v11818_v44 = vmul.f32 %v6477_v19, %v11587_v63 }
 0x338   : > { %16391 = vst [vmem:[#allocation16_spill] sm:$0xff] %v11811_v49  ;;  %v3374_v20 = vmul.f32 %v11760_v22, %v3373_v38  ;;  %8232 = vrcp.f32 %v11804_v16  ;;  %v3487_v54 = vmul.f32 %v3486_v61, %v11689_v14  ;;  %v3345_v39 = vmul.f32 %v3344_v59, %v3320_v45  ;;  %v16395_v45 = vld [vmem:[#allocation18_spill] sm:$0xff] }
 0x339   : > { %16392 = vst [vmem:[#allocation20_spill] sm:$0xff] %v11818_v44  ;;  %v11824_v42 = vmul.f32 %v3359_v31, %v11469_v17  ;;  %v3382_v4 = vand.u32 2147483648, %v11720_v0  ;;  %v3563_v35 = vmul.f32 %v3562_v50, %v11765_v11  ;;  %v3436_v27 = vmul.f32 %v3435_v5, %v11597_v7  ;;  %v16397_v31 = vld [vmem:[#allocation19_spill] sm:$0xff] }
 0x33a   : > { %v3472_v60 = vmul.f32 %v3471_v29, %v11689_v14  ;;  %v3526_v63 = vadd.f32 0.112945676, %v3525_v55  ;;  %v11830_v15 = vmin.f32 %v3588_v18, 16.0  ;;  %vm3376_vm15 = vweird.f32 %v11720_v0  ;;  %v16398_v5 = vld [vmem:[#allocation23_spill] sm:$0xff] }
 0x33b   : > { %vm3377_vm0 = vweird.f32 %v11760_v22  ;;  %vm11834_vm1 = vcmp.eq.f32.partialorder %v3380_v34, 8.507059e+37  ;;  %v3398_v17 = vmul.f32 %v3397_v58, %v11589_v28  ;;  %v11839_v43 = vpop.eup %8230  ;;  %v3375_v21 = vadd.f32 %v11760_v22, %v3374_v20 }
 0x33c   : > { %v3488_v41 = vadd.f32 0.4994258, %v3487_v54  ;;  %v3510_v29 = vmul.f32 2.1237322e-06, %v11722_v23  ;;  %v6686_v32 = vpack.c.bf16 %v16396_v53, %v16395_v45  ;;  %v7750_v19 = vclamps-f32 %v3345_v39, 1.0  ;;  %vm11855_vm2 = vmor %vm3376_vm15, %vm3377_vm0  ;;  %v16402_v45 = vld [vmem:[#allocation28_spill] sm:$0xff] }
 0x33d   : > { %v3383_v61 = vor.u32 1.1754944e-38, %v3382_v4  ;;  %v3564_v59 = vadd.f32 0.014752088, %v3563_v35  ;;  %v6687_v50 = vpack.c.bf16 %v16398_v5, %v16397_v31  ;;  %v3437_v28 = vadd.f32 0.18741608, %v3436_v27  ;;  %v1007_v31 = vpop.f32.mrf.mxu3  ;;  %v16404_v5 = vld [vmem:[#allocation29_spill] sm:$0xff] }
 0x33e   : > { %v11847_v55 = vpop.eup %8232  ;;  %v3473_v18 = vadd.f32 0.0036580483, %v3472_v60  ;;  %v3527_v34 = vmul.f32 %v3526_v63, %v11722_v23  ;;  %v3601_v58 = vmul.f32 3.8918573e-05, %v11830_v15  ;;  %7194 = vmatmul.bf16.vlgmr.msrb.gmra.mxu2 %v6686_v32  ;;  %v3399_v54 = vadd.f32 1.1283791, %v3398_v17 }
 0x33f   : > { %v3412_v39 = vmul.f32 %v11839_v43, %v11797_v26  ;;  %v11862_v4 = vmul.f32 0.5, %v11655_v30  ;;  %v11865_v35 = vadd.f32 %v918_v48, %v8910_v12  ;;  %7283 = vmatmul.bf16.vlgmr.msrb.gmra.mxu3 %v6687_v50  ;;  %v3379_v27 = vsel %vm11855_vm2, %v11760_v22, %v3375_v21  ;;  %v16401_v63 = vld [vmem:[#allocation24_spill] sm:$0xff]  ;;  %v16403_v48 = vld [vmem:[#allocation25_spill] sm:$0xff] }
 0x340   : > { %v3489_v0 = vmul.f32 %v3488_v41, %v11689_v14  ;;  %v3511_v60 = vadd.f32 0.00028619796, %v3510_v29  ;;  %v6688_v17 = vpack.c.bf16 %v16402_v45, %v16401_v63  ;;  %v6478_v53 = vadd.f32 1.0, %v7750_v19 }
 0x341   : > { %v3452_v32 = vmul.f32 %v11847_v55, %v11804_v16  ;;  %v3565_v30 = vmul.f32 %v3564_v59, %v11765_v11  ;;  %v6689_v50 = vpack.c.bf16 %v16404_v5, %v16403_v48  ;;  %v3438_v44 = vmul.f32 %v3437_v28, %v11597_v7 }
 0x342   : > { %v3474_v22 = vmul.f32 %v3473_v18, %v11689_v14  ;;  %v3528_v21 = vadd.f32 0.4994258, %v3527_v34  ;;  %v3602_v41 = vadd.f32 0.001143296, %v3601_v58  ;;  %7021 = vmatmul.bf16.gmra.mxu0 %v6688_v17  ;;  %v3384_v29 = vsel %vm11834_vm1, %v3383_v61, %v3379_v27 }
 0x343   : > { %v11883_v19 = vmul.f32 %v3399_v54, %v11548_v57  ;;  %v3413_v20 = vsub.f32 1.0, %v3412_v39  ;;  %v11886_v59 = vmul.f32 0.70710677, %v11865_v35  ;;  %7110 = vmatmul.bf16.gmra.mxu1 %v6689_v50  ;;  %v3420_v63 = vand.u32 2147483647, %v11797_v26 }
 0x344   : > { %v11889_v45 = vadd.f32 1.0, %v3489_v0  ;;  %v3512_v7 = vmul.f32 %v3511_v60, %v11722_v23  ;;  %v11893_v28 = vadd.f32 %v1007_v31, %v8930_v25  ;;  %v11896_v38 = vmul.f32 %v6478_v53, %v11624_v2  ;;  %v742_v31 = vpop.f32.mrf.mxu0 }
 0x345   : > { %v3453_v61 = vsub.f32 1.0, %v3452_v32  ;;  %v3550_v57 = vmul.f32 2.1237322e-06, %v11765_v11  ;;  %v3566_v18 = vadd.f32 0.112945676, %v3565_v30  ;;  %v3529_v54 = vmul.f32 %v3528_v21, %v11722_v23 }
 0x346   : > { %16405 = vst [vmem:[#allocation17_spill] sm:$0xff] %v11896_v38  ;;  %v3439_v34 = vadd.f32 1.1283791, %v3438_v44  ;;  %v3475_v58 = vadd.f32 0.05243302, %v3474_v22  ;;  %v3603_v39 = vmul.f32 %v3602_v41, %v11830_v15  ;;  %v3385_v27 = vmul.f32 %v3384_v29, %v11824_v42 }
 0x347   : > { %v3414_v0 = vmul.f32 %v11839_v43, %v3413_v20  ;;  %vm3416_vm3 = vweird.f32 %v11797_v26  ;;  %v3628_v2 = vmul.f32 %v11886_v59, %v11886_v59  ;;  %v3422_v60 = vand.u32 2147483648, %v11797_v26 }
 0x348   : > { %8234 = vrcp.f32 %v11889_v45  ;;  %v3513_v17 = vadd.f32 0.0036580483, %v3512_v7  ;;  %v11909_v44 = vmul.f32 0.70710677, %v11893_v28  ;;  %vm11911_vm4 = vcmp.eq.f32.partialorder %v3420_v63, 8.507059e+37  ;;  %v16408_v63 = vld [vmem:[#allocation26_spill] sm:$0xff] }
 0x349   : > { %v3454_v42 = vmul.f32 %v11847_v55, %v3453_v61  ;;  %v3551_v32 = vadd.f32 0.00028619796, %v3550_v57  ;;  %v3567_v30 = vmul.f32 %v3566_v18, %v11765_v11  ;;  %vm3456_vm5 = vweird.f32 %v11804_v16  ;;  %v16409_v7 = vld [vmem:[#allocation30_spill] sm:$0xff] }
 0x34a   : > { %v3476_v48 = vmul.f32 %v3475_v58, %v11689_v14  ;;  %v11919_v5 = vadd.f32 1.0, %v3529_v54  ;;  %v3604_v50 = vadd.f32 0.014752088, %v3603_v39  ;;  %v3415_v22 = vadd.f32 %v11839_v43, %v3414_v0  ;;  %v16410_v54 = vld [vmem:[#allocation27_spill] sm:$0xff] }
 0x34b   : > { %vm3417_vm6 = vweird.f32 %v11839_v43  ;;  %vm3457_vm7 = vweird.f32 %v11847_v55  ;;  %v11924_v21 = vmin.f32 %v3628_v2, 16.0  ;;  %v3514_v41 = vmul.f32 %v3513_v17, %v11722_v23  ;;  %v16411_v39 = vld [vmem:[#allocation31_spill] sm:$0xff] }
 0x34c   : > { %v3668_v29 = vmul.f32 %v11909_v44, %v11909_v44  ;;  %v11930_v20 = vadd.f32 %v742_v31, %v8891_v1  ;;  %v6690_v61 = vpack.c.bf16 %v16409_v7, %v16408_v63  ;;  %v3455_v57 = vadd.f32 %v11847_v55, %v3454_v42  ;;  %vm11942_vm8 = vmor %vm3416_vm3, %vm3417_vm6 }
 0x34d   : > { %v3552_v18 = vmul.f32 %v3551_v32, %v11765_v11  ;;  %v3568_v58 = vadd.f32 0.4994258, %v3567_v30  ;;  %v6691_v0 = vpack.c.bf16 %v16411_v39, %v16410_v54  ;;  %v3462_v31 = vand.u32 2147483648, %v11804_v16  ;;  %vm11958_vm9 = vmor %vm3456_vm5, %vm3457_vm7 }
 0x34e   : > { %v11938_v2 = vpop.eup %8234  ;;  %v3477_v38 = vadd.f32 0.18741608, %v3476_v48  ;;  %8236 = vrcp.f32 %v11919_v5  ;;  %v3605_v42 = vmul.f32 %v3604_v50, %v11830_v15  ;;  %7199 = vmatmul.bf16.gmra.mxu2 %v6690_v61  ;;  %v7751_v32 = vclamps-f32 %v3385_v27, 1.0 }
 0x34f   : > { %v3419_v30 = vsel %vm11942_vm8, %v11839_v43, %v3415_v22  ;;  %v3460_v63 = vand.u32 2147483647, %v11804_v16  ;;  %v3641_v26 = vmul.f32 3.8918573e-05, %v11924_v21  ;;  %7288 = vmatmul.bf16.gmra.mxu3 %v6691_v0  ;;  %v3423_v7 = vor.u32 1.1754944e-38, %v3422_v60 }
 0x350   : > { %v3515_v50 = vadd.f32 0.05243302, %v3514_v41  ;;  %v11962_v27 = vmin.f32 %v3668_v29, 16.0  ;;  %v11965_v61 = vmul.f32 0.70710677, %v11930_v20  ;;  %v3459_v43 = vsel %vm11958_vm9, %v11847_v55, %v3455_v57 }
 0x351   : > { %v3492_v60 = vmul.f32 %v11938_v2, %v11889_v45  ;;  %v3553_v22 = vadd.f32 0.0036580483, %v3552_v18  ;;  %v3569_v16 = vmul.f32 %v3568_v58, %v11765_v11  ;;  %v3424_v54 = vsel %vm11911_vm4, %v3423_v7, %v3419_v30 }
 0x352   : > { %v3463_v39 = vor.u32 1.1754944e-38, %v3462_v31  ;;  %v3478_v41 = vmul.f32 %v3477_v38, %v11689_v14  ;;  %v3606_v29 = vadd.f32 0.112945676, %v3605_v42  ;;  %v6479_v0 = vadd.f32 1.0, %v7751_v32 }
 0x353   : > { %v3440_v17 = vmul.f32 %v3439_v34, %v11561_v52  ;;  %vm3461_vm10 = vcmp.eq.f32.partialorder %v3460_v63, 8.507059e+37  ;;  %v3642_v49 = vadd.f32 0.001143296, %v3641_v26  ;;  %v3516_v57 = vmul.f32 %v3515_v50, %v11722_v23 }
 0x354   : > { %v11977_v48 = vpop.eup %8236  ;;  %v3464_v55 = vsel %vm3461_vm10, %v3463_v39, %v3459_v43  ;;  %v3681_v18 = vmul.f32 3.8918573e-05, %v11962_v27  ;;  %v3708_v53 = vmul.f32 %v11965_v61, %v11965_v61  ;;  %v3425_v58 = vmul.f32 %v3424_v54, %v11883_v19  ;;  %v831_v54 = vpop.f32.mrf.mxu1 }
 0x355   : > { %v3493_v31 = vsub.f32 1.0, %v3492_v60  ;;  %v3554_v14 = vmul.f32 %v3553_v22, %v11765_v11  ;;  %v11985_v38 = vadd.f32 1.0, %v3569_v16  ;;  %v3479_v52 = vadd.f32 1.1283791, %v3478_v41 }
 0x356   : > { %v11988_v34 = vmul.f32 0.5, %v11716_v33  ;;  %v3590_v42 = vmul.f32 2.1237322e-06, %v11830_v15  ;;  %v3607_v32 = vmul.f32 %v3606_v29, %v11830_v15  ;;  %v3465_v30 = vmul.f32 %v3464_v55, %v3440_v17 }
 0x357   : > { %v3500_v63 = vand.u32 2147483647, %v11889_v45  ;;  %v3532_v26 = vmul.f32 %v11977_v48, %v11919_v5  ;;  %v3643_v19 = vmul.f32 %v3642_v49, %v11924_v21  ;;  %v11997_v7 = vmul.f32 %v6479_v0, %v11638_v62 }
 0x358   : > { %v3517_v50 = vadd.f32 0.18741608, %v3516_v57  ;;  %v3682_v43 = vadd.f32 0.001143296, %v3681_v18  ;;  %v11999_v60 = vmin.f32 %v3708_v53, 16.0  ;;  %v7752_v33 = vclamps-f32 %v3425_v58, 1.0 }
 0x359   : > { %16416 = vst [vmem:[#allocation21_spill] sm:$0xff] %v11997_v7  ;;  %v3494_v22 = vmul.f32 %v11938_v2, %v3493_v31  ;;  %v3555_v16 = vadd.f32 0.05243302, %v3554_v14  ;;  %8238 = vrcp.f32 %v11985_v38  ;;  %v3502_v39 = vand.u32 2147483648, %v11889_v45 }
 0x35a   : > { %v12005_v41 = vmul.f32 0.5, %v11771_v10  ;;  %v3591_v49 = vadd.f32 0.00028619796, %v3590_v42  ;;  %v3608_v29 = vadd.f32 0.4994258, %v3607_v32  ;;  %v7753_v62 = vclamps-f32 %v3465_v30, 1.0 }
 0x35b   : > { %vm3496_vm11 = vweird.f32 %v11889_v45  ;;  %v3533_v0 = vsub.f32 1.0, %v3532_v26  ;;  %v3644_v17 = vadd.f32 0.014752088, %v3643_v19  ;;  %v3518_v55 = vmul.f32 %v3517_v50, %v11722_v23 }
 0x35c   : > { %v3683_v57 = vmul.f32 %v3682_v43, %v11962_v27  ;;  %v3721_v18 = vmul.f32 3.8918573e-05, %v11999_v60  ;;  %v12012_v53 = vadd.f32 %v831_v54, %v8893_v3  ;;  %v6480_v58 = vadd.f32 1.0, %v7752_v33 }
 0x35d   : > { %v3495_v10 = vadd.f32 %v11938_v2, %v3494_v22  ;;  %vm3497_vm12 = vweird.f32 %v11938_v2  ;;  %v3556_v31 = vmul.f32 %v3555_v16, %v11765_v11  ;;  %vm12017_vm13 = vcmp.eq.f32.partialorder %v3500_v63, 8.507059e+37 }
 0x35e   : > { %v3503_v42 = vor.u32 1.1754944e-38, %v3502_v39  ;;  %v3592_v23 = vmul.f32 %v3591_v49, %v11830_v15  ;;  %v3609_v32 = vmul.f32 %v3608_v29, %v11830_v15  ;;  %v6481_v26 = vadd.f32 1.0, %v7753_v62  ;;  %vm12031_vm14 = vmor %vm3496_vm11, %vm3497_vm12 }
 0x35f   : > { %v12023_v30 = vpop.eup %8238  ;;  %v3534_v19 = vmul.f32 %v11977_v48, %v3533_v0  ;;  %v3630_v50 = vmul.f32 2.1237322e-06, %v11924_v21  ;;  %v3645_v43 = vmul.f32 %v3644_v17, %v11924_v21  ;;  %v3480_v33 = vmul.f32 %v3479_v52, %v11644_v56  ;;  %v920_v0 = vpop.f32.mrf.mxu2 }
 0x360   : > { %v3684_v22 = vadd.f32 0.014752088, %v3683_v57  ;;  %v3722_v16 = vadd.f32 0.001143296, %v3721_v18  ;;  %v12036_v54 = vmul.f32 0.70710677, %v12012_v53  ;;  %v12039_v39 = vmul.f32 %v6480_v58, %v11696_v24 }
 0x361   : > { %v3499_v49 = vsel %vm12031_vm14, %v11938_v2, %v3495_v10  ;;  %v3519_v29 = vadd.f32 1.1283791, %v3518_v55  ;;  %v3557_v56 = vadd.f32 0.18741608, %v3556_v31  ;;  %vm3537_vm15 = vweird.f32 %v11977_v48 }
 0x362   : > { %16421 = vst [vmem:[#allocation18_spill] sm:$0xff] %v12039_v39  ;;  %v3572_v45 = vmul.f32 %v12023_v30, %v11985_v38  ;;  %v3593_v52 = vadd.f32 0.0036580483, %v3592_v23  ;;  %v12047_v62 = vadd.f32 1.0, %v3609_v32  ;;  %v3535_v17 = vadd.f32 %v11977_v48, %v3534_v19 }
 0x363   : > { %v3631_v57 = vadd.f32 0.00028619796, %v3630_v50  ;;  %v3646_v24 = vadd.f32 0.112945676, %v3645_v43  ;;  %v3670_v18 = vmul.f32 2.1237322e-06, %v11962_v27  ;;  %v3685_v2 = vmul.f32 %v3684_v22, %v11962_v27 }
 0x364   : > { %v3542_v58 = vand.u32 2147483648, %v11919_v5  ;;  %v3723_v55 = vmul.f32 %v3722_v16, %v11999_v60  ;;  %v3748_v10 = vmul.f32 %v12036_v54, %v12036_v54  ;;  %vm3536_vm0 = vweird.f32 %v11919_v5 }
 0x365   : > { %v3540_v31 = vand.u32 2147483647, %v11919_v5  ;;  %v3558_v23 = vmul.f32 %v3557_v56, %v11765_v11  ;;  %v12060_v32 = vadd.f32 %v920_v0, %v8910_v12  ;;  %v3504_v19 = vsel %vm12017_vm13, %v3503_v42, %v3499_v49  ;;  %vm12066_vm1 = vmor %vm3536_vm0, %vm3537_vm15 }
 0x366   : > { %v3573_v43 = vsub.f32 1.0, %v3572_v45  ;;  %v3594_v63 = vmul.f32 %v3593_v52, %v11830_v15  ;;  %8240 = vrcp.f32 %v12047_v62  ;;  %v3539_v11 = vsel %vm12066_vm1, %v11977_v48, %v3535_v17 }
 0x367   : > { %v3632_v5 = vmul.f32 %v3631_v57, %v11924_v21  ;;  %v3647_v14 = vmul.f32 %v3646_v24, %v11924_v21  ;;  %v3671_v42 = vadd.f32 0.00028619796, %v3670_v18  ;;  %v3543_v22 = vor.u32 1.1754944e-38, %v3542_v58 }
 0x368   : > { %v3686_v16 = vadd.f32 0.112945676, %v3685_v2  ;;  %v3724_v49 = vadd.f32 0.014752088, %v3723_v55  ;;  %v12077_v56 = vmin.f32 %v3748_v10, 16.0  ;;  %v3505_v0 = vmul.f32 %v3504_v19, %v3480_v33 }
 0x369   : > { %vm3541_vm2 = vcmp.eq.f32.partialorder %v3540_v31, 8.507059e+37  ;;  %v3559_v45 = vadd.f32 1.1283791, %v3558_v23  ;;  %v12080_v52 = vmul.f32 0.70710677, %v12060_v32  ;;  %v12083_v7 = vmul.f32 %v6481_v26, %v11757_v8 }
 0x36a   : > { %v3544_v48 = vsel %vm3541_vm2, %v3543_v22, %v3539_v11  ;;  %v3574_v17 = vmul.f32 %v12023_v30, %v3573_v43  ;;  %v3595_v57 = vadd.f32 0.05243302, %v3594_v63  ;;  %v3520_v24 = vmul.f32 %v3519_v29, %v11671_v6 }
 0x36b   : > { %16424 = vst [vmem:[#allocation22_spill] sm:$0xff] %v12083_v7  ;;  %v3633_v18 = vadd.f32 0.0036580483, %v3632_v5  ;;  %v3648_v58 = vadd.f32 0.4994258, %v3647_v14  ;;  %v3672_v2 = vmul.f32 %v3671_v42, %v11962_v27  ;;  %v12091_v33 = vmul.f32 0.5, %v11865_v35 }
 0x36c   : > { %v12088_v55 = vpop.eup %8240  ;;  %v3687_v10 = vmul.f32 %v3686_v16, %v11962_v27  ;;  %v3725_v8 = vmul.f32 %v3724_v49, %v11999_v60  ;;  %v3761_v26 = vmul.f32 3.8918573e-05, %v12077_v56  ;;  %v7754_v31 = vclamps-f32 %v3505_v0, 1.0 }
 0x36d   : > { %v3545_v23 = vmul.f32 %v3544_v48, %v3520_v24  ;;  %v3560_v19 = vmul.f32 %v3559_v45, %v11739_v51  ;;  %v3788_v6 = vmul.f32 %v12080_v52, %v12080_v52  ;;  %v3575_v29 = vadd.f32 %v12023_v30, %v3574_v17  ;;  %v1009_v51 = vpop.f32.mrf.mxu3 }
 0x36e   : > { %vm3577_vm3 = vweird.f32 %v12023_v30  ;;  %v3582_v35 = vand.u32 2147483648, %v11985_v38  ;;  %v3596_v50 = vmul.f32 %v3595_v57, %v11830_v15  ;;  %v3612_v43 = vmul.f32 %v12088_v55, %v12047_v62 }
 0x36f   : > { %v3634_v63 = vmul.f32 %v3633_v18, %v11924_v21  ;;  %v3649_v11 = vmul.f32 %v3648_v58, %v11924_v21  ;;  %v3673_v5 = vadd.f32 0.0036580483, %v3672_v2  ;;  %vm3576_vm4 = vweird.f32 %v11985_v38 }
 0x370   : > { %v3688_v14 = vadd.f32 0.4994258, %v3687_v10  ;;  %v3726_v42 = vadd.f32 0.112945676, %v3725_v8  ;;  %v3762_v22 = vadd.f32 0.001143296, %v3761_v26  ;;  %vm12108_vm5 = vmor %vm3576_vm4, %vm3577_vm3  ;;  %v12120_v18 = vadd.f32 %v1009_v51, %v8930_v25 }
 0x371   : > { %v6482_v16 = vadd.f32 1.0, %v7754_v31  ;;  %v7755_v49 = vclamps-f32 %v3545_v23, 1.0  ;;  %v3580_v45 = vand.u32 2147483647, %v11985_v38  ;;  %v12113_v48 = vmin.f32 %v3788_v6, 16.0 }
 0x372   : > { %v3579_v17 = vsel %vm12108_vm5, %v12023_v30, %v3575_v29  ;;  %v3597_v57 = vadd.f32 0.18741608, %v3596_v50  ;;  %v3710_v24 = vmul.f32 2.1237322e-06, %v11999_v60  ;;  %v3613_v58 = vsub.f32 1.0, %v3612_v43 }
 0x373   : > { %v3635_v2 = vadd.f32 0.05243302, %v3634_v63  ;;  %v12122_v10 = vadd.f32 1.0, %v3649_v11  ;;  %v3674_v8 = vmul.f32 %v3673_v5, %v11962_v27  ;;  %v3583_v26 = vor.u32 1.1754944e-38, %v3582_v35  ;;  %v745_v35 = vpop.f32.mrf.mxu0 }
 0x374   : > { %v3689_v38 = vmul.f32 %v3688_v14, %v11962_v27  ;;  %v3727_v31 = vmul.f32 %v3726_v42, %v11999_v60  ;;  %v3763_v23 = vmul.f32 %v3762_v22, %v12077_v56  ;;  %v6483_v30 = vadd.f32 1.0, %v7755_v49 }
 0x375   : > { %vm3581_vm6 = vcmp.eq.f32.partialorder %v3580_v45, 8.507059e+37  ;;  %v12129_v6 = vmul.f32 0.5, %v11893_v28  ;;  %v3801_v29 = vmul.f32 3.8918573e-05, %v12113_v48  ;;  %v3598_v43 = vmul.f32 %v3597_v57, %v11830_v15 }
 0x376   : > { %v3584_v50 = vsel %vm3581_vm6, %v3583_v26, %v3579_v17  ;;  %v3711_v63 = vadd.f32 0.00028619796, %v3710_v24  ;;  %v12134_v11 = vmul.f32 0.70710677, %v12120_v18  ;;  %v3614_v5 = vmul.f32 %v12088_v55, %v3613_v58 }
 0x377   : > { %v3636_v51 = vmul.f32 %v3635_v2, %v11924_v21  ;;  %8242 = vrcp.f32 %v12122_v10  ;;  %v3675_v14 = vadd.f32 0.05243302, %v3674_v8  ;;  %v12140_v28 = vmul.f32 %v6482_v16, %v11815_v9 }
 0x378   : > { %v12142_v42 = vadd.f32 1.0, %v3689_v38  ;;  %v3728_v22 = vadd.f32 0.4994258, %v3727_v31  ;;  %v3764_v49 = vadd.f32 0.014752088, %v3763_v23  ;;  %v12145_v15 = vmul.f32 %v6483_v30, %v11862_v4 }
 0x379   : > { %16427 = vst [vmem:[#allocation19_spill] sm:$0xff] %v12140_v28  ;;  %v12148_v0 = vmul.f32 0.5, %v11930_v20  ;;  %v3802_v45 = vadd.f32 0.001143296, %v3801_v29  ;;  %v12151_v17 = vadd.f32 %v745_v35, %v8891_v1  ;;  %v3585_v57 = vmul.f32 %v3584_v50, %v3560_v19  ;;  %v834_v20 = vpop.f32.mrf.mxu1 }
 0x37a   : > { %16428 = vst [vmem:[#allocation23_spill] sm:$0xff] %v12145_v15  ;;  %v3599_v24 = vadd.f32 1.1283791, %v3598_v43  ;;  %v3712_v58 = vmul.f32 %v3711_v63, %v11999_v60  ;;  %v3828_v9 = vmul.f32 %v12134_v11, %v12134_v11  ;;  %v3615_v16 = vadd.f32 %v12088_v55, %v3614_v5 }
 0x37b   : > { %vm3617_vm7 = vweird.f32 %v12088_v55  ;;  %v3637_v4 = vadd.f32 0.18741608, %v3636_v51  ;;  %v3676_v2 = vmul.f32 %v3675_v14, %v11962_v27  ;;  %vm3616_vm8 = vweird.f32 %v12047_v62 }
 0x37c   : > { %8244 = vrcp.f32 %v12142_v42  ;;  %v3729_v19 = vmul.f32 %v3728_v22, %v11999_v60  ;;  %v3765_v8 = vmul.f32 %v3764_v49, %v12077_v56  ;;  %v3620_v38 = vand.u32 2147483647, %v12047_v62  ;;  %vm12172_vm9 = vmor %vm3616_vm8, %vm3617_vm7 }
 0x37d   : > { %v12163_v26 = vpop.eup %8242  ;;  %v3622_v31 = vand.u32 2147483648, %v12047_v62  ;;  %v3803_v23 = vmul.f32 %v3802_v45, %v12113_v48  ;;  %v12169_v30 = vmul.f32 0.70710677, %v12151_v17  ;;  %v3600_v29 = vmul.f32 %v3599_v24, %v11800_v13 }
 0x37e   : > { %v3713_v43 = vadd.f32 0.0036580483, %v3712_v58  ;;  %v12176_v63 = vmin.f32 %v3828_v9, 16.0  ;;  %v12179_v35 = vadd.f32 %v834_v20, %v8893_v3  ;;  %v7756_v5 = vclamps-f32 %v3585_v57, 1.0 }
 0x37f   : > { %v3619_v62 = vsel %vm12172_vm9, %v12088_v55, %v3615_v16  ;;  %v3638_v51 = vmul.f32 %v3637_v4, %v11924_v21  ;;  %v3677_v14 = vadd.f32 0.18741608, %v3676_v2  ;;  %v3652_v13 = vmul.f32 %v12163_v26, %v12122_v10 }
 0x380   : > { %v12187_v22 = vadd.f32 1.0, %v3729_v19  ;;  %v3750_v49 = vmul.f32 2.1237322e-06, %v12077_v56  ;;  %v3766_v45 = vadd.f32 0.112945676, %v3765_v8  ;;  %vm3621_vm10 = vcmp.eq.f32.partialorder %v3620_v38, 8.507059e+37  ;;  %v923_v38 = vpop.f32.mrf.mxu2 }
 0x381   : > { %v3623_v24 = vor.u32 1.1754944e-38, %v3622_v31  ;;  %v3804_v58 = vadd.f32 0.014752088, %v3803_v23  ;;  %v3868_v57 = vmul.f32 %v12169_v30, %v12169_v30  ;;  %v3714_v55 = vmul.f32 %v3713_v43, %v11999_v60 }
 0x382   : > { %v12192_v9 = vpop.eup %8244  ;;  %v12196_v21 = vmul.f32 0.5, %v12012_v53  ;;  %v3841_v16 = vmul.f32 3.8918573e-05, %v12176_v63  ;;  %v12200_v4 = vmul.f32 0.70710677, %v12179_v35  ;;  %v12202_v2 = vadd.f32 1.0, %v7756_v5 }
 0x383   : > { %v3624_v20 = vsel %vm3621_vm10, %v3623_v24, %v3619_v62  ;;  %v3639_v19 = vadd.f32 1.1283791, %v3638_v51  ;;  %v3678_v8 = vmul.f32 %v3677_v14, %v11962_v27  ;;  %v3653_v31 = vsub.f32 1.0, %v3652_v13 }
 0x384   : > { %8246 = vrcp.f32 %v12187_v22  ;;  %v3751_v23 = vadd.f32 0.00028619796, %v3750_v49  ;;  %v3767_v50 = vmul.f32 %v3766_v45, %v12077_v56  ;;  %v3662_v53 = vand.u32 2147483648, %v12122_v10 }
 0x385   : > { %v3692_v43 = vmul.f32 %v12192_v9, %v12142_v42  ;;  %v3805_v15 = vmul.f32 %v3804_v58, %v12113_v48  ;;  %v12211_v5 = vmin.f32 %v3868_v57, 16.0  ;;  %v3715_v62 = vadd.f32 0.05243302, %v3714_v55 }
 0x386   : > { %v3842_v51 = vadd.f32 0.001143296, %v3841_v16  ;;  %v3908_v27 = vmul.f32 %v12200_v4, %v12200_v4  ;;  %v12216_v14 = vadd.f32 %v923_v38, %v8910_v12  ;;  %v3625_v13 = vmul.f32 %v3624_v20, %v3600_v29 }
 0x387   : > { %v12219_v49 = vmul.f32 %v3639_v19, %v11886_v59  ;;  %v3660_v45 = vand.u32 2147483647, %v12122_v10  ;;  %v3679_v24 = vadd.f32 1.1283791, %v3678_v8  ;;  %v3654_v28 = vmul.f32 %v12163_v26, %v3653_v31 }
 0x388   : > { %16431 = vst [vmem:[#allocation24_spill] sm:$0xff] %v12216_v14  ;;  %vm3656_vm11 = vweird.f32 %v12122_v10  ;;  %v3752_v58 = vmul.f32 %v3751_v23, %v12077_v56  ;;  %v3768_v57 = vadd.f32 0.4994258, %v3767_v50  ;;  %v3663_v55 = vor.u32 1.1754944e-38, %v3662_v53 }
 0x389   : > { %v3693_v16 = vsub.f32 1.0, %v3692_v43  ;;  %v3806_v7 = vadd.f32 0.112945676, %v3805_v15  ;;  %v3881_v38 = vmul.f32 3.8918573e-05, %v12211_v5  ;;  %v3716_v59 = vmul.f32 %v3715_v62, %v11999_v60 }
 0x38a   : > { %v12226_v39 = vpop.eup %8246  ;;  %v3843_v29 = vmul.f32 %v3842_v51, %v12176_v63  ;;  %v12230_v20 = vmin.f32 %v3908_v27, 16.0  ;;  %v12233_v19 = vmul.f32 0.70710677, %v12216_v14  ;;  %v7757_v8 = vclamps-f32 %v3625_v13, 1.0 }
 0x38b   : > { %vm12235_vm12 = vcmp.eq.f32.partialorder %v3660_v45, 8.507059e+37  ;;  %v12240_v15 = vmul.f32 %v3679_v24, %v11909_v44  ;;  %v12243_v23 = vmul.f32 0.5, %v12060_v32  ;;  %v3790_v50 = vmul.f32 2.1237322e-06, %v12113_v48 }
 0x38c   : > { %v3655_v53 = vadd.f32 %v12163_v26, %v3654_v28  ;;  %vm3657_vm13 = vweird.f32 %v12163_v26  ;;  %v3753_v43 = vadd.f32 0.0036580483, %v3752_v58  ;;  %v3769_v62 = vmul.f32 %v3768_v57, %v12077_v56 }
 0x38d   : > { %v3694_v51 = vmul.f32 %v12192_v9, %v3693_v16  ;;  %v3732_v27 = vmul.f32 %v12226_v39, %v12187_v22  ;;  %v3807_v44 = vmul.f32 %v3806_v7, %v12113_v48  ;;  %v3882_v13 = vadd.f32 0.001143296, %v3881_v38  ;;  %vm12259_vm15 = vmor %vm3656_vm11, %vm3657_vm13 }
 0x38e   : > { %vm3696_vm14 = vweird.f32 %v12142_v42  ;;  %v3844_v32 = vadd.f32 0.014752088, %v3843_v29  ;;  %v3921_v45 = vmul.f32 3.8918573e-05, %v12230_v20  ;;  %v3948_v28 = vmul.f32 %v12233_v19, %v12233_v19 }
 0x38f   : > { %vm3697_vm0 = vweird.f32 %v12192_v9  ;;  %v3700_v58 = vand.u32 2147483647, %v12142_v42  ;;  %v3717_v7 = vadd.f32 0.18741608, %v3716_v59  ;;  %v3791_v57 = vadd.f32 0.00028619796, %v3790_v50 }
 0x390   : > { %v3659_v16 = vsel %vm12259_vm15, %v12163_v26, %v3655_v53  ;;  %v3754_v38 = vmul.f32 %v3753_v43, %v12077_v56  ;;  %v12269_v29 = vadd.f32 1.0, %v3769_v62  ;;  %v3830_v10 = vmul.f32 2.1237322e-06, %v12176_v63  ;;  %vm12290_vm2 = vmor %vm3696_vm14, %vm3697_vm0 }
 0x391   : > { %v3695_v46 = vadd.f32 %v12192_v9, %v3694_v51  ;;  %v3733_v37 = vsub.f32 1.0, %v3732_v27  ;;  %v3808_v47 = vadd.f32 0.4994258, %v3807_v44  ;;  %v3883_v40 = vmul.f32 %v3882_v13, %v12211_v5 }
 0x392   : > { %v3702_v36 = vand.u32 2147483648, %v12142_v42  ;;  %v3845_v59 = vmul.f32 %v3844_v32, %v12176_v63  ;;  %v3922_v50 = vadd.f32 0.001143296, %v3921_v45  ;;  %v12276_v14 = vmin.f32 %v3948_v28, 16.0 }
 0x393   : > { %v6485_v26 = vadd.f32 1.0, %v7757_v8  ;;  %vm12278_vm1 = vcmp.eq.f32.partialorder %v3700_v58, 8.507059e+37  ;;  %v3718_v43 = vmul.f32 %v3717_v7, %v11999_v60  ;;  %v3792_v62 = vmul.f32 %v3791_v57, %v12113_v48 }
 0x394   : > { %v3664_v51 = vsel %vm12235_vm12, %v3663_v55, %v3659_v16  ;;  %v3755_v8 = vadd.f32 0.05243302, %v3754_v38  ;;  %8248 = vrcp.f32 %v12269_v29  ;;  %v3831_v44 = vadd.f32 0.00028619796, %v3830_v10 }
 0x395   : > { %v3699_v60 = vsel %vm12290_vm2, %v12192_v9, %v3695_v46  ;;  %v3734_v13 = vmul.f32 %v12226_v39, %v3733_v37  ;;  %v3809_v55 = vmul.f32 %v3808_v47, %v12113_v48  ;;  %v3884_v31 = vadd.f32 0.014752088, %v3883_v40 }
 0x396   : > { %v3703_v32 = vor.u32 1.1754944e-38, %v3702_v36  ;;  %v3846_v45 = vadd.f32 0.112945676, %v3845_v59  ;;  %v3923_v42 = vmul.f32 %v3922_v50, %v12230_v20  ;;  %v3961_v28 = vmul.f32 3.8918573e-05, %v12276_v14 }
 0x397   : > { %v3665_v24 = vmul.f32 %v3664_v51, %v12219_v49  ;;  %v3719_v58 = vadd.f32 1.1283791, %v3718_v43  ;;  %vm3736_vm3 = vweird.f32 %v12187_v22  ;;  %v3793_v7 = vadd.f32 0.0036580483, %v3792_v62 }
 0x398   : > { %v3704_v46 = vsel %vm12278_vm1, %v3703_v32, %v3699_v60  ;;  %v3756_v37 = vmul.f32 %v3755_v8, %v12077_v56  ;;  %v3832_v47 = vmul.f32 %v3831_v44, %v12176_v63  ;;  %v3870_v36 = vmul.f32 2.1237322e-06, %v12211_v5 }
 0x399   : > { %v3735_v40 = vadd.f32 %v12226_v39, %v3734_v13  ;;  %vm3737_vm4 = vweird.f32 %v12226_v39  ;;  %v12311_v9 = vadd.f32 1.0, %v3809_v55  ;;  %v3885_v49 = vmul.f32 %v3884_v31, %v12211_v5 }
 0x39a   : > { %v12314_v57 = vpop.eup %8248  ;;  %v3742_v16 = vand.u32 2147483648, %v12187_v22  ;;  %v3847_v38 = vmul.f32 %v3846_v45, %v12176_v63  ;;  %v3924_v10 = vadd.f32 0.014752088, %v3923_v42  ;;  %v3962_v59 = vadd.f32 0.001143296, %v3961_v28  ;;  %vm12327_vm5 = vmor %vm3736_vm3, %vm3737_vm4 }
 0x39b   : > { %v7758_v50 = vclamps-f32 %v3665_v24, 1.0  ;;  %v3705_v53 = vmul.f32 %v3704_v46, %v12240_v15  ;;  %v3740_v43 = vand.u32 2147483647, %v12187_v22  ;;  %v3794_v62 = vmul.f32 %v3793_v7, %v12113_v48 }
 0x39c   : > { %v12323_v51 = vmul.f32 %v12202_v2, %v11988_v34  ;;  %v3757_v8 = vadd.f32 0.18741608, %v3756_v37  ;;  %v3833_v44 = vadd.f32 0.0036580483, %v3832_v47  ;;  %v3871_v60 = vadd.f32 0.00028619796, %v3870_v36 }
 0x39d   : > { %v3739_v15 = vsel %vm12327_vm5, %v12226_v39, %v3735_v40  ;;  %v3772_v13 = vmul.f32 %v12314_v57, %v12269_v29  ;;  %8250 = vrcp.f32 %v12311_v9  ;;  %v3886_v34 = vadd.f32 0.112945676, %v3885_v49  ;;  %v1012_v40 = vpop.f32.mrf.mxu3 }
 0x39e   : > { %v3743_v2 = vor.u32 1.1754944e-38, %v3742_v16  ;;  %v3848_v55 = vadd.f32 0.4994258, %v3847_v38  ;;  %v3925_v22 = vmul.f32 %v3924_v10, %v12230_v20  ;;  %v3963_v31 = vmul.f32 %v3962_v59, %v12276_v14 }
 0x39f   : > { %v12340_v32 = vmul.f32 %v6485_v26, %v12005_v41  ;;  %v7759_v45 = vclamps-f32 %v3705_v53, 1.0  ;;  %vm3741_vm6 = vcmp.eq.f32.partialorder %v3740_v43, 8.507059e+37  ;;  %v3795_v42 = vadd.f32 0.05243302, %v3794_v62 }
 0x3a0   : > { %v6486_v28 = vadd.f32 1.0, %v7758_v50  ;;  %v3744_v39 = vsel %vm3741_vm6, %v3743_v2, %v3739_v15  ;;  %v3834_v24 = vmul.f32 %v3833_v44, %v12176_v63  ;;  %v3872_v7 = vmul.f32 %v3871_v60, %v12211_v5  ;;  %v747_v15 = vpop.f32.mrf.mxu0 }
 0x3a1   : > { %16442 = vst [vmem:[#allocation28_spill] sm:$0xff] %v12340_v32  ;;  %v3720_v46 = vmul.f32 %v3719_v58, %v11965_v61  ;;  %v3758_v37 = vmul.f32 %v3757_v8, %v12077_v56  ;;  %v3773_v47 = vsub.f32 1.0, %v3772_v13  ;;  %v3887_v36 = vmul.f32 %v3886_v34, %v12211_v5 }
 0x3a2   : > { %v12348_v41 = vmul.f32 0.5, %v12120_v18  ;;  %v3849_v26 = vmul.f32 %v3848_v55, %v12176_v63  ;;  %v3926_v49 = vadd.f32 0.112945676, %v3925_v22  ;;  %v3964_v16 = vadd.f32 0.014752088, %v3963_v31 }
 0x3a3   : > { %v12351_v38 = vpop.eup %8250  ;;  %v6487_v10 = vadd.f32 1.0, %v7759_v45  ;;  %v3745_v59 = vmul.f32 %v3744_v39, %v3720_v46  ;;  %v3796_v50 = vmul.f32 %v3795_v42, %v12113_v48  ;;  %v12355_v61 = vmul.f32 0.5, %v12151_v17 }
 0x3a4   : > { %v12358_v56 = vmul.f32 %v6486_v28, %v12091_v33  ;;  %v3835_v58 = vadd.f32 0.05243302, %v3834_v24  ;;  %v3873_v53 = vadd.f32 0.0036580483, %v3872_v7  ;;  %v12361_v18 = vadd.f32 %v1012_v40, %v8930_v25 }
 0x3a5   : > { %v3759_v43 = vadd.f32 1.1283791, %v3758_v37  ;;  %v3774_v62 = vmul.f32 %v12314_v57, %v3773_v47  ;;  %v3888_v27 = vadd.f32 0.4994258, %v3887_v36  ;;  %v3910_v8 = vmul.f32 2.1237322e-06, %v12230_v20 }
 0x3a6   : > { %16443 = vst [vmem:[#allocation25_spill] sm:$0xff] %v12358_v56  ;;  %v3812_v44 = vmul.f32 %v12351_v38, %v12311_v9  ;;  %v12367_v60 = vadd.f32 1.0, %v3849_v26  ;;  %v3927_v17 = vmul.f32 %v3926_v49, %v12230_v20  ;;  %v3965_v33 = vmul.f32 %v3964_v16, %v12276_v14 }
 0x3a7   : > { %v12372_v13 = vmul.f32 %v6487_v10, %v12129_v6  ;;  %v7760_v34 = vclamps-f32 %v3745_v59, 1.0  ;;  %v3782_v2 = vand.u32 2147483648, %v12269_v29  ;;  %v3797_v55 = vadd.f32 0.18741608, %v3796_v50 }
 0x3a8   : > { %vm3777_vm7 = vweird.f32 %v12314_v57  ;;  %v3836_v22 = vmul.f32 %v3835_v58, %v12176_v63  ;;  %v3874_v31 = vmul.f32 %v3873_v53, %v12211_v5  ;;  %v12379_v45 = vmul.f32 0.70710677, %v12361_v18 }
 0x3a9   : > { %16444 = vst [vmem:[#allocation29_spill] sm:$0xff] %v12372_v13  ;;  %v3775_v42 = vadd.f32 %v12314_v57, %v3774_v62  ;;  %v3889_v28 = vmul.f32 %v3888_v27, %v12211_v5  ;;  %v3911_v39 = vadd.f32 0.00028619796, %v3910_v8  ;;  %v12384_v6 = vadd.f32 %v747_v15, %v8891_v1  ;;  %v836_v62 = vpop.f32.mrf.mxu1 }
 0x3aa   : > { %v3813_v24 = vsub.f32 1.0, %v3812_v44  ;;  %8252 = vrcp.f32 %v12367_v60  ;;  %v3928_v7 = vadd.f32 0.4994258, %v3927_v17  ;;  %v3966_v46 = vadd.f32 0.112945676, %v3965_v33 }
 0x3ab   : > { %v6488_v37 = vadd.f32 1.0, %v7760_v34  ;;  %vm3776_vm8 = vweird.f32 %v12269_v29  ;;  %v3780_v47 = vand.u32 2147483647, %v12269_v29  ;;  %v3798_v36 = vmul.f32 %v3797_v55, %v12113_v48 }
 0x3ac   : > { %v3760_v40 = vmul.f32 %v3759_v43, %v12036_v54  ;;  %vm12393_vm9 = vmor %vm3776_vm8, %vm3777_vm7  ;;  %v3837_v49 = vadd.f32 0.18741608, %v3836_v22  ;;  %v3875_v16 = vadd.f32 0.05243302, %v3874_v31  ;;  %v3988_v10 = vmul.f32 %v12379_v45, %v12379_v45 }
 0x3ad   : > { %v3779_v59 = vsel %vm12393_vm9, %v12314_v57, %v3775_v42  ;;  %v12402_v29 = vadd.f32 1.0, %v3889_v28  ;;  %v3912_v48 = vmul.f32 %v3911_v39, %v12230_v20  ;;  %v12406_v54 = vmul.f32 0.70710677, %v12384_v6  ;;  %v925_v39 = vpop.f32.mrf.mxu2 }
 0x3ae   : > { %v3783_v50 = vor.u32 1.1754944e-38, %v3782_v2  ;;  %v3814_v58 = vmul.f32 %v12351_v38, %v3813_v24  ;;  %v3929_v53 = vmul.f32 %v3928_v7, %v12230_v20  ;;  %v3967_v43 = vmul.f32 %v3966_v46, %v12276_v14 }
 0x3af   : > { %v12412_v27 = vmul.f32 %v6488_v37, %v12148_v0  ;;  %vm3781_vm10 = vcmp.eq.f32.partialorder %v3780_v47, 8.507059e+37  ;;  %v3799_v57 = vadd.f32 1.1283791, %v3798_v36  ;;  %v12415_v8 = vmul.f32 0.5, %v12179_v35 }
 0x3b0   : > { %v12417_v44 = vpop.eup %8252  ;;  %v3784_v17 = vsel %vm3781_vm10, %v3783_v50, %v3779_v59  ;;  %v3838_v33 = vmul.f32 %v3837_v49, %v12176_v63  ;;  %v3876_v15 = vmul.f32 %v3875_v16, %v12211_v5  ;;  %v12421_v34 = vmin.f32 %v3988_v10, 16.0 }
 0x3b1   : > { %8254 = vrcp.f32 %v12402_v29  ;;  %v3913_v2 = vadd.f32 0.0036580483, %v3912_v48  ;;  %v4028_v0 = vmul.f32 %v12406_v54, %v12406_v54  ;;  %v12427_v55 = vadd.f32 %v836_v62, %v8893_v3 }
 0x3b2   : > { %v3815_v35 = vadd.f32 %v12351_v38, %v3814_v58  ;;  %vm3817_vm11 = vweird.f32 %v12351_v38  ;;  %v12431_v22 = vadd.f32 1.0, %v3929_v53  ;;  %v3968_v63 = vadd.f32 0.4994258, %v3967_v43 }
 0x3b3   : > { %vm3816_vm12 = vweird.f32 %v12311_v9  ;;  %v3822_v31 = vand.u32 2147483648, %v12311_v9  ;;  %v3852_v42 = vmul.f32 %v12417_v44, %v12367_v60  ;;  %v3950_v28 = vmul.f32 2.1237322e-06, %v12276_v14 }
 0x3b4   : > { %v3785_v24 = vmul.f32 %v3784_v17, %v3760_v40  ;;  %v3820_v7 = vand.u32 2147483647, %v12311_v9  ;;  %v3877_v46 = vadd.f32 0.18741608, %v3876_v15  ;;  %v4001_v37 = vmul.f32 3.8918573e-05, %v12421_v34  ;;  %vm12440_vm13 = vmor %vm3816_vm12, %vm3817_vm11 }
 0x3b5   : > { %v3839_v36 = vadd.f32 1.1283791, %v3838_v33  ;;  %v3914_v26 = vmul.f32 %v3913_v2, %v12230_v20  ;;  %v12445_v49 = vmin.f32 %v4028_v0, 16.0  ;;  %v12448_v16 = vmul.f32 0.70710677, %v12427_v55 }
 0x3b6   : > { %v3819_v40 = vsel %vm12440_vm13, %v12351_v38, %v3815_v35  ;;  %8256 = vrcp.f32 %v12431_v22  ;;  %v3969_v9 = vmul.f32 %v3968_v63, %v12276_v14  ;;  %v12456_v10 = vadd.f32 %v925_v39, %v8910_v12 }
 0x3b7   : > { %v12458_v59 = vpop.eup %8254  ;;  %v3800_v48 = vmul.f32 %v3799_v57, %v12080_v52  ;;  %v3823_v50 = vor.u32 1.1754944e-38, %v3822_v31  ;;  %v3853_v58 = vsub.f32 1.0, %v3852_v42  ;;  %v3951_v53 = vadd.f32 0.00028619796, %v3950_v28 }
 0x3b8   : > { %v7761_v43 = vclamps-f32 %v3785_v24, 1.0  ;;  %vm3821_vm14 = vcmp.eq.f32.partialorder %v3820_v7, 8.507059e+37  ;;  %v3878_v62 = vmul.f32 %v3877_v46, %v12211_v5  ;;  %v4002_v17 = vadd.f32 0.001143296, %v4001_v37 }
 0x3b9   : > { %v3824_v38 = vsel %vm3821_vm14, %v3823_v50, %v3819_v40  ;;  %v3915_v33 = vadd.f32 0.05243302, %v3914_v26  ;;  %v4041_v15 = vmul.f32 3.8918573e-05, %v12445_v49  ;;  %v4068_v2 = vmul.f32 %v12448_v16, %v12448_v16 }
 0x3ba   : > { %v12466_v0 = vmul.f32 %v3839_v36, %v12134_v11  ;;  %v3892_v52 = vmul.f32 %v12458_v59, %v12402_v29  ;;  %v12470_v57 = vadd.f32 1.0, %v3969_v9  ;;  %v12473_v35 = vmul.f32 0.70710677, %v12456_v10 }
 0x3bb   : > { %v3854_v5 = vmul.f32 %v12417_v44, %v3853_v58  ;;  %vm3856_vm15 = vweird.f32 %v12367_v60  ;;  %v3860_v63 = vand.u32 2147483647, %v12367_v60  ;;  %v3952_v31 = vmul.f32 %v3951_v53, %v12276_v14 }
 0x3bc   : > { %v12479_v42 = vpop.eup %8256  ;;  %v6489_v11 = vadd.f32 1.0, %v7761_v43  ;;  %v3825_v28 = vmul.f32 %v3824_v38, %v3800_v48  ;;  %v3862_v39 = vand.u32 2147483648, %v12367_v60  ;;  %v4003_v24 = vmul.f32 %v4002_v17, %v12421_v34 }
 0x3bd   : > { %v3879_v7 = vadd.f32 1.1283791, %v3878_v62  ;;  %v3916_v46 = vmul.f32 %v3915_v33, %v12230_v20  ;;  %v4042_v37 = vadd.f32 0.001143296, %v4041_v15  ;;  %v12484_v47 = vmin.f32 %v4068_v2, 16.0  ;;  %v1014_v2 = vpop.f32.mrf.mxu3 }
 0x3be   : > { %vm3857_vm0 = vweird.f32 %v12417_v44  ;;  %v3893_v36 = vsub.f32 1.0, %v3892_v52  ;;  %8258 = vrcp.f32 %v12470_v57  ;;  %v4108_v26 = vmul.f32 %v12473_v35, %v12473_v35 }
 0x3bf   : > { %v3855_v40 = vadd.f32 %v12417_v44, %v3854_v5  ;;  %v3932_v9 = vmul.f32 %v12479_v42, %v12431_v22  ;;  %v3953_v48 = vadd.f32 0.0036580483, %v3952_v31  ;;  %v3990_v50 = vmul.f32 2.1237322e-06, %v12421_v34  ;;  %vm12507_vm2 = vmor %vm3856_vm15, %vm3857_vm0 }
 0x3c0   : > { %v12495_v58 = vmul.f32 %v6489_v11, %v12196_v21  ;;  %vm12497_vm1 = vcmp.eq.f32.partialorder %v3860_v63, 8.507059e+37  ;;  %v3863_v43 = vor.u32 1.1754944e-38, %v3862_v39  ;;  %v4004_v62 = vadd.f32 0.014752088, %v4003_v24 }
 0x3c1   : > { %v7762_v17 = vclamps-f32 %v3825_v28, 1.0  ;;  %v3917_v38 = vadd.f32 0.18741608, %v3916_v46  ;;  %v4043_v33 = vmul.f32 %v4042_v37, %v12445_v49  ;;  %v4081_v15 = vmul.f32 3.8918573e-05, %v12484_v47 }
 0x3c2   : > { %16449 = vst [vmem:[#allocation26_spill] sm:$0xff] %v12495_v58  ;;  %v12512_v52 = vmul.f32 %v3879_v7, %v12169_v30  ;;  %v3894_v5 = vmul.f32 %v12458_v59, %v3893_v36  ;;  %vm3896_vm3 = vweird.f32 %v12402_v29  ;;  %v12516_v63 = vmin.f32 %v4108_v26, 16.0 }
 0x3c3   : > { %v3859_v31 = vsel %vm12507_vm2, %v12417_v44, %v3855_v40  ;;  %v3933_v11 = vsub.f32 1.0, %v3932_v9  ;;  %v3954_v60 = vmul.f32 %v3953_v48, %v12276_v14  ;;  %v3991_v28 = vadd.f32 0.00028619796, %v3990_v50 }
 0x3c4   : > { %v12522_v39 = vpop.eup %8258  ;;  %v3900_v24 = vand.u32 2147483647, %v12402_v29  ;;  %v3902_v30 = vand.u32 2147483648, %v12402_v29  ;;  %v4005_v7 = vmul.f32 %v4004_v62, %v12421_v34  ;;  %v12528_v46 = vadd.f32 %v1014_v2, %v8930_v25 }
 0x3c5   : > { %v12530_v37 = vadd.f32 1.0, %v7762_v17  ;;  %v3918_v36 = vmul.f32 %v3917_v38, %v12230_v20  ;;  %v4044_v44 = vadd.f32 0.014752088, %v4043_v33  ;;  %v4082_v26 = vadd.f32 0.001143296, %v4081_v15 }
 0x3c6   : > { %v3864_v40 = vsel %vm12497_vm1, %v3863_v43, %v3859_v31  ;;  %v3895_v9 = vadd.f32 %v12458_v59, %v3894_v5  ;;  %vm3897_vm4 = vweird.f32 %v12458_v59  ;;  %v4121_v48 = vmul.f32 3.8918573e-05, %v12516_v63 }
 0x3c7   : > { %v3934_v50 = vmul.f32 %v12479_v42, %v3933_v11  ;;  %v3955_v62 = vadd.f32 0.05243302, %v3954_v60  ;;  %v3972_v17 = vmul.f32 %v12522_v39, %v12470_v57  ;;  %v3992_v2 = vmul.f32 %v3991_v28, %v12421_v34  ;;  %vm12554_vm6 = vmor %vm3896_vm3, %vm3897_vm4 }
 0x3c8   : > { %vm12542_vm5 = vcmp.eq.f32.partialorder %v3900_v24, 8.507059e+37  ;;  %v3903_v53 = vor.u32 1.1754944e-38, %v3902_v30  ;;  %v4006_v43 = vadd.f32 0.112945676, %v4005_v7  ;;  %v12547_v38 = vmul.f32 0.70710677, %v12528_v46 }
 0x3c9   : > { %v12550_v33 = vmul.f32 %v3864_v40, %v12466_v0  ;;  %v3919_v21 = vadd.f32 1.1283791, %v3918_v36  ;;  %v4045_v5 = vmul.f32 %v4044_v44, %v12445_v49  ;;  %v4083_v31 = vmul.f32 %v4082_v26, %v12484_v47 }
 0x3ca   : > { %v3899_v11 = vsel %vm12554_vm6, %v12458_v59, %v3895_v9  ;;  %vm3937_vm7 = vweird.f32 %v12479_v42  ;;  %v4030_v0 = vmul.f32 2.1237322e-06, %v12445_v49  ;;  %v4122_v60 = vadd.f32 0.001143296, %v4121_v48 }
 0x3cb   : > { %v3935_v29 = vadd.f32 %v12479_v42, %v3934_v50  ;;  %v3956_v28 = vmul.f32 %v3955_v62, %v12276_v14  ;;  %v3973_v24 = vsub.f32 1.0, %v3972_v17  ;;  %v3993_v30 = vadd.f32 0.0036580483, %v3992_v2 }
 0x3cc   : > { %v3942_v7 = vand.u32 2147483648, %v12431_v22  ;;  %v4007_v36 = vmul.f32 %v4006_v43, %v12421_v34  ;;  %v4070_v44 = vmul.f32 2.1237322e-06, %v12484_v47  ;;  %v4148_v59 = vmul.f32 %v12547_v38, %v12547_v38 }
 0x3cd   : > { %vm3936_vm8 = vweird.f32 %v12431_v22  ;;  %v3940_v26 = vand.u32 2147483647, %v12431_v22  ;;  %v4046_v40 = vadd.f32 0.112945676, %v4045_v5  ;;  %v4084_v9 = vadd.f32 0.014752088, %v4083_v31 }
 0x3ce   : > { %v3904_v50 = vsel %vm12542_vm5, %v3903_v53, %v3899_v11  ;;  %vm12579_vm9 = vmor %vm3936_vm8, %vm3937_vm7  ;;  %v4031_v17 = vadd.f32 0.00028619796, %v4030_v0  ;;  %v4123_v2 = vmul.f32 %v4122_v60, %v12516_v63  ;;  %v3957_v43 = vadd.f32 0.18741608, %v3956_v28 }
 0x3cf   : > { %v3939_v22 = vsel %vm12579_vm9, %v12479_v42, %v3935_v29  ;;  %v3974_v15 = vmul.f32 %v12522_v39, %v3973_v24  ;;  %v3994_v5 = vmul.f32 %v3993_v30, %v12421_v34  ;;  %v3943_v20 = vor.u32 1.1754944e-38, %v3942_v7  ;;  %v750_v24 = vpop.f32.mrf.mxu0 }
 0x3d0   : > { %v4008_v53 = vadd.f32 0.4994258, %v4007_v36  ;;  %v4071_v31 = vadd.f32 0.00028619796, %v4070_v44  ;;  %v12589_v11 = vmin.f32 %v4148_v59, 16.0  ;;  %v3920_v48 = vmul.f32 %v3919_v21, %v12200_v4 }
 0x3d1   : > { %vm3941_vm10 = vcmp.eq.f32.partialorder %v3940_v26, 8.507059e+37  ;;  %v4047_v0 = vmul.f32 %v4046_v40, %v12445_v49  ;;  %v4085_v60 = vmul.f32 %v4084_v9, %v12484_v47  ;;  %v3905_v62 = vmul.f32 %v3904_v50, %v12512_v52 }
 0x3d2   : > { %v3944_v42 = vsel %vm3941_vm10, %v3943_v20, %v3939_v22  ;;  %v4032_v29 = vmul.f32 %v4031_v17, %v12445_v49  ;;  %v4124_v28 = vadd.f32 0.014752088, %v4123_v2  ;;  %v3958_v30 = vmul.f32 %v3957_v43, %v12276_v14 }
 0x3d3   : > { %v3975_v7 = vadd.f32 %v12522_v39, %v3974_v15  ;;  %vm3977_vm11 = vweird.f32 %v12522_v39  ;;  %v3995_v36 = vadd.f32 0.05243302, %v3994_v5  ;;  %vm3976_vm12 = vweird.f32 %v12470_v57 }
 0x3d4   : > { %v4009_v4 = vmul.f32 %v4008_v53, %v12421_v34  ;;  %v4072_v21 = vmul.f32 %v4071_v31, %v12484_v47  ;;  %v4161_v52 = vmul.f32 3.8918573e-05, %v12589_v11  ;;  %v3982_v44 = vand.u32 2147483648, %v12470_v57  ;;  %vm12607_vm13 = vmor %vm3976_vm12, %vm3977_vm11  ;;  %v839_v31 = vpop.f32.mrf.mxu1 }
 0x3d5   : > { %v4048_v59 = vadd.f32 0.4994258, %v4047_v0  ;;  %v4086_v26 = vadd.f32 0.112945676, %v4085_v60  ;;  %v12605_v40 = vadd.f32 %v750_v24, %v8891_v1  ;;  %v3945_v14 = vmul.f32 %v3944_v42, %v3920_v48  ;;  %v16462_v0 = vld [vmem:[#allocation32_spill] sm:$0xff] }
 0x3d6   : > { %v3980_v50 = vand.u32 2147483647, %v12470_v57  ;;  %v4033_v17 = vadd.f32 0.0036580483, %v4032_v29  ;;  %v4125_v2 = vmul.f32 %v4124_v28, %v12516_v63  ;;  %v7764_v22 = vclamps-f32 %v3905_v62, 1.0  ;;  %v16463_v60 = vld [vmem:[#allocation36_spill] sm:$0xff] }
 0x3d7   : > { %v3959_v43 = vadd.f32 1.1283791, %v3958_v30  ;;  %v3979_v15 = vsel %vm12607_vm13, %v12522_v39, %v3975_v7  ;;  %v3996_v5 = vmul.f32 %v3995_v36, %v12421_v34  ;;  %v12617_v20 = vadd.f32 1.0, %v4009_v4 }
 0x3d8   : > { %v4073_v48 = vadd.f32 0.0036580483, %v4072_v21  ;;  %v4162_v53 = vadd.f32 0.001143296, %v4161_v52  ;;  %v6692_v42 = vpack.c.bf16 %v16463_v60, %v16462_v0  ;;  %v3983_v57 = vor.u32 1.1754944e-38, %v3982_v44 }
 0x3d9   : > { %v4049_v29 = vmul.f32 %v4048_v59, %v12445_v49  ;;  %v4087_v62 = vmul.f32 %v4086_v26, %v12484_v47  ;;  %v12624_v28 = vmul.f32 0.70710677, %v12605_v40  ;;  %v7765_v24 = vclamps-f32 %v3945_v14, 1.0  ;;  %v16464_v59 = vld [vmem:[#allocation33_spill] sm:$0xff] }
 0x3da   : > { %vm3981_vm14 = vcmp.eq.f32.partialorder %v3980_v50, 8.507059e+37  ;;  %v4034_v39 = vmul.f32 %v4033_v17, %v12445_v49  ;;  %v4126_v30 = vadd.f32 0.112945676, %v4125_v2  ;;  %7026 = vmatmul.bf16.gmra.mxu0 %v6692_v42  ;;  %v3960_v7 = vmul.f32 %v3959_v43, %v12233_v19  ;;  %v16465_v26 = vld [vmem:[#allocation37_spill] sm:$0xff] }
 0x3db   : > { %v3984_v36 = vsel %vm3981_vm14, %v3983_v57, %v3979_v15  ;;  %v3997_v4 = vadd.f32 0.18741608, %v3996_v5  ;;  %v12629_v21 = vadd.f32 %v839_v31, %v8893_v3  ;;  %8260 = vrcp.f32 %v12617_v20  ;;  %v16468_v57 = vld [vmem:[#allocation24_spill] sm:$0xff] }
 0x3dc   : > { %v4074_v52 = vmul.f32 %v4073_v48, %v12484_v47  ;;  %v4163_v44 = vmul.f32 %v4162_v53, %v12589_v11  ;;  %v6693_v14 = vpack.c.bf16 %v16465_v26, %v16464_v59  ;;  %v12636_v9 = vadd.f32 1.0, %v4049_v29 }
 0x3dd   : > { %v4088_v50 = vadd.f32 0.4994258, %v4087_v62  ;;  %v4110_v17 = vmul.f32 2.1237322e-06, %v12516_v63  ;;  %v4188_v19 = vmul.f32 %v12624_v28, %v12624_v28  ;;  %v16466_v2 = vclamps-f32 %v12550_v33, 1.0 }
 0x3de   : > { %v6492_v15 = vadd.f32 1.0, %v7764_v22  ;;  %v4035_v5 = vadd.f32 0.05243302, %v4034_v39  ;;  %v4127_v48 = vmul.f32 %v4126_v30, %v12516_v63  ;;  %7115 = vmatmul.bf16.gmra.mxu1 %v6693_v14  ;;  %v12646_v53 = vmul.f32 %v12530_v37, %v12243_v23  ;;  %v928_v14 = vpop.f32.mrf.mxu2 }
 0x3df   : > { %v6491_v43 = vadd.f32 1.0, %v16466_v2  ;;  %v3985_v31 = vmul.f32 %v3984_v36, %v3960_v7  ;;  %v3998_v0 = vmul.f32 %v3997_v4, %v12421_v34  ;;  %v12650_v60 = vmul.f32 0.70710677, %v12629_v21 }
 0x3e0   : > { %16467 = vst [vmem:[#allocation30_spill] sm:$0xff] %v12646_v53  ;;  %v6493_v42 = vadd.f32 1.0, %v7765_v24  ;;  %v1118_v29 = vmul.f32 0.5, %v16468_v57  ;;  %v4075_v33 = vadd.f32 0.05243302, %v4074_v52  ;;  %8262 = vrcp.f32 %v12636_v9 }
 0x3e1   : > { %v4164_v62 = vadd.f32 0.014752088, %v4163_v44  ;;  %v4089_v22 = vmul.f32 %v4088_v50, %v12484_v47  ;;  %v4111_v39 = vadd.f32 0.00028619796, %v4110_v17  ;;  %v12655_v30 = vmin.f32 %v4188_v19, 16.0  ;;  %v12657_v23 = vpop.eup %8260 }
 0x3e2   : > { %v12660_v37 = vmul.f32 %v6491_v43, %v12348_v41  ;;  %v12663_v34 = vmul.f32 %v6492_v15, %v12355_v61  ;;  %v4036_v24 = vmul.f32 %v4035_v5, %v12445_v49  ;;  %v4128_v7 = vadd.f32 0.4994258, %v4127_v48 }
 0x3e3   : > { %v7766_v36 = vclamps-f32 %v3985_v31, 1.0  ;;  %v12667_v4 = vmul.f32 0.5, %v12361_v18  ;;  %v3999_v52 = vadd.f32 1.1283791, %v3998_v0  ;;  %v4228_v44 = vmul.f32 %v12650_v60, %v12650_v60 }
 0x3e4   : > { %16469 = vst [vmem:[#allocation27_spill] sm:$0xff] %v12660_v37  ;;  %v12672_v59 = vmul.f32 %v6493_v42, %v12415_v8  ;;  %v12675_v41 = vmul.f32 0.5, %v12384_v6  ;;  %v4076_v61 = vmul.f32 %v4075_v33, %v12484_v47  ;;  %v4165_v26 = vmul.f32 %v4164_v62, %v12589_v11  ;;  %v16472_v33 = vld [vmem:[#allocation34_spill] sm:$0xff] }
 0x3e5   : > { %16470 = vst [vmem:[#allocation31_spill] sm:$0xff] %v12663_v34  ;;  %v4012_v50 = vmul.f32 %v12657_v23, %v12617_v20  ;;  %v12681_v18 = vadd.f32 1.0, %v4089_v22  ;;  %v4112_v17 = vmul.f32 %v4111_v39, %v12516_v63  ;;  %v4201_v19 = vmul.f32 3.8918573e-05, %v12655_v30 }
 0x3e6   : > { %16471 = vst [vmem:[#allocation32_spill] sm:$0xff] %v12672_v59  ;;  %v4037_v2 = vadd.f32 0.18741608, %v4036_v24  ;;  %v12686_v8 = vmul.f32 0.5, %v12427_v55  ;;  %v12689_v6 = vmul.f32 0.5, %v12456_v10  ;;  %v4129_v43 = vmul.f32 %v4128_v7, %v12516_v63  ;;  %v12692_v15 = vpop.eup %8262  ;;  %v16473_v10 = vld [vmem:[#allocation38_spill] sm:$0xff] }
 0x3e7   : > { %v6494_v5 = vadd.f32 1.0, %v7766_v36  ;;  %v12695_v48 = vmul.f32 %v3999_v52, %v12379_v45  ;;  %v12697_v31 = vmin.f32 %v4228_v44, 16.0  ;;  %v12700_v0 = vadd.f32 %v928_v14, %v8910_v12 }
 0x3e8   : > { %v4022_v42 = vand.u32 2147483648, %v12617_v20  ;;  %v4077_v55 = vadd.f32 0.18741608, %v4076_v61  ;;  %v4166_v57 = vadd.f32 0.112945676, %v4165_v26  ;;  %v6694_v62 = vpack.c.bf16 %v16473_v10, %v16472_v33  ;;  %v16478_v33 = vld [vmem:[#allocation44_spill] sm:$0xff] }
 0x3e9   : > { %v4013_v22 = vsub.f32 1.0, %v4012_v50  ;;  %8264 = vrcp.f32 %v12681_v18  ;;  %v4113_v39 = vadd.f32 0.0036580483, %v4112_v17  ;;  %v4202_v24 = vadd.f32 0.001143296, %v4201_v19  ;;  %v16475_v17 = vld [vmem:[#allocation35_spill] sm:$0xff] }
 0x3ea   : > { %v4038_v45 = vmul.f32 %v4037_v2, %v12445_v49  ;;  %v4052_v7 = vmul.f32 %v12692_v15, %v12636_v9  ;;  %v12709_v36 = vadd.f32 1.0, %v4129_v43  ;;  %v4150_v52 = vmul.f32 2.1237322e-06, %v12589_v11  ;;  %7204 = vmatmul.bf16.gmra.mxu2 %v6694_v62  ;;  %v16476_v19 = vld [vmem:[#allocation39_spill] sm:$0xff]  ;;  %v16477_v43 = vld [vmem:[#allocation40_spill] sm:$0xff] }
 0x3eb   : > { %v12712_v44 = vmul.f32 %v6494_v5, %v1118_v29  ;;  %vm4016_vm15 = vweird.f32 %v12617_v20  ;;  %v4020_v61 = vand.u32 2147483647, %v12617_v20  ;;  %v4241_v26 = vmul.f32 3.8918573e-05, %v12697_v31 }
 0x3ec   : > { %v12718_v14 = vmul.f32 0.70710677, %v12700_v0  ;;  %v4078_v49 = vmul.f32 %v4077_v55, %v12484_v47  ;;  %v4167_v50 = vmul.f32 %v4166_v57, %v12589_v11  ;;  %v6695_v2 = vpack.c.bf16 %v16476_v19, %v16475_v17  ;;  %v16481_v17 = vld [vmem:[#allocation41_spill] sm:$0xff] }
 0x3ed   : > { %16474 = vst [vmem:[#allocation36_spill] sm:$0xff] %v12712_v44  ;;  %v6696_v29 = vpack.c.bf16 %v16478_v33, %v16477_v43  ;;  %v4014_v5 = vmul.f32 %v12657_v23, %v4013_v22  ;;  %v4023_v10 = vor.u32 1.1754944e-38, %v4022_v42  ;;  %v4114_v62 = vmul.f32 %v4113_v39, %v12516_v63  ;;  %v1017_v39 = vpop.f32.mrf.mxu3  ;;  %v16482_v19 = vld [vmem:[#allocation45_spill] sm:$0xff] }
 0x3ee   : > { %v4203_v44 = vmul.f32 %v4202_v24, %v12655_v30  ;;  %v4039_v59 = vadd.f32 1.1283791, %v4038_v45  ;;  %v4053_v34 = vsub.f32 1.0, %v4052_v7  ;;  %8266 = vrcp.f32 %v12709_v36  ;;  %7293 = vmatmul.bf16.gmra.mxu3 %v6695_v2 }
 0x3ef   : > { %v4151_v47 = vadd.f32 0.00028619796, %v4150_v52  ;;  %7031 = vmatmul.bf16.gmra.mxu0 %v6696_v29  ;;  %v12730_v55 = vpop.eup %8264  ;;  %vm4017_vm0 = vweird.f32 %v12657_v23  ;;  %v12734_v57 = vmul.f32 0.5, %v12528_v46  ;;  %v4242_v22 = vadd.f32 0.001143296, %v4241_v26 }
 0x3f0   : > { %v4268_v42 = vmul.f32 %v12718_v14, %v12718_v14  ;;  %vm12738_vm1 = vcmp.eq.f32.partialorder %v4020_v61, 8.507059e+37  ;;  %v4062_v45 = vand.u32 2147483648, %v12636_v9  ;;  %v4079_v7 = vadd.f32 1.1283791, %v4078_v49  ;;  %vm12767_vm2 = vmor %vm4016_vm15, %vm4017_vm0 }
 0x3f1   : > { %v4168_v52 = vadd.f32 0.4994258, %v4167_v50  ;;  %v6697_v2 = vpack.c.bf16 %v16482_v19, %v16481_v17  ;;  %v4015_v43 = vadd.f32 %v12657_v23, %v4014_v5  ;;  %v4060_v46 = vand.u32 2147483647, %v12636_v9 }
 0x3f2   : > { %v4115_v26 = vadd.f32 0.05243302, %v4114_v62  ;;  %v4204_v33 = vadd.f32 0.014752088, %v4203_v44  ;;  %v4054_v29 = vmul.f32 %v12692_v15, %v4053_v34  ;;  %v4092_v61 = vmul.f32 %v12730_v55, %v12681_v18 }
 0x3f3   : > { %v4152_v37 = vmul.f32 %v4151_v47, %v12589_v11  ;;  %v12752_v13 = vadd.f32 %v1017_v39, %v8930_v25  ;;  %7120 = vmatmul.bf16.gmra.mxu1 %v6697_v2  ;;  %v12755_v49 = vmul.f32 %v4039_v59, %v12406_v54  ;;  %v4190_v50 = vmul.f32 2.1237322e-06, %v12655_v30 }
 0x3f4   : > { %v4243_v5 = vmul.f32 %v4242_v22, %v12697_v31  ;;  %v12759_v62 = vmin.f32 %v4268_v42, 16.0  ;;  %v12761_v44 = vpop.eup %8266  ;;  %vm4056_vm3 = vweird.f32 %v12636_v9  ;;  %v4063_v54 = vor.u32 1.1754944e-38, %v4062_v45 }
 0x3f5   : > { %v12773_v59 = vmul.f32 %v4079_v7, %v12448_v16  ;;  %v4169_v47 = vmul.f32 %v4168_v52, %v12589_v11  ;;  %v4019_v22 = vsel %vm12767_vm2, %v12657_v23, %v4015_v43  ;;  %vm4057_vm4 = vweird.f32 %v12692_v15 }
 0x3f6   : > { %vm12780_vm5 = vcmp.eq.f32.partialorder %v4060_v46, 8.507059e+37  ;;  %v4116_v42 = vmul.f32 %v4115_v26, %v12516_v63  ;;  %v4205_v39 = vmul.f32 %v4204_v33, %v12655_v30  ;;  %v4055_v45 = vadd.f32 %v12692_v15, %v4054_v29  ;;  %v16487_v33 = vld [vmem:[#allocation42_spill] sm:$0xff]  ;;  %vm12807_vm6 = vmor %vm4056_vm3, %vm4057_vm4 }
 0x3f7   : > { %v4093_v16 = vsub.f32 1.0, %v4092_v61  ;;  %v4153_v7 = vadd.f32 0.0036580483, %v4152_v37  ;;  %v12788_v52 = vmul.f32 0.70710677, %v12752_v13  ;;  %v4132_v23 = vmul.f32 %v12761_v44, %v12709_v36  ;;  %v16488_v29 = vld [vmem:[#allocation46_spill] sm:$0xff] }
 0x3f8   : > { %v4191_v17 = vadd.f32 0.00028619796, %v4190_v50  ;;  %v4244_v19 = vadd.f32 0.014752088, %v4243_v5  ;;  %v4281_v2 = vmul.f32 3.8918573e-05, %v12759_v62  ;;  %v6698_v37 = vpack.c.bf16 %v16488_v29, %v16487_v33 }
 0x3f9   : > { %v4100_v43 = vand.u32 2147483647, %v12681_v18  ;;  %v12794_v46 = vadd.f32 1.0, %v4169_v47  ;;  %v12797_v26 = vmul.f32 0.5, %v12605_v40  ;;  %v4024_v61 = vsel %vm12738_vm1, %v4023_v10, %v4019_v22  ;;  %v752_v47 = vpop.f32.mrf.mxu0 }
 0x3fa   : > { %vm4096_vm7 = vweird.f32 %v12681_v18  ;;  %v4102_v5 = vand.u32 2147483648, %v12681_v18  ;;  %v4117_v40 = vadd.f32 0.18741608, %v4116_v42  ;;  %v4206_v34 = vadd.f32 0.112945676, %v4205_v39  ;;  %7209 = vmatmul.bf16.gmra.mxu2 %v6698_v37 }
 0x3fb   : > { %v4059_v24 = vsel %vm12807_vm6, %v12692_v15, %v4055_v45  ;;  %v4094_v10 = vmul.f32 %v12730_v55, %v4093_v16  ;;  %v4154_v22 = vmul.f32 %v4153_v7, %v12589_v11  ;;  %v4308_v9 = vmul.f32 %v12788_v52, %v12788_v52  ;;  %v16491_v45 = vld [vmem:[#allocation43_spill] sm:$0xff] }
 0x3fc   : > { %v4133_v33 = vsub.f32 1.0, %v4132_v23  ;;  %v4192_v29 = vmul.f32 %v4191_v17, %v12655_v30  ;;  %v4245_v53 = vmul.f32 %v4244_v19, %v12697_v31  ;;  %v4282_v42 = vadd.f32 0.001143296, %v4281_v2  ;;  %v16492_v16 = vld [vmem:[#allocation47_spill] sm:$0xff] }
 0x3fd   : > { %8268 = vrcp.f32 %v12794_v46  ;;  %v4230_v39 = vmul.f32 2.1237322e-06, %v12697_v31  ;;  %v12825_v15 = vadd.f32 %v752_v47, %v8891_v1  ;;  %v6699_v7 = vpack.c.bf16 %v16492_v16, %v16491_v45 }
 0x3fe   : > { %v4025_v50 = vmul.f32 %v4024_v61, %v12695_v48  ;;  %vm12830_vm8 = vcmp.eq.f32.partialorder %v4100_v43, 8.507059e+37  ;;  %v4118_v23 = vmul.f32 %v4117_v40, %v12516_v63  ;;  %v4207_v17 = vmul.f32 %v4206_v34, %v12655_v30 }
 0x3ff   : > { %v4064_v19 = vsel %vm12780_vm5, %v4063_v54, %v4059_v24  ;;  %vm4097_vm9 = vweird.f32 %v12730_v55  ;;  %v4155_v2 = vadd.f32 0.05243302, %v4154_v22  ;;  %v12839_v47 = vmin.f32 %v4308_v9, 16.0  ;;  %7298 = vmatmul.bf16.gmra.mxu3 %v6699_v7 }
 0x400   : > { %v4095_v45 = vadd.f32 %v12730_v55, %v4094_v10  ;;  %v4193_v48 = vadd.f32 0.0036580483, %v4192_v29  ;;  %v4246_v43 = vadd.f32 0.112945676, %v4245_v53  ;;  %v4283_v61 = vmul.f32 %v4282_v42, %v12759_v62  ;;  %vm12857_vm10 = vmor %vm4096_vm7, %vm4097_vm9 }
 0x401   : > { %v4103_v16 = vor.u32 1.1754944e-38, %v4102_v5  ;;  %v4134_v63 = vmul.f32 %v12761_v44, %v4133_v33  ;;  %v4231_v40 = vadd.f32 0.00028619796, %v4230_v39  ;;  %v12845_v34 = vmul.f32 0.70710677, %v12825_v15 }
 0x402   : > { %v7767_v54 = vclamps-f32 %v4025_v50, 1.0  ;;  %v4119_v20 = vadd.f32 1.1283791, %v4118_v23  ;;  %v4208_v24 = vadd.f32 0.4994258, %v4207_v17  ;;  %v12848_v22 = vmul.f32 0.5, %v12629_v21 }
 0x403   : > { %v12850_v9 = vpop.eup %8268  ;;  %v4065_v10 = vmul.f32 %v4064_v19, %v12755_v49  ;;  %v4140_v5 = vand.u32 2147483647, %v12709_v36  ;;  %v4156_v33 = vmul.f32 %v4155_v2, %v12589_v11  ;;  %v4321_v29 = vmul.f32 3.8918573e-05, %v12839_v47 }
 0x404   : > { %v4099_v21 = vsel %vm12857_vm10, %v12730_v55, %v4095_v45  ;;  %v4194_v49 = vmul.f32 %v4193_v48, %v12655_v30  ;;  %v4247_v42 = vmul.f32 %v4246_v43, %v12697_v31  ;;  %v4284_v39 = vadd.f32 0.014752088, %v4283_v61  ;;  %v841_v43 = vpop.f32.mrf.mxu1 }
 0x405   : > { %v4135_v18 = vadd.f32 %v12761_v44, %v4134_v63  ;;  %vm4137_vm11 = vweird.f32 %v12761_v44  ;;  %v4232_v7 = vmul.f32 %v4231_v40, %v12697_v31  ;;  %v4348_v50 = vmul.f32 %v12845_v34, %v12845_v34 }
 0x406   : > { %v6495_v23 = vadd.f32 1.0, %v7767_v54  ;;  %vm4136_vm12 = vweird.f32 %v12709_v36  ;;  %v4172_v55 = vmul.f32 %v12850_v9, %v12794_v46  ;;  %v4209_v17 = vmul.f32 %v4208_v24, %v12655_v30 }
 0x407   : > { %v7768_v19 = vclamps-f32 %v4065_v10, 1.0  ;;  %v4104_v2 = vsel %vm12830_vm8, %v4103_v16, %v4099_v21  ;;  %v4142_v45 = vand.u32 2147483648, %v12709_v36  ;;  %v4322_v48 = vadd.f32 0.001143296, %v4321_v29  ;;  %vm12881_vm13 = vmor %vm4136_vm12, %vm4137_vm11 }
 0x408   : > { %v4157_v63 = vadd.f32 0.18741608, %v4156_v33  ;;  %v4195_v40 = vadd.f32 0.05243302, %v4194_v49  ;;  %v4248_v54 = vadd.f32 0.4994258, %v4247_v42  ;;  %v4285_v53 = vmul.f32 %v4284_v39, %v12759_v62 }
 0x409   : > { %v4139_v24 = vsel %vm12881_vm13, %v12761_v44, %v4135_v18  ;;  %vm12889_vm14 = vcmp.eq.f32.partialorder %v4140_v5, 8.507059e+37  ;;  %v4233_v36 = vadd.f32 0.0036580483, %v4232_v7  ;;  %v12893_v16 = vmin.f32 %v4348_v50, 16.0 }
 0x40a   : > { %v4173_v10 = vsub.f32 1.0, %v4172_v55  ;;  %v12895_v29 = vadd.f32 1.0, %v4209_v17  ;;  %v4270_v33 = vmul.f32 2.1237322e-06, %v12759_v62  ;;  %v12899_v21 = vadd.f32 %v841_v43, %v8893_v3 }
 0x40b   : > { %v6496_v49 = vadd.f32 1.0, %v7768_v19  ;;  %v4105_v42 = vmul.f32 %v4104_v2, %v12773_v59  ;;  %v4143_v39 = vor.u32 1.1754944e-38, %v4142_v45  ;;  %v4323_v44 = vmul.f32 %v4322_v48, %v12839_v47 }
 0x40c   : > { %v4158_v5 = vmul.f32 %v4157_v63, %v12589_v11  ;;  %v4196_v18 = vmul.f32 %v4195_v40, %v12655_v30  ;;  %v4249_v7 = vmul.f32 %v4248_v54, %v12697_v31  ;;  %v4286_v50 = vadd.f32 0.112945676, %v4285_v53  ;;  %v930_v53 = vpop.f32.mrf.mxu2 }
 0x40d   : > { %v4120_v55 = vmul.f32 %v4119_v20, %v12473_v35  ;;  %v4144_v17 = vsel %vm12889_vm14, %v4143_v39, %v4139_v24  ;;  %v4234_v43 = vmul.f32 %v4233_v36, %v12697_v31  ;;  %v4361_v19 = vmul.f32 3.8918573e-05, %v12893_v16 }
 0x40e   : > { %v4174_v59 = vmul.f32 %v12850_v9, %v4173_v10  ;;  %8270 = vrcp.f32 %v12895_v29  ;;  %v4271_v2 = vadd.f32 0.00028619796, %v4270_v33  ;;  %v12914_v11 = vmul.f32 0.70710677, %v12899_v21 }
 0x40f   : > { %v12917_v45 = vmul.f32 %v6495_v23, %v12667_v4  ;;  %v12920_v35 = vmul.f32 %v6496_v49, %v12675_v41  ;;  %v7769_v20 = vclamps-f32 %v4105_v42, 1.0  ;;  %v4324_v48 = vadd.f32 0.014752088, %v4323_v44 }
 0x410   : > { %v4159_v61 = vadd.f32 1.1283791, %v4158_v5  ;;  %v4197_v63 = vadd.f32 0.18741608, %v4196_v18  ;;  %v12922_v40 = vadd.f32 1.0, %v4249_v7  ;;  %v4287_v54 = vmul.f32 %v4286_v50, %v12759_v62 }
 0x411   : > { %16501 = vst [vmem:[#allocation33_spill] sm:$0xff] %v12917_v45  ;;  %v4145_v24 = vmul.f32 %v4144_v17, %v4120_v55  ;;  %v4182_v37 = vand.u32 2147483648, %v12794_v46  ;;  %v4235_v36 = vadd.f32 0.05243302, %v4234_v43  ;;  %v4362_v10 = vadd.f32 0.001143296, %v4361_v19 }
 0x412   : > { %16502 = vst [vmem:[#allocation37_spill] sm:$0xff] %v12920_v35  ;;  %v4175_v4 = vadd.f32 %v12850_v9, %v4174_v59  ;;  %vm4177_vm15 = vweird.f32 %v12850_v9  ;;  %v4272_v41 = vmul.f32 %v4271_v2, %v12759_v62  ;;  %v4388_v23 = vmul.f32 %v12914_v11, %v12914_v11 }
 0x413   : > { %v6497_v33 = vadd.f32 1.0, %v7769_v20  ;;  %vm4176_vm0 = vweird.f32 %v12794_v46  ;;  %v4325_v49 = vmul.f32 %v4324_v48, %v12839_v47  ;;  %v12934_v42 = vadd.f32 %v930_v53, %v8910_v12 }
 0x414   : > { %v12936_v39 = vpop.eup %8270  ;;  %v4180_v44 = vand.u32 2147483647, %v12794_v46  ;;  %v4198_v5 = vmul.f32 %v4197_v63, %v12655_v30  ;;  %8272 = vrcp.f32 %v12922_v40  ;;  %v4288_v18 = vadd.f32 0.4994258, %v4287_v54  ;;  %vm12942_vm1 = vmor %vm4176_vm0, %vm4177_vm15 }
 0x415   : > { %v4160_v7 = vmul.f32 %v4159_v61, %v12547_v38  ;;  %v4183_v55 = vor.u32 1.1754944e-38, %v4182_v37  ;;  %v4236_v17 = vmul.f32 %v4235_v36, %v12697_v31  ;;  %v4363_v43 = vmul.f32 %v4362_v10, %v12893_v16  ;;  %v1019_v36 = vpop.f32.mrf.mxu3 }
 0x416   : > { %v7770_v19 = vclamps-f32 %v4145_v24, 1.0  ;;  %v4179_v46 = vsel %vm12942_vm1, %v12850_v9, %v4175_v4  ;;  %v4273_v30 = vadd.f32 0.0036580483, %v4272_v41  ;;  %v12951_v59 = vmin.f32 %v4388_v23, 16.0 }
 0x417   : > { %v4212_v38 = vmul.f32 %v12936_v39, %v12895_v29  ;;  %v4310_v2 = vmul.f32 2.1237322e-06, %v12839_v47  ;;  %v4326_v20 = vadd.f32 0.112945676, %v4325_v49  ;;  %v12957_v48 = vmul.f32 0.70710677, %v12934_v42 }
 0x418   : > { %vm4181_vm2 = vcmp.eq.f32.partialorder %v4180_v44, 8.507059e+37  ;;  %v4199_v61 = vadd.f32 1.1283791, %v4198_v5  ;;  %v12960_v63 = vmul.f32 0.5, %v12700_v0  ;;  %v4289_v54 = vmul.f32 %v4288_v18, %v12759_v62 }
 0x419   : > { %v12964_v9 = vmul.f32 %v6497_v33, %v12686_v8  ;;  %v4184_v53 = vsel %vm4181_vm2, %v4183_v55, %v4179_v46  ;;  %v4237_v24 = vadd.f32 0.18741608, %v4236_v17  ;;  %v4364_v37 = vadd.f32 0.014752088, %v4363_v43 }
 0x41a   : > { %v12966_v10 = vpop.eup %8272  ;;  %v6498_v4 = vadd.f32 1.0, %v7770_v19  ;;  %v4274_v41 = vmul.f32 %v4273_v30, %v12759_v62  ;;  %v12970_v23 = vmul.f32 0.5, %v12752_v13  ;;  %v4401_v0 = vmul.f32 3.8918573e-05, %v12951_v59 }
 0x41b   : > { %16505 = vst [vmem:[#allocation24_spill] sm:$0xff] %v12964_v9  ;;  %v4213_v49 = vsub.f32 1.0, %v4212_v38  ;;  %v4311_v44 = vadd.f32 0.00028619796, %v4310_v2  ;;  %v4327_v5 = vmul.f32 %v4326_v20, %v12839_v47  ;;  %v4428_v8 = vmul.f32 %v12957_v48, %v12957_v48 }
 0x41c   : > { %v4185_v33 = vmul.f32 %v4184_v53, %v4160_v7  ;;  %v12977_v18 = vmul.f32 %v4199_v61, %v12624_v28  ;;  %v12979_v50 = vadd.f32 1.0, %v4289_v54  ;;  %v12982_v55 = vadd.f32 %v1019_v36, %v8930_v25 }
 0x41d   : > { %vm4216_vm3 = vweird.f32 %v12895_v29  ;;  %v4222_v13 = vand.u32 2147483648, %v12895_v29  ;;  %v4238_v17 = vmul.f32 %v4237_v24, %v12697_v31  ;;  %v4252_v43 = vmul.f32 %v12966_v10, %v12922_v40 }
 0x41e   : > { %v4365_v19 = vmul.f32 %v4364_v37, %v12893_v16  ;;  %v12991_v7 = vmul.f32 %v6498_v4, %v12689_v6  ;;  %v4220_v28 = vand.u32 2147483647, %v12895_v29  ;;  %v4275_v46 = vadd.f32 0.05243302, %v4274_v41  ;;  %v755_v4 = vpop.f32.mrf.mxu0 }
 0x41f   : > { %v4402_v30 = vadd.f32 0.001143296, %v4401_v0  ;;  %v4214_v38 = vmul.f32 %v12936_v39, %v4213_v49  ;;  %v4312_v2 = vmul.f32 %v4311_v44, %v12839_v47  ;;  %v4328_v20 = vadd.f32 0.4994258, %v4327_v5  ;;  %v844_v5 = vpop.f32.mrf.mxu1 }
 0x420   : > { %16506 = vst [vmem:[#allocation34_spill] sm:$0xff] %v12991_v7  ;;  %v12996_v61 = vmin.f32 %v4428_v8, 16.0  ;;  %v7771_v31 = vclamps-f32 %v4185_v33, 1.0  ;;  %8274 = vrcp.f32 %v12979_v50  ;;  %v4350_v54 = vmul.f32 2.1237322e-06, %v12893_v16 }
 0x421   : > { %v13001_v53 = vmul.f32 0.70710677, %v12982_v55  ;;  %v4223_v6 = vor.u32 1.1754944e-38, %v4222_v13  ;;  %v4239_v24 = vadd.f32 1.1283791, %v4238_v17  ;;  %v4253_v37 = vsub.f32 1.0, %v4252_v43 }
 0x422   : > { %v4366_v36 = vadd.f32 0.112945676, %v4365_v19  ;;  %vm4217_vm4 = vweird.f32 %v12936_v39  ;;  %vm13004_vm5 = vcmp.eq.f32.partialorder %v4220_v28, 8.507059e+37  ;;  %v4276_v0 = vmul.f32 %v4275_v46, %v12759_v62 }
 0x423   : > { %v13010_v49 = vmul.f32 0.5, %v12825_v15  ;;  %v4403_v44 = vmul.f32 %v4402_v30, %v12951_v59  ;;  %v4215_v8 = vadd.f32 %v12936_v39, %v4214_v38  ;;  %v4313_v33 = vadd.f32 0.0036580483, %v4312_v2  ;;  %vm13035_vm6 = vmor %vm4216_vm3, %vm4217_vm4 }
 0x424   : > { %v4329_v13 = vmul.f32 %v4328_v20, %v12839_v47  ;;  %v4441_v17 = vmul.f32 3.8918573e-05, %v12996_v61  ;;  %v6499_v43 = vadd.f32 1.0, %v7771_v31  ;;  %v4351_v19 = vadd.f32 0.00028619796, %v4350_v54 }
 0x425   : > { %v4468_v28 = vmul.f32 %v13001_v53, %v13001_v53  ;;  %v13019_v46 = vadd.f32 %v755_v4, %v8891_v1  ;;  %v13022_v15 = vmul.f32 %v4239_v24, %v12650_v60  ;;  %v4254_v30 = vmul.f32 %v12966_v10, %v4253_v37 }
 0x426   : > { %v4367_v38 = vmul.f32 %v4366_v36, %v12893_v16  ;;  %v13027_v2 = vadd.f32 %v844_v5, %v8893_v3  ;;  %v13029_v20 = vpop.eup %8274  ;;  %vm4256_vm7 = vweird.f32 %v12922_v40  ;;  %v4262_v60 = vand.u32 2147483648, %v12922_v40 }
 0x427   : > { %v4277_v54 = vadd.f32 0.18741608, %v4276_v0  ;;  %v4404_v24 = vadd.f32 0.014752088, %v4403_v44  ;;  %v4219_v37 = vsel %vm13035_vm6, %v12936_v39, %v4215_v8  ;;  %v4314_v36 = vmul.f32 %v4313_v33, %v12839_v47 }
 0x428   : > { %v13045_v4 = vadd.f32 1.0, %v4329_v13  ;;  %v4442_v5 = vadd.f32 0.001143296, %v4441_v17  ;;  %vm4257_vm8 = vweird.f32 %v12966_v10  ;;  %v4352_v29 = vmul.f32 %v4351_v19, %v12893_v16 }
 0x429   : > { %v13049_v45 = vmin.f32 %v4468_v28, 16.0  ;;  %v13052_v7 = vmul.f32 0.70710677, %v13019_v46  ;;  %v4255_v0 = vadd.f32 %v12966_v10, %v4254_v30  ;;  %v4292_v44 = vmul.f32 %v13029_v20, %v12979_v50  ;;  %vm13072_vm9 = vmor %vm4256_vm7, %vm4257_vm8 }
 0x42a   : > { %v4368_v39 = vadd.f32 0.4994258, %v4367_v38  ;;  %v13058_v8 = vmul.f32 0.70710677, %v13027_v2  ;;  %v4260_v33 = vand.u32 2147483647, %v12922_v40  ;;  %v4278_v13 = vmul.f32 %v4277_v54, %v12759_v62 }
 0x42b   : > { %v4390_v17 = vmul.f32 2.1237322e-06, %v12951_v59  ;;  %v4405_v19 = vmul.f32 %v4404_v24, %v12951_v59  ;;  %v4224_v28 = vsel %vm13004_vm5, %v4223_v6, %v4219_v37  ;;  %v4315_v31 = vadd.f32 0.05243302, %v4314_v36 }
 0x42c   : > { %8276 = vrcp.f32 %v13045_v4  ;;  %v4443_v30 = vmul.f32 %v4442_v5, %v12996_v61  ;;  %v4263_v62 = vor.u32 1.1754944e-38, %v4262_v60  ;;  %v4353_v54 = vadd.f32 0.0036580483, %v4352_v29 }
 0x42d   : > { %v4481_v24 = vmul.f32 3.8918573e-05, %v13049_v45  ;;  %v4508_v6 = vmul.f32 %v13052_v7, %v13052_v7  ;;  %v4259_v41 = vsel %vm13072_vm9, %v12966_v10, %v4255_v0  ;;  %v4293_v37 = vsub.f32 1.0, %v4292_v44 }
 0x42e   : > { %v4369_v36 = vmul.f32 %v4368_v39, %v12893_v16  ;;  %v4548_v40 = vmul.f32 %v13058_v8, %v13058_v8  ;;  %v4225_v5 = vmul.f32 %v4224_v28, %v12977_v18  ;;  %v4279_v9 = vadd.f32 1.1283791, %v4278_v13 }
 0x42f   : > { %v4391_v60 = vadd.f32 0.00028619796, %v4390_v17  ;;  %v4406_v29 = vadd.f32 0.112945676, %v4405_v19  ;;  %v13087_v35 = vmul.f32 %v6499_v43, %v12734_v57  ;;  %vm4261_vm10 = vcmp.eq.f32.partialorder %v4260_v33, 8.507059e+37 }
 0x430   : > { %v4316_v56 = vmul.f32 %v4315_v31, %v12839_v47  ;;  %v4444_v58 = vadd.f32 0.014752088, %v4443_v30  ;;  %v4264_v38 = vsel %vm4261_vm10, %v4263_v62, %v4259_v41  ;;  %v13091_v10 = vmul.f32 0.5, %v12899_v21 }
 0x431   : > { %16513 = vst [vmem:[#allocation38_spill] sm:$0xff] %v13087_v35  ;;  %v4482_v0 = vadd.f32 0.001143296, %v4481_v24  ;;  %v13093_v44 = vmin.f32 %v4508_v6, 16.0  ;;  %v4294_v18 = vmul.f32 %v13029_v20, %v4293_v37  ;;  %v4354_v13 = vmul.f32 %v4353_v54, %v12893_v16 }
 0x432   : > { %v13095_v39 = vpop.eup %8276  ;;  %v13099_v17 = vadd.f32 1.0, %v4369_v36  ;;  %v13101_v57 = vmin.f32 %v4548_v40, 16.0  ;;  %v7772_v43 = vclamps-f32 %v4225_v5, 1.0  ;;  %v4280_v33 = vmul.f32 %v4279_v9, %v12718_v14 }
 0x433   : > { %v4392_v19 = vmul.f32 %v4391_v60, %v12951_v59  ;;  %v4407_v21 = vmul.f32 %v4406_v29, %v12951_v59  ;;  %vm4297_vm11 = vweird.f32 %v13029_v20  ;;  %v4300_v28 = vand.u32 2147483647, %v12979_v50 }
 0x434   : > { %v4317_v31 = vadd.f32 0.18741608, %v4316_v56  ;;  %v4445_v30 = vmul.f32 %v4444_v58, %v12996_v61  ;;  %v4265_v62 = vmul.f32 %v4264_v38, %v13022_v15  ;;  %v4332_v54 = vmul.f32 %v13095_v39, %v13045_v4 }
 0x435   : > { %v4483_v24 = vmul.f32 %v4482_v0, %v13049_v45  ;;  %v4521_v14 = vmul.f32 3.8918573e-05, %v13093_v44  ;;  %v4295_v9 = vadd.f32 %v13029_v20, %v4294_v18  ;;  %v4355_v6 = vadd.f32 0.05243302, %v4354_v13 }
 0x436   : > { %8278 = vrcp.f32 %v13099_v17  ;;  %v4561_v41 = vmul.f32 3.8918573e-05, %v13101_v57  ;;  %vm4296_vm12 = vweird.f32 %v12979_v50  ;;  %v4302_v56 = vand.u32 2147483648, %v12979_v50 }
 0x437   : > { %v4393_v58 = vadd.f32 0.0036580483, %v4392_v19  ;;  %v4408_v15 = vadd.f32 0.4994258, %v4407_v21  ;;  %v6500_v37 = vadd.f32 1.0, %v7772_v43  ;;  %vm13119_vm13 = vcmp.eq.f32.partialorder %v4300_v28, 8.507059e+37  ;;  %vm13126_vm14 = vmor %vm4296_vm12, %vm4297_vm11 }
 0x438   : > { %v4318_v40 = vmul.f32 %v4317_v31, %v12839_v47  ;;  %v4446_v5 = vadd.f32 0.112945676, %v4445_v30  ;;  %v7773_v60 = vclamps-f32 %v4265_v62, 1.0  ;;  %v4333_v38 = vsub.f32 1.0, %v4332_v54 }
 0x439   : > { %v4484_v0 = vadd.f32 0.014752088, %v4483_v24  ;;  %v4522_v50 = vadd.f32 0.001143296, %v4521_v14  ;;  %v4299_v18 = vsel %vm13126_vm14, %v13029_v20, %v4295_v9  ;;  %v4356_v13 = vmul.f32 %v4355_v6, %v12893_v16 }
 0x43a   : > { %v4430_v43 = vmul.f32 2.1237322e-06, %v12996_v61  ;;  %v4562_v47 = vadd.f32 0.001143296, %v4561_v41  ;;  %v4303_v19 = vor.u32 1.1754944e-38, %v4302_v56  ;;  %v4394_v21 = vmul.f32 %v4393_v58, %v12951_v59 }
 0x43b   : > { %v4409_v28 = vmul.f32 %v4408_v15, %v12951_v59  ;;  %v4470_v31 = vmul.f32 2.1237322e-06, %v13049_v45  ;;  %v13141_v62 = vmul.f32 %v6500_v37, %v12797_v26  ;;  %v4319_v54 = vadd.f32 1.1283791, %v4318_v40 }
 0x43c   : > { %v13138_v30 = vpop.eup %8278  ;;  %v13144_v20 = vmul.f32 0.5, %v12934_v42  ;;  %v4447_v24 = vmul.f32 %v4446_v5, %v12996_v61  ;;  %v4304_v14 = vsel %vm13119_vm13, %v4303_v19, %v4299_v18  ;;  %v4334_v9 = vmul.f32 %v13095_v39, %v4333_v38  ;;  %v933_v18 = vpop.f32.mrf.mxu2 }
 0x43d   : > { %16518 = vst [vmem:[#allocation35_spill] sm:$0xff] %v13141_v62  ;;  %v4485_v6 = vmul.f32 %v4484_v0, %v13049_v45  ;;  %v4523_v41 = vmul.f32 %v4522_v50, %v13093_v44  ;;  %v6501_v56 = vadd.f32 1.0, %v7773_v60  ;;  %v4357_v58 = vadd.f32 0.18741608, %v4356_v13 }
 0x43e   : > { %v4431_v15 = vadd.f32 0.00028619796, %v4430_v43  ;;  %v4563_v26 = vmul.f32 %v4562_v47, %v13101_v57  ;;  %v4372_v42 = vmul.f32 %v13138_v30, %v13099_v17  ;;  %v4395_v37 = vadd.f32 0.05243302, %v4394_v21 }
 0x43f   : > { %v13155_v40 = vadd.f32 1.0, %v4409_v28  ;;  %v4471_v5 = vadd.f32 0.00028619796, %v4470_v31  ;;  %v4305_v36 = vmul.f32 %v4304_v14, %v4280_v33  ;;  %vm4336_vm15 = vweird.f32 %v13045_v4 }
 0x440   : > { %v4340_v29 = vand.u32 2147483647, %v13045_v4  ;;  %v4448_v38 = vadd.f32 0.4994258, %v4447_v24  ;;  %v4335_v0 = vadd.f32 %v13095_v39, %v4334_v9  ;;  %vm4337_vm0 = vweird.f32 %v13095_v39 }
 0x441   : > { %v4486_v60 = vadd.f32 0.112945676, %v4485_v6  ;;  %v4524_v50 = vadd.f32 0.014752088, %v4523_v41  ;;  %v4342_v13 = vand.u32 2147483648, %v13045_v4  ;;  %v4358_v43 = vmul.f32 %v4357_v58, %v12893_v16  ;;  %vm13170_vm1 = vmor %vm4336_vm15, %vm4337_vm0 }
 0x442   : > { %v4432_v47 = vmul.f32 %v4431_v15, %v12996_v61  ;;  %v4564_v19 = vadd.f32 0.014752088, %v4563_v26  ;;  %v4373_v33 = vsub.f32 1.0, %v4372_v42  ;;  %v4396_v21 = vmul.f32 %v4395_v37, %v12951_v59 }
 0x443   : > { %8280 = vrcp.f32 %v13155_v40  ;;  %v4472_v28 = vmul.f32 %v4471_v5, %v13049_v45  ;;  %v7774_v31 = vclamps-f32 %v4305_v36, 1.0  ;;  %v4320_v24 = vmul.f32 %v4319_v54, %v12788_v52 }
 0x444   : > { %v4449_v16 = vmul.f32 %v4448_v38, %v12996_v61  ;;  %v13176_v9 = vadd.f32 %v933_v18, %v8910_v12  ;;  %v4339_v6 = vsel %vm13170_vm1, %v13095_v39, %v4335_v0  ;;  %vm4341_vm2 = vcmp.eq.f32.partialorder %v4340_v29, 8.507059e+37 }
 0x445   : > { %v4487_v41 = vmul.f32 %v4486_v60, %v13049_v45  ;;  %v4525_v52 = vmul.f32 %v4524_v50, %v13093_v44  ;;  %v4343_v54 = vor.u32 1.1754944e-38, %v4342_v13  ;;  %v4433_v4 = vadd.f32 0.0036580483, %v4432_v47  ;;  %v1022_v13 = vpop.f32.mrf.mxu3 }
 0x446   : > { %v13184_v58 = vmul.f32 0.5, %v12982_v55  ;;  %v4565_v15 = vmul.f32 %v4564_v19, %v13101_v57  ;;  %v4359_v26 = vadd.f32 1.1283791, %v4358_v43  ;;  %v4374_v42 = vmul.f32 %v13138_v30, %v4373_v33 }
 0x447   : > { %v4397_v37 = vadd.f32 0.18741608, %v4396_v21  ;;  %v4473_v5 = vadd.f32 0.0036580483, %v4472_v28  ;;  %v6502_v36 = vadd.f32 1.0, %v7774_v31  ;;  %v4344_v38 = vsel %vm4341_vm2, %v4343_v54, %v4339_v6  ;;  %v757_v6 = vpop.f32.mrf.mxu0 }
 0x448   : > { %v13188_v39 = vadd.f32 1.0, %v4449_v16  ;;  %v13191_v29 = vmul.f32 0.70710677, %v13176_v9  ;;  %v13196_v60 = vmul.f32 %v6501_v56, %v12848_v22  ;;  %v4488_v55 = vadd.f32 0.4994258, %v4487_v41 }
 0x449   : > { %v13193_v0 = vpop.eup %8280  ;;  %v4510_v50 = vmul.f32 2.1237322e-06, %v13093_v44  ;;  %v4526_v18 = vadd.f32 0.112945676, %v4525_v52  ;;  %vm4376_vm3 = vweird.f32 %v13099_v17  ;;  %vm4377_vm4 = vweird.f32 %v13138_v30 }
 0x44a   : > { %16521 = vst [vmem:[#allocation39_spill] sm:$0xff] %v13196_v60  ;;  %v4434_v43 = vmul.f32 %v4433_v4, %v12996_v61  ;;  %v4566_v47 = vadd.f32 0.112945676, %v4565_v15  ;;  %v4345_v19 = vmul.f32 %v4344_v38, %v4320_v24  ;;  %v4375_v33 = vadd.f32 %v13138_v30, %v4374_v42  ;;  %vm13221_vm5 = vmor %vm4376_vm3, %vm4377_vm4 }
 0x44b   : > { %v4398_v21 = vmul.f32 %v4397_v37, %v12951_v59  ;;  %v4474_v22 = vmul.f32 %v4473_v5, %v13049_v45  ;;  %v4382_v56 = vand.u32 2147483648, %v13099_v17  ;;  %v4412_v28 = vmul.f32 %v13193_v0, %v13155_v40 }
 0x44c   : > { %v4588_v31 = vmul.f32 %v13191_v29, %v13191_v29  ;;  %v13211_v14 = vadd.f32 %v1022_v13, %v8930_v25  ;;  %8282 = vrcp.f32 %v13188_v39  ;;  %v4489_v24 = vmul.f32 %v4488_v55, %v13049_v45 }
 0x44d   : > { %v4511_v16 = vadd.f32 0.00028619796, %v4510_v50  ;;  %v4527_v59 = vmul.f32 %v4526_v18, %v13093_v44  ;;  %v4360_v41 = vmul.f32 %v4359_v26, %v12845_v34  ;;  %v4380_v54 = vand.u32 2147483647, %v13099_v17 }
 0x44e   : > { %v4435_v4 = vadd.f32 0.05243302, %v4434_v43  ;;  %v4567_v15 = vmul.f32 %v4566_v47, %v13101_v57  ;;  %v7775_v42 = vclamps-f32 %v4345_v19, 1.0  ;;  %v4379_v37 = vsel %vm13221_vm5, %v13138_v30, %v4375_v33 }
 0x44f   : > { %v4399_v5 = vadd.f32 1.1283791, %v4398_v21  ;;  %v4475_v34 = vadd.f32 0.05243302, %v4474_v22  ;;  %v4413_v26 = vsub.f32 1.0, %v4412_v28  ;;  %v13230_v38 = vmin.f32 %v4588_v31, 16.0 }
 0x450   : > { %v13233_v55 = vmul.f32 0.70710677, %v13211_v14  ;;  %v13236_v50 = vadd.f32 %v757_v6, %v8891_v1  ;;  %v4383_v17 = vor.u32 1.1754944e-38, %v4382_v56  ;;  %v13238_v18 = vadd.f32 1.0, %v4489_v24 }
 0x451   : > { %v4512_v13 = vmul.f32 %v4511_v16, %v13093_v44  ;;  %v4528_v43 = vadd.f32 0.4994258, %v4527_v59  ;;  %v13242_v47 = vmul.f32 %v6502_v36, %v12960_v63  ;;  %vm4381_vm6 = vcmp.eq.f32.partialorder %v4380_v54, 8.507059e+37 }
 0x452   : > { %v4436_v30 = vmul.f32 %v4435_v4, %v12996_v61  ;;  %v4568_v19 = vadd.f32 0.4994258, %v4567_v15  ;;  %v13245_v33 = vpop.eup %8282  ;;  %v6503_v21 = vadd.f32 1.0, %v7775_v42  ;;  %v4384_v22 = vsel %vm4381_vm6, %v4383_v17, %v4379_v37 }
 0x453   : > { %16524 = vst [vmem:[#allocation40_spill] sm:$0xff] %v13242_v47  ;;  %v13248_v28 = vmul.f32 %v4399_v5, %v12914_v11  ;;  %v4476_v56 = vmul.f32 %v4475_v34, %v13049_v45  ;;  %v4414_v31 = vmul.f32 %v13193_v0, %v4413_v26  ;;  %v4601_v24 = vmul.f32 3.8918573e-05, %v13230_v38  ;;  %v846_v34 = vpop.f32.mrf.mxu1 }
 0x454   : > { %v4628_v63 = vmul.f32 %v13233_v55, %v13233_v55  ;;  %v13256_v36 = vmul.f32 0.70710677, %v13236_v50  ;;  %8284 = vrcp.f32 %v13238_v18  ;;  %v4513_v16 = vadd.f32 0.0036580483, %v4512_v13 }
 0x455   : > { %v4529_v59 = vmul.f32 %v4528_v43, %v13093_v44  ;;  %v4550_v11 = vmul.f32 2.1237322e-06, %v13101_v57  ;;  %v4437_v6 = vadd.f32 0.18741608, %v4436_v30  ;;  %v4452_v52 = vmul.f32 %v13245_v33, %v13188_v39 }
 0x456   : > { %v13264_v54 = vmul.f32 0.5, %v13019_v46  ;;  %v4569_v4 = vmul.f32 %v4568_v19, %v13101_v57  ;;  %v4385_v15 = vmul.f32 %v4384_v22, %v4360_v41  ;;  %v4420_v42 = vand.u32 2147483647, %v13155_v40 }
 0x457   : > { %v4422_v37 = vand.u32 2147483648, %v13155_v40  ;;  %v4477_v5 = vadd.f32 0.18741608, %v4476_v56  ;;  %vm4417_vm7 = vweird.f32 %v13193_v0  ;;  %v4602_v26 = vadd.f32 0.001143296, %v4601_v24 }
 0x458   : > { %v13270_v17 = vmin.f32 %v4628_v63, 16.0  ;;  %v4668_v13 = vmul.f32 %v13256_v36, %v13256_v36  ;;  %v4415_v46 = vadd.f32 %v13193_v0, %v4414_v31  ;;  %v4514_v43 = vmul.f32 %v4513_v16, %v13093_v44 }
 0x459   : > { %v13276_v30 = vadd.f32 1.0, %v4529_v59  ;;  %v4551_v41 = vadd.f32 0.00028619796, %v4550_v11  ;;  %vm4416_vm8 = vweird.f32 %v13155_v40  ;;  %v4453_v19 = vsub.f32 1.0, %v4452_v52 }
 0x45a   : > { %v13279_v22 = vadd.f32 1.0, %v4569_v4  ;;  %v13282_v56 = vadd.f32 %v846_v34, %v8893_v3  ;;  %v13284_v24 = vpop.eup %8284  ;;  %v7776_v63 = vclamps-f32 %v4385_v15, 1.0  ;;  %vm13286_vm9 = vcmp.eq.f32.partialorder %v4420_v42, 8.507059e+37  ;;  %vm13293_vm10 = vmor %vm4416_vm8, %vm4417_vm7 }
 0x45b   : > { %v4423_v31 = vor.u32 1.1754944e-38, %v4422_v37  ;;  %v4438_v16 = vmul.f32 %v4437_v6, %v12996_v61  ;;  %v4478_v59 = vmul.f32 %v4477_v5, %v13049_v45  ;;  %v4603_v11 = vmul.f32 %v4602_v26, %v13230_v38 }
 0x45c   : > { %v4641_v52 = vmul.f32 3.8918573e-05, %v13270_v17  ;;  %v13300_v4 = vmin.f32 %v4668_v13, 16.0  ;;  %v4419_v15 = vsel %vm13293_vm10, %v13193_v0, %v4415_v46  ;;  %v4515_v42 = vadd.f32 0.05243302, %v4514_v43 }
 0x45d   : > { %8286 = vrcp.f32 %v13276_v30  ;;  %v4552_v61 = vmul.f32 %v4551_v41, %v13101_v57  ;;  %v4454_v6 = vmul.f32 %v13245_v33, %v4453_v19  ;;  %v4492_v45 = vmul.f32 %v13284_v24, %v13238_v18 }
 0x45e   : > { %8288 = vrcp.f32 %v13279_v22  ;;  %v13312_v37 = vmul.f32 0.70710677, %v13282_v56  ;;  %v13314_v5 = vadd.f32 1.0, %v7776_v63  ;;  %v4439_v34 = vadd.f32 1.1283791, %v4438_v16 }
 0x45f   : > { %v4460_v0 = vand.u32 2147483647, %v13188_v39  ;;  %v4462_v26 = vand.u32 2147483648, %v13188_v39  ;;  %v13319_v13 = vmul.f32 %v6503_v21, %v12970_v23  ;;  %v4604_v46 = vadd.f32 0.014752088, %v4603_v11 }
 0x460   : > { %v4642_v43 = vadd.f32 0.001143296, %v4641_v52  ;;  %v4681_v41 = vmul.f32 3.8918573e-05, %v13300_v4  ;;  %v4424_v19 = vsel %vm13286_vm9, %v4423_v31, %v4419_v15  ;;  %v4479_v40 = vadd.f32 1.1283791, %v4478_v59 }
 0x461   : > { %16529 = vst [vmem:[#allocation44_spill] sm:$0xff] %v13319_v13  ;;  %v4516_v60 = vmul.f32 %v4515_v42, %v13093_v44  ;;  %v4553_v63 = vadd.f32 0.0036580483, %v4552_v61  ;;  %v4455_v16 = vadd.f32 %v13245_v33, %v4454_v6  ;;  %vm4457_vm11 = vweird.f32 %v13245_v33 }
 0x462   : > { %v4493_v62 = vsub.f32 1.0, %v4492_v45  ;;  %v4708_v23 = vmul.f32 %v13312_v37, %v13312_v37  ;;  %v4440_v11 = vmul.f32 %v4439_v34, %v12957_v48  ;;  %vm4456_vm12 = vweird.f32 %v13188_v39 }
 0x463   : > { %v13329_v21 = vpop.eup %8286  ;;  %vm13333_vm13 = vcmp.eq.f32.partialorder %v4460_v0, 8.507059e+37  ;;  %v4463_v31 = vor.u32 1.1754944e-38, %v4462_v26  ;;  %v4425_v52 = vmul.f32 %v4424_v19, %v13248_v28  ;;  %v4605_v15 = vmul.f32 %v4604_v46, %v13230_v38  ;;  %vm13342_vm14 = vmor %vm4456_vm12, %vm4457_vm11 }
 0x464   : > { %v13337_v59 = vpop.eup %8288  ;;  %v4643_v42 = vmul.f32 %v4642_v43, %v13270_v17  ;;  %v4682_v61 = vadd.f32 0.001143296, %v4681_v41  ;;  %v13347_v48 = vmul.f32 %v4479_v40, %v13001_v53  ;;  %v4517_v39 = vadd.f32 0.18741608, %v4516_v60 }
 0x465   : > { %v4554_v45 = vmul.f32 %v4553_v63, %v13101_v57  ;;  %v4590_v34 = vmul.f32 2.1237322e-06, %v13230_v38  ;;  %v4459_v28 = vsel %vm13342_vm14, %v13245_v33, %v4455_v16  ;;  %v4494_v0 = vmul.f32 %v13284_v24, %v4493_v62 }
 0x466   : > { %v4532_v26 = vmul.f32 %v13329_v21, %v13276_v30  ;;  %v13357_v46 = vmin.f32 %v4708_v23, 16.0  ;;  %vm4496_vm15 = vweird.f32 %v13238_v18  ;;  %v4500_v53 = vand.u32 2147483647, %v13238_v18 }
 0x467   : > { %v4502_v60 = vand.u32 2147483648, %v13238_v18  ;;  %v4572_v43 = vmul.f32 %v13337_v59, %v13279_v22  ;;  %v7777_v41 = vclamps-f32 %v4425_v52, 1.0  ;;  %v4606_v19 = vadd.f32 0.112945676, %v4605_v15 }
 0x468   : > { %v4644_v40 = vadd.f32 0.014752088, %v4643_v42  ;;  %v4683_v33 = vmul.f32 %v4682_v61, %v13300_v4  ;;  %v4464_v62 = vsel %vm13333_vm13, %v4463_v31, %v4459_v28  ;;  %v4518_v63 = vmul.f32 %v4517_v39, %v13093_v44  ;;  %v935_v31 = vpop.f32.mrf.mxu2 }
 0x469   : > { %v4555_v16 = vadd.f32 0.05243302, %v4554_v45  ;;  %v4591_v23 = vadd.f32 0.00028619796, %v4590_v34  ;;  %v4495_v6 = vadd.f32 %v13284_v24, %v4494_v0  ;;  %vm4497_vm0 = vweird.f32 %v13284_v24 }
 0x46a   : > { %v4533_v13 = vsub.f32 1.0, %v4532_v26  ;;  %v4721_v35 = vmul.f32 3.8918573e-05, %v13357_v46  ;;  %vm13371_vm1 = vcmp.eq.f32.partialorder %v4500_v53, 8.507059e+37  ;;  %v4503_v15 = vor.u32 1.1754944e-38, %v4502_v60  ;;  %vm13384_vm2 = vmor %vm4496_vm15, %vm4497_vm0 }
 0x46b   : > { %v4573_v42 = vsub.f32 1.0, %v4572_v43  ;;  %v4630_v47 = vmul.f32 2.1237322e-06, %v13270_v17  ;;  %v13376_v61 = vadd.f32 1.0, %v7777_v41  ;;  %v4607_v44 = vmul.f32 %v4606_v19, %v13230_v38 }
 0x46c   : > { %v4645_v39 = vmul.f32 %v4644_v40, %v13270_v17  ;;  %v4684_v45 = vadd.f32 0.014752088, %v4683_v33  ;;  %v13380_v34 = vmul.f32 %v4464_v62, %v4440_v11  ;;  %v13388_v0 = vadd.f32 1.1283791, %v4518_v63 }
 0x46d   : > { %v4556_v26 = vmul.f32 %v4555_v16, %v13101_v57  ;;  %v4592_v53 = vmul.f32 %v4591_v23, %v13230_v38  ;;  %v4499_v60 = vsel %vm13384_vm2, %v13284_v24, %v4495_v6  ;;  %v4534_v43 = vmul.f32 %v13329_v21, %v4533_v13 }
 0x46e   : > { %v4722_v11 = vadd.f32 0.001143296, %v4721_v35  ;;  %v13397_v41 = vadd.f32 %v935_v31, %v8910_v12  ;;  %vm4536_vm3 = vweird.f32 %v13276_v30  ;;  %v4574_v18 = vmul.f32 %v13337_v59, %v4573_v42 }
 0x46f   : > { %v4631_v19 = vadd.f32 0.00028619796, %v4630_v47  ;;  %v4670_v40 = vmul.f32 2.1237322e-06, %v13300_v4  ;;  %v4540_v33 = vand.u32 2147483647, %v13276_v30  ;;  %v4685_v16 = vmul.f32 %v4684_v45, %v13300_v4 }
 0x470   : > { %v4608_v62 = vadd.f32 0.4994258, %v4607_v44  ;;  %v4646_v63 = vadd.f32 0.112945676, %v4645_v39  ;;  %v4504_v24 = vsel %vm13371_vm1, %v4503_v15, %v4499_v60  ;;  %v4542_v35 = vand.u32 2147483648, %v13276_v30 }
 0x471   : > { %v4557_v13 = vadd.f32 0.18741608, %v4556_v26  ;;  %v4593_v23 = vadd.f32 0.0036580483, %v4592_v53  ;;  %v4535_v6 = vadd.f32 %v13329_v21, %v4534_v43  ;;  %vm4537_vm4 = vweird.f32 %v13329_v21 }
 0x472   : > { %v4723_v42 = vmul.f32 %v4722_v11, %v13357_v46  ;;  %v13411_v47 = vmul.f32 0.70710677, %v13397_v41  ;;  %v4575_v31 = vadd.f32 %v13337_v59, %v4574_v18  ;;  %vm4577_vm5 = vweird.f32 %v13337_v59  ;;  %vm13424_vm7 = vmor %vm4536_vm3, %vm4537_vm4  ;;  %v1024_v11 = vpop.f32.mrf.mxu3 }
 0x473   : > { %v4632_v52 = vmul.f32 %v4631_v19, %v13270_v17  ;;  %v4671_v15 = vadd.f32 0.00028619796, %v4670_v40  ;;  %vm13416_vm6 = vcmp.eq.f32.partialorder %v4540_v33, 8.507059e+37  ;;  %v4609_v39 = vmul.f32 %v4608_v62, %v13230_v38 }
 0x474   : > { %v4647_v45 = vmul.f32 %v4646_v63, %v13270_v17  ;;  %v4686_v28 = vadd.f32 0.112945676, %v4685_v16  ;;  %v4558_v53 = vmul.f32 %v4557_v13, %v13101_v57  ;;  %vm4576_vm8 = vweird.f32 %v13279_v22 }
 0x475   : > { %v4582_v60 = vand.u32 2147483648, %v13279_v22  ;;  %v4594_v43 = vmul.f32 %v4593_v23, %v13230_v38  ;;  %v4543_v18 = vor.u32 1.1754944e-38, %v4542_v35  ;;  %vm13432_vm9 = vmor %vm4576_vm8, %vm4577_vm5  ;;  %v4580_v30 = vand.u32 2147483647, %v13279_v22 }
 0x476   : > { %v4724_v40 = vadd.f32 0.014752088, %v4723_v42  ;;  %v4748_v33 = vmul.f32 %v13411_v47, %v13411_v47  ;;  %v4539_v57 = vsel %vm13424_vm7, %v13329_v21, %v4535_v6  ;;  %v4579_v62 = vsel %vm13432_vm9, %v13337_v59, %v4575_v31 }
 0x477   : > { %v4633_v63 = vadd.f32 0.0036580483, %v4632_v52  ;;  %v4672_v16 = vmul.f32 %v4671_v15, %v13300_v4  ;;  %v13446_v35 = vadd.f32 1.0, %v4609_v39  ;;  %v4648_v13 = vadd.f32 0.4994258, %v4647_v45 }
 0x478   : > { %v4687_v22 = vmul.f32 %v4686_v28, %v13300_v4  ;;  %v13450_v23 = vadd.f32 %v1024_v11, %v8930_v25  ;;  %v4505_v42 = vmul.f32 %v4504_v24, %v13347_v48  ;;  %v4559_v32 = vadd.f32 1.1283791, %v4558_v53 }
 0x479   : > { %v4583_v26 = vor.u32 1.1754944e-38, %v4582_v60  ;;  %v4595_v21 = vadd.f32 0.05243302, %v4594_v43  ;;  %v4544_v6 = vsel %vm13416_vm6, %v4543_v18, %v4539_v57  ;;  %vm4581_vm10 = vcmp.eq.f32.partialorder %v4580_v30, 8.507059e+37 }
 0x47a   : > { %v4725_v59 = vmul.f32 %v4724_v40, %v13357_v46  ;;  %v13456_v31 = vmin.f32 %v4748_v33, 16.0  ;;  %v4634_v15 = vmul.f32 %v4633_v63, %v13270_v17  ;;  %v4673_v39 = vadd.f32 0.0036580483, %v4672_v16  ;;  %v760_v63 = vpop.f32.mrf.mxu0 }
 0x47b   : > { %v4584_v52 = vsel %vm4581_vm10, %v4583_v26, %v4579_v62  ;;  %v4710_v45 = vmul.f32 2.1237322e-06, %v13357_v46  ;;  %8290 = vrcp.f32 %v13446_v35  ;;  %v4649_v48 = vmul.f32 %v4648_v13, %v13270_v17 }
 0x47c   : > { %v4688_v24 = vadd.f32 0.4994258, %v4687_v22  ;;  %v13463_v28 = vmul.f32 0.70710677, %v13450_v23  ;;  %v7778_v44 = vclamps-f32 %v13380_v34, 1.0  ;;  %v4520_v53 = vmul.f32 %v13388_v0, %v13052_v7 }
 0x47d   : > { %v4560_v60 = vmul.f32 %v4559_v32, %v13058_v8  ;;  %v4596_v43 = vmul.f32 %v4595_v21, %v13230_v38  ;;  %v7779_v11 = vclamps-f32 %v4505_v42, 1.0  ;;  %v1133_v18 = vmul.f32 0.5, %v13027_v2 }
 0x47e   : > { %v4726_v19 = vadd.f32 0.112945676, %v4725_v59  ;;  %v4761_v30 = vmul.f32 3.8918573e-05, %v13456_v31  ;;  %v4545_v40 = vmul.f32 %v4544_v6, %v4520_v53  ;;  %v4674_v57 = vmul.f32 %v4673_v39, %v13300_v4 }
 0x47f   : > { %v4585_v33 = vmul.f32 %v4584_v52, %v4560_v60  ;;  %v4711_v62 = vadd.f32 0.00028619796, %v4710_v45  ;;  %v4635_v34 = vadd.f32 0.05243302, %v4634_v15  ;;  %v13473_v16 = vadd.f32 1.0, %v4649_v48 }
 0x480   : > { %v4689_v7 = vmul.f32 %v4688_v24, %v13300_v4  ;;  %v4788_v32 = vmul.f32 %v13463_v28, %v13463_v28  ;;  %v13480_v2 = vmul.f32 %v13314_v5, %v13010_v49  ;;  %v13484_v8 = vmul.f32 %v13376_v61, %v13091_v10 }
 0x481   : > { %v6506_v0 = vadd.f32 1.0, %v7778_v44  ;;  %v4597_v13 = vadd.f32 0.18741608, %v4596_v43  ;;  %v13486_v22 = vpop.eup %8290  ;;  %v6507_v42 = vadd.f32 1.0, %v7779_v11  ;;  %v4727_v26 = vmul.f32 %v4726_v19, %v13357_v46 }
 0x482   : > { %16544 = vst [vmem:[#allocation41_spill] sm:$0xff] %v13480_v2  ;;  %v4762_v21 = vadd.f32 0.001143296, %v4761_v30  ;;  %v13490_v6 = vadd.f32 %v760_v63, %v8891_v1  ;;  %v7780_v59 = vclamps-f32 %v4545_v40, 1.0  ;;  %v7781_v52 = vclamps-f32 %v4585_v33, 1.0 }
 0x483   : > { %16545 = vst [vmem:[#allocation45_spill] sm:$0xff] %v13484_v8  ;;  %v4675_v15 = vadd.f32 0.05243302, %v4674_v57  ;;  %v4712_v49 = vmul.f32 %v4711_v62, %v13357_v46  ;;  %v4636_v5 = vmul.f32 %v4635_v34, %v13270_v17  ;;  %8292 = vrcp.f32 %v13473_v16 }
 0x484   : > { %v13495_v10 = vadd.f32 1.0, %v4689_v7  ;;  %v13497_v61 = vmin.f32 %v4788_v32, 16.0  ;;  %v13500_v39 = vmul.f32 %v6506_v0, %v13144_v20  ;;  %v13503_v45 = vmul.f32 0.5, %v13176_v9 }
 0x485   : > { %v4598_v48 = vmul.f32 %v4597_v13, %v13230_v38  ;;  %v4612_v24 = vmul.f32 %v13486_v22, %v13446_v35  ;;  %v13509_v44 = vmul.f32 %v6507_v42, %v13184_v58  ;;  %v4728_v53 = vadd.f32 0.4994258, %v4727_v26  ;;  %v849_v26 = vpop.f32.mrf.mxu1 }
 0x486   : > { %16546 = vst [vmem:[#allocation42_spill] sm:$0xff] %v13500_v39  ;;  %v4763_v60 = vmul.f32 %v4762_v21, %v13456_v31  ;;  %v13513_v43 = vmul.f32 0.70710677, %v13490_v6  ;;  %v6508_v11 = vadd.f32 1.0, %v7780_v59  ;;  %v13516_v20 = vmul.f32 0.5, %v13211_v14 }
 0x487   : > { %16547 = vst [vmem:[#allocation46_spill] sm:$0xff] %v13509_v44  ;;  %v4676_v9 = vmul.f32 %v4675_v15, %v13300_v4  ;;  %v4713_v19 = vadd.f32 0.0036580483, %v4712_v49  ;;  %v6509_v38 = vadd.f32 1.0, %v7781_v52  ;;  %v4637_v30 = vadd.f32 0.18741608, %v4636_v5 }
 0x488   : > { %8294 = vrcp.f32 %v13495_v10  ;;  %v4801_v58 = vmul.f32 3.8918573e-05, %v13497_v61  ;;  %v4599_v40 = vadd.f32 1.1283791, %v4598_v48  ;;  %v4613_v33 = vsub.f32 1.0, %v4612_v24 }
 0x489   : > { %v13522_v57 = vmul.f32 0.5, %v13236_v50  ;;  %v4750_v62 = vmul.f32 2.1237322e-06, %v13456_v31  ;;  %v13525_v63 = vpop.eup %8292  ;;  %v13528_v14 = vmul.f32 0.5, %v13282_v56  ;;  %v4729_v34 = vmul.f32 %v4728_v53, %v13357_v46 }
 0x48a   : > { %v4764_v7 = vadd.f32 0.014752088, %v4763_v60  ;;  %v4828_v32 = vmul.f32 %v13513_v43, %v13513_v43  ;;  %v13534_v0 = vmul.f32 %v6508_v11, %v13264_v54  ;;  %v4620_v13 = vand.u32 2147483647, %v13446_v35 }
 0x48b   : > { %v4677_v50 = vadd.f32 0.18741608, %v4676_v9  ;;  %v4714_v42 = vmul.f32 %v4713_v19, %v13357_v46  ;;  %v13538_v21 = vmul.f32 %v6509_v38, %v1133_v18  ;;  %v4622_v56 = vand.u32 2147483648, %v13446_v35 }
 0x48c   : > { %16548 = vst [vmem:[#allocation43_spill] sm:$0xff] %v13534_v0  ;;  %v4638_v59 = vmul.f32 %v4637_v30, %v13270_v17  ;;  %v4802_v52 = vadd.f32 0.001143296, %v4801_v58  ;;  %v13543_v15 = vmul.f32 %v4599_v40, %v13191_v29  ;;  %v4614_v49 = vmul.f32 %v13486_v22, %v4613_v33  ;;  %v938_v30 = vpop.f32.mrf.mxu2  ;;  %v16565_v0 = vld [vmem:[#allocation53_spill] sm:$0xff] }
 0x48d   : > { %16549 = vst [vmem:[#allocation47_spill] sm:$0xff] %v13538_v21  ;;  %v4652_v54 = vmul.f32 %v13525_v63, %v13473_v16  ;;  %v4751_v5 = vadd.f32 0.00028619796, %v4750_v62  ;;  %v13550_v24 = vadd.f32 1.0, %v4729_v34  ;;  %v4765_v18 = vmul.f32 %v4764_v7, %v13456_v31 }
 0x48e   : > { %v13548_v48 = vpop.eup %8294  ;;  %v13553_v53 = vmin.f32 %v4828_v32, 16.0  ;;  %v13556_v17 = vadd.f32 %v849_v26, %v8893_v3  ;;  %vm4616_vm11 = vweird.f32 %v13446_v35  ;;  %vm13559_vm12 = vcmp.eq.f32.partialorder %v4620_v13, 8.507059e+37  ;;  %v16557_v26 = vld [vmem:[#allocation52_spill] sm:$0xff] }
 0x48f   : > { %v4678_v60 = vmul.f32 %v4677_v50, %v13300_v4  ;;  %v4715_v11 = vadd.f32 0.05243302, %v4714_v42  ;;  %vm4617_vm13 = vweird.f32 %v13486_v22  ;;  %v4623_v9 = vor.u32 1.1754944e-38, %v4622_v56 }
 0x490   : > { %v4639_v19 = vadd.f32 1.1283791, %v4638_v59  ;;  %v4803_v38 = vmul.f32 %v4802_v52, %v13497_v61  ;;  %v4615_v58 = vadd.f32 %v13486_v22, %v4614_v49  ;;  %v4653_v40 = vsub.f32 1.0, %v4652_v54  ;;  %vm13584_vm14 = vmor %vm4616_vm11, %vm4617_vm13 }
 0x491   : > { %v4692_v33 = vmul.f32 %v13548_v48, %v13495_v10  ;;  %v4752_v62 = vmul.f32 %v4751_v5, %v13456_v31  ;;  %8296 = vrcp.f32 %v13550_v24  ;;  %v4766_v34 = vadd.f32 0.112945676, %v4765_v18 }
 0x492   : > { %v4841_v4 = vmul.f32 3.8918573e-05, %v13553_v53  ;;  %v13573_v7 = vmul.f32 0.70710677, %v13556_v17  ;;  %v4662_v32 = vand.u32 2147483648, %v13473_v16  ;;  %v4716_v50 = vmul.f32 %v4715_v11, %v13357_v46 }
 0x493   : > { %v4679_v13 = vadd.f32 1.1283791, %v4678_v60  ;;  %v13578_v42 = vadd.f32 %v938_v30, %v8910_v12  ;;  %v13589_v56 = vmul.f32 %v4639_v19, %v13233_v55  ;;  %v4660_v59 = vand.u32 2147483647, %v13473_v16 }
 0x494   : > { %v13593_v52 = vmul.f32 0.5, %v13397_v41  ;;  %v4804_v49 = vadd.f32 0.014752088, %v4803_v38  ;;  %v4619_v54 = vsel %vm13584_vm14, %v13486_v22, %v4615_v58  ;;  %v4654_v5 = vmul.f32 %v13525_v63, %v4653_v40 }
 0x495   : > { %v4693_v35 = vsub.f32 1.0, %v4692_v33  ;;  %v4753_v18 = vadd.f32 0.0036580483, %v4752_v62  ;;  %vm4656_vm15 = vweird.f32 %v13473_v16  ;;  %v4767_v60 = vmul.f32 %v4766_v34, %v13456_v31 }
 0x496   : > { %v4842_v55 = vadd.f32 0.001143296, %v4841_v4  ;;  %v4868_v11 = vmul.f32 %v13573_v7, %v13573_v7  ;;  %v4663_v19 = vor.u32 1.1754944e-38, %v4662_v32  ;;  %v13604_v41 = vmul.f32 %v4679_v13, %v13256_v36 }
 0x497   : > { %v4717_v38 = vadd.f32 0.18741608, %v4716_v50  ;;  %v13607_v30 = vmul.f32 0.70710677, %v13578_v42  ;;  %v13609_v22 = vpop.eup %8296  ;;  %v4624_v58 = vsel %vm13559_vm12, %v4623_v9, %v4619_v54  ;;  %vm13613_vm0 = vcmp.eq.f32.partialorder %v4660_v59, 8.507059e+37  ;;  %v16556_v50 = vld [vmem:[#allocation48_spill] sm:$0xff] }
 0x498   : > { %v4700_v33 = vand.u32 2147483647, %v13495_v10  ;;  %v4790_v62 = vmul.f32 2.1237322e-06, %v13497_v61  ;;  %v4805_v36 = vmul.f32 %v4804_v49, %v13497_v61  ;;  %v4655_v34 = vadd.f32 %v13525_v63, %v4654_v5 }
 0x499   : > { %vm4657_vm1 = vweird.f32 %v13525_v63  ;;  %v4694_v4 = vmul.f32 %v13548_v48, %v4693_v35  ;;  %v4754_v32 = vmul.f32 %v4753_v18, %v13456_v31  ;;  %v4768_v29 = vadd.f32 0.4994258, %v4767_v60 }
 0x49a   : > { %v4843_v9 = vmul.f32 %v4842_v55, %v13553_v53  ;;  %v13625_v13 = vmin.f32 %v4868_v11, 16.0  ;;  %v6700_v59 = vpack.c.bf16 %v16557_v26, %v16556_v50  ;;  %v4702_v54 = vand.u32 2147483648, %v13495_v10  ;;  %vm13638_vm2 = vmor %vm4656_vm15, %vm4657_vm1 }
 0x49b   : > { %v4718_v49 = vmul.f32 %v4717_v38, %v13357_v46  ;;  %v4732_v5 = vmul.f32 %v13609_v22, %v13550_v24  ;;  %v4908_v35 = vmul.f32 %v13607_v30, %v13607_v30  ;;  %v4625_v18 = vmul.f32 %v4624_v58, %v13543_v15  ;;  %v1027_v15 = vpop.f32.mrf.mxu3 }
 0x49c   : > { %vm4696_vm3 = vweird.f32 %v13495_v10  ;;  %v4791_v55 = vadd.f32 0.00028619796, %v4790_v62  ;;  %v4806_v11 = vadd.f32 0.112945676, %v4805_v36  ;;  %7036 = vmatmul.bf16.gmra.mxu0 %v6700_v59  ;;  %v4659_v46 = vsel %vm13638_vm2, %v13525_v63, %v4655_v34 }
 0x49d   : > { %vm4697_vm4 = vweird.f32 %v13548_v48  ;;  %vm13647_vm5 = vcmp.eq.f32.partialorder %v4700_v33, 8.507059e+37  ;;  %v4755_v16 = vadd.f32 0.05243302, %v4754_v32  ;;  %v4695_v58 = vadd.f32 %v13548_v48, %v4694_v4 }
 0x49e   : > { %v4769_v50 = vmul.f32 %v4768_v29, %v13456_v31  ;;  %v4844_v26 = vadd.f32 0.014752088, %v4843_v9  ;;  %v4881_v62 = vmul.f32 3.8918573e-05, %v13625_v13  ;;  %v4703_v36 = vor.u32 1.1754944e-38, %v4702_v54  ;;  %vm13667_vm6 = vmor %vm4696_vm3, %vm4697_vm4  ;;  %v16564_v29 = vld [vmem:[#allocation49_spill] sm:$0xff] }
 0x49f   : > { %v4719_v59 = vadd.f32 1.1283791, %v4718_v49  ;;  %v4733_v21 = vsub.f32 1.0, %v4732_v5  ;;  %v13654_v60 = vmin.f32 %v4908_v35, 16.0  ;;  %v7782_v63 = vclamps-f32 %v4625_v18, 1.0 }
 0x4a0   : > { %v4792_v33 = vmul.f32 %v4791_v55, %v13497_v61  ;;  %v4807_v34 = vmul.f32 %v4806_v11, %v13497_v61  ;;  %v13659_v32 = vadd.f32 %v1027_v15, %v8930_v25  ;;  %v4664_v4 = vsel %vm13613_vm0, %v4663_v19, %v4659_v46 }
 0x4a1   : > { %v4756_v9 = vmul.f32 %v4755_v16, %v13456_v31  ;;  %v13673_v54 = vmul.f32 0.5, %v13450_v23  ;;  %v4830_v49 = vmul.f32 2.1237322e-06, %v13553_v53  ;;  %v4699_v40 = vsel %vm13667_vm6, %v13548_v48, %v4695_v58 }
 0x4a2   : > { %v13679_v19 = vadd.f32 1.0, %v4769_v50  ;;  %v4845_v5 = vmul.f32 %v4844_v26, %v13553_v53  ;;  %v4882_v10 = vadd.f32 0.001143296, %v4881_v62  ;;  %v4734_v35 = vmul.f32 %v13609_v22, %v4733_v21 }
 0x4a3   : > { %v4740_v18 = vand.u32 2147483647, %v13550_v24  ;;  %v4742_v55 = vand.u32 2147483648, %v13550_v24  ;;  %v4921_v23 = vmul.f32 3.8918573e-05, %v13654_v60  ;;  %v4720_v11 = vmul.f32 %v4719_v59, %v13312_v37 }
 0x4a4   : > { %v4793_v46 = vadd.f32 0.0036580483, %v4792_v33  ;;  %v4808_v16 = vadd.f32 0.4994258, %v4807_v34  ;;  %v13688_v15 = vmul.f32 0.70710677, %v13659_v32  ;;  %v4665_v48 = vmul.f32 %v4664_v4, %v13589_v56 }
 0x4a5   : > { %v4704_v58 = vsel %vm13647_vm5, %v4703_v36, %v4699_v40  ;;  %v4757_v50 = vadd.f32 0.18741608, %v4756_v9  ;;  %v4831_v21 = vadd.f32 0.00028619796, %v4830_v49  ;;  %8298 = vrcp.f32 %v13679_v19  ;;  %v16566_v34 = vld [vmem:[#allocation50_spill] sm:$0xff] }
 0x4a6   : > { %v4846_v26 = vadd.f32 0.112945676, %v4845_v5  ;;  %v4883_v62 = vmul.f32 %v4882_v10, %v13625_v13  ;;  %v6701_v37 = vpack.c.bf16 %v16565_v0, %v16564_v29  ;;  %v4735_v59 = vadd.f32 %v13609_v22, %v4734_v35  ;;  %v16567_v56 = vld [vmem:[#allocation54_spill] sm:$0xff] }
 0x4a7   : > { %vm4737_vm7 = vweird.f32 %v13609_v22  ;;  %v4922_v33 = vadd.f32 0.001143296, %v4921_v23  ;;  %v6702_v4 = vpack.c.bf16 %v16567_v56, %v16566_v34  ;;  %v4705_v38 = vmul.f32 %v4704_v58, %v13604_v41  ;;  %v16574_v56 = vld [vmem:[#allocation56_spill] sm:$0xff] }
 0x4a8   : > { %v4794_v36 = vmul.f32 %v4793_v46, %v13497_v61  ;;  %v4809_v9 = vmul.f32 %v4808_v16, %v13497_v61  ;;  %v4948_v49 = vmul.f32 %v13688_v15, %v13688_v15  ;;  %7125 = vmatmul.bf16.gmra.mxu1 %v6701_v37  ;;  %v6510_v40 = vadd.f32 1.0, %v7782_v63 }
 0x4a9   : > { %v7783_v0 = vclamps-f32 %v4665_v48, 1.0  ;;  %vm4736_vm8 = vweird.f32 %v13550_v24  ;;  %v4832_v5 = vmul.f32 %v4831_v21, %v13553_v53  ;;  %7214 = vmatmul.bf16.gmra.mxu2 %v6702_v4  ;;  %vm13712_vm10 = vcmp.eq.f32.partialorder %v4740_v18, 8.507059e+37 }
 0x4aa   : > { %vm13708_vm9 = vmor %vm4736_vm8, %vm4737_vm7  ;;  %v4758_v35 = vmul.f32 %v4757_v50, %v13456_v31  ;;  %v4847_v23 = vmul.f32 %v4846_v26, %v13553_v53  ;;  %v4884_v46 = vadd.f32 0.014752088, %v4883_v62  ;;  %v4743_v63 = vor.u32 1.1754944e-38, %v4742_v55  ;;  %v16572_v26 = vld [vmem:[#allocation51_spill] sm:$0xff] }
 0x4ab   : > { %v4739_v24 = vsel %vm13708_vm9, %v13609_v22, %v4735_v59  ;;  %v4870_v16 = vmul.f32 2.1237322e-06, %v13625_v13  ;;  %v4923_v48 = vmul.f32 %v4922_v33, %v13654_v60  ;;  %v13723_v58 = vpop.eup %8298  ;;  %v7784_v18 = vclamps-f32 %v4705_v38, 1.0  ;;  %v16573_v62 = vld [vmem:[#allocation55_spill] sm:$0xff]  ;;  %v16575_v22 = vld [vmem:[#allocation60_spill] sm:$0xff] }
 0x4ac   : > { %v4795_v21 = vadd.f32 0.05243302, %v4794_v36  ;;  %v13725_v29 = vadd.f32 1.0, %v4809_v9  ;;  %v13727_v37 = vmin.f32 %v4948_v49, 16.0  ;;  %v6511_v31 = vadd.f32 1.0, %v7783_v0  ;;  %v762_v36 = vpop.f32.mrf.mxu0 }
 0x4ad   : > { %v4833_v50 = vadd.f32 0.0036580483, %v4832_v5  ;;  %v6703_v34 = vpack.c.bf16 %v16573_v62, %v16572_v26  ;;  %v6704_v55 = vpack.c.bf16 %v16575_v22, %v16574_v56  ;;  %v4744_v59 = vsel %vm13712_vm10, %v4743_v63, %v4739_v24 }
 0x4ae   : > { %v4759_v33 = vadd.f32 1.1283791, %v4758_v35  ;;  %v4848_v4 = vadd.f32 0.4994258, %v4847_v23  ;;  %v4885_v38 = vmul.f32 %v4884_v46, %v13625_v13  ;;  %v13737_v9 = vmul.f32 %v6510_v40, %v13503_v45 }
 0x4af   : > { %v4772_v49 = vmul.f32 %v13723_v58, %v13679_v19  ;;  %v4871_v0 = vadd.f32 0.00028619796, %v4870_v16  ;;  %v4924_v5 = vadd.f32 0.014752088, %v4923_v48  ;;  %7303 = vmatmul.bf16.gmra.mxu3 %v6703_v34  ;;  %7041 = vmatmul.bf16.gmra.mxu0 %v6704_v55  ;;  %v6512_v10 = vadd.f32 1.0, %v7784_v18 }
 0x4b0   : > { %16576 = vst [vmem:[#allocation48_spill] sm:$0xff] %v13737_v9  ;;  %v4796_v26 = vmul.f32 %v4795_v21, %v13497_v61  ;;  %8300 = vrcp.f32 %v13725_v29  ;;  %v4961_v41 = vmul.f32 3.8918573e-05, %v13727_v37  ;;  %v4745_v35 = vmul.f32 %v4744_v59, %v4720_v11  ;;  %v16579_v59 = vld [vmem:[#allocation57_spill] sm:$0xff] }
 0x4b1   : > { %v13745_v23 = vmul.f32 0.5, %v13490_v6  ;;  %v4834_v45 = vmul.f32 %v4833_v50, %v13553_v53  ;;  %v13749_v40 = vadd.f32 %v762_v36, %v8891_v1  ;;  %v13752_v46 = vmul.f32 %v6511_v31, %v13516_v20 }
 0x4b2   : > { %v13755_v24 = vmul.f32 %v4759_v33, %v13411_v47  ;;  %v4849_v63 = vmul.f32 %v4848_v4, %v13553_v53  ;;  %v4886_v16 = vadd.f32 0.112945676, %v4885_v38  ;;  %v4773_v48 = vsub.f32 1.0, %v4772_v49  ;;  %v16580_v33 = vld [vmem:[#allocation61_spill] sm:$0xff] }
 0x4b3   : > { %16577 = vst [vmem:[#allocation52_spill] sm:$0xff] %v13752_v46  ;;  %v13759_v11 = vmul.f32 0.5, %v13556_v17  ;;  %v4872_v6 = vmul.f32 %v4871_v0, %v13625_v13  ;;  %v4925_v18 = vmul.f32 %v4924_v5, %v13654_v60  ;;  %v13764_v21 = vmul.f32 %v6512_v10, %v13522_v57  ;;  %v851_v17 = vpop.f32.mrf.mxu1  ;;  %v16581_v0 = vld [vmem:[#allocation58_spill] sm:$0xff] }
 0x4b4   : > { %v4780_v20 = vand.u32 2147483647, %v13679_v19  ;;  %v4797_v31 = vadd.f32 0.18741608, %v4796_v26  ;;  %v4962_v50 = vadd.f32 0.001143296, %v4961_v41  ;;  %vm4776_vm11 = vweird.f32 %v13679_v19 }
 0x4b5   : > { %16578 = vst [vmem:[#allocation49_spill] sm:$0xff] %v13764_v21  ;;  %v7785_v47 = vclamps-f32 %v4745_v35, 1.0  ;;  %v4835_v62 = vadd.f32 0.05243302, %v4834_v45  ;;  %v13769_v34 = vmul.f32 0.70710677, %v13749_v40  ;;  %v4887_v55 = vmul.f32 %v4886_v16, %v13625_v13 }
 0x4b6   : > { %v13771_v56 = vpop.eup %8300  ;;  %v13773_v22 = vadd.f32 1.0, %v4849_v63  ;;  %v4910_v57 = vmul.f32 2.1237322e-06, %v13654_v60  ;;  %v6705_v4 = vpack.c.bf16 %v16580_v33, %v16579_v59  ;;  %v4774_v38 = vmul.f32 %v13723_v58, %v4773_v48  ;;  %v16582_v5 = vld [vmem:[#allocation62_spill] sm:$0xff] }
 0x4b7   : > { %v4873_v36 = vadd.f32 0.0036580483, %v4872_v6  ;;  %v4926_v49 = vadd.f32 0.112945676, %v4925_v18  ;;  %v6706_v10 = vpack.c.bf16 %v16582_v5, %v16581_v0  ;;  %v4782_v26 = vand.u32 2147483648, %v13679_v19  ;;  %v940_v18 = vpop.f32.mrf.mxu2 }
 0x4b8   : > { %v4798_v41 = vmul.f32 %v4797_v31, %v13497_v61  ;;  %v4963_v35 = vmul.f32 %v4962_v50, %v13727_v37  ;;  %v13786_v45 = vadd.f32 %v851_v17, %v8893_v3  ;;  %7130 = vmatmul.bf16.gmra.mxu1 %v6705_v4  ;;  %vm13788_vm12 = vcmp.eq.f32.partialorder %v4780_v20, 8.507059e+37 }
 0x4b9   : > { %v4812_v16 = vmul.f32 %v13771_v56, %v13725_v29  ;;  %v4836_v48 = vmul.f32 %v4835_v62, %v13553_v53  ;;  %v4988_v6 = vmul.f32 %v13769_v34, %v13769_v34  ;;  %7219 = vmatmul.bf16.gmra.mxu2 %v6706_v10  ;;  %v6513_v61 = vadd.f32 1.0, %v7785_v47 }
 0x4ba   : > { %8302 = vrcp.f32 %v13773_v22  ;;  %v4888_v31 = vadd.f32 0.4994258, %v4887_v55  ;;  %v4911_v50 = vadd.f32 0.00028619796, %v4910_v57  ;;  %v4775_v20 = vadd.f32 %v13723_v58, %v4774_v38  ;;  %v16585_v57 = vld [vmem:[#allocation59_spill] sm:$0xff] }
 0x4bb   : > { %vm4777_vm13 = vweird.f32 %v13723_v58  ;;  %v4874_v17 = vmul.f32 %v4873_v36, %v13625_v13  ;;  %v4927_v59 = vmul.f32 %v4926_v49, %v13654_v60  ;;  %v4799_v33 = vadd.f32 1.1283791, %v4798_v41  ;;  %v16586_v38 = vld [vmem:[#allocation63_spill] sm:$0xff] }
 0x4bc   : > { %v4964_v62 = vadd.f32 0.014752088, %v4963_v35  ;;  %v13803_v4 = vmul.f32 0.70710677, %v13786_v45  ;;  %v13806_v0 = vadd.f32 %v940_v18, %v8910_v12  ;;  %v4813_v47 = vsub.f32 1.0, %v4812_v16  ;;  %vm13814_vm14 = vmor %vm4776_vm11, %vm4777_vm13 }
 0x4bd   : > { %v4837_v5 = vadd.f32 0.18741608, %v4836_v48  ;;  %v13808_v55 = vmin.f32 %v4988_v6, 16.0  ;;  %v6707_v10 = vpack.c.bf16 %v16586_v38, %v16585_v57  ;;  %v4783_v49 = vor.u32 1.1754944e-38, %v4782_v26 }
 0x4be   : > { %v4889_v41 = vmul.f32 %v4888_v31, %v13625_v13  ;;  %v13820_v35 = vmul.f32 0.5, %v13578_v42  ;;  %v4912_v16 = vmul.f32 %v4911_v50, %v13654_v60  ;;  %v13824_v48 = vmul.f32 %v6513_v61, %v13528_v14 }
 0x4bf   : > { %v4779_v6 = vsel %vm13814_vm14, %v13723_v58, %v4775_v20  ;;  %v4875_v19 = vadd.f32 0.05243302, %v4874_v17  ;;  %v4928_v18 = vadd.f32 0.4994258, %v4927_v59  ;;  %7308 = vmatmul.bf16.gmra.mxu3 %v6707_v10  ;;  %v13832_v26 = vmul.f32 %v4799_v33, %v13463_v28 }
 0x4c0   : > { %16589 = vst [vmem:[#allocation53_spill] sm:$0xff] %v13824_v48  ;;  %v13829_v57 = vpop.eup %8302  ;;  %v4965_v42 = vmul.f32 %v4964_v62, %v13727_v37  ;;  %v5028_v31 = vmul.f32 %v13803_v4, %v13803_v4  ;;  %v13838_v14 = vmul.f32 0.70710677, %v13806_v0  ;;  %v4814_v61 = vmul.f32 %v13771_v56, %v4813_v47 }
 0x4c1   : > { %v4838_v58 = vmul.f32 %v4837_v5, %v13553_v53  ;;  %v13843_v50 = vmul.f32 0.5, %v13659_v32  ;;  %v5001_v20 = vmul.f32 3.8918573e-05, %v13808_v55  ;;  %v4784_v28 = vsel %vm13788_vm12, %v4783_v49, %v4779_v6 }
 0x4c2   : > { %v13848_v17 = vadd.f32 1.0, %v4889_v41  ;;  %v4913_v59 = vadd.f32 0.0036580483, %v4912_v16  ;;  %v4950_v33 = vmul.f32 2.1237322e-06, %v13727_v37  ;;  %v4852_v47 = vmul.f32 %v13829_v57, %v13773_v22 }
 0x4c3   : > { %v4820_v62 = vand.u32 2147483647, %v13725_v29  ;;  %v4876_v53 = vmul.f32 %v4875_v19, %v13625_v13  ;;  %v4929_v32 = vmul.f32 %v4928_v18, %v13654_v60  ;;  %v4822_v5 = vand.u32 2147483648, %v13725_v29  ;;  %v1029_v18 = vpop.f32.mrf.mxu3 }
 0x4c4   : > { %v4966_v38 = vadd.f32 0.112945676, %v4965_v42  ;;  %v13857_v10 = vmin.f32 %v5028_v31, 16.0  ;;  %v5068_v63 = vmul.f32 %v13838_v14, %v13838_v14  ;;  %v4785_v36 = vmul.f32 %v4784_v28, %v13755_v24 }
 0x4c5   : > { %v4815_v49 = vadd.f32 %v13771_v56, %v4814_v61  ;;  %vm4817_vm15 = vweird.f32 %v13771_v56  ;;  %v5002_v41 = vadd.f32 0.001143296, %v5001_v20  ;;  %v4839_v16 = vadd.f32 1.1283791, %v4838_v58 }
 0x4c6   : > { %8304 = vrcp.f32 %v13848_v17  ;;  %v4914_v6 = vmul.f32 %v4913_v59, %v13654_v60  ;;  %v4951_v19 = vadd.f32 0.00028619796, %v4950_v33  ;;  %vm4816_vm0 = vweird.f32 %v13725_v29 }
 0x4c7   : > { %v4853_v42 = vsub.f32 1.0, %v4852_v47  ;;  %v4877_v31 = vadd.f32 0.18741608, %v4876_v53  ;;  %v13867_v46 = vadd.f32 1.0, %v4929_v32  ;;  %vm13869_vm1 = vmor %vm4816_vm0, %vm4817_vm15  ;;  %vm13873_vm2 = vcmp.eq.f32.partialorder %v4820_v62, 8.507059e+37 }
 0x4c8   : > { %v4967_v58 = vmul.f32 %v4966_v38, %v13727_v37  ;;  %v5041_v20 = vmul.f32 3.8918573e-05, %v13857_v10  ;;  %v13879_v28 = vmin.f32 %v5068_v63, 16.0  ;;  %v4819_v29 = vsel %vm13869_vm1, %v13771_v56, %v4815_v49 }
 0x4c9   : > { %v4823_v59 = vor.u32 1.1754944e-38, %v4822_v5  ;;  %v5003_v33 = vmul.f32 %v5002_v41, %v13808_v55  ;;  %v13886_v47 = vadd.f32 %v1029_v18, %v8930_v25  ;;  %v7786_v62 = vclamps-f32 %v4785_v36, 1.0 }
 0x4ca   : > { %v13889_v53 = vmul.f32 %v4839_v16, %v13513_v43  ;;  %v4915_v32 = vadd.f32 0.05243302, %v4914_v6  ;;  %v4952_v38 = vmul.f32 %v4951_v19, %v13727_v37  ;;  %v4854_v63 = vmul.f32 %v13829_v57, %v4853_v42 }
 0x4cb   : > { %v4860_v9 = vand.u32 2147483647, %v13773_v22  ;;  %v4878_v24 = vmul.f32 %v4877_v31, %v13625_v13  ;;  %8306 = vrcp.f32 %v13867_v46  ;;  %v4824_v5 = vsel %vm13873_vm2, %v4823_v59, %v4819_v29 }
 0x4cc   : > { %v13896_v56 = vpop.eup %8304  ;;  %v4968_v36 = vadd.f32 0.4994258, %v4967_v58  ;;  %v5042_v49 = vadd.f32 0.001143296, %v5041_v20  ;;  %v5081_v43 = vmul.f32 3.8918573e-05, %v13879_v28  ;;  %vm4856_vm3 = vweird.f32 %v13773_v22 }
 0x4cd   : > { %v4862_v41 = vand.u32 2147483648, %v13773_v22  ;;  %v5004_v16 = vadd.f32 0.014752088, %v5003_v33  ;;  %v13904_v6 = vmul.f32 0.70710677, %v13886_v47  ;;  %v6514_v13 = vadd.f32 1.0, %v7786_v62 }
 0x4ce   : > { %vm4857_vm4 = vweird.f32 %v13829_v57  ;;  %v4916_v19 = vmul.f32 %v4915_v32, %v13654_v60  ;;  %v4953_v18 = vadd.f32 0.0036580483, %v4952_v38  ;;  %v4825_v42 = vmul.f32 %v4824_v5, %v13832_v26 }
 0x4cf   : > { %v4855_v31 = vadd.f32 %v13829_v57, %v4854_v63  ;;  %v4879_v61 = vadd.f32 1.1283791, %v4878_v24  ;;  %v4892_v58 = vmul.f32 %v13896_v56, %v13848_v17  ;;  %vm13912_vm5 = vcmp.eq.f32.partialorder %v4860_v9, 8.507059e+37  ;;  %vm13931_vm6 = vmor %vm4856_vm3, %vm4857_vm4 }
 0x4d0   : > { %v4969_v29 = vmul.f32 %v4968_v36, %v13727_v37  ;;  %v5043_v59 = vmul.f32 %v5042_v49, %v13857_v10  ;;  %v5082_v33 = vadd.f32 0.001143296, %v5081_v43  ;;  %v4863_v32 = vor.u32 1.1754944e-38, %v4862_v41 }
 0x4d1   : > { %v13918_v62 = vpop.eup %8306  ;;  %v4990_v26 = vmul.f32 2.1237322e-06, %v13808_v55  ;;  %v5005_v38 = vmul.f32 %v5004_v16, %v13808_v55  ;;  %v5108_v63 = vmul.f32 %v13904_v6, %v13904_v6  ;;  %v13925_v9 = vmul.f32 %v6514_v13, %v13593_v52 }
 0x4d2   : > { %v4917_v5 = vadd.f32 0.18741608, %v4916_v19  ;;  %v4954_v36 = vmul.f32 %v4953_v18, %v13727_v37  ;;  %v13937_v49 = vmul.f32 0.5, %v13749_v40  ;;  %v7787_v43 = vclamps-f32 %v4825_v42, 1.0 }
 0x4d3   : > { %16596 = vst [vmem:[#allocation50_spill] sm:$0xff] %v13925_v9  ;;  %v4859_v52 = vsel %vm13931_vm6, %v13829_v57, %v4855_v31  ;;  %v13943_v41 = vmul.f32 %v4879_v61, %v13573_v7  ;;  %v4893_v16 = vsub.f32 1.0, %v4892_v58  ;;  %v4932_v22 = vmul.f32 %v13918_v62, %v13867_v46  ;;  %v765_v9 = vpop.f32.mrf.mxu0 }
 0x4d4   : > { %v13947_v13 = vadd.f32 1.0, %v4969_v29  ;;  %v5044_v19 = vadd.f32 0.014752088, %v5043_v59  ;;  %v5083_v18 = vmul.f32 %v5082_v33, %v13879_v28  ;;  %vm4896_vm7 = vweird.f32 %v13848_v17 }
 0x4d5   : > { %v4991_v40 = vadd.f32 0.00028619796, %v4990_v26  ;;  %v5006_v42 = vadd.f32 0.112945676, %v5005_v38  ;;  %v13951_v48 = vmin.f32 %v5108_v63, 16.0  ;;  %v4902_v7 = vand.u32 2147483648, %v13848_v17 }
 0x4d6   : > { %v4900_v57 = vand.u32 2147483647, %v13848_v17  ;;  %v4918_v31 = vmul.f32 %v4917_v5, %v13654_v60  ;;  %v4955_v61 = vadd.f32 0.05243302, %v4954_v36  ;;  %v4864_v58 = vsel %vm13912_vm5, %v4863_v32, %v4859_v52  ;;  %v854_v32 = vpop.f32.mrf.mxu1 }
 0x4d7   : > { %v4894_v29 = vmul.f32 %v13896_v56, %v4893_v16  ;;  %v5030_v59 = vmul.f32 2.1237322e-06, %v13857_v10  ;;  %v13961_v33 = vadd.f32 %v765_v9, %v8891_v1  ;;  %v4933_v26 = vsub.f32 1.0, %v4932_v22 }
 0x4d8   : > { %8308 = vrcp.f32 %v13947_v13  ;;  %v5045_v38 = vmul.f32 %v5044_v19, %v13857_v10  ;;  %v5084_v63 = vadd.f32 0.014752088, %v5083_v18  ;;  %v6515_v24 = vadd.f32 1.0, %v7787_v43 }
 0x4d9   : > { %v4992_v60 = vmul.f32 %v4991_v40, %v13808_v55  ;;  %v5007_v5 = vmul.f32 %v5006_v42, %v13808_v55  ;;  %v5121_v20 = vmul.f32 3.8918573e-05, %v13951_v48  ;;  %v4865_v36 = vmul.f32 %v4864_v58, %v13889_v53 }
 0x4da   : > { %vm13969_vm8 = vcmp.eq.f32.partialorder %v4900_v57, 8.507059e+37  ;;  %v4903_v9 = vor.u32 1.1754944e-38, %v4902_v7  ;;  %v4919_v16 = vadd.f32 1.1283791, %v4918_v31  ;;  %v4956_v22 = vmul.f32 %v4955_v61, %v13727_v37 }
 0x4db   : > { %v4895_v19 = vadd.f32 %v13896_v56, %v4894_v29  ;;  %vm4897_vm9 = vweird.f32 %v13896_v56  ;;  %v5031_v43 = vadd.f32 0.00028619796, %v5030_v59  ;;  %v13977_v18 = vmul.f32 0.70710677, %v13961_v33 }
 0x4dc   : > { %v4934_v40 = vmul.f32 %v13918_v62, %v4933_v26  ;;  %v5046_v42 = vadd.f32 0.112945676, %v5045_v38  ;;  %v5085_v53 = vmul.f32 %v5084_v63, %v13879_v28  ;;  %v13982_v57 = vadd.f32 %v854_v32, %v8893_v3  ;;  %vm13991_vm10 = vmor %vm4896_vm7, %vm4897_vm9 }
 0x4dd   : > { %v13985_v7 = vmul.f32 %v6515_v24, %v13673_v54  ;;  %v4993_v31 = vadd.f32 0.0036580483, %v4992_v60  ;;  %v5008_v61 = vadd.f32 0.4994258, %v5007_v5  ;;  %v5122_v58 = vadd.f32 0.001143296, %v5121_v20 }
 0x4de   : > { %v13987_v29 = vpop.eup %8308  ;;  %v7788_v59 = vclamps-f32 %v4865_v36, 1.0  ;;  %v4920_v26 = vmul.f32 %v4919_v16, %v13607_v30  ;;  %v4942_v38 = vand.u32 2147483648, %v13867_v46  ;;  %v4957_v63 = vadd.f32 0.18741608, %v4956_v22 }
 0x4df   : > { %16601 = vst [vmem:[#allocation54_spill] sm:$0xff] %v13985_v7  ;;  %v4899_v54 = vsel %vm13991_vm10, %v13896_v56, %v4895_v19  ;;  %vm4937_vm11 = vweird.f32 %v13918_v62  ;;  %v5032_v24 = vmul.f32 %v5031_v43, %v13857_v10  ;;  %v5148_v17 = vmul.f32 %v13977_v18, %v13977_v18 }
 0x4e0   : > { %v4935_v60 = vadd.f32 %v13918_v62, %v4934_v40  ;;  %v5047_v5 = vmul.f32 %v5046_v42, %v13857_v10  ;;  %v5086_v20 = vadd.f32 0.112945676, %v5085_v53  ;;  %v14007_v30 = vmul.f32 0.70710677, %v13982_v57 }
 0x4e1   : > { %v4972_v32 = vmul.f32 %v13987_v29, %v13947_v13  ;;  %v4994_v21 = vmul.f32 %v4993_v31, %v13808_v55  ;;  %v5009_v56 = vmul.f32 %v5008_v61, %v13808_v55  ;;  %v5123_v36 = vmul.f32 %v5122_v58, %v13951_v48  ;;  %v943_v61 = vpop.f32.mrf.mxu2 }
 0x4e2   : > { %v6516_v16 = vadd.f32 1.0, %v7788_v59  ;;  %vm4936_vm12 = vweird.f32 %v13867_v46  ;;  %v4940_v22 = vand.u32 2147483647, %v13867_v46  ;;  %v4943_v19 = vor.u32 1.1754944e-38, %v4942_v38 }
 0x4e3   : > { %v4904_v43 = vsel %vm13969_vm8, %v4903_v9, %v4899_v54  ;;  %vm14020_vm13 = vmor %vm4936_vm12, %vm4937_vm11  ;;  %v4958_v42 = vmul.f32 %v4957_v63, %v13727_v37  ;;  %v5033_v53 = vadd.f32 0.0036580483, %v5032_v24  ;;  %v14025_v31 = vmin.f32 %v5148_v17, 16.0 }
 0x4e4   : > { %v4939_v46 = vsel %vm14020_vm13, %v13918_v62, %v4935_v60  ;;  %v5048_v58 = vadd.f32 0.4994258, %v5047_v5  ;;  %v5087_v52 = vmul.f32 %v5086_v20, %v13879_v28  ;;  %v5188_v9 = vmul.f32 %v14007_v30, %v14007_v30 }
 0x4e5   : > { %v4973_v59 = vsub.f32 1.0, %v4972_v32  ;;  %v4995_v38 = vadd.f32 0.05243302, %v4994_v21  ;;  %v14033_v54 = vadd.f32 1.0, %v5009_v56  ;;  %v5124_v7 = vadd.f32 0.014752088, %v5123_v36 }
 0x4e6   : > { %v4905_v37 = vmul.f32 %v4904_v43, %v13943_v41  ;;  %vm4941_vm14 = vcmp.eq.f32.partialorder %v4940_v22, 8.507059e+37  ;;  %v5070_v63 = vmul.f32 2.1237322e-06, %v13879_v28  ;;  %v14038_v24 = vadd.f32 %v943_v61, %v8910_v12 }
 0x4e7   : > { %v4944_v62 = vsel %vm4941_vm14, %v4943_v19, %v4939_v46  ;;  %v4959_v17 = vadd.f32 1.1283791, %v4958_v42  ;;  %v5034_v60 = vmul.f32 %v5033_v53, %v13857_v10  ;;  %v5161_v5 = vmul.f32 3.8918573e-05, %v14025_v31 }
 0x4e8   : > { %v14043_v20 = vmul.f32 0.5, %v13786_v45  ;;  %v5049_v32 = vmul.f32 %v5048_v58, %v13857_v10  ;;  %v5088_v21 = vadd.f32 0.4994258, %v5087_v52  ;;  %v14046_v56 = vmin.f32 %v5188_v9, 16.0 }
 0x4e9   : > { %v4974_v41 = vmul.f32 %v13987_v29, %v4973_v59  ;;  %v4996_v36 = vmul.f32 %v4995_v38, %v13808_v55  ;;  %8310 = vrcp.f32 %v14033_v54  ;;  %v5125_v22 = vmul.f32 %v5124_v7, %v13951_v48 }
 0x4ea   : > { %v7789_v19 = vclamps-f32 %v4905_v37, 1.0  ;;  %v4945_v43 = vmul.f32 %v4944_v62, %v4920_v26  ;;  %v5071_v40 = vadd.f32 0.00028619796, %v5070_v63  ;;  %v14053_v42 = vmul.f32 0.70710677, %v14038_v24 }
 0x4eb   : > { %v14056_v45 = vmul.f32 %v6516_v16, %v13745_v23  ;;  %v4960_v53 = vmul.f32 %v4959_v17, %v13688_v15  ;;  %v5035_v61 = vadd.f32 0.05243302, %v5034_v60  ;;  %v5162_v46 = vadd.f32 0.001143296, %v5161_v5 }
 0x4ec   : > { %v4982_v58 = vand.u32 2147483648, %v13947_v13  ;;  %v14060_v52 = vadd.f32 1.0, %v5049_v32  ;;  %v5089_v9 = vmul.f32 %v5088_v21, %v13879_v28  ;;  %v5201_v7 = vmul.f32 3.8918573e-05, %v14046_v56 }
 0x4ed   : > { %16606 = vst [vmem:[#allocation51_spill] sm:$0xff] %v14056_v45  ;;  %v4975_v26 = vadd.f32 %v13987_v29, %v4974_v41  ;;  %vm4977_vm15 = vweird.f32 %v13987_v29  ;;  %v4997_v59 = vadd.f32 0.18741608, %v4996_v36  ;;  %v5126_v38 = vadd.f32 0.112945676, %v5125_v22 }
 0x4ee   : > { %v6517_v23 = vadd.f32 1.0, %v7789_v19  ;;  %v7790_v16 = vclamps-f32 %v4945_v43, 1.0  ;;  %v5072_v15 = vmul.f32 %v5071_v40, %v13879_v28  ;;  %v5228_v37 = vmul.f32 %v14053_v42, %v14053_v42 }
 0x4ef   : > { %v14069_v63 = vpop.eup %8310  ;;  %vm4976_vm0 = vweird.f32 %v13947_v13  ;;  %v4980_v62 = vand.u32 2147483647, %v13947_v13  ;;  %v5036_v17 = vmul.f32 %v5035_v61, %v13857_v10  ;;  %v5163_v60 = vmul.f32 %v5162_v46, %v14025_v31 }
 0x4f0   : > { %vm14075_vm1 = vmor %vm4976_vm0, %vm4977_vm15  ;;  %8312 = vrcp.f32 %v14060_v52  ;;  %v14080_v32 = vadd.f32 1.0, %v5089_v9  ;;  %v5110_v21 = vmul.f32 2.1237322e-06, %v13951_v48  ;;  %v5202_v41 = vadd.f32 0.001143296, %v5201_v7 }
 0x4f1   : > { %v4979_v36 = vsel %vm14075_vm1, %v13987_v29, %v4975_v26  ;;  %v4983_v13 = vor.u32 1.1754944e-38, %v4982_v58  ;;  %v4998_v22 = vmul.f32 %v4997_v59, %v13808_v55  ;;  %v5127_v19 = vmul.f32 %v5126_v38, %v13951_v48 }
 0x4f2   : > { %v6518_v43 = vadd.f32 1.0, %v7790_v16  ;;  %v5012_v40 = vmul.f32 %v14069_v63, %v14033_v54  ;;  %v5073_v61 = vadd.f32 0.0036580483, %v5072_v15  ;;  %v14090_v46 = vmin.f32 %v5228_v37, 16.0 }
 0x4f3   : > { %vm4981_vm2 = vcmp.eq.f32.partialorder %v4980_v62, 8.507059e+37  ;;  %v5037_v9 = vadd.f32 0.18741608, %v5036_v17  ;;  %v14093_v7 = vmul.f32 0.5, %v13806_v0  ;;  %v5164_v45 = vadd.f32 0.014752088, %v5163_v60 }
 0x4f4   : > { %v4984_v5 = vsel %vm4981_vm2, %v4983_v13, %v4979_v36  ;;  %8314 = vrcp.f32 %v14080_v32  ;;  %v5111_v29 = vadd.f32 0.00028619796, %v5110_v21  ;;  %v5203_v55 = vmul.f32 %v5202_v41, %v14046_v56 }
 0x4f5   : > { %v14098_v58 = vmul.f32 %v6517_v23, %v13759_v11  ;;  %v4999_v26 = vadd.f32 1.1283791, %v4998_v22  ;;  %v14101_v59 = vmul.f32 0.5, %v13886_v47  ;;  %v5128_v38 = vadd.f32 0.4994258, %v5127_v19  ;;  %v1032_v47 = vpop.f32.mrf.mxu3 }
 0x4f6   : > { %v14103_v16 = vpop.eup %8312  ;;  %v14106_v0 = vmul.f32 %v6518_v43, %v13820_v35  ;;  %v5013_v15 = vsub.f32 1.0, %v5012_v40  ;;  %v5074_v37 = vmul.f32 %v5073_v61, %v13879_v28  ;;  %v5241_v62 = vmul.f32 3.8918573e-05, %v14090_v46 }
 0x4f7   : > { %16609 = vst [vmem:[#allocation55_spill] sm:$0xff] %v14098_v58  ;;  %v4985_v17 = vmul.f32 %v4984_v5, %v4960_v53  ;;  %v5020_v60 = vand.u32 2147483647, %v14033_v54  ;;  %v5038_v11 = vmul.f32 %v5037_v9, %v13857_v10  ;;  %v5165_v23 = vmul.f32 %v5164_v45, %v14025_v31 }
 0x4f8   : > { %16610 = vst [vmem:[#allocation56_spill] sm:$0xff] %v14106_v0  ;;  %v5022_v21 = vand.u32 2147483648, %v14033_v54  ;;  %v5112_v41 = vmul.f32 %v5111_v29, %v13951_v48  ;;  %v5150_v35 = vmul.f32 2.1237322e-06, %v14025_v31  ;;  %v5204_v36 = vadd.f32 0.014752088, %v5203_v55 }
 0x4f9   : > { %v14117_v13 = vmul.f32 %v4999_v26, %v13769_v34  ;;  %v5052_v53 = vmul.f32 %v14103_v16, %v14060_v52  ;;  %v5129_v22 = vmul.f32 %v5128_v38, %v13951_v48  ;;  %v14123_v10 = vmul.f32 0.5, %v13961_v33 }
 0x4fa   : > { %v14125_v45 = vpop.eup %8314  ;;  %v5014_v19 = vmul.f32 %v14069_v63, %v5013_v15  ;;  %v5075_v43 = vadd.f32 0.05243302, %v5074_v37  ;;  %v5242_v40 = vadd.f32 0.001143296, %v5241_v62  ;;  %v14129_v61 = vadd.f32 %v1032_v47, %v8930_v25  ;;  %v767_v15 = vpop.f32.mrf.mxu0 }
 0x4fb   : > { %v7791_v9 = vclamps-f32 %v4985_v17, 1.0  ;;  %vm5016_vm3 = vweird.f32 %v14033_v54  ;;  %v5039_v34 = vadd.f32 1.1283791, %v5038_v11  ;;  %v5166_v5 = vadd.f32 0.112945676, %v5165_v23 }
 0x4fc   : > { %vm14132_vm4 = vcmp.eq.f32.partialorder %v5020_v60, 8.507059e+37  ;;  %v5023_v33 = vor.u32 1.1754944e-38, %v5022_v21  ;;  %v5113_v55 = vadd.f32 0.0036580483, %v5112_v41  ;;  %v5151_v26 = vadd.f32 0.00028619796, %v5150_v35 }
 0x4fd   : > { %v5205_v38 = vmul.f32 %v5204_v36, %v14046_v56  ;;  %vm5017_vm5 = vweird.f32 %v14069_v63  ;;  %v5053_v37 = vsub.f32 1.0, %v5052_v53  ;;  %v5092_v62 = vmul.f32 %v14125_v45, %v14080_v32 }
 0x4fe   : > { %v14140_v17 = vadd.f32 1.0, %v5129_v22  ;;  %v5015_v11 = vadd.f32 %v14069_v63, %v5014_v19  ;;  %v5076_v60 = vmul.f32 %v5075_v43, %v13879_v28  ;;  %v5243_v23 = vmul.f32 %v5242_v40, %v14090_v46  ;;  %vm14164_vm6 = vmor %vm5016_vm3, %vm5017_vm5 }
 0x4ff   : > { %v14146_v47 = vmul.f32 0.70710677, %v14129_v61  ;;  %v14148_v21 = vadd.f32 1.0, %v7791_v9  ;;  %v14151_v41 = vmul.f32 %v5039_v34, %v13803_v4  ;;  %v5167_v35 = vmul.f32 %v5166_v5, %v14025_v31 }
 0x500   : > { %v14155_v36 = vadd.f32 %v767_v15, %v8891_v1  ;;  %v5060_v53 = vand.u32 2147483647, %v14060_v52  ;;  %v5114_v22 = vmul.f32 %v5113_v55, %v13951_v48  ;;  %v5152_v19 = vmul.f32 %v5151_v26, %v14025_v31 }
 0x501   : > { %v5206_v43 = vadd.f32 0.112945676, %v5205_v38  ;;  %v5054_v4 = vmul.f32 %v14103_v16, %v5053_v37  ;;  %v5062_v9 = vand.u32 2147483648, %v14060_v52  ;;  %v5093_v34 = vsub.f32 1.0, %v5092_v62  ;;  %v856_v62 = vpop.f32.mrf.mxu1 }
 0x502   : > { %8316 = vrcp.f32 %v14140_v17  ;;  %v5019_v5 = vsel %vm14164_vm6, %v14069_v63, %v5015_v11  ;;  %v5077_v55 = vadd.f32 0.18741608, %v5076_v60  ;;  %v5244_v26 = vadd.f32 0.014752088, %v5243_v23 }
 0x503   : > { %v5268_v54 = vmul.f32 %v14146_v47, %v14146_v47  ;;  %vm5056_vm7 = vweird.f32 %v14060_v52  ;;  %v5168_v38 = vadd.f32 0.4994258, %v5167_v35  ;;  %v5190_v15 = vmul.f32 2.1237322e-06, %v14046_v56 }
 0x504   : > { %v14179_v37 = vmul.f32 0.70710677, %v14155_v36  ;;  %vm14181_vm8 = vcmp.eq.f32.partialorder %v5060_v53, 8.507059e+37  ;;  %v5115_v40 = vadd.f32 0.05243302, %v5114_v22  ;;  %v5207_v11 = vmul.f32 %v5206_v43, %v14046_v56 }
 0x505   : > { %v5153_v63 = vadd.f32 0.0036580483, %v5152_v19  ;;  %v5024_v60 = vsel %vm14132_vm4, %v5023_v33, %v5019_v5  ;;  %v5055_v23 = vadd.f32 %v14103_v16, %v5054_v4  ;;  %vm5057_vm9 = vweird.f32 %v14103_v16 }
 0x506   : > { %v5094_v35 = vmul.f32 %v14125_v45, %v5093_v34  ;;  %v5063_v58 = vor.u32 1.1754944e-38, %v5062_v9  ;;  %v5245_v44 = vmul.f32 %v5244_v26, %v14090_v46  ;;  %v14192_v53 = vmin.f32 %v5268_v54, 16.0  ;;  %vm14206_vm10 = vmor %vm5056_vm7, %vm5057_vm9 }
 0x507   : > { %v14195_v39 = vadd.f32 %v856_v62, %v8893_v3  ;;  %v5078_v19 = vmul.f32 %v5077_v55, %v13879_v28  ;;  %v5169_v29 = vmul.f32 %v5168_v38, %v14025_v31  ;;  %v5191_v33 = vadd.f32 0.00028619796, %v5190_v15 }
 0x508   : > { %v14197_v22 = vpop.eup %8316  ;;  %v5308_v43 = vmul.f32 %v14179_v37, %v14179_v37  ;;  %v5025_v4 = vmul.f32 %v5024_v60, %v14117_v13  ;;  %v5116_v34 = vmul.f32 %v5115_v40, %v13951_v48  ;;  %v5154_v5 = vmul.f32 %v5153_v63, %v14025_v31 }
 0x509   : > { %v5208_v26 = vadd.f32 0.4994258, %v5207_v11  ;;  %v5059_v28 = vsel %vm14206_vm10, %v14103_v16, %v5055_v23  ;;  %v5095_v55 = vadd.f32 %v14125_v45, %v5094_v35  ;;  %vm5096_vm11 = vweird.f32 %v14080_v32 }
 0x50a   : > { %vm5097_vm12 = vweird.f32 %v14125_v45  ;;  %v5132_v52 = vmul.f32 %v14197_v22, %v14140_v17  ;;  %v5246_v13 = vadd.f32 0.112945676, %v5245_v44  ;;  %v5281_v54 = vmul.f32 3.8918573e-05, %v14192_v53 }
 0x50b   : > { %v14222_v38 = vmul.f32 0.70710677, %v14195_v39  ;;  %v5102_v15 = vand.u32 2147483648, %v14080_v32  ;;  %v14225_v62 = vadd.f32 1.0, %v5169_v29  ;;  %v5192_v16 = vmul.f32 %v5191_v33, %v14046_v56  ;;  %vm14230_vm13 = vmor %vm5096_vm11, %vm5097_vm12 }
 0x50c   : > { %v14228_v40 = vmin.f32 %v5308_v43, 16.0  ;;  %v5100_v11 = vand.u32 2147483647, %v14080_v32  ;;  %v5117_v44 = vadd.f32 0.18741608, %v5116_v34  ;;  %v5209_v23 = vmul.f32 %v5208_v26, %v14046_v56 }
 0x50d   : > { %v5155_v60 = vadd.f32 0.05243302, %v5154_v5  ;;  %v7792_v35 = vclamps-f32 %v5025_v4, 1.0  ;;  %v5064_v9 = vsel %vm14181_vm8, %v5063_v58, %v5059_v28  ;;  %v5079_v29 = vadd.f32 1.1283791, %v5078_v19 }
 0x50e   : > { %v5099_v33 = vsel %vm14230_vm13, %v14125_v45, %v5095_v55  ;;  %v5133_v43 = vsub.f32 1.0, %v5132_v52  ;;  %v5247_v8 = vmul.f32 %v5246_v13, %v14090_v46  ;;  %v5282_v2 = vadd.f32 0.001143296, %v5281_v54 }
 0x50f   : > { %v5348_v32 = vmul.f32 %v14222_v38, %v14222_v38  ;;  %v5103_v34 = vor.u32 1.1754944e-38, %v5102_v15  ;;  %8318 = vrcp.f32 %v14225_v62  ;;  %v5193_v5 = vadd.f32 0.0036580483, %v5192_v16 }
 0x510   : > { %v5321_v4 = vmul.f32 3.8918573e-05, %v14228_v40  ;;  %vm5101_vm14 = vcmp.eq.f32.partialorder %v5100_v11, 8.507059e+37  ;;  %v5118_v58 = vmul.f32 %v5117_v44, %v13951_v48  ;;  %v5156_v0 = vmul.f32 %v5155_v60, %v14025_v31 }
 0x511   : > { %v14248_v19 = vadd.f32 1.0, %v5209_v23  ;;  %v5065_v45 = vmul.f32 %v5064_v9, %v14151_v41  ;;  %v5104_v26 = vsel %vm5101_vm14, %v5103_v34, %v5099_v33  ;;  %v14252_v28 = vmul.f32 0.5, %v13982_v57  ;;  %v945_v9 = vpop.f32.mrf.mxu2 }
 0x512   : > { %v5230_v55 = vmul.f32 2.1237322e-06, %v14090_v46  ;;  %v5134_v52 = vmul.f32 %v14197_v22, %v5133_v43  ;;  %v5248_v13 = vadd.f32 0.4994258, %v5247_v8  ;;  %v5283_v54 = vmul.f32 %v5282_v2, %v14192_v53 }
 0x513   : > { %v14257_v15 = vmin.f32 %v5348_v32, 16.0  ;;  %v14261_v48 = vmul.f32 %v14148_v21, %v13843_v50  ;;  %v5080_v16 = vmul.f32 %v5079_v29, %v13838_v14  ;;  %v5194_v41 = vmul.f32 %v5193_v5, %v14046_v56 }
 0x514   : > { %v5322_v63 = vadd.f32 0.001143296, %v5321_v4  ;;  %v6520_v57 = vadd.f32 1.0, %v7792_v35  ;;  %v5119_v11 = vadd.f32 1.1283791, %v5118_v58  ;;  %8320 = vrcp.f32 %v14248_v19 }
 0x515   : > { %16621 = vst [vmem:[#allocation60_spill] sm:$0xff] %v14261_v48  ;;  %v5157_v44 = vadd.f32 0.18741608, %v5156_v0  ;;  %v14266_v60 = vpop.eup %8318  ;;  %v7793_v8 = vclamps-f32 %v5065_v45, 1.0  ;;  %v5105_v2 = vmul.f32 %v5104_v26, %v5080_v16  ;;  %vm5137_vm15 = vweird.f32 %v14197_v22 }
 0x516   : > { %v5231_v23 = vadd.f32 0.00028619796, %v5230_v55  ;;  %v5135_v50 = vadd.f32 %v14197_v22, %v5134_v52  ;;  %v5249_v14 = vmul.f32 %v5248_v13, %v14090_v46  ;;  %v5284_v21 = vadd.f32 0.014752088, %v5283_v54 }
 0x517   : > { %v5361_v29 = vmul.f32 3.8918573e-05, %v14257_v15  ;;  %vm5136_vm0 = vweird.f32 %v14140_v17  ;;  %v5142_v35 = vand.u32 2147483648, %v14140_v17  ;;  %v5195_v33 = vadd.f32 0.05243302, %v5194_v41 }
 0x518   : > { %v5323_v43 = vmul.f32 %v5322_v63, %v14228_v40  ;;  %v5140_v32 = vand.u32 2147483647, %v14140_v17  ;;  %v5158_v34 = vmul.f32 %v5157_v44, %v14025_v31  ;;  %v5172_v5 = vmul.f32 %v14266_v60, %v14225_v62  ;;  %vm14288_vm1 = vmor %vm5136_vm0, %vm5137_vm15 }
 0x519   : > { %v14280_v4 = vadd.f32 %v945_v9, %v8910_v12  ;;  %v14283_v58 = vmul.f32 %v6520_v57, %v13937_v49  ;;  %v7794_v0 = vclamps-f32 %v5105_v2, 1.0  ;;  %v5120_v45 = vmul.f32 %v5119_v11, %v13904_v6 }
 0x51a   : > { %v5232_v31 = vmul.f32 %v5231_v23, %v14090_v46  ;;  %v14293_v17 = vpop.eup %8320  ;;  %v5139_v55 = vsel %vm14288_vm1, %v14197_v22, %v5135_v50  ;;  %v14298_v52 = vadd.f32 1.0, %v5249_v14  ;;  %v5285_v49 = vmul.f32 %v5284_v21, %v14192_v53 }
 0x51b   : > { %16622 = vst [vmem:[#allocation57_spill] sm:$0xff] %v14283_v58  ;;  %v5362_v13 = vadd.f32 0.001143296, %v5361_v29  ;;  %v6521_v6 = vadd.f32 1.0, %v7793_v8  ;;  %v5143_v54 = vor.u32 1.1754944e-38, %v5142_v35  ;;  %v5196_v16 = vmul.f32 %v5195_v33, %v14046_v56 }
 0x51c   : > { %v5324_v41 = vadd.f32 0.014752088, %v5323_v43  ;;  %vm5141_vm2 = vcmp.eq.f32.partialorder %v5140_v32, 8.507059e+37  ;;  %v5159_v63 = vadd.f32 1.1283791, %v5158_v34  ;;  %v5173_v57 = vsub.f32 1.0, %v5172_v5 }
 0x51d   : > { %v14303_v11 = vmul.f32 0.70710677, %v14280_v4  ;;  %v5144_v44 = vsel %vm5141_vm2, %v5143_v54, %v5139_v55  ;;  %v5212_v22 = vmul.f32 %v14293_v17, %v14248_v19  ;;  %v5233_v2 = vadd.f32 0.0036580483, %v5232_v31 }
 0x51e   : > { %v5270_v23 = vmul.f32 2.1237322e-06, %v14192_v53  ;;  %v6522_v9 = vadd.f32 1.0, %v7794_v0  ;;  %8322 = vrcp.f32 %v14298_v52  ;;  %v5286_v8 = vadd.f32 0.112945676, %v5285_v49  ;;  %v1034_v49 = vpop.f32.mrf.mxu3 }
 0x51f   : > { %v5363_v50 = vmul.f32 %v5362_v13, %v14257_v15  ;;  %v14311_v14 = vmul.f32 %v6521_v6, %v14043_v20  ;;  %v5182_v21 = vand.u32 2147483648, %v14225_v62  ;;  %v5197_v29 = vadd.f32 0.18741608, %v5196_v16 }
 0x520   : > { %v5325_v35 = vmul.f32 %v5324_v41, %v14228_v40  ;;  %v5145_v33 = vmul.f32 %v5144_v44, %v5120_v45  ;;  %v5174_v43 = vmul.f32 %v14266_v60, %v5173_v57  ;;  %v5180_v32 = vand.u32 2147483647, %v14225_v62  ;;  %v770_v44 = vpop.f32.mrf.mxu0 }
 0x521   : > { %16625 = vst [vmem:[#allocation61_spill] sm:$0xff] %v14311_v14  ;;  %v5388_v34 = vmul.f32 %v14303_v11, %v14303_v11  ;;  %v14320_v5 = vmul.f32 %v5159_v63, %v13977_v18  ;;  %v5213_v0 = vsub.f32 1.0, %v5212_v22  ;;  %v5234_v20 = vmul.f32 %v5233_v2, %v14090_v46 }
 0x522   : > { %v5271_v26 = vadd.f32 0.00028619796, %v5270_v23  ;;  %v14324_v31 = vmul.f32 %v6522_v9, %v14093_v7  ;;  %vm5176_vm3 = vweird.f32 %v14225_v62  ;;  %v5287_v45 = vmul.f32 %v5286_v8, %v14192_v53 }
 0x523   : > { %v5364_v55 = vadd.f32 0.014752088, %v5363_v50  ;;  %v5183_v13 = vor.u32 1.1754944e-38, %v5182_v21  ;;  %v5198_v6 = vmul.f32 %v5197_v29, %v14046_v56  ;;  %v14330_v54 = vmul.f32 0.5, %v14038_v24 }
 0x524   : > { %16626 = vst [vmem:[#allocation58_spill] sm:$0xff] %v14324_v31  ;;  %v5326_v18 = vadd.f32 0.112945676, %v5325_v35  ;;  %v14332_v16 = vpop.eup %8322  ;;  %v7795_v41 = vclamps-f32 %v5145_v33, 1.0  ;;  %v5175_v63 = vadd.f32 %v14266_v60, %v5174_v43  ;;  %vm5177_vm4 = vweird.f32 %v14266_v60 }
 0x525   : > { %vm14336_vm5 = vcmp.eq.f32.partialorder %v5180_v32, 8.507059e+37  ;;  %v14340_v57 = vmin.f32 %v5388_v34, 16.0  ;;  %v5214_v56 = vmul.f32 %v14293_v17, %v5213_v0  ;;  %v5235_v22 = vadd.f32 0.05243302, %v5234_v20  ;;  %vm14352_vm6 = vmor %vm5176_vm3, %vm5177_vm4 }
 0x526   : > { %v5272_v24 = vmul.f32 %v5271_v26, %v14192_v53  ;;  %v14345_v2 = vadd.f32 %v1034_v49, %v8930_v25  ;;  %v5288_v23 = vadd.f32 0.4994258, %v5287_v45  ;;  %v5310_v9 = vmul.f32 2.1237322e-06, %v14228_v40 }
 0x527   : > { %v5350_v8 = vmul.f32 2.1237322e-06, %v14257_v15  ;;  %v5365_v50 = vmul.f32 %v5364_v55, %v14257_v15  ;;  %v5199_v29 = vadd.f32 1.1283791, %v5198_v6  ;;  %v5252_v35 = vmul.f32 %v14332_v16, %v14298_v52 }
 0x528   : > { %v5327_v33 = vmul.f32 %v5326_v18, %v14228_v40  ;;  %v14360_v43 = vadd.f32 %v770_v44, %v8891_v1  ;;  %v5179_v32 = vsel %vm14352_vm6, %v14266_v60, %v5175_v63  ;;  %vm5217_vm7 = vweird.f32 %v14293_v17 }
 0x529   : > { %v5222_v62 = vand.u32 2147483648, %v14248_v19  ;;  %v5401_v34 = vmul.f32 3.8918573e-05, %v14340_v57  ;;  %v5215_v0 = vadd.f32 %v14293_v17, %v5214_v56  ;;  %v5236_v20 = vmul.f32 %v5235_v22, %v14090_v46 }
 0x52a   : > { %v5273_v26 = vadd.f32 0.0036580483, %v5272_v24  ;;  %v14371_v45 = vmul.f32 0.70710677, %v14345_v2  ;;  %v5289_v55 = vmul.f32 %v5288_v23, %v14192_v53  ;;  %v5311_v49 = vadd.f32 0.00028619796, %v5310_v9 }
 0x52b   : > { %v5351_v6 = vadd.f32 0.00028619796, %v5350_v8  ;;  %v5366_v18 = vadd.f32 0.112945676, %v5365_v50  ;;  %v14374_v60 = vadd.f32 1.0, %v7795_v41  ;;  %v5253_v63 = vsub.f32 1.0, %v5252_v35 }
 0x52c   : > { %v5328_v44 = vadd.f32 0.4994258, %v5327_v33  ;;  %v14377_v21 = vmul.f32 0.70710677, %v14360_v43  ;;  %vm5216_vm8 = vweird.f32 %v14248_v19  ;;  %v5220_v56 = vand.u32 2147483647, %v14248_v19 }
 0x52d   : > { %v5223_v22 = vor.u32 1.1754944e-38, %v5222_v62  ;;  %v5402_v24 = vadd.f32 0.001143296, %v5401_v34  ;;  %v5184_v48 = vsel %vm14336_vm5, %v5183_v13, %v5179_v32  ;;  %vm14385_vm9 = vmor %vm5216_vm8, %vm5217_vm7  ;;  %v5237_v41 = vadd.f32 0.18741608, %v5236_v20 }
 0x52e   : > { %v5274_v9 = vmul.f32 %v5273_v26, %v14192_v53  ;;  %v5428_v8 = vmul.f32 %v14371_v45, %v14371_v45  ;;  %v5219_v19 = vsel %vm14385_vm9, %v14293_v17, %v5215_v0  ;;  %v14395_v50 = vadd.f32 1.0, %v5289_v55 }
 0x52f   : > { %v5312_v13 = vmul.f32 %v5311_v49, %v14228_v40  ;;  %v5367_v7 = vmul.f32 %v5366_v18, %v14257_v15  ;;  %v5254_v35 = vmul.f32 %v14332_v16, %v5253_v63  ;;  %v5329_v33 = vmul.f32 %v5328_v44, %v14228_v40 }
 0x530   : > { %v5352_v32 = vmul.f32 %v5351_v6, %v14257_v15  ;;  %v5468_v62 = vmul.f32 %v14377_v21, %v14377_v21  ;;  %v5185_v34 = vmul.f32 %v5184_v48, %v14320_v5  ;;  %v5200_v20 = vmul.f32 %v5199_v29, %v14007_v30 }
 0x531   : > { %vm5221_vm10 = vcmp.eq.f32.partialorder %v5220_v56, 8.507059e+37  ;;  %v5403_v17 = vmul.f32 %v5402_v24, %v14340_v57  ;;  %v5238_v26 = vmul.f32 %v5237_v41, %v14090_v46  ;;  %v5275_v55 = vadd.f32 0.05243302, %v5274_v9  ;;  %v859_v41 = vpop.f32.mrf.mxu1 }
 0x532   : > { %v5224_v0 = vsel %vm5221_vm10, %v5223_v22, %v5219_v19  ;;  %v14408_v49 = vmin.f32 %v5428_v8, 16.0  ;;  %vm5257_vm11 = vweird.f32 %v14332_v16  ;;  %8324 = vrcp.f32 %v14395_v50 }
 0x533   : > { %v5313_v6 = vadd.f32 0.0036580483, %v5312_v13  ;;  %v5368_v18 = vadd.f32 0.4994258, %v5367_v7  ;;  %v5255_v63 = vadd.f32 %v14332_v16, %v5254_v35  ;;  %v14413_v48 = vadd.f32 1.0, %v5329_v33 }
 0x534   : > { %v5353_v30 = vadd.f32 0.0036580483, %v5352_v32  ;;  %v14415_v5 = vmin.f32 %v5468_v62, 16.0  ;;  %v7796_v29 = vclamps-f32 %v5185_v34, 1.0  ;;  %v5225_v44 = vmul.f32 %v5224_v0, %v5200_v20 }
 0x535   : > { %v5262_v46 = vand.u32 2147483648, %v14298_v52  ;;  %v5404_v56 = vadd.f32 0.014752088, %v5403_v17  ;;  %vm5256_vm12 = vweird.f32 %v14298_v52  ;;  %v5260_v22 = vand.u32 2147483647, %v14298_v52 }
 0x536   : > { %v5276_v24 = vmul.f32 %v5275_v55, %v14192_v53  ;;  %v5441_v23 = vmul.f32 3.8918573e-05, %v14408_v49  ;;  %v5239_v9 = vadd.f32 1.1283791, %v5238_v26  ;;  %vm14424_vm13 = vmor %vm5256_vm12, %vm5257_vm11  ;;  %v5314_v19 = vmul.f32 %v5313_v6, %v14228_v40 }
 0x537   : > { %v5369_v13 = vmul.f32 %v5368_v18, %v14257_v15  ;;  %v5390_v7 = vmul.f32 2.1237322e-06, %v14340_v57  ;;  %v5259_v52 = vsel %vm14424_vm13, %v14332_v16, %v5255_v63  ;;  %8326 = vrcp.f32 %v14413_v48 }
 0x538   : > { %v5354_v35 = vmul.f32 %v5353_v30, %v14257_v15  ;;  %v5481_v33 = vmul.f32 3.8918573e-05, %v14415_v5  ;;  %v14437_v32 = vpop.eup %8324  ;;  %v6524_v62 = vadd.f32 1.0, %v7796_v29  ;;  %v5263_v34 = vor.u32 1.1754944e-38, %v5262_v46 }
 0x539   : > { %v5405_v20 = vmul.f32 %v5404_v56, %v14340_v57  ;;  %v14441_v17 = vadd.f32 %v859_v41, %v8893_v3  ;;  %v7797_v0 = vclamps-f32 %v5225_v44, 1.0  ;;  %vm5261_vm14 = vcmp.eq.f32.partialorder %v5260_v22, 8.507059e+37 }
 0x53a   : > { %v5277_v26 = vadd.f32 0.18741608, %v5276_v24  ;;  %v5442_v55 = vadd.f32 0.001143296, %v5441_v23  ;;  %v5240_v16 = vmul.f32 %v5239_v9, %v14053_v42  ;;  %v5264_v6 = vsel %vm5261_vm14, %v5263_v34, %v5259_v52 }
 0x53b   : > { %v14444_v18 = vadd.f32 1.0, %v5369_v13  ;;  %v5391_v63 = vadd.f32 0.00028619796, %v5390_v7  ;;  %v5292_v30 = vmul.f32 %v14437_v32, %v14395_v50  ;;  %v5315_v29 = vadd.f32 0.05243302, %v5314_v19  ;;  %v948_v13 = vpop.f32.mrf.mxu2 }
 0x53c   : > { %v5355_v46 = vadd.f32 0.05243302, %v5354_v35  ;;  %v5482_v8 = vadd.f32 0.001143296, %v5481_v33  ;;  %v14450_v56 = vmul.f32 %v14374_v60, %v14101_v59  ;;  %v14453_v44 = vmul.f32 %v6524_v62, %v14123_v10 }
 0x53d   : > { %v5406_v22 = vadd.f32 0.112945676, %v5405_v20  ;;  %v14456_v42 = vmul.f32 0.70710677, %v14441_v17  ;;  %v14458_v24 = vpop.eup %8326  ;;  %v5265_v23 = vmul.f32 %v5264_v6, %v5240_v16  ;;  %v14461_v41 = vmul.f32 0.5, %v14129_v61 }
 0x53e   : > { %16635 = vst [vmem:[#allocation62_spill] sm:$0xff] %v14450_v56  ;;  %v5278_v9 = vmul.f32 %v5277_v26, %v14192_v53  ;;  %v5443_v19 = vmul.f32 %v5442_v55, %v14408_v49  ;;  %v6525_v59 = vadd.f32 1.0, %v7797_v0  ;;  %v14466_v60 = vmul.f32 0.5, %v14155_v36  ;;  %v1037_v56 = vpop.f32.mrf.mxu3 }
 0x53f   : > { %16636 = vst [vmem:[#allocation59_spill] sm:$0xff] %v14453_v44  ;;  %8328 = vrcp.f32 %v14444_v18  ;;  %v5392_v10 = vmul.f32 %v5391_v63, %v14340_v57  ;;  %v5293_v7 = vsub.f32 1.0, %v5292_v30  ;;  %v5316_v52 = vmul.f32 %v5315_v29, %v14228_v40 }
 0x540   : > { %v5356_v35 = vmul.f32 %v5355_v46, %v14257_v15  ;;  %v5483_v61 = vmul.f32 %v5482_v8, %v14415_v5  ;;  %v5332_v53 = vmul.f32 %v14458_v24, %v14413_v48  ;;  %v5407_v33 = vmul.f32 %v5406_v22, %v14340_v57 }
 0x541   : > { %v5508_v36 = vmul.f32 %v14456_v42, %v14456_v42  ;;  %v14479_v62 = vadd.f32 %v948_v13, %v8910_v12  ;;  %v7798_v34 = vclamps-f32 %v5265_v23, 1.0  ;;  %v5279_v20 = vadd.f32 1.1283791, %v5278_v9 }
 0x542   : > { %v14482_v0 = vmul.f32 0.5, %v14195_v39  ;;  %v5444_v26 = vadd.f32 0.014752088, %v5443_v19  ;;  %v14485_v55 = vmul.f32 %v6525_v59, %v14252_v28  ;;  %v14488_v16 = vmul.f32 0.5, %v14280_v4 }
 0x543   : > { %v5393_v6 = vadd.f32 0.0036580483, %v5392_v10  ;;  %v14491_v63 = vmul.f32 0.5, %v14345_v2  ;;  %v5294_v30 = vmul.f32 %v14437_v32, %v5293_v7  ;;  %v5317_v29 = vadd.f32 0.18741608, %v5316_v52 }
 0x544   : > { %16637 = vst [vmem:[#allocation63_spill] sm:$0xff] %v14485_v55  ;;  %v5357_v46 = vadd.f32 0.18741608, %v5356_v35  ;;  %v5484_v8 = vadd.f32 0.014752088, %v5483_v61  ;;  %v5333_v39 = vsub.f32 1.0, %v5332_v53  ;;  %v5280_v19 = vmul.f32 %v5279_v20, %v14146_v47 }
 0x545   : > { %v14494_v22 = vpop.eup %8328  ;;  %v5408_v23 = vadd.f32 0.4994258, %v5407_v33  ;;  %v14496_v9 = vmin.f32 %v5508_v36, 16.0  ;;  %v14499_v28 = vmul.f32 0.70710677, %v14479_v62  ;;  %v14501_v4 = vadd.f32 1.0, %v7798_v34 }
 0x546   : > { %v5430_v2 = vmul.f32 2.1237322e-06, %v14408_v49  ;;  %v5445_v13 = vmul.f32 %v5444_v26, %v14408_v49  ;;  %vm5296_vm15 = vweird.f32 %v14395_v50  ;;  %v5300_v59 = vand.u32 2147483647, %v14395_v50 }
 0x547   : > { %v5302_v10 = vand.u32 2147483648, %v14395_v50  ;;  %v5394_v7 = vmul.f32 %v5393_v6, %v14340_v57  ;;  %v5295_v52 = vadd.f32 %v14437_v32, %v5294_v30  ;;  %vm5297_vm0 = vweird.f32 %v14437_v32  ;;  %v16644_v30 = vld [vmem:[#allocation16_spill] sm:$0xff] }
 0x548   : > { %v5372_v35 = vmul.f32 %v14494_v22, %v14444_v18  ;;  %v5485_v47 = vmul.f32 %v5484_v8, %v14415_v5  ;;  %v5334_v61 = vmul.f32 %v14458_v24, %v5333_v39  ;;  %v5409_v53 = vmul.f32 %v5408_v23, %v14340_v57  ;;  %vm14524_vm1 = vmor %vm5296_vm15, %vm5297_vm0  ;;  %v16645_v8 = vld [vmem:[#allocation18_spill] sm:$0xff] }
 0x549   : > { %v5521_v33 = vmul.f32 3.8918573e-05, %v14496_v9  ;;  %v5548_v36 = vmul.f32 %v14499_v28, %v14499_v28  ;;  %v5318_v34 = vmul.f32 %v5317_v29, %v14228_v40  ;;  %v5431_v20 = vadd.f32 0.00028619796, %v5430_v2 }
 0x54a   : > { %v5446_v26 = vadd.f32 0.112945676, %v5445_v13  ;;  %v5470_v6 = vmul.f32 2.1237322e-06, %v14415_v5  ;;  %vm14528_vm2 = vcmp.eq.f32.partialorder %v5300_v59, 8.507059e+37  ;;  %v5303_v39 = vor.u32 1.1754944e-38, %v5302_v10 }
 0x54b   : > { %v5358_v23 = vmul.f32 %v5357_v46, %v14257_v15  ;;  %v5395_v55 = vadd.f32 0.05243302, %v5394_v7  ;;  %v5299_v40 = vsel %vm14524_vm1, %v14437_v32, %v5295_v52  ;;  %vm5337_vm3 = vweird.f32 %v14458_v24 }
 0x54c   : > { %v5373_v29 = vsub.f32 1.0, %v5372_v35  ;;  %v5486_v50 = vadd.f32 0.112945676, %v5485_v47  ;;  %v5335_v2 = vadd.f32 %v14458_v24, %v5334_v61  ;;  %v14538_v13 = vadd.f32 1.0, %v5409_v53 }
 0x54d   : > { %v5522_v59 = vadd.f32 0.001143296, %v5521_v33  ;;  %v14540_v44 = vmin.f32 %v5548_v36, 16.0  ;;  %v5319_v10 = vadd.f32 1.1283791, %v5318_v34  ;;  %v5432_v15 = vmul.f32 %v5431_v20, %v14408_v49 }
 0x54e   : > { %v5447_v46 = vmul.f32 %v5446_v26, %v14408_v49  ;;  %v5471_v7 = vadd.f32 0.00028619796, %v5470_v6  ;;  %vm5336_vm4 = vweird.f32 %v14413_v48  ;;  %v5340_v32 = vand.u32 2147483647, %v14413_v48 }
 0x54f   : > { %v5342_v52 = vand.u32 2147483648, %v14413_v48  ;;  %v5396_v35 = vmul.f32 %v5395_v55, %v14340_v57  ;;  %v5304_v47 = vsel %vm14528_vm2, %v5303_v39, %v5299_v40  ;;  %vm14552_vm5 = vmor %vm5336_vm4, %vm5337_vm3  ;;  %v5374_v53 = vmul.f32 %v14494_v22, %v5373_v29 }
 0x550   : > { %v5487_v33 = vmul.f32 %v5486_v50, %v14415_v5  ;;  %v14559_v36 = vadd.f32 %v1037_v56, %v8930_v25  ;;  %v5339_v48 = vsel %vm14552_vm5, %v14458_v24, %v5335_v2  ;;  %8330 = vrcp.f32 %v14538_v13 }
 0x551   : > { %v5523_v55 = vmul.f32 %v5522_v59, %v14496_v9  ;;  %v5561_v34 = vmul.f32 3.8918573e-05, %v14540_v44  ;;  %v5433_v20 = vadd.f32 0.0036580483, %v5432_v15  ;;  %v5448_v26 = vadd.f32 0.4994258, %v5447_v46 }
 0x552   : > { %v5472_v6 = vmul.f32 %v5471_v7, %v14415_v5  ;;  %v6708_v39 = vpack.c.bf16 %v16645_v8, %v16644_v30  ;;  %vm5341_vm6 = vcmp.eq.f32.partialorder %v5340_v32, 8.507059e+37  ;;  %v5343_v56 = vor.u32 1.1754944e-38, %v5342_v52 }
 0x553   : > { %v5359_v40 = vadd.f32 1.1283791, %v5358_v23  ;;  %v5397_v29 = vadd.f32 0.18741608, %v5396_v35  ;;  %v5305_v50 = vmul.f32 %v5304_v47, %v5280_v19  ;;  %vm5377_vm7 = vweird.f32 %v14494_v22 }
 0x554   : > { %v5488_v24 = vadd.f32 0.4994258, %v5487_v33  ;;  %v14572_v2 = vmul.f32 0.70710677, %v14559_v36  ;;  %7046 = vmatmul.bf16.gmra.mxu0 %v6708_v39  ;;  %v5344_v59 = vsel %vm5341_vm6, %v5343_v56, %v5339_v48  ;;  %v5375_v15 = vadd.f32 %v14494_v22, %v5374_v53 }
 0x555   : > { %v5524_v46 = vadd.f32 0.014752088, %v5523_v55  ;;  %v5562_v7 = vadd.f32 0.001143296, %v5561_v34  ;;  %v5320_v61 = vmul.f32 %v5319_v10, %v14179_v37  ;;  %v5434_v32 = vmul.f32 %v5433_v20, %v14408_v49  ;;  %v772_v37 = vpop.f32.mrf.mxu0 }
 0x556   : > { %v5449_v23 = vmul.f32 %v5448_v26, %v14408_v49  ;;  %v5473_v52 = vadd.f32 0.0036580483, %v5472_v6  ;;  %v14578_v19 = vpop.eup %8330  ;;  %vm5376_vm8 = vweird.f32 %v14444_v18  ;;  %v5380_v35 = vand.u32 2147483647, %v14444_v18 }
 0x557   : > { %v5382_v47 = vand.u32 2147483648, %v14444_v18  ;;  %v5398_v33 = vmul.f32 %v5397_v29, %v14340_v57  ;;  %v5345_v53 = vmul.f32 %v5344_v59, %v5320_v61  ;;  %v5360_v48 = vmul.f32 %v5359_v40, %v14222_v38  ;;  %vm14587_vm9 = vmor %vm5376_vm8, %vm5377_vm7 }
 0x558   : > { %v5489_v10 = vmul.f32 %v5488_v24, %v14415_v5  ;;  %v5588_v55 = vmul.f32 %v14572_v2, %v14572_v2  ;;  %v7799_v34 = vclamps-f32 %v5305_v50, 1.0  ;;  %v5379_v18 = vsel %vm14587_vm9, %v14494_v22, %v5375_v15  ;;  %v16648_v50 = vld [vmem:[#allocation20_spill] sm:$0xff]  ;;  %v16649_v24 = vld [vmem:[#allocation22_spill] sm:$0xff] }
 0x559   : > { %v5525_v57 = vmul.f32 %v5524_v46, %v14496_v9  ;;  %v5563_v38 = vmul.f32 %v5562_v7, %v14540_v44  ;;  %v5412_v20 = vmul.f32 %v14578_v19, %v14538_v13  ;;  %v5435_v26 = vadd.f32 0.05243302, %v5434_v32 }
 0x55a   : > { %v14601_v6 = vadd.f32 1.0, %v5449_v23  ;;  %v5474_v30 = vmul.f32 %v5473_v52, %v14415_v5  ;;  %vm5381_vm10 = vcmp.eq.f32.partialorder %v5380_v35, 8.507059e+37  ;;  %v5383_v8 = vor.u32 1.1754944e-38, %v5382_v47 }
 0x55b   : > { %v5399_v39 = vadd.f32 1.1283791, %v5398_v33  ;;  %v5510_v56 = vmul.f32 2.1237322e-06, %v14496_v9  ;;  %v7800_v40 = vclamps-f32 %v5345_v53, 1.0  ;;  %v14605_v29 = vadd.f32 1.0, %v5489_v10 }
 0x55c   : > { %v14607_v22 = vmin.f32 %v5588_v55, 16.0  ;;  %v6709_v59 = vpack.c.bf16 %v16649_v24, %v16648_v50  ;;  %v6527_v15 = vadd.f32 1.0, %v7799_v34  ;;  %v5384_v46 = vsel %vm5381_vm10, %v5383_v8, %v5379_v18  ;;  %v861_v18 = vpop.f32.mrf.mxu1 }
 0x55d   : > { %v5526_v7 = vadd.f32 0.112945676, %v5525_v57  ;;  %v5564_v61 = vadd.f32 0.014752088, %v5563_v38  ;;  %v5413_v32 = vsub.f32 1.0, %v5412_v20  ;;  %v5436_v23 = vmul.f32 %v5435_v26, %v14408_v49 }
 0x55e   : > { %8332 = vrcp.f32 %v14601_v6  ;;  %v5475_v52 = vadd.f32 0.05243302, %v5474_v30  ;;  %7135 = vmatmul.bf16.gmra.mxu1 %v6709_v59  ;;  %v14615_v35 = vmul.f32 %v14501_v4, %v14330_v54  ;;  %v14618_v47 = vmul.f32 0.5, %v14360_v43 }
 0x55f   : > { %v14621_v33 = vmul.f32 0.5, %v14441_v17  ;;  %v5511_v53 = vadd.f32 0.00028619796, %v5510_v56  ;;  %v6528_v10 = vadd.f32 1.0, %v7800_v40  ;;  %v5385_v55 = vmul.f32 %v5384_v46, %v5360_v48 }
 0x560   : > { %16650 = vst [vmem:[#allocation16_spill] sm:$0xff] %v14615_v35  ;;  %8334 = vrcp.f32 %v14605_v29  ;;  %v5601_v34 = vmul.f32 3.8918573e-05, %v14607_v22  ;;  %v14626_v57 = vmul.f32 %v6527_v15, %v14461_v41  ;;  %v14629_v54 = vmul.f32 %v5399_v39, %v14303_v11 }
 0x561   : > { %v5527_v43 = vmul.f32 %v5526_v7, %v14496_v9  ;;  %v5565_v17 = vmul.f32 %v5564_v61, %v14540_v44  ;;  %v5414_v4 = vmul.f32 %v14578_v19, %v5413_v32  ;;  %v5437_v38 = vadd.f32 0.18741608, %v5436_v23 }
 0x562   : > { %16651 = vst [vmem:[#allocation18_spill] sm:$0xff] %v14626_v57  ;;  %v5476_v48 = vmul.f32 %v5475_v52, %v14415_v5  ;;  %v14636_v20 = vadd.f32 %v772_v37, %v8891_v1  ;;  %vm5416_vm11 = vweird.f32 %v14538_v13  ;;  %v5420_v41 = vand.u32 2147483647, %v14538_v13  ;;  %v16654_v37 = vld [vmem:[#allocation19_spill] sm:$0xff] }
 0x563   : > { %v5512_v26 = vmul.f32 %v5511_v53, %v14496_v9  ;;  %v14642_v11 = vadd.f32 %v861_v18, %v8893_v3  ;;  %v14647_v8 = vmul.f32 %v6528_v10, %v14466_v60  ;;  %v7801_v39 = vclamps-f32 %v5385_v55, 1.0  ;;  %v16653_v53 = vld [vmem:[#allocation17_spill] sm:$0xff] }
 0x564   : > { %v14644_v30 = vpop.eup %8332  ;;  %v5422_v56 = vand.u32 2147483648, %v14538_v13  ;;  %v5602_v40 = vadd.f32 0.001143296, %v5601_v34  ;;  %vm5417_vm12 = vweird.f32 %v14578_v19  ;;  %v5528_v50 = vadd.f32 0.4994258, %v5527_v43 }
 0x565   : > { %16652 = vst [vmem:[#allocation20_spill] sm:$0xff] %v14647_v8  ;;  %v5550_v24 = vmul.f32 2.1237322e-06, %v14540_v44  ;;  %v5566_v59 = vadd.f32 0.112945676, %v5565_v17  ;;  %v5415_v46 = vadd.f32 %v14578_v19, %v5414_v4  ;;  %v5438_v7 = vmul.f32 %v5437_v38, %v14408_v49  ;;  %vm14679_vm14 = vmor %vm5416_vm11, %vm5417_vm12 }
 0x566   : > { %v14652_v15 = vpop.eup %8334  ;;  %v5477_v61 = vadd.f32 0.18741608, %v5476_v48  ;;  %v14657_v60 = vmul.f32 0.70710677, %v14636_v20  ;;  %v5452_v32 = vmul.f32 %v14644_v30, %v14601_v6  ;;  %v5513_v23 = vadd.f32 0.0036580483, %v5512_v26  ;;  %v950_v48 = vpop.f32.mrf.mxu2 }
 0x567   : > { %v14662_v52 = vmul.f32 0.70710677, %v14642_v11  ;;  %v6710_v10 = vpack.c.bf16 %v16654_v37, %v16653_v53  ;;  %v6529_v55 = vadd.f32 1.0, %v7801_v39  ;;  %vm14666_vm13 = vcmp.eq.f32.partialorder %v5420_v41, 8.507059e+37 }
 0x568   : > { %v5423_v49 = vor.u32 1.1754944e-38, %v5422_v56  ;;  %v5603_v18 = vmul.f32 %v5602_v40, %v14607_v22  ;;  %v5492_v43 = vmul.f32 %v14652_v15, %v14605_v29  ;;  %v5529_v17 = vmul.f32 %v5528_v50, %v14496_v9  ;;  %v16659_v40 = vld [vmem:[#allocation21_spill] sm:$0xff]  ;;  %v16660_v50 = vld [vmem:[#allocation23_spill] sm:$0xff] }
 0x569   : > { %v5551_v4 = vadd.f32 0.00028619796, %v5550_v24  ;;  %v5567_v38 = vmul.f32 %v5566_v59, %v14540_v44  ;;  %7224 = vmatmul.bf16.gmra.mxu2 %v6710_v10  ;;  %v5439_v26 = vadd.f32 1.1283791, %v5438_v7  ;;  %v5478_v39 = vmul.f32 %v5477_v61, %v14415_v5  ;;  %v16661_v61 = vld [vmem:[#allocation28_spill] sm:$0xff] }
 0x56a   : > { %v5628_v56 = vmul.f32 %v14657_v60, %v14657_v60  ;;  %v6711_v24 = vpack.c.bf16 %v16660_v50, %v16659_v40  ;;  %v5419_v59 = vsel %vm14679_vm14, %v14578_v19, %v5415_v46  ;;  %v5453_v53 = vsub.f32 1.0, %v5452_v32  ;;  %v16662_v40 = vld [vmem:[#allocation26_spill] sm:$0xff] }
 0x56b   : > { %v5514_v13 = vmul.f32 %v5513_v23, %v14496_v9  ;;  %v5668_v37 = vmul.f32 %v14662_v52, %v14662_v52  ;;  %v5604_v10 = vadd.f32 0.014752088, %v5603_v18  ;;  %v14695_v7 = vadd.f32 %v950_v48, %v8910_v12 }
 0x56c   : > { %7313 = vmatmul.bf16.gmra.mxu3 %v6711_v24  ;;  %v6712_v5 = vpack.c.bf16 %v12412_v27, %v12323_v51  ;;  %v6713_v50 = vpack.c.bf16 %v16662_v40, %v16661_v61  ;;  %v5493_v57 = vsub.f32 1.0, %v5492_v43  ;;  %v14701_v41 = vadd.f32 1.0, %v5529_v17 }
 0x56d   : > { %v5552_v19 = vmul.f32 %v5551_v4, %v14540_v44  ;;  %v5568_v46 = vadd.f32 0.4994258, %v5567_v38  ;;  %v14705_v32 = vmul.f32 %v6529_v55, %v14482_v0  ;;  %v14708_v23 = vmul.f32 %v5439_v26, %v14371_v45 }
 0x56e   : > { %v5460_v18 = vand.u32 2147483647, %v14601_v6  ;;  %v14711_v48 = vmin.f32 %v5628_v56, 16.0  ;;  %7051 = vmatmul.bf16.gmra.mxu0 %v6712_v5  ;;  %7140 = vmatmul.bf16.gmra.mxu1 %v6713_v50  ;;  %vm5456_vm15 = vweird.f32 %v14601_v6  ;;  %v5479_v51 = vadd.f32 1.1283791, %v5478_v39 }
 0x56f   : > { %16663 = vst [vmem:[#allocation22_spill] sm:$0xff] %v14705_v32  ;;  %v5515_v27 = vadd.f32 0.05243302, %v5514_v13  ;;  %v14714_v43 = vmin.f32 %v5668_v37, 16.0  ;;  %v5424_v17 = vsel %vm14666_vm13, %v5423_v49, %v5419_v59  ;;  %v5454_v0 = vmul.f32 %v14644_v30, %v5453_v53 }
 0x570   : > { %v5605_v45 = vmul.f32 %v5604_v10, %v14607_v22  ;;  %v14721_v55 = vmul.f32 0.70710677, %v14695_v7  ;;  %v5494_v4 = vmul.f32 %v14652_v15, %v5493_v57  ;;  %8336 = vrcp.f32 %v14701_v41 }
 0x571   : > { %v5553_v38 = vadd.f32 0.0036580483, %v5552_v19  ;;  %v5569_v26 = vmul.f32 %v5568_v46, %v14540_v44  ;;  %vm14726_vm0 = vcmp.eq.f32.partialorder %v5460_v18, 8.507059e+37  ;;  %v5462_v34 = vand.u32 2147483648, %v14601_v6 }
 0x572   : > { %v5500_v49 = vand.u32 2147483647, %v14605_v29  ;;  %v5641_v56 = vmul.f32 3.8918573e-05, %v14711_v48  ;;  %v5425_v24 = vmul.f32 %v5424_v17, %v14629_v54  ;;  %vm5457_vm1 = vweird.f32 %v14644_v30 }
 0x573   : > { %v5516_v57 = vmul.f32 %v5515_v27, %v14496_v9  ;;  %v5681_v59 = vmul.f32 3.8918573e-05, %v14714_v43  ;;  %v5455_v53 = vadd.f32 %v14644_v30, %v5454_v0  ;;  %v5590_v13 = vmul.f32 2.1237322e-06, %v14607_v22  ;;  %vm14754_vm4 = vmor %vm5456_vm15, %vm5457_vm1 }
 0x574   : > { %v5606_v37 = vadd.f32 0.112945676, %v5605_v45  ;;  %v5708_v10 = vmul.f32 %v14721_v55, %v14721_v55  ;;  %v5495_v5 = vadd.f32 %v14652_v15, %v5494_v4  ;;  %vm5497_vm2 = vweird.f32 %v14652_v15  ;;  %v16670_v45 = vld [vmem:[#allocation25_spill] sm:$0xff]  ;;  %v16671_v4 = vld [vmem:[#allocation30_spill] sm:$0xff] }
 0x575   : > { %v5554_v54 = vmul.f32 %v5553_v38, %v14540_v44  ;;  %v14744_v61 = vadd.f32 1.0, %v5569_v26  ;;  %v5463_v40 = vor.u32 1.1754944e-38, %v5462_v34  ;;  %vm5496_vm3 = vweird.f32 %v14605_v29 }
 0x576   : > { %v5502_v50 = vand.u32 2147483648, %v14605_v29  ;;  %v5642_v19 = vadd.f32 0.001143296, %v5641_v56  ;;  %v14748_v46 = vpop.eup %8336  ;;  %v7802_v18 = vclamps-f32 %v5425_v24, 1.0  ;;  %vm14758_vm5 = vcmp.eq.f32.partialorder %v5500_v49, 8.507059e+37  ;;  %vm14767_vm6 = vmor %vm5496_vm3, %vm5497_vm2 }
 0x577   : > { %v5682_v0 = vadd.f32 0.001143296, %v5681_v59  ;;  %v6714_v29 = vpack.c.bf16 %v16671_v4, %v16670_v45  ;;  %v5459_v38 = vsel %vm14754_vm4, %v14644_v30, %v5455_v53  ;;  %v5591_v6 = vadd.f32 0.00028619796, %v5590_v13  ;;  %v16674_v13 = vld [vmem:[#allocation29_spill] sm:$0xff]  ;;  %v16675_v45 = vld [vmem:[#allocation27_spill] sm:$0xff] }
 0x578   : > { %v5607_v34 = vmul.f32 %v5606_v37, %v14607_v22  ;;  %v14772_v56 = vmin.f32 %v5708_v10, 16.0  ;;  %v5499_v49 = vsel %vm14767_vm6, %v14652_v15, %v5495_v5  ;;  %v5517_v24 = vadd.f32 0.18741608, %v5516_v57 }
 0x579   : > { %v5555_v59 = vadd.f32 0.05243302, %v5554_v54  ;;  %8338 = vrcp.f32 %v14744_v61  ;;  %7229 = vmatmul.bf16.gmra.mxu2 %v6714_v29  ;;  %v5503_v27 = vor.u32 1.1754944e-38, %v5502_v50  ;;  %v5532_v30 = vmul.f32 %v14748_v46, %v14701_v41 }
 0x57a   : > { %v5643_v53 = vmul.f32 %v5642_v19, %v14711_v48  ;;  %v6715_v37 = vpack.c.bf16 %v16675_v45, %v16674_v13  ;;  %v6530_v10 = vadd.f32 1.0, %v7802_v18  ;;  %v5464_v4 = vsel %vm14726_vm0, %v5463_v40, %v5459_v38 }
 0x57b   : > { %v5630_v15 = vmul.f32 2.1237322e-06, %v14711_v48  ;;  %v5683_v57 = vmul.f32 %v5682_v0, %v14714_v43  ;;  %v5504_v5 = vsel %vm14758_vm5, %v5503_v27, %v5499_v49  ;;  %v5592_v54 = vmul.f32 %v5591_v6, %v14607_v22  ;;  %v1039_v6 = vpop.f32.mrf.mxu3 }
 0x57c   : > { %v5608_v50 = vadd.f32 0.4994258, %v5607_v34  ;;  %v5721_v29 = vmul.f32 3.8918573e-05, %v14772_v56  ;;  %7318 = vmatmul.bf16.gmra.mxu3 %v6715_v37  ;;  %v5480_v19 = vmul.f32 %v5479_v51, %v14377_v21  ;;  %v5518_v18 = vmul.f32 %v5517_v24, %v14496_v9 }
 0x57d   : > { %v14794_v39 = vmul.f32 0.5, %v14479_v62  ;;  %v5556_v40 = vmul.f32 %v5555_v59, %v14540_v44  ;;  %v5465_v0 = vmul.f32 %v5464_v4, %v14708_v23  ;;  %v5533_v38 = vsub.f32 1.0, %v5532_v30 }
 0x57e   : > { %v14799_v17 = vmul.f32 0.5, %v14559_v36  ;;  %v5644_v26 = vadd.f32 0.014752088, %v5643_v53  ;;  %v14804_v49 = vmul.f32 %v6530_v10, %v14488_v16  ;;  %v5505_v21 = vmul.f32 %v5504_v5, %v5480_v19 }
 0x57f   : > { %v14801_v34 = vpop.eup %8338  ;;  %v5631_v9 = vadd.f32 0.00028619796, %v5630_v15  ;;  %v5684_v51 = vadd.f32 0.014752088, %v5683_v57  ;;  %v5593_v62 = vadd.f32 0.0036580483, %v5592_v54  ;;  %v5609_v24 = vmul.f32 %v5608_v50, %v14607_v22 }
 0x580   : > { %16676 = vst [vmem:[#allocation17_spill] sm:$0xff] %v14804_v49  ;;  %v5670_v59 = vmul.f32 2.1237322e-06, %v14714_v43  ;;  %v5722_v23 = vadd.f32 0.001143296, %v5721_v29  ;;  %v14809_v36 = vmul.f32 0.5, %v14636_v20  ;;  %v14812_v53 = vadd.f32 %v1039_v6, %v8930_v25 }
 0x581   : > { %v5519_v27 = vadd.f32 1.1283791, %v5518_v18  ;;  %v5557_v30 = vadd.f32 0.18741608, %v5556_v40  ;;  %v7803_v13 = vclamps-f32 %v5465_v0, 1.0  ;;  %v5534_v16 = vmul.f32 %v14748_v46, %v5533_v38 }
 0x582   : > { %v5572_v45 = vmul.f32 %v14801_v34, %v14744_v61  ;;  %v5645_v37 = vmul.f32 %v5644_v26, %v14711_v48  ;;  %v7804_v10 = vclamps-f32 %v5505_v21, 1.0  ;;  %vm5536_vm7 = vweird.f32 %v14701_v41 }
 0x583   : > { %v5632_v4 = vmul.f32 %v5631_v9, %v14711_v48  ;;  %v5685_v15 = vmul.f32 %v5684_v51, %v14714_v43  ;;  %v5594_v20 = vmul.f32 %v5593_v62, %v14607_v22  ;;  %v14822_v57 = vadd.f32 1.0, %v5609_v24  ;;  %v775_v51 = vpop.f32.mrf.mxu0 }
 0x584   : > { %v5671_v5 = vadd.f32 0.00028619796, %v5670_v59  ;;  %v5723_v54 = vmul.f32 %v5722_v23, %v14772_v56  ;;  %v5540_v50 = vand.u32 2147483647, %v14701_v41  ;;  %v5542_v29 = vand.u32 2147483648, %v14701_v41 }
 0x585   : > { %v5558_v19 = vmul.f32 %v5557_v30, %v14540_v44  ;;  %v14829_v18 = vmul.f32 0.70710677, %v14812_v53  ;;  %v5535_v40 = vadd.f32 %v14748_v46, %v5534_v16  ;;  %vm5537_vm8 = vweird.f32 %v14748_v46 }
 0x586   : > { %v5573_v0 = vsub.f32 1.0, %v5572_v45  ;;  %v5646_v38 = vadd.f32 0.112945676, %v5645_v37  ;;  %v6531_v26 = vadd.f32 1.0, %v7803_v13  ;;  %v6532_v6 = vadd.f32 1.0, %v7804_v10  ;;  %vm14838_vm9 = vmor %vm5536_vm7, %vm5537_vm8 }
 0x587   : > { %v5633_v21 = vadd.f32 0.0036580483, %v5632_v4  ;;  %v5686_v9 = vadd.f32 0.112945676, %v5685_v15  ;;  %v5595_v62 = vadd.f32 0.05243302, %v5594_v20  ;;  %8340 = vrcp.f32 %v14822_v57 }
 0x588   : > { %v5672_v24 = vmul.f32 %v5671_v5, %v14714_v43  ;;  %v5724_v44 = vadd.f32 0.014752088, %v5723_v54  ;;  %v5520_v59 = vmul.f32 %v5519_v27, %v14456_v42  ;;  %vm5541_vm10 = vcmp.eq.f32.partialorder %v5540_v50, 8.507059e+37 }
 0x589   : > { %v5559_v30 = vadd.f32 1.1283791, %v5558_v19  ;;  %v5748_v13 = vmul.f32 %v14829_v18, %v14829_v18  ;;  %v5539_v16 = vsel %vm14838_vm9, %v14748_v46, %v5535_v40  ;;  %v5574_v45 = vmul.f32 %v14801_v34, %v5573_v0 }
 0x58a   : > { %v5647_v37 = vmul.f32 %v5646_v38, %v14711_v48  ;;  %v14850_v42 = vadd.f32 %v775_v51, %v8891_v1  ;;  %v14853_v41 = vmul.f32 %v6531_v26, %v14491_v63  ;;  %v5543_v27 = vor.u32 1.1754944e-38, %v5542_v29  ;;  %v864_v38 = vpop.f32.mrf.mxu1 }
 0x58b   : > { %v5634_v10 = vmul.f32 %v5633_v21, %v14711_v48  ;;  %v5687_v4 = vmul.f32 %v5686_v9, %v14714_v43  ;;  %v14858_v15 = vmul.f32 %v6532_v6, %v14618_v47  ;;  %v5596_v46 = vmul.f32 %v5595_v62, %v14607_v22  ;;  %v953_v21 = vpop.f32.mrf.mxu2 }
 0x58c   : > { %16679 = vst [vmem:[#allocation19_spill] sm:$0xff] %v14853_v41  ;;  %v5673_v20 = vadd.f32 0.0036580483, %v5672_v24  ;;  %v5725_v5 = vmul.f32 %v5724_v44, %v14772_v56  ;;  %v5544_v54 = vsel %vm5541_vm10, %v5543_v27, %v5539_v16  ;;  %v5560_v50 = vmul.f32 %v5559_v30, %v14499_v28 }
 0x58d   : > { %16680 = vst [vmem:[#allocation21_spill] sm:$0xff] %v14858_v15  ;;  %v5582_v19 = vand.u32 2147483648, %v14744_v61  ;;  %v14864_v63 = vmin.f32 %v5748_v13, 16.0  ;;  %v14866_v29 = vpop.eup %8340  ;;  %v5575_v40 = vadd.f32 %v14801_v34, %v5574_v45  ;;  %vm5577_vm11 = vweird.f32 %v14801_v34 }
 0x58e   : > { %v5648_v47 = vadd.f32 0.4994258, %v5647_v37  ;;  %v14871_v0 = vmul.f32 0.70710677, %v14850_v42  ;;  %vm5576_vm12 = vweird.f32 %v14744_v61  ;;  %v5635_v26 = vadd.f32 0.05243302, %v5634_v10 }
 0x58f   : > { %v5688_v6 = vadd.f32 0.4994258, %v5687_v4  ;;  %v5710_v28 = vmul.f32 2.1237322e-06, %v14772_v56  ;;  %v5580_v9 = vand.u32 2147483647, %v14744_v61  ;;  %v5674_v62 = vmul.f32 %v5673_v20, %v14714_v43  ;;  %vm14877_vm13 = vmor %vm5576_vm12, %vm5577_vm11 }
 0x590   : > { %v5597_v51 = vadd.f32 0.18741608, %v5596_v46  ;;  %v5726_v24 = vadd.f32 0.112945676, %v5725_v5  ;;  %v5545_v44 = vmul.f32 %v5544_v54, %v5520_v59  ;;  %v5612_v30 = vmul.f32 %v14866_v29, %v14822_v57 }
 0x591   : > { %v5761_v13 = vmul.f32 3.8918573e-05, %v14864_v63  ;;  %v14885_v16 = vadd.f32 %v864_v38, %v8893_v3  ;;  %v5579_v61 = vsel %vm14877_vm13, %v14801_v34, %v5575_v40  ;;  %v5649_v45 = vmul.f32 %v5648_v47, %v14711_v48 }
 0x592   : > { %v5788_v59 = vmul.f32 %v14871_v0, %v14871_v0  ;;  %v14894_v37 = vadd.f32 %v953_v21, %v8910_v12  ;;  %v5583_v27 = vor.u32 1.1754944e-38, %v5582_v19  ;;  %v5636_v10 = vmul.f32 %v5635_v26, %v14711_v48 }
 0x593   : > { %v5689_v4 = vmul.f32 %v5688_v6, %v14714_v43  ;;  %v5711_v46 = vadd.f32 0.00028619796, %v5710_v28  ;;  %vm5581_vm14 = vcmp.eq.f32.partialorder %v5580_v9, 8.507059e+37  ;;  %v5598_v20 = vmul.f32 %v5597_v51, %v14607_v22 }
 0x594   : > { %v5675_v5 = vadd.f32 0.05243302, %v5674_v62  ;;  %v5727_v34 = vmul.f32 %v5726_v24, %v14772_v56  ;;  %v5584_v54 = vsel %vm5581_vm14, %v5583_v27, %v5579_v61  ;;  %v5613_v40 = vsub.f32 1.0, %v5612_v30 }
 0x595   : > { %v5762_v47 = vadd.f32 0.001143296, %v5761_v13  ;;  %v14901_v38 = vmul.f32 0.70710677, %v14885_v16  ;;  %v7805_v21 = vclamps-f32 %v5545_v44, 1.0  ;;  %v14903_v23 = vadd.f32 1.0, %v5649_v45 }
 0x596   : > { %v14905_v19 = vmin.f32 %v5788_v59, 16.0  ;;  %v14908_v26 = vmul.f32 0.70710677, %v14894_v37  ;;  %v5637_v6 = vadd.f32 0.18741608, %v5636_v10  ;;  %v14911_v22 = vmul.f32 0.5, %v14642_v11 }
 0x597   : > { %v14913_v28 = vadd.f32 1.0, %v5689_v4  ;;  %v5712_v9 = vmul.f32 %v5711_v46, %v14772_v56  ;;  %v5585_v51 = vmul.f32 %v5584_v54, %v5560_v50  ;;  %v5599_v62 = vadd.f32 1.1283791, %v5598_v20 }
 0x598   : > { %v14917_v24 = vmul.f32 0.5, %v14695_v7  ;;  %v5728_v44 = vadd.f32 0.4994258, %v5727_v34  ;;  %v5614_v30 = vmul.f32 %v14866_v29, %v5613_v40  ;;  %v5676_v13 = vmul.f32 %v5675_v5, %v14714_v43 }
 0x599   : > { %v5763_v61 = vmul.f32 %v5762_v47, %v14864_v63  ;;  %v5828_v11 = vmul.f32 %v14901_v38, %v14901_v38  ;;  %v6533_v45 = vadd.f32 1.0, %v7805_v21  ;;  %8342 = vrcp.f32 %v14903_v23 }
 0x59a   : > { %v5801_v59 = vmul.f32 3.8918573e-05, %v14905_v19  ;;  %v5868_v50 = vmul.f32 %v14908_v26, %v14908_v26  ;;  %v5620_v7 = vand.u32 2147483647, %v14822_v57  ;;  %v5638_v27 = vmul.f32 %v5637_v6, %v14711_v48 }
 0x59b   : > { %8344 = vrcp.f32 %v14913_v28  ;;  %v5713_v10 = vadd.f32 0.0036580483, %v5712_v9  ;;  %v7806_v4 = vclamps-f32 %v5585_v51, 1.0  ;;  %vm5617_vm15 = vweird.f32 %v14866_v29 }
 0x59c   : > { %v5622_v46 = vand.u32 2147483648, %v14822_v57  ;;  %v5729_v20 = vmul.f32 %v5728_v44, %v14772_v56  ;;  %v5615_v5 = vadd.f32 %v14866_v29, %v5614_v30  ;;  %v5677_v34 = vadd.f32 0.18741608, %v5676_v13 }
 0x59d   : > { %v5764_v54 = vadd.f32 0.014752088, %v5763_v61  ;;  %v14935_v40 = vmin.f32 %v5828_v11, 16.0  ;;  %v14938_v47 = vmul.f32 %v6533_v45, %v14621_v33  ;;  %v5600_v48 = vmul.f32 %v5599_v62, %v14572_v2 }
 0x59e   : > { %v5802_v21 = vadd.f32 0.001143296, %v5801_v59  ;;  %v14941_v6 = vmin.f32 %v5868_v50, 16.0  ;;  %vm5616_vm0 = vweird.f32 %v14822_v57  ;;  %v5639_v9 = vadd.f32 1.1283791, %v5638_v27 }
 0x59f   : > { %16683 = vst [vmem:[#allocation23_spill] sm:$0xff] %v14938_v47  ;;  %v5714_v51 = vmul.f32 %v5713_v10, %v14772_v56  ;;  %v5750_v44 = vmul.f32 2.1237322e-06, %v14864_v63  ;;  %v14946_v30 = vpop.eup %8342  ;;  %v14948_v13 = vadd.f32 1.0, %v7806_v4  ;;  %vm14952_vm1 = vmor %vm5616_vm0, %vm5617_vm15  ;;  %vm14956_vm2 = vcmp.eq.f32.partialorder %v5620_v7, 8.507059e+37  ;;  %v1042_v4 = vpop.f32.mrf.mxu3 }
 0x5a0   : > { %v5623_v57 = vor.u32 1.1754944e-38, %v5622_v46  ;;  %v14960_v62 = vadd.f32 1.0, %v5729_v20  ;;  %v5619_v11 = vsel %vm14952_vm1, %v14866_v29, %v5615_v5  ;;  %v5678_v45 = vmul.f32 %v5677_v34, %v14714_v43  ;;  %v16688_v46 = vld [vmem:[#allocation31_spill] sm:$0xff]  ;;  %v16689_v20 = vld [vmem:[#allocation37_spill] sm:$0xff] }
 0x5a1   : > { %v14962_v61 = vpop.eup %8344  ;;  %v5765_v59 = vmul.f32 %v5764_v54, %v14864_v63  ;;  %v5841_v50 = vmul.f32 3.8918573e-05, %v14935_v40  ;;  %v5662_v7 = vand.u32 2147483648, %v14903_v23  ;;  %v5803_v27 = vmul.f32 %v5802_v21, %v14905_v19 }
 0x5a2   : > { %v5881_v10 = vmul.f32 3.8918573e-05, %v14941_v6  ;;  %v6716_v47 = vpack.c.bf16 %v16689_v20, %v16688_v46  ;;  %v14976_v15 = vmul.f32 %v5639_v9, %v14657_v60  ;;  %v5652_v43 = vmul.f32 %v14946_v30, %v14903_v23  ;;  %v777_v20 = vpop.f32.mrf.mxu0 }
 0x5a3   : > { %v5715_v29 = vadd.f32 0.05243302, %v5714_v51  ;;  %v5751_v5 = vadd.f32 0.00028619796, %v5750_v44  ;;  %v5624_v34 = vsel %vm14956_vm2, %v5623_v57, %v5619_v11  ;;  %v5660_v54 = vand.u32 2147483647, %v14903_v23 }
 0x5a4   : > { %v5692_v21 = vmul.f32 %v14962_v61, %v14913_v28  ;;  %8346 = vrcp.f32 %v14960_v62  ;;  %7056 = vmatmul.bf16.gmra.mxu0 %v6716_v47  ;;  %v5679_v33 = vadd.f32 1.1283791, %v5678_v45  ;;  %v5766_v46 = vadd.f32 0.112945676, %v5765_v59  ;;  %v866_v45 = vpop.f32.mrf.mxu1 }
 0x5a5   : > { %v5842_v60 = vadd.f32 0.001143296, %v5841_v50  ;;  %v14987_v9 = vadd.f32 %v1042_v4, %v8930_v25  ;;  %v14989_v51 = vor.u32 1.1754944e-38, %v5662_v7  ;;  %v14992_v44 = vmul.f32 0.5, %v14812_v53 }
 0x5a6   : > { %v5804_v2 = vadd.f32 0.014752088, %v5803_v27  ;;  %v5882_v57 = vadd.f32 0.001143296, %v5881_v10  ;;  %v14994_v11 = vmul.f32 %v5624_v34, %v5600_v48  ;;  %v5653_v41 = vsub.f32 1.0, %v5652_v43 }
 0x5a7   : > { %v5716_v49 = vmul.f32 %v5715_v29, %v14772_v56  ;;  %v5752_v47 = vmul.f32 %v5751_v5, %v14864_v63  ;;  %vm5657_vm3 = vweird.f32 %v14946_v30  ;;  %v5693_v59 = vsub.f32 1.0, %v5692_v21 }
 0x5a8   : > { %v5790_v50 = vmul.f32 2.1237322e-06, %v14905_v19  ;;  %v15001_v7 = vadd.f32 %v777_v20, %v8891_v1  ;;  %vm5656_vm4 = vweird.f32 %v14903_v23  ;;  %v15005_v53 = vmul.f32 %v5679_v33, %v14662_v52 }
 0x5a9   : > { %v5767_v48 = vmul.f32 %v5766_v46, %v14864_v63  ;;  %v5843_v27 = vmul.f32 %v5842_v60, %v14935_v40  ;;  %v15010_v10 = vmul.f32 0.70710677, %v14987_v9  ;;  %v5700_v43 = vand.u32 2147483647, %v14913_v28  ;;  %vm15059_vm9 = vmor %vm5656_vm4, %vm5657_vm3 }
 0x5aa   : > { %16690 = vst [vmem:[#allocation28_spill] sm:$0xff] %v15001_v7  ;;  %v15012_v4 = vpop.eup %8346  ;;  %v5805_v29 = vmul.f32 %v5804_v2, %v14905_v19  ;;  %v5883_v5 = vmul.f32 %v5882_v57, %v14941_v6  ;;  %v15018_v34 = vadd.f32 %v866_v45, %v8893_v3  ;;  %v7807_v52 = vclamps-f32 %v14994_v11, 1.0 }
 0x5ab   : > { %v5654_v21 = vmul.f32 %v14946_v30, %v5653_v41  ;;  %v5702_v33 = vand.u32 2147483648, %v14913_v28  ;;  %v5753_v46 = vadd.f32 0.0036580483, %v5752_v47  ;;  %v5694_v60 = vmul.f32 %v14962_v61, %v5693_v59 }
 0x5ac   : > { %16691 = vst [vmem:[#allocation26_spill] sm:$0xff] %v15018_v34  ;;  %v5717_v20 = vadd.f32 0.18741608, %v5716_v49  ;;  %v5791_v35 = vadd.f32 0.00028619796, %v5790_v50  ;;  %v5732_v2 = vmul.f32 %v15012_v4, %v14960_v62  ;;  %v5908_v11 = vmul.f32 %v15010_v10, %v15010_v10 }
 0x5ad   : > { %v15025_v32 = vmul.f32 0.70710677, %v15001_v7  ;;  %v5768_v57 = vadd.f32 0.4994258, %v5767_v48  ;;  %v5844_v45 = vadd.f32 0.014752088, %v5843_v27  ;;  %vm5696_vm6 = vweird.f32 %v14913_v28 }
 0x5ae   : > { %vm15031_vm5 = vcmp.eq.f32.partialorder %v5660_v54, 8.507059e+37  ;;  %v5806_v47 = vadd.f32 0.112945676, %v5805_v29  ;;  %v5884_v49 = vadd.f32 0.014752088, %v5883_v5  ;;  %v5655_v50 = vadd.f32 %v14946_v30, %v5654_v21 }
 0x5af   : > { %v15037_v59 = vmul.f32 0.70710677, %v15018_v34  ;;  %vm5697_vm7 = vweird.f32 %v14962_v61  ;;  %vm15041_vm8 = vcmp.eq.f32.partialorder %v5700_v43, 8.507059e+37  ;;  %v5754_v54 = vmul.f32 %v5753_v46, %v14864_v63 }
 0x5b0   : > { %v5695_v27 = vadd.f32 %v14962_v61, %v5694_v60  ;;  %v5792_v8 = vmul.f32 %v5791_v35, %v14905_v19  ;;  %v5830_v29 = vmul.f32 2.1237322e-06, %v14935_v40  ;;  %v5948_v5 = vmul.f32 %v15025_v32, %v15025_v32  ;;  %vm15074_vm10 = vmor %vm5696_vm6, %vm5697_vm7 }
 0x5b1   : > { %v5733_v31 = vsub.f32 1.0, %v5732_v2  ;;  %v5769_v21 = vmul.f32 %v5768_v57, %v14864_v63  ;;  %v5845_v14 = vmul.f32 %v5844_v45, %v14935_v40  ;;  %v15053_v43 = vmin.f32 %v5908_v11, 16.0 }
 0x5b2   : > { %v5703_v35 = vor.u32 1.1754944e-38, %v5702_v33  ;;  %v5807_v60 = vmul.f32 %v5806_v47, %v14905_v19  ;;  %v5885_v58 = vmul.f32 %v5884_v49, %v14941_v6  ;;  %v5988_v2 = vmul.f32 %v15037_v59, %v15037_v59 }
 0x5b3   : > { %v5659_v57 = vsel %vm15059_vm9, %v14946_v30, %v5655_v50  ;;  %v5718_v33 = vmul.f32 %v5717_v20, %v14772_v56  ;;  %v5755_v45 = vadd.f32 0.05243302, %v5754_v54  ;;  %v15080_v11 = vmul.f32 0.5, %v14850_v42 }
 0x5b4   : > { %v5699_v47 = vsel %vm15074_vm10, %v14962_v61, %v5695_v27  ;;  %v5793_v49 = vadd.f32 0.0036580483, %v5792_v8  ;;  %v5831_v30 = vadd.f32 0.00028619796, %v5830_v29  ;;  %v15085_v50 = vmin.f32 %v5948_v5, 16.0 }
 0x5b5   : > { %v5734_v28 = vmul.f32 %v15012_v4, %v5733_v31  ;;  %v15088_v46 = vadd.f32 1.0, %v5769_v21  ;;  %v5846_v34 = vadd.f32 0.112945676, %v5845_v14  ;;  %v5921_v7 = vmul.f32 3.8918573e-05, %v15053_v43 }
 0x5b6   : > { %v6535_v56 = vadd.f32 1.0, %v7807_v52  ;;  %v5808_v20 = vadd.f32 0.4994258, %v5807_v60  ;;  %v5886_v54 = vadd.f32 0.112945676, %v5885_v58  ;;  %v15091_v42 = vmin.f32 %v5988_v2, 16.0 }
 0x5b7   : > { %v5664_v61 = vsel %vm15031_vm5, %v14989_v51, %v5659_v57  ;;  %v5704_v8 = vsel %vm15041_vm8, %v5703_v35, %v5699_v47  ;;  %v5719_v27 = vadd.f32 1.1283791, %v5718_v33  ;;  %vm5737_vm11 = vweird.f32 %v15012_v4 }
 0x5b8   : > { %v5756_v31 = vmul.f32 %v5755_v45, %v14864_v63  ;;  %v5794_v14 = vmul.f32 %v5793_v49, %v14905_v19  ;;  %v5832_v52 = vmul.f32 %v5831_v30, %v14935_v40  ;;  %v5961_v58 = vmul.f32 3.8918573e-05, %v15085_v50 }
 0x5b9   : > { %v5735_v29 = vadd.f32 %v15012_v4, %v5734_v28  ;;  %8348 = vrcp.f32 %v15088_v46  ;;  %v5847_v51 = vmul.f32 %v5846_v34, %v14935_v40  ;;  %v5922_v41 = vadd.f32 0.001143296, %v5921_v7 }
 0x5ba   : > { %v5742_v48 = vand.u32 2147483648, %v14960_v62  ;;  %v5809_v5 = vmul.f32 %v5808_v20, %v14905_v19  ;;  %v5887_v21 = vmul.f32 %v5886_v54, %v14941_v6  ;;  %v6001_v35 = vmul.f32 3.8918573e-05, %v15091_v42 }
 0x5bb   : > { %v5665_v60 = vmul.f32 %v5664_v61, %v14976_v15  ;;  %v5705_v2 = vmul.f32 %v5704_v8, %v15005_v53  ;;  %vm5736_vm12 = vweird.f32 %v14960_v62  ;;  %v5740_v57 = vand.u32 2147483647, %v14960_v62 }
 0x5bc   : > { %v15116_v34 = vmul.f32 %v14948_v13, %v14794_v39  ;;  %vm15120_vm13 = vmor %vm5736_vm12, %vm5737_vm11  ;;  %v5757_v23 = vadd.f32 0.18741608, %v5756_v31  ;;  %v5795_v33 = vadd.f32 0.05243302, %v5794_v14  ;;  %v5962_v45 = vadd.f32 0.001143296, %v5961_v58 }
 0x5bd   : > { %v5739_v15 = vsel %vm15120_vm13, %v15012_v4, %v5735_v29  ;;  %v5833_v53 = vadd.f32 0.0036580483, %v5832_v52  ;;  %v5848_v47 = vadd.f32 0.4994258, %v5847_v51  ;;  %v5923_v62 = vmul.f32 %v5922_v41, %v15053_v43 }
 0x5be   : > { %v5743_v49 = vor.u32 1.1754944e-38, %v5742_v48  ;;  %v15128_v39 = vadd.f32 1.0, %v5809_v5  ;;  %v5888_v13 = vadd.f32 0.4994258, %v5887_v21  ;;  %v6002_v30 = vadd.f32 0.001143296, %v6001_v35 }
 0x5bf   : > { %v15130_v28 = vpop.eup %8348  ;;  %v7808_v20 = vclamps-f32 %v5665_v60, 1.0  ;;  %v7809_v54 = vclamps-f32 %v5705_v2, 1.0  ;;  %vm5741_vm14 = vcmp.eq.f32.partialorder %v5740_v57, 8.507059e+37  ;;  %v5870_v61 = vmul.f32 2.1237322e-06, %v14941_v6 }
 0x5c0   : > { %v5720_v8 = vmul.f32 %v5719_v27, %v14721_v55  ;;  %v5744_v31 = vsel %vm5741_vm14, %v5743_v49, %v5739_v15  ;;  %v5796_v4 = vmul.f32 %v5795_v33, %v14905_v19  ;;  %v5963_v14 = vmul.f32 %v5962_v45, %v15085_v50  ;;  %v955_v27 = vpop.f32.mrf.mxu2 }
 0x5c1   : > { %v5758_v52 = vmul.f32 %v5757_v23, %v14864_v63  ;;  %v5834_v58 = vmul.f32 %v5833_v53, %v14935_v40  ;;  %v5849_v29 = vmul.f32 %v5848_v47, %v14935_v40  ;;  %v5924_v51 = vadd.f32 0.014752088, %v5923_v62 }
 0x5c2   : > { %v5772_v41 = vmul.f32 %v15130_v28, %v15088_v46  ;;  %8350 = vrcp.f32 %v15128_v39  ;;  %v5889_v48 = vmul.f32 %v5888_v13, %v14941_v6  ;;  %v6003_v55 = vmul.f32 %v6002_v30, %v15091_v42 }
 0x5c3   : > { %v6536_v5 = vadd.f32 1.0, %v7808_v20  ;;  %v6537_v21 = vadd.f32 1.0, %v7809_v54  ;;  %v5745_v35 = vmul.f32 %v5744_v31, %v5720_v8  ;;  %v5871_v60 = vadd.f32 0.00028619796, %v5870_v61 }
 0x5c4   : > { %v15145_v63 = vmul.f32 %v6535_v56, %v14799_v17  ;;  %v5797_v2 = vadd.f32 0.18741608, %v5796_v4  ;;  %v15148_v57 = vmul.f32 0.5, %v14885_v16  ;;  %v5964_v7 = vadd.f32 0.014752088, %v5963_v14 }
 0x5c5   : > { %v5835_v23 = vadd.f32 0.05243302, %v5834_v58  ;;  %v15150_v33 = vadd.f32 1.0, %v5849_v29  ;;  %v5925_v45 = vmul.f32 %v5924_v51, %v15053_v43  ;;  %v15154_v15 = vadd.f32 %v955_v27, %v8910_v12 }
 0x5c6   : > { %v5759_v53 = vadd.f32 1.1283791, %v5758_v52  ;;  %v5773_v47 = vsub.f32 1.0, %v5772_v41  ;;  %v15156_v62 = vadd.f32 1.0, %v5889_v48  ;;  %v6004_v49 = vadd.f32 0.014752088, %v6003_v55 }
 0x5c7   : > { %v15159_v17 = vmul.f32 %v6536_v5, %v14809_v36  ;;  %v15162_v16 = vmul.f32 %v6537_v21, %v14911_v22  ;;  %v7810_v56 = vclamps-f32 %v5745_v35, 1.0  ;;  %v5872_v13 = vmul.f32 %v5871_v60, %v14941_v6 }
 0x5c8   : > { %v15165_v30 = vpop.eup %8350  ;;  %v5780_v20 = vand.u32 2147483647, %v15088_v46  ;;  %v5798_v54 = vmul.f32 %v5797_v2, %v14905_v19  ;;  %v5910_v61 = vmul.f32 2.1237322e-06, %v15053_v43  ;;  %v5965_v8 = vmul.f32 %v5964_v7, %v15085_v50 }
 0x5c9   : > { %v5836_v31 = vmul.f32 %v5835_v23, %v14935_v40  ;;  %8352 = vrcp.f32 %v15150_v33  ;;  %v5926_v36 = vadd.f32 0.112945676, %v5925_v45  ;;  %v15174_v22 = vmul.f32 0.70710677, %v15154_v15 }
 0x5ca   : > { %v15177_v4 = vmul.f32 %v5759_v53, %v14829_v18  ;;  %v5774_v14 = vmul.f32 %v15130_v28, %v5773_v47  ;;  %8354 = vrcp.f32 %v15156_v62  ;;  %v6005_v19 = vmul.f32 %v6004_v49, %v15091_v42 }
 0x5cb   : > { %v6538_v52 = vadd.f32 1.0, %v7810_v56  ;;  %v5782_v58 = vand.u32 2147483648, %v15088_v46  ;;  %v5812_v29 = vmul.f32 %v15165_v30, %v15128_v39  ;;  %v5873_v51 = vadd.f32 0.0036580483, %v5872_v13 }
 0x5cc   : > { %vm5776_vm15 = vweird.f32 %v15088_v46  ;;  %v5799_v41 = vadd.f32 1.1283791, %v5798_v54  ;;  %v5911_v48 = vadd.f32 0.00028619796, %v5910_v61  ;;  %v5966_v55 = vadd.f32 0.112945676, %v5965_v8 }
 0x5cd   : > { %vm15186_vm0 = vcmp.eq.f32.partialorder %v5780_v20, 8.507059e+37  ;;  %v5837_v27 = vadd.f32 0.18741608, %v5836_v31  ;;  %v5927_v5 = vmul.f32 %v5926_v36, %v15053_v43  ;;  %v6028_v21 = vmul.f32 %v15174_v22, %v15174_v22  ;;  %v1044_v36 = vpop.f32.mrf.mxu3 }
 0x5ce   : > { %v5775_v35 = vadd.f32 %v15130_v28, %v5774_v14  ;;  %vm5777_vm1 = vweird.f32 %v15130_v28  ;;  %v5822_v60 = vand.u32 2147483648, %v15128_v39  ;;  %v6006_v2 = vadd.f32 0.112945676, %v6005_v19 }
 0x5cf   : > { %v15196_v7 = vpop.eup %8352  ;;  %v15199_v23 = vmul.f32 %v6538_v52, %v14917_v24  ;;  %v5783_v45 = vor.u32 1.1754944e-38, %v5782_v58  ;;  %v5813_v53 = vsub.f32 1.0, %v5812_v29  ;;  %v5874_v47 = vmul.f32 %v5873_v51, %v14941_v6  ;;  %vm15212_vm2 = vmor %vm5776_vm15, %vm5777_vm1 }
 0x5d0   : > { %v15202_v49 = vpop.eup %8354  ;;  %v15205_v56 = vmul.f32 %v5799_v41, %v14871_v0  ;;  %v5912_v13 = vmul.f32 %v5911_v48, %v15053_v43  ;;  %v5950_v20 = vmul.f32 2.1237322e-06, %v15085_v50  ;;  %v5967_v54 = vmul.f32 %v5966_v55, %v15085_v50 }
 0x5d1   : > { %vm5816_vm3 = vweird.f32 %v15128_v39  ;;  %v5820_v61 = vand.u32 2147483647, %v15128_v39  ;;  %v5838_v8 = vmul.f32 %v5837_v27, %v14935_v40  ;;  %v5928_v0 = vadd.f32 0.4994258, %v5927_v5 }
 0x5d2   : > { %v15219_v31 = vmin.f32 %v6028_v21, 16.0  ;;  %v5779_v14 = vsel %vm15212_vm2, %v15130_v28, %v5775_v35  ;;  %v5823_v19 = vor.u32 1.1754944e-38, %v5822_v60  ;;  %v5852_v46 = vmul.f32 %v15196_v7, %v15150_v33  ;;  %v780_v28 = vpop.f32.mrf.mxu0 }
 0x5d3   : > { %v6007_v52 = vmul.f32 %v6006_v2, %v15091_v42  ;;  %v5814_v58 = vmul.f32 %v15165_v30, %v5813_v53  ;;  %v5875_v29 = vadd.f32 0.05243302, %v5874_v47  ;;  %v5892_v40 = vmul.f32 %v15202_v49, %v15156_v62 }
 0x5d4   : > { %v5990_v51 = vmul.f32 2.1237322e-06, %v15091_v42  ;;  %v5913_v41 = vadd.f32 0.0036580483, %v5912_v13  ;;  %v5951_v48 = vadd.f32 0.00028619796, %v5950_v20  ;;  %v15232_v27 = vadd.f32 %v1044_v36, %v8930_v25 }
 0x5d5   : > { %v5968_v55 = vadd.f32 0.4994258, %v5967_v54  ;;  %vm15234_vm4 = vcmp.eq.f32.partialorder %v5820_v61, 8.507059e+37  ;;  %v5839_v5 = vadd.f32 1.1283791, %v5838_v8  ;;  %v15239_v21 = vmul.f32 0.5, %v14894_v37 }
 0x5d6   : > { %v5929_v35 = vmul.f32 %v5928_v0, %v15053_v43  ;;  %v6041_v60 = vmul.f32 3.8918573e-05, %v15219_v31  ;;  %v5784_v2 = vsel %vm15186_vm0, %v5783_v45, %v5779_v14  ;;  %vm5817_vm5 = vweird.f32 %v15165_v30 }
 0x5d7   : > { %v5853_v53 = vsub.f32 1.0, %v5852_v46  ;;  %v6008_v47 = vadd.f32 0.4994258, %v6007_v52  ;;  %v5815_v13 = vadd.f32 %v15165_v30, %v5814_v58  ;;  %v5876_v20 = vmul.f32 %v5875_v29, %v14941_v6  ;;  %vm15264_vm6 = vmor %vm5816_vm3, %vm5817_vm5 }
 0x5d8   : > { %v5893_v54 = vsub.f32 1.0, %v5892_v40  ;;  %v5991_v24 = vadd.f32 0.00028619796, %v5990_v51  ;;  %v5914_v37 = vmul.f32 %v5913_v41, %v15053_v43  ;;  %v5952_v61 = vmul.f32 %v5951_v48, %v15085_v50 }
 0x5d9   : > { %v5969_v8 = vmul.f32 %v5968_v55, %v15085_v50  ;;  %v15252_v0 = vmul.f32 0.70710677, %v15232_v27  ;;  %v5785_v18 = vmul.f32 %v5784_v2, %v15177_v4  ;;  %v15256_v45 = vmul.f32 %v5839_v5, %v14901_v38 }
 0x5da   : > { %v15258_v36 = vadd.f32 1.0, %v5929_v35  ;;  %v6042_v14 = vadd.f32 0.001143296, %v6041_v60  ;;  %v5854_v52 = vmul.f32 %v15196_v7, %v5853_v53  ;;  %vm5856_vm7 = vweird.f32 %v15150_v33 }
 0x5db   : > { %v5860_v4 = vand.u32 2147483647, %v15150_v33  ;;  %v6009_v38 = vmul.f32 %v6008_v47, %v15091_v42  ;;  %v5819_v58 = vsel %vm15264_vm6, %v15165_v30, %v5815_v13  ;;  %v5877_v29 = vadd.f32 0.18741608, %v5876_v20 }
 0x5dc   : > { %v5894_v40 = vmul.f32 %v15202_v49, %v5893_v54  ;;  %v5992_v39 = vmul.f32 %v5991_v24, %v15091_v42  ;;  %v5915_v51 = vadd.f32 0.05243302, %v5914_v37  ;;  %v5953_v41 = vadd.f32 0.0036580483, %v5952_v61 }
 0x5dd   : > { %v15277_v48 = vadd.f32 1.0, %v5969_v8  ;;  %v6068_v55 = vmul.f32 %v15252_v0, %v15252_v0  ;;  %v7811_v5 = vclamps-f32 %v5785_v18, 1.0  ;;  %v5862_v35 = vand.u32 2147483648, %v15150_v33  ;;  %v869_v18 = vpop.f32.mrf.mxu1 }
 0x5de   : > { %8356 = vrcp.f32 %v15258_v36  ;;  %v6043_v60 = vmul.f32 %v6042_v14, %v15219_v31  ;;  %v5824_v30 = vsel %vm15234_vm4, %v5823_v19, %v5819_v58  ;;  %v5855_v2 = vadd.f32 %v15196_v7, %v5854_v52 }
 0x5df   : > { %vm5857_vm8 = vweird.f32 %v15196_v7  ;;  %v15288_v53 = vadd.f32 1.0, %v6009_v38  ;;  %v5878_v47 = vmul.f32 %v5877_v29, %v14941_v6  ;;  %v5895_v13 = vadd.f32 %v15202_v49, %v5894_v40 }
 0x5e0   : > { %vm5897_vm9 = vweird.f32 %v15202_v49  ;;  %v5993_v20 = vadd.f32 0.0036580483, %v5992_v39  ;;  %v5916_v54 = vmul.f32 %v5915_v51, %v15053_v43  ;;  %v5954_v24 = vmul.f32 %v5953_v41, %v15085_v50  ;;  %vm15304_vm10 = vmor %vm5856_vm7, %vm5857_vm8 }
 0x5e1   : > { %8358 = vrcp.f32 %v15277_v48  ;;  %v15296_v19 = vmin.f32 %v6068_v55, 16.0  ;;  %v5825_v37 = vmul.f32 %v5824_v30, %v15205_v56  ;;  %v5863_v61 = vor.u32 1.1754944e-38, %v5862_v35 }
 0x5e2   : > { %v5902_v8 = vand.u32 2147483648, %v15156_v62  ;;  %v6044_v6 = vadd.f32 0.014752088, %v6043_v60  ;;  %vm5896_vm11 = vweird.f32 %v15156_v62  ;;  %v5900_v14 = vand.u32 2147483647, %v15156_v62 }
 0x5e3   : > { %8360 = vrcp.f32 %v15288_v53  ;;  %v6030_v56 = vmul.f32 2.1237322e-06, %v15219_v31  ;;  %v5859_v52 = vsel %vm15304_vm10, %v15196_v7, %v5855_v2  ;;  %v5879_v38 = vadd.f32 1.1283791, %v5878_v47  ;;  %vm15319_vm12 = vmor %vm5896_vm11, %vm5897_vm9 }
 0x5e4   : > { %v15312_v46 = vpop.eup %8356  ;;  %v5994_v58 = vmul.f32 %v5993_v20, %v15091_v42  ;;  %v15325_v62 = vadd.f32 %v780_v28, %v8891_v1  ;;  %v5899_v29 = vsel %vm15319_vm12, %v15202_v49, %v5895_v13  ;;  %v5917_v40 = vadd.f32 0.18741608, %v5916_v54 }
 0x5e5   : > { %v5955_v39 = vadd.f32 0.05243302, %v5954_v24  ;;  %v6081_v7 = vmul.f32 3.8918573e-05, %v15296_v19  ;;  %v6539_v51 = vadd.f32 1.0, %v7811_v5  ;;  %vm5861_vm13 = vcmp.eq.f32.partialorder %v5860_v4, 8.507059e+37 }
 0x5e6   : > { %v5903_v41 = vor.u32 1.1754944e-38, %v5902_v8  ;;  %v6045_v55 = vmul.f32 %v6044_v6, %v15219_v31  ;;  %v5864_v60 = vsel %vm5861_vm13, %v5863_v61, %v5859_v52  ;;  %vm5901_vm14 = vcmp.eq.f32.partialorder %v5900_v14, 8.507059e+37 }
 0x5e7   : > { %v15332_v35 = vpop.eup %8358  ;;  %v5932_v30 = vmul.f32 %v15312_v46, %v15258_v36  ;;  %v6031_v2 = vadd.f32 0.00028619796, %v6030_v56  ;;  %v7812_v47 = vclamps-f32 %v5825_v37, 1.0  ;;  %v5995_v49 = vadd.f32 0.05243302, %v5994_v58 }
 0x5e8   : > { %v5904_v20 = vsel %vm5901_vm14, %v5903_v41, %v5899_v29  ;;  %v15337_v13 = vmul.f32 0.70710677, %v15325_v62  ;;  %v5880_v4 = vmul.f32 %v5879_v38, %v14908_v26  ;;  %v5918_v5 = vmul.f32 %v5917_v40, %v15053_v43 }
 0x5e9   : > { %v15339_v54 = vpop.eup %8360  ;;  %v5956_v24 = vmul.f32 %v5955_v39, %v15085_v50  ;;  %v6082_v28 = vadd.f32 0.001143296, %v6081_v7  ;;  %v15345_v61 = vmul.f32 %v6539_v51, %v14992_v44  ;;  %v15348_v8 = vmul.f32 %v5864_v60, %v15256_v45 }
 0x5ea   : > { %v5972_v37 = vmul.f32 %v15332_v35, %v15277_v48  ;;  %v6046_v6 = vadd.f32 0.112945676, %v6045_v55  ;;  %v15352_v14 = vmul.f32 %v5904_v20, %v5880_v4  ;;  %v5933_v56 = vsub.f32 1.0, %v5932_v30 }
 0x5eb   : > { %v6032_v26 = vmul.f32 %v6031_v2, %v15219_v31  ;;  %v6070_v43 = vmul.f32 2.1237322e-06, %v15296_v19  ;;  %v15356_v52 = vadd.f32 1.0, %v7812_v47  ;;  %v5996_v44 = vmul.f32 %v5995_v49, %v15091_v42 }
 0x5ec   : > { %v6012_v45 = vmul.f32 %v15339_v54, %v15288_v53  ;;  %v6108_v38 = vmul.f32 %v15337_v13, %v15337_v13  ;;  %v5919_v33 = vadd.f32 1.1283791, %v5918_v5  ;;  %v5957_v58 = vadd.f32 0.18741608, %v5956_v24 }
 0x5ed   : > { %v6083_v29 = vmul.f32 %v6082_v28, %v15296_v19  ;;  %v15365_v40 = vadd.f32 %v869_v18, %v8893_v3  ;;  %v7813_v39 = vclamps-f32 %v15348_v8, 1.0  ;;  %v5940_v7 = vand.u32 2147483647, %v15258_v36  ;;  %v1047_v8 = vpop.f32.mrf.mxu3 }
 0x5ee   : > { %v5973_v51 = vsub.f32 1.0, %v5972_v37  ;;  %v6047_v41 = vmul.f32 %v6046_v6, %v15219_v31  ;;  %v7814_v55 = vclamps-f32 %v15352_v14, 1.0  ;;  %v5934_v60 = vmul.f32 %v15312_v46, %v5933_v56  ;;  %v16724_v14 = vld [vmem:[#allocation26_spill] sm:$0xff] }
 0x5ef   : > { %16714 = vst [vmem:[#allocation25_spill] sm:$0xff] %v15365_v40  ;;  %v6033_v30 = vadd.f32 0.0036580483, %v6032_v26  ;;  %v6071_v2 = vadd.f32 0.00028619796, %v6070_v43  ;;  %v5942_v47 = vand.u32 2147483648, %v15258_v36  ;;  %v5920_v5 = vmul.f32 %v5919_v33, %v15010_v10 }
 0x5f0   : > { %v5997_v20 = vadd.f32 0.18741608, %v5996_v44  ;;  %v6013_v49 = vsub.f32 1.0, %v6012_v45  ;;  %v15373_v4 = vmin.f32 %v6108_v38, 16.0  ;;  %v5958_v24 = vmul.f32 %v5957_v58, %v15085_v50 }
 0x5f1   : > { %v6084_v28 = vadd.f32 0.014752088, %v6083_v29  ;;  %v15378_v37 = vmul.f32 0.70710677, %v15365_v40  ;;  %vm5936_vm15 = vweird.f32 %v15258_v36  ;;  %vm15381_vm0 = vcmp.eq.f32.partialorder %v5940_v7, 8.507059e+37 }
 0x5f2   : > { %v5974_v18 = vmul.f32 %v15332_v35, %v5973_v51  ;;  %v6048_v56 = vadd.f32 0.4994258, %v6047_v41  ;;  %v5935_v26 = vadd.f32 %v15312_v46, %v5934_v60  ;;  %vm5937_vm1 = vweird.f32 %v15312_v46 }
 0x5f3   : > { %v6034_v10 = vmul.f32 %v6033_v30, %v15219_v31  ;;  %v6072_v50 = vmul.f32 %v6071_v2, %v15296_v19  ;;  %v5943_v43 = vor.u32 1.1754944e-38, %v5942_v47  ;;  %v5998_v44 = vmul.f32 %v5997_v20, %v15091_v42  ;;  %vm15399_vm3 = vmor %vm5936_vm15, %vm5937_vm1 }
 0x5f4   : > { %v6014_v45 = vmul.f32 %v15339_v54, %v6013_v49  ;;  %v6110_v38 = vmul.f32 2.1237322e-06, %v15373_v4  ;;  %v5959_v33 = vadd.f32 1.1283791, %v5958_v24  ;;  %vm5976_vm2 = vweird.f32 %v15277_v48 }
 0x5f5   : > { %v6085_v58 = vmul.f32 %v6084_v28, %v15296_v19  ;;  %v6148_v29 = vmul.f32 %v15378_v37, %v15378_v37  ;;  %v5975_v42 = vadd.f32 %v15332_v35, %v5974_v18  ;;  %vm5977_vm4 = vweird.f32 %v15332_v35 }
 0x5f6   : > { %v5980_v51 = vand.u32 2147483647, %v15277_v48  ;;  %v6049_v41 = vmul.f32 %v6048_v56, %v15219_v31  ;;  %v5939_v60 = vsel %vm15399_vm3, %v15312_v46, %v5935_v26  ;;  %v5982_v30 = vand.u32 2147483648, %v15277_v48  ;;  %vm15416_vm6 = vmor %vm5976_vm2, %vm5977_vm4 }
 0x5f7   : > { %v6035_v2 = vadd.f32 0.05243302, %v6034_v10  ;;  %v6073_v36 = vadd.f32 0.0036580483, %v6072_v50  ;;  %v6015_v47 = vadd.f32 %v15339_v54, %v6014_v45  ;;  %vm6017_vm5 = vweird.f32 %v15339_v54 }
 0x5f8   : > { %v6111_v20 = vadd.f32 0.00028619796, %v6110_v38  ;;  %v6121_v49 = vmul.f32 3.8918573e-05, %v15373_v4  ;;  %v5999_v28 = vadd.f32 1.1283791, %v5998_v44  ;;  %v5979_v26 = vsel %vm15416_vm6, %v15332_v35, %v5975_v42 }
 0x5f9   : > { %v6022_v46 = vand.u32 2147483648, %v15288_v53  ;;  %v6086_v18 = vadd.f32 0.112945676, %v6085_v58  ;;  %v15421_v56 = vmin.f32 %v6148_v29, 16.0  ;;  %vm6016_vm7 = vweird.f32 %v15288_v53 }
 0x5fa   : > { %v6020_v10 = vand.u32 2147483647, %v15288_v53  ;;  %v15428_v50 = vadd.f32 1.0, %v6049_v41  ;;  %v5944_v48 = vsel %vm15381_vm0, %v5943_v43, %v5939_v60  ;;  %v5983_v45 = vor.u32 1.1754944e-38, %v5982_v30  ;;  %vm15432_vm8 = vmor %vm6016_vm7, %vm6017_vm5 }
 0x5fb   : > { %v6036_v38 = vmul.f32 %v6035_v2, %v15219_v31  ;;  %v6074_v58 = vmul.f32 %v6073_v36, %v15296_v19  ;;  %vm5981_vm9 = vcmp.eq.f32.partialorder %v5980_v51, 8.507059e+37  ;;  %v6019_v35 = vsel %vm15432_vm8, %v15339_v54, %v6015_v47 }
 0x5fc   : > { %v6112_v53 = vmul.f32 %v6111_v20, %v15373_v4  ;;  %v6122_v29 = vadd.f32 0.001143296, %v6121_v49  ;;  %v5984_v7 = vsel %vm5981_vm9, %v5983_v45, %v5979_v26  ;;  %v6023_v6 = vor.u32 1.1754944e-38, %v6022_v46  ;;  %v958_v46 = vpop.f32.mrf.mxu2 }
 0x5fd   : > { %v6087_v43 = vmul.f32 %v6086_v18, %v15296_v19  ;;  %v6150_v42 = vmul.f32 2.1237322e-06, %v15421_v56  ;;  %v5945_v41 = vmul.f32 %v5944_v48, %v5920_v5  ;;  %v5960_v60 = vmul.f32 %v5959_v33, %v15025_v32 }
 0x5fe   : > { %vm6021_vm10 = vcmp.eq.f32.partialorder %v6020_v10, 8.507059e+37  ;;  %8362 = vrcp.f32 %v15428_v50  ;;  %v6541_v51 = vadd.f32 1.0, %v7813_v39  ;;  %v6037_v54 = vadd.f32 0.18741608, %v6036_v38  ;;  %v871_v10 = vpop.f32.mrf.mxu1 }
 0x5ff   : > { %v6024_v30 = vsel %vm6021_vm10, %v6023_v6, %v6019_v35  ;;  %v6075_v2 = vadd.f32 0.05243302, %v6074_v58  ;;  %v5985_v36 = vmul.f32 %v5984_v7, %v5960_v60  ;;  %v6000_v47 = vmul.f32 %v5999_v28, %v15037_v59  ;;  %v782_v28 = vpop.f32.mrf.mxu0 }
 0x600   : > { %v6113_v20 = vadd.f32 0.0036580483, %v6112_v53  ;;  %v6123_v49 = vmul.f32 %v6122_v29, %v15373_v4  ;;  %v15452_v5 = vmul.f32 %v15356_v52, %v15080_v11  ;;  %v6088_v32 = vadd.f32 0.4994258, %v6087_v43  ;;  %v16723_v11 = vld [vmem:[#allocation28_spill] sm:$0xff] }
 0x601   : > { %v6151_v33 = vadd.f32 0.00028619796, %v6150_v42  ;;  %v6161_v24 = vmul.f32 3.8918573e-05, %v15421_v56  ;;  %v6542_v39 = vadd.f32 1.0, %v7814_v55  ;;  %v1167_v18 = vmul.f32 0.5, %v14987_v9 }
 0x602   : > { %v7815_v26 = vclamps-f32 %v5945_v41, 1.0  ;;  %v6025_v59 = vmul.f32 %v6024_v30, %v6000_v47  ;;  %v15459_v48 = vmul.f32 %v6541_v51, %v15148_v57  ;;  %v1168_v52 = vmul.f32 0.5, %v16723_v11  ;;  %v16726_v30 = vld [vmem:[#allocation32_spill] sm:$0xff] }
 0x603   : > { %v6038_v45 = vmul.f32 %v6037_v54, %v15219_v31  ;;  %v6076_v44 = vmul.f32 %v6075_v2, %v15296_v19  ;;  %v7816_v58 = vclamps-f32 %v5985_v36, 1.0  ;;  %v1169_v55 = vmul.f32 0.5, %v16724_v14  ;;  %v16727_v54 = vld [vmem:[#allocation24_spill] sm:$0xff] }
 0x604   : > { %v15464_v38 = vpop.eup %8362  ;;  %v6114_v9 = vmul.f32 %v6113_v20, %v15373_v4  ;;  %v6124_v35 = vadd.f32 0.014752088, %v6123_v49  ;;  %v6089_v53 = vmul.f32 %v6088_v32, %v15296_v19  ;;  %v6152_v29 = vmul.f32 %v6151_v33, %v15421_v56 }
 0x605   : > { %v6162_v57 = vadd.f32 0.001143296, %v6161_v24  ;;  %v15471_v7 = vadd.f32 %v958_v46, %v8910_v12  ;;  %v15474_v31 = vmul.f32 %v6542_v39, %v15239_v21  ;;  %v6543_v6 = vadd.f32 1.0, %v7815_v26 }
 0x606   : > { %v7817_v43 = vclamps-f32 %v6025_v59, 1.0  ;;  %v15477_v42 = vmul.f32 0.5, %v15154_v15  ;;  %v6039_v41 = vadd.f32 1.1283791, %v6038_v45  ;;  %v6052_v60 = vmul.f32 %v15464_v38, %v15428_v50  ;;  %v960_v45 = vpop.f32.mrf.mxu2 }
 0x607   : > { %16725 = vst [vmem:[#allocation30_spill] sm:$0xff] %v15471_v7  ;;  %v6077_v51 = vadd.f32 0.18741608, %v6076_v44  ;;  %v6717_v2 = vpack.c.bf16 %v16727_v54, %v16726_v30  ;;  %v6544_v36 = vadd.f32 1.0, %v7816_v58  ;;  %v6115_v47 = vadd.f32 0.05243302, %v6114_v9  ;;  %v15508_v44 = vpop.f32.mrf.mxu3 }
 0x608   : > { %v6125_v20 = vmul.f32 %v6124_v35, %v15373_v4  ;;  %v15485_v21 = vadd.f32 %v782_v28, %v8891_v1  ;;  %v15487_v49 = vadd.f32 1.0, %v6089_v53  ;;  %v6153_v32 = vadd.f32 0.0036580483, %v6152_v29  ;;  %v16733_v30 = vld [vmem:[#allocation33_spill] sm:$0xff]  ;;  %v16734_v54 = vld [vmem:[#allocation38_spill] sm:$0xff] }
 0x609   : > { %v6163_v15 = vmul.f32 %v6162_v57, %v15421_v56  ;;  %v15491_v33 = vmul.f32 0.70710677, %v15471_v7  ;;  %7145 = vmatmul.bf16.gmra.mxu1 %v6717_v2  ;;  %v6545_v24 = vadd.f32 1.0, %v7817_v43  ;;  %v15494_v46 = vmul.f32 0.5, %v15232_v27 }
 0x60a   : > { %v15497_v39 = vmul.f32 0.5, %v15325_v62  ;;  %v15500_v26 = vadd.f32 %v1047_v8, %v8930_v25  ;;  %v15502_v1 = vmul.f32 %v6543_v6, %v1167_v18  ;;  %v15505_v59 = vmul.f32 %v6039_v41, %v15174_v22  ;;  %v15519_v8 = vld [vmem:[%s16161_s6] ss:$0 sm:$0xff]  ;;  %v7017_v22 = vpop.f32.mrf.mxu0  ;;  %v7106_v18 = vpop.f32.mrf.mxu1  ;;  %v16731_v41 = vld [vmem:[#allocation36_spill] sm:$0xff] }
 0x60b   : > { %v6053_v28 = vsub.f32 1.0, %v6052_v60  ;;  %v6078_v11 = vmul.f32 %v6077_v51, %v15296_v19  ;;  %v15510_v58 = vmul.f32 %v6544_v36, %v1168_v52  ;;  %v6116_v27 = vmul.f32 %v6115_v47, %v15373_v4  ;;  %v16732_v60 = vld [vmem:[#allocation34_spill] sm:$0xff] }
 0x60c   : > { %16728 = vst [vmem:[#allocation29_spill] sm:$0xff] %v15500_v26  ;;  %v6126_v62 = vadd.f32 0.112945676, %v6125_v20  ;;  %v15514_v14 = vmul.f32 0.70710677, %v15485_v21  ;;  %8364 = vrcp.f32 %v15487_v49  ;;  %v6154_v19 = vmul.f32 %v6153_v32, %v15421_v56 }
 0x60d   : > { %16729 = vst [vmem:[#allocation27_spill] sm:$0xff] %v15502_v1  ;;  %v6164_v9 = vadd.f32 0.014752088, %v6163_v15  ;;  %v6188_v52 = vmul.f32 %v15491_v33, %v15491_v33  ;;  %v15525_v35 = vmul.f32 %v6545_v24, %v1169_v55  ;;  %v6060_v53 = vand.u32 2147483647, %v15428_v50  ;;  %v16735_v15 = vld [vmem:[#allocation35_spill] sm:$0xff] }
 0x60e   : > { %v6062_v29 = vand.u32 2147483648, %v15428_v50  ;;  %v15530_v57 = vadd.f32 %v871_v10, %v8893_v3  ;;  %v6054_v6 = vmul.f32 %v15464_v38, %v6053_v28  ;;  %v6079_v43 = vadd.f32 1.1283791, %v6078_v11  ;;  %v16736_v24 = vld [vmem:[#allocation41_spill] sm:$0xff] }
 0x60f   : > { %v6718_v51 = vpack.c.bf16 %v16732_v60, %v16731_v41  ;;  %v6719_v2 = vpack.c.bf16 %v16734_v54, %v16733_v30  ;;  %v6117_v36 = vadd.f32 0.18741608, %v6116_v27  ;;  %v6127_v55 = vmul.f32 %v6126_v62, %v15373_v4 }
 0x610   : > { %16730 = vst [vmem:[#allocation31_spill] sm:$0xff] %v15530_v57  ;;  %v6268_v47 = vmul.f32 %v15514_v14, %v15514_v14  ;;  %v7018_v20 = vadd.f32 %v15519_v8, %v7017_v22  ;;  %v6155_v32 = vadd.f32 0.05243302, %v6154_v19  ;;  %v6165_v3 = vmul.f32 %v6164_v9, %v15421_v56 }
 0x611   : > { %v15542_v10 = vmin.f32 %v6188_v52, 16.0  ;;  %7234 = vmatmul.bf16.gmra.mxu2 %v6718_v51  ;;  %7323 = vmatmul.bf16.gmra.mxu3 %v6719_v2  ;;  %v6720_v28 = vpack.c.bf16 %v16736_v24, %v16735_v15  ;;  %vm6056_vm11 = vweird.f32 %v15428_v50  ;;  %vm15547_vm12 = vcmp.eq.f32.partialorder %v6060_v53, 8.507059e+37  ;;  %v7195_v2 = vpop.f32.mrf.mxu2  ;;  %v7284_v15 = vpop.f32.mrf.mxu3  ;;  %v16742_v24 = vld [vmem:[#allocation39_spill] sm:$0xff] }
 0x612   : > { %v6063_v27 = vor.u32 1.1754944e-38, %v6062_v29  ;;  %v15552_v62 = vmul.f32 0.70710677, %v15530_v57  ;;  %v15554_v22 = vpop.eup %8364  ;;  %v6055_v19 = vadd.f32 %v15464_v38, %v6054_v6  ;;  %vm6057_vm13 = vweird.f32 %v15464_v38 }
 0x613   : > { %v15559_v9 = vmul.f32 %v6079_v43, %v15252_v0  ;;  %7061 = vmatmul.bf16.gmra.mxu0 %v6720_v28  ;;  %v6102_v53 = vand.u32 2147483648, %v15487_v49  ;;  %v6128_v41 = vadd.f32 0.4994258, %v6127_v55  ;;  %v15563_v60 = vmin.f32 %v6268_v47, 16.0  ;;  %vm15570_vm14 = vmor %vm6056_vm11, %vm6057_vm13  ;;  %v7019_v47 = vpop.f32.mrf.mxu0  ;;  %v16743_v28 = vld [vmem:[#allocation45_spill] sm:$0xff] }
 0x614   : > { %v7107_v29 = vadd.f32 %v7106_v18, %v7018_v20  ;;  %v6118_v51 = vmul.f32 %v6117_v36, %v15373_v4  ;;  %v6156_v30 = vmul.f32 %v6155_v32, %v15421_v56  ;;  %v6166_v54 = vadd.f32 0.112945676, %v6165_v3  ;;  %v7108_v20 = vpop.f32.mrf.mxu1 }
 0x615   : > { %v6201_v6 = vmul.f32 3.8918573e-05, %v15542_v10  ;;  %v6092_v43 = vmul.f32 %v15554_v22, %v15487_v49  ;;  %v15577_v18 = vmul.f32 0.70710677, %v15500_v26  ;;  %v6308_v36 = vmul.f32 %v15552_v62, %v15552_v62 }
 0x616   : > { %v7196_v55 = vadd.f32 %v7195_v2, %v7107_v29  ;;  %v6059_v50 = vsel %vm15570_vm14, %v15464_v38, %v6055_v19  ;;  %v6190_v32 = vmul.f32 2.1237322e-06, %v15542_v10  ;;  %v15586_v3 = vadd.f32 %v960_v45, %v8910_v12 }
 0x617   : > { %v6721_v52 = vpack.c.bf16 %v16743_v28, %v16742_v24  ;;  %v6129_v26 = vmul.f32 %v6128_v41, %v15373_v4  ;;  %v6281_v7 = vmul.f32 3.8918573e-05, %v15563_v60  ;;  %v15594_v29 = vadd.f32 %v15508_v44, %v8930_v25 }
 0x618   : > { %16741 = vst [vmem:[#allocation37_spill] sm:$0xff] %v15586_v3  ;;  %v7285_v2 = vadd.f32 %v7284_v15, %v7196_v55  ;;  %v6157_v0 = vadd.f32 0.18741608, %v6156_v30  ;;  %v6167_v38 = vmul.f32 %v6166_v54, %v15421_v56  ;;  %v6202_v19 = vadd.f32 0.001143296, %v6201_v6  ;;  %v8385_v54 = vld [vmem:[%s8816_s18] sm:$0xff] }
 0x619   : > { %16744 = vst [vmem:[#allocation28_spill] sm:$0xff] %v15594_v29  ;;  %v7020_v12 = vadd.f32 %v15519_v8, %v7019_v47  ;;  %7150 = vmatmul.bf16.gmra.mxu1 %v6721_v52  ;;  %v6064_v45 = vsel %vm15547_vm12, %v6063_v27, %v6059_v50  ;;  %v6093_v24 = vsub.f32 1.0, %v6092_v43  ;;  %v6228_v4 = vmul.f32 %v15577_v18, %v15577_v18  ;;  %v7286_v55 = vpop.f32.mrf.mxu3 }
 0x61a   : > { %v15602_v41 = vmin.f32 %v6308_v36, 16.0  ;;  %v6119_v25 = vadd.f32 1.1283791, %v6118_v51  ;;  %v6191_v44 = vadd.f32 0.00028619796, %v6190_v32  ;;  %v7364_v6 = vadd.f32 %v8385_v54, %v7285_v2 }
 0x61b   : > { %v15605_v30 = vmul.f32 0.70710677, %v15586_v3  ;;  %v15608_v15 = vor.u32 1.1754944e-38, %v6102_v53  ;;  %v15610_v52 = vadd.f32 1.0, %v6129_v26  ;;  %v6282_v11 = vadd.f32 0.001143296, %v6281_v7  ;;  %v7197_v26 = vpop.f32.mrf.mxu2  ;;  %v7022_v32 = vpop.f32.mrf.mxu0 }
 0x61c   : > { %v15613_v27 = vmul.f32 0.70710677, %v15594_v29  ;;  %v6065_v43 = vmul.f32 %v6064_v45, %v15505_v59  ;;  %vm6096_vm15 = vweird.f32 %v15487_v49  ;;  %v6158_v51 = vmul.f32 %v6157_v0, %v15421_v56  ;;  %7396 = vst [vmem:[%s15621_s20] sm:$0xff] %v7364_v6  ;;  %v7111_v28 = vpop.f32.mrf.mxu1  ;;  %v16746_v45 = vld [vmem:[#allocation42_spill] sm:$0xff]  ;;  %v16747_v6 = vld [vmem:[#allocation44_spill] sm:$0xff] }
 0x61d   : > { %v6203_v36 = vmul.f32 %v6202_v19, %v15542_v10  ;;  %v7109_v53 = vadd.f32 %v7108_v20, %v7020_v12  ;;  %v6094_v7 = vmul.f32 %v15554_v22, %v6093_v24  ;;  %v6168_v47 = vadd.f32 0.4994258, %v6167_v38  ;;  %v16745_v19 = vld [vmem:[#allocation40_spill] sm:$0xff]  ;;  %v16748_v20 = vld [vmem:[#allocation46_spill] sm:$0xff] }
 0x61e   : > { %v15625_v50 = vmin.f32 %v6228_v4, 16.0  ;;  %v6321_v59 = vmul.f32 3.8918573e-05, %v15602_v41  ;;  %v6348_v2 = vmul.f32 %v15605_v30, %v15605_v30  ;;  %v6722_v54 = vpack.c.bf16 %v16746_v45, %v16745_v19 }
 0x61f   : > { %v7198_v0 = vadd.f32 %v7197_v26, %v7109_v53  ;;  %v6723_v12 = vpack.c.bf16 %v16748_v20, %v16747_v6  ;;  %8366 = vrcp.f32 %v15610_v52  ;;  %v6283_v38 = vmul.f32 %v6282_v11, %v15563_v60  ;;  %v16752_v6 = vld [vmem:[#allocation43_spill] sm:$0xff]  ;;  %v16753_v11 = vld [vmem:[#allocation49_spill] sm:$0xff] }
 0x620   : > { %v6388_v24 = vmul.f32 %v15613_v27, %v15613_v27  ;;  %v7023_v4 = vadd.f32 %v15519_v8, %v7022_v32  ;;  %v16749_v29 = vand.u32 2147483647, %v15487_v49  ;;  %v6192_v26 = vmul.f32 %v6191_v44, %v15542_v10  ;;  %v8386_v44 = vld [vmem:[%s8816_s18 + $0x8] sm:$0xff]  ;;  %v16756_v49 = vld [vmem:[#allocation47_spill] sm:$0xff] }
 0x621   : > { %v6204_v19 = vadd.f32 0.014752088, %v6203_v36  ;;  %v7287_v45 = vadd.f32 %v7286_v55, %v7198_v0  ;;  %7239 = vmatmul.bf16.gmra.mxu2 %v6722_v54  ;;  %7328 = vmatmul.bf16.gmra.mxu3 %v6723_v12  ;;  %v6724_v20 = vpack.c.bf16 %v16753_v11, %v16752_v6  ;;  %v7818_v3 = vclamps-f32 %v6065_v43, 1.0 }
 0x622   : > { %vm15641_vm0 = vcmp.eq.f32.partialorder %v16749_v29, 8.507059e+37  ;;  %vm6097_vm1 = vweird.f32 %v15554_v22  ;;  %v6169_v32 = vmul.f32 %v6168_v47, %v15421_v56  ;;  %v6241_v29 = vmul.f32 3.8918573e-05, %v15625_v50 }
 0x623   : > { %v6095_v40 = vadd.f32 %v15554_v22, %v6094_v7  ;;  %v6322_v57 = vadd.f32 0.001143296, %v6321_v59  ;;  %v15652_v1 = vmin.f32 %v6348_v2, 16.0  ;;  %v7365_v36 = vadd.f32 %v8386_v44, %v7287_v45  ;;  %7066 = vmatmul.bf16.gmra.mxu0 %v6724_v20  ;;  %v7200_v7 = vpop.f32.mrf.mxu2  ;;  %v7289_v59 = vpop.f32.mrf.mxu3  ;;  %vm15669_vm2 = vmor %vm6096_vm15, %vm6097_vm1 }
 0x624   : > { %v15656_v55 = vmul.f32 %v6119_v25, %v15337_v13  ;;  %v6284_v0 = vadd.f32 0.014752088, %v6283_v38  ;;  %v15658_v43 = vmin.f32 %v6388_v24, 16.0  ;;  %v7112_v54 = vadd.f32 %v7111_v28, %v7023_v4  ;;  %v7024_v38 = vpop.f32.mrf.mxu0  ;;  %v7113_v24 = vpop.f32.mrf.mxu1 }
 0x625   : > { %v6142_v56 = vand.u32 2147483648, %v15610_v52  ;;  %v6159_v47 = vadd.f32 1.1283791, %v6158_v51  ;;  %v6193_v12 = vadd.f32 0.0036580483, %v6192_v26  ;;  %v6205_v6 = vmul.f32 %v6204_v19, %v15542_v10  ;;  %7397 = vst [vmem:[%s15621_s20 + $0x8] sm:$0xff] %v7365_v36  ;;  %v15663_v2 = vpop.eup %8366 }
 0x626   : > { %v6546_v45 = vadd.f32 1.0, %v7818_v3  ;;  %v15673_v25 = vadd.f32 1.0, %v6169_v32  ;;  %v6242_v51 = vadd.f32 0.001143296, %v6241_v29  ;;  %v7201_v28 = vadd.f32 %v7200_v7, %v7112_v54  ;;  %v16757_v19 = vld [vmem:[#allocation53_spill] sm:$0xff] }
 0x627   : > { %v6099_v4 = vsel %vm15669_vm2, %v15554_v22, %v6095_v40  ;;  %v6323_v3 = vmul.f32 %v6322_v57, %v15602_v41  ;;  %v6361_v26 = vmul.f32 3.8918573e-05, %v15652_v1  ;;  %v6725_v11 = vpack.c.bf16 %v16757_v19, %v16756_v49 }
 0x628   : > { %v6285_v20 = vmul.f32 %v6284_v0, %v15563_v60  ;;  %v6401_v32 = vmul.f32 3.8918573e-05, %v15658_v43  ;;  %v7290_v29 = vadd.f32 %v7289_v59, %v7201_v28  ;;  %v7025_v44 = vadd.f32 %v15519_v8, %v7024_v38  ;;  %v8387_v59 = vld [vmem:[%s8816_s18 + $0x10] sm:$0xff] }
 0x629   : > { %v6132_v36 = vmul.f32 %v15663_v2, %v15610_v52  ;;  %v6140_v40 = vand.u32 2147483647, %v15610_v52  ;;  %v15688_v22 = vor.u32 1.1754944e-38, %v6142_v56  ;;  %v6206_v57 = vadd.f32 0.112945676, %v6205_v6  ;;  %7155 = vmatmul.bf16.gmra.mxu1 %v6725_v11 }
 0x62a   : > { %v6104_v54 = vsel %vm15641_vm0, %v15608_v15, %v6099_v4  ;;  %v15694_v0 = vmul.f32 %v6159_v47, %v15378_v37  ;;  %v6243_v7 = vmul.f32 %v6242_v51, %v15625_v50  ;;  %v7366_v13 = vadd.f32 %v8387_v59, %v7290_v29  ;;  %v16760_v29 = vld [vmem:[#allocation50_spill] sm:$0xff] }
 0x62b   : > { %v15699_v28 = vmul.f32 %v6546_v45, %v15477_v42  ;;  %v6194_v38 = vmul.f32 %v6193_v12, %v15542_v10  ;;  %v6324_v56 = vadd.f32 0.014752088, %v6323_v3  ;;  %v6362_v49 = vadd.f32 0.001143296, %v6361_v26  ;;  %v7202_v4 = vpop.f32.mrf.mxu2  ;;  %v7291_v42 = vpop.f32.mrf.mxu3 }
 0x62c   : > { %8368 = vrcp.f32 %v15673_v25  ;;  %v6286_v6 = vadd.f32 0.112945676, %v6285_v20  ;;  %v6402_v19 = vadd.f32 0.001143296, %v6401_v32  ;;  %7398 = vst [vmem:[%s15621_s20 + $0x10] sm:$0xff] %v7366_v13  ;;  %v7114_v15 = vadd.f32 %v7113_v24, %v7025_v44  ;;  %v7027_v11 = vpop.f32.mrf.mxu0  ;;  %v7116_v20 = vpop.f32.mrf.mxu1  ;;  %v16759_v32 = vld [vmem:[#allocation48_spill] sm:$0xff] }
 0x62d   : > { %16758 = vst [vmem:[#allocation26_spill] sm:$0xff] %v15699_v28  ;;  %v6105_v37 = vmul.f32 %v6104_v54, %v15559_v9  ;;  %v6133_v53 = vsub.f32 1.0, %v6132_v36  ;;  %v6207_v47 = vmul.f32 %v6206_v57, %v15542_v10  ;;  %v6230_v51 = vmul.f32 2.1237322e-06, %v15625_v50  ;;  %v16761_v36 = vld [vmem:[#allocation52_spill] sm:$0xff]  ;;  %v16762_v57 = vld [vmem:[#allocation54_spill] sm:$0xff] }
 0x62e   : > { %v6182_v12 = vand.u32 2147483648, %v15673_v25  ;;  %v6244_v3 = vadd.f32 0.014752088, %v6243_v7  ;;  %v7203_v26 = vadd.f32 %v7202_v4, %v7114_v15  ;;  %vm6136_vm3 = vweird.f32 %v15610_v52  ;;  %v16764_v28 = vld [vmem:[#allocation57_spill] sm:$0xff] }
 0x62f   : > { %v6325_v24 = vmul.f32 %v6324_v56, %v15602_v41  ;;  %v6363_v9 = vmul.f32 %v6362_v49, %v15652_v1  ;;  %v6726_v44 = vpack.c.bf16 %v16760_v29, %v16759_v32  ;;  %v6727_v54 = vpack.c.bf16 %v16762_v57, %v16761_v36  ;;  %v16763_v49 = vld [vmem:[#allocation51_spill] sm:$0xff] }
 0x630   : > { %v6287_v59 = vmul.f32 %v6286_v6, %v15563_v60  ;;  %v6403_v7 = vmul.f32 %v6402_v19, %v15658_v43  ;;  %v7292_v13 = vadd.f32 %v7291_v42, %v7203_v26  ;;  %v7028_v15 = vadd.f32 %v15519_v8, %v7027_v11  ;;  %v8388_v42 = vld [vmem:[%s8816_s18 + $0x18] sm:$0xff] }
 0x631   : > { %v6134_v4 = vmul.f32 %v15663_v2, %v6133_v53  ;;  %v6208_v45 = vadd.f32 0.4994258, %v6207_v47  ;;  %v6231_v56 = vadd.f32 0.00028619796, %v6230_v51  ;;  %7244 = vmatmul.bf16.gmra.mxu2 %v6726_v44  ;;  %7333 = vmatmul.bf16.gmra.mxu3 %v6727_v54  ;;  %v6728_v32 = vpack.c.bf16 %v16764_v28, %v16763_v49  ;;  %v16771_v51 = vld [vmem:[#allocation56_spill] sm:$0xff] }
 0x632   : > { %v15722_v29 = vpop.eup %8368  ;;  %v6195_v36 = vadd.f32 0.05243302, %v6194_v38  ;;  %v6245_v6 = vmul.f32 %v6244_v3, %v15625_v50  ;;  %v6270_v19 = vmul.f32 2.1237322e-06, %v15563_v60  ;;  %v7367_v26 = vadd.f32 %v8388_v42, %v7292_v13 }
 0x633   : > { %v7819_v11 = vclamps-f32 %v6105_v37, 1.0  ;;  %vm6137_vm4 = vweird.f32 %v15663_v2  ;;  %v6326_v53 = vadd.f32 0.112945676, %v6325_v24  ;;  %v6364_v47 = vadd.f32 0.014752088, %v6363_v9  ;;  %7071 = vmatmul.bf16.gmra.mxu0 %v6728_v32  ;;  %v7205_v9 = vpop.f32.mrf.mxu2 }
 0x634   : > { %vm15728_vm5 = vcmp.eq.f32.partialorder %v6140_v40, 8.507059e+37  ;;  %v15732_v28 = vor.u32 1.1754944e-38, %v6182_v12  ;;  %v6288_v44 = vadd.f32 0.4994258, %v6287_v59  ;;  %v6404_v38 = vadd.f32 0.014752088, %v6403_v7  ;;  %v7294_v40 = vpop.f32.mrf.mxu3  ;;  %v7029_v59 = vpop.f32.mrf.mxu0  ;;  %vm15751_vm6 = vmor %vm6136_vm3, %vm6137_vm4 }
 0x635   : > { %7399 = vst [vmem:[%s15621_s20 + $0x18] sm:$0xff] %v7367_v26  ;;  %v7117_v3 = vadd.f32 %v7116_v20, %v7028_v15  ;;  %v6135_v57 = vadd.f32 %v15663_v2, %v6134_v4  ;;  %v6172_v37 = vmul.f32 %v15722_v29, %v15673_v25  ;;  %v6209_v54 = vmul.f32 %v6208_v45, %v15542_v10  ;;  %v7118_v7 = vpop.f32.mrf.mxu1  ;;  %v16767_v4 = vld [vmem:[#allocation55_spill] sm:$0xff]  ;;  %v16768_v45 = vld [vmem:[#allocation61_spill] sm:$0xff] }
 0x636   : > { %v6232_v24 = vmul.f32 %v6231_v56, %v15625_v50  ;;  %v6196_v13 = vmul.f32 %v6195_v36, %v15542_v10  ;;  %v6246_v49 = vadd.f32 0.112945676, %v6245_v6  ;;  %v6271_v12 = vadd.f32 0.00028619796, %v6270_v19 }
 0x637   : > { %v7206_v32 = vadd.f32 %v7205_v9, %v7117_v3  ;;  %v15741_v42 = vadd.f32 1.0, %v7819_v11  ;;  %v6327_v20 = vmul.f32 %v6326_v53, %v15602_v41  ;;  %v6365_v15 = vmul.f32 %v6364_v47, %v15652_v1 }
 0x638   : > { %v6729_v26 = vpack.c.bf16 %v16768_v45, %v16767_v4  ;;  %v6289_v36 = vmul.f32 %v6288_v44, %v15563_v60  ;;  %v6405_v6 = vmul.f32 %v6404_v38, %v15658_v43  ;;  %v7030_v11 = vadd.f32 %v15519_v8, %v7029_v59  ;;  %v8389_v38 = vld [vmem:[%s8816_s18 + $0x20] sm:$0xff] }
 0x639   : > { %v7295_v19 = vadd.f32 %v7294_v40, %v7206_v32  ;;  %v6139_v53 = vsel %vm15751_vm6, %v15663_v2, %v6135_v57  ;;  %v6173_v47 = vsub.f32 1.0, %v6172_v37  ;;  %v15761_v3 = vadd.f32 1.0, %v6209_v54 }
 0x63a   : > { %v6233_v52 = vadd.f32 0.0036580483, %v6232_v24  ;;  %7160 = vmatmul.bf16.gmra.mxu1 %v6729_v26  ;;  %v6247_v9 = vmul.f32 %v6246_v49, %v15625_v50  ;;  %v6272_v4 = vmul.f32 %v6271_v12, %v15563_v60  ;;  %v6310_v44 = vmul.f32 2.1237322e-06, %v15602_v41 }
 0x63b   : > { %v7368_v40 = vadd.f32 %v8389_v38, %v7295_v19  ;;  %vm6176_vm7 = vweird.f32 %v15673_v25  ;;  %v6197_v32 = vadd.f32 0.18741608, %v6196_v13  ;;  %v6328_v59 = vadd.f32 0.4994258, %v6327_v20  ;;  %v7207_v13 = vpop.f32.mrf.mxu2 }
 0x63c   : > { %v6366_v45 = vadd.f32 0.112945676, %v6365_v15  ;;  %vm6177_vm8 = vweird.f32 %v15722_v29  ;;  %v15769_v2 = vadd.f32 1.0, %v6289_v36  ;;  %v6406_v57 = vadd.f32 0.112945676, %v6405_v6  ;;  %v7296_v12 = vpop.f32.mrf.mxu3  ;;  %v7032_v36 = vpop.f32.mrf.mxu0 }
 0x63d   : > { %7400 = vst [vmem:[%s15621_s20 + $0x20] sm:$0xff] %v7368_v40  ;;  %v7119_v37 = vadd.f32 %v7118_v7, %v7030_v11  ;;  %v6144_v54 = vsel %vm15728_vm5, %v15688_v22, %v6139_v53  ;;  %v6174_v24 = vmul.f32 %v15722_v29, %v6173_v47  ;;  %8370 = vrcp.f32 %v15761_v3  ;;  %v7121_v6 = vpop.f32.mrf.mxu1  ;;  %v16772_v22 = vld [vmem:[#allocation58_spill] sm:$0xff]  ;;  %v16773_v53 = vld [vmem:[#allocation60_spill] sm:$0xff]  ;;  %vm15817_vm10 = vmor %vm6176_vm7, %vm6177_vm8 }
 0x63e   : > { %v6234_v49 = vmul.f32 %v6233_v52, %v15625_v50  ;;  %v6248_v20 = vadd.f32 0.4994258, %v6247_v9  ;;  %v6273_v15 = vadd.f32 0.0036580483, %v6272_v4  ;;  %v6311_v26 = vadd.f32 0.00028619796, %v6310_v44 }
 0x63f   : > { %v7208_v56 = vadd.f32 %v7207_v13, %v7119_v37  ;;  %v6329_v7 = vmul.f32 %v6328_v59, %v15602_v41  ;;  %v6367_v19 = vmul.f32 %v6366_v45, %v15652_v1  ;;  %v6730_v11 = vpack.c.bf16 %v16772_v22, %v16771_v51  ;;  %v16774_v47 = vld [vmem:[#allocation62_spill] sm:$0xff]  ;;  %v16778_v13 = vld [vmem:[#allocation59_spill] sm:$0xff]  ;;  %v16779_v51 = vld [vmem:[#allocation20_spill] sm:$0xff] }
 0x640   : > { %v6731_v38 = vpack.c.bf16 %v16774_v47, %v16773_v53  ;;  %v16775_v52 = vand.u32 2147483647, %v15673_v25  ;;  %8372 = vrcp.f32 %v15769_v2  ;;  %v6407_v4 = vmul.f32 %v6406_v57, %v15658_v43 }
 0x641   : > { %v7297_v44 = vadd.f32 %v7296_v12, %v7208_v56  ;;  %v7033_v40 = vadd.f32 %v15519_v8, %v7032_v36  ;;  %v6145_v59 = vmul.f32 %v6144_v54, %v15656_v55  ;;  %v6175_v45 = vadd.f32 %v15722_v29, %v6174_v24  ;;  %7249 = vmatmul.bf16.gmra.mxu2 %v6730_v11  ;;  %v8390_v12 = vld [vmem:[%s8816_s18 + $0x28] sm:$0xff] }
 0x642   : > { %vm15786_vm9 = vcmp.eq.f32.partialorder %v16775_v52, 8.507059e+37  ;;  %v6235_v37 = vadd.f32 0.05243302, %v6234_v49  ;;  %7338 = vmatmul.bf16.gmra.mxu3 %v6731_v38  ;;  %v6732_v22 = vpack.c.bf16 %v16779_v51, %v16778_v13  ;;  %v6274_v53 = vmul.f32 %v6273_v15, %v15563_v60 }
 0x643   : > { %v6312_v47 = vmul.f32 %v6311_v26, %v15602_v41  ;;  %v6350_v57 = vmul.f32 2.1237322e-06, %v15652_v1  ;;  %v7369_v56 = vadd.f32 %v8390_v12, %v7297_v44  ;;  %v15801_v36 = vpop.eup %8370  ;;  %v15804_v55 = vmul.f32 0.5, %v15485_v21  ;;  %v7210_v52 = vpop.f32.mrf.mxu2 }
 0x644   : > { %v15806_v54 = vadd.f32 1.0, %v6329_v7  ;;  %v6368_v24 = vadd.f32 0.4994258, %v6367_v19  ;;  %v6390_v49 = vmul.f32 2.1237322e-06, %v15658_v43  ;;  %7076 = vmatmul.bf16.gmra.mxu0 %v6732_v22  ;;  %v15811_v15 = vmul.f32 %v15741_v42, %v15494_v46  ;;  %v7299_v25 = vpop.f32.mrf.mxu3 }
 0x645   : > { %v6249_v21 = vmul.f32 %v6248_v20, %v15625_v50  ;;  %v6408_v7 = vadd.f32 0.4994258, %v6407_v4  ;;  %7401 = vst [vmem:[%s15621_s20 + $0x28] sm:$0xff] %v7369_v56  ;;  %v7122_v19 = vadd.f32 %v7121_v6, %v7033_v40  ;;  %v7820_v11 = vclamps-f32 %v6145_v59, 1.0  ;;  %v7034_v4 = vpop.f32.mrf.mxu0  ;;  %v7123_v12 = vpop.f32.mrf.mxu1  ;;  %v16782_v40 = vld [vmem:[#allocation63_spill] sm:$0xff] }
 0x646   : > { %v6179_v38 = vsel %vm15817_vm10, %v15722_v29, %v6175_v45  ;;  %v6198_v46 = vmul.f32 %v6197_v32, %v15542_v10  ;;  %v6236_v42 = vmul.f32 %v6235_v37, %v15625_v50  ;;  %v15828_v44 = vpop.eup %8372  ;;  %v6275_v13 = vadd.f32 0.05243302, %v6274_v53  ;;  %v16783_v10 = vld [vmem:[#allocation22_spill] sm:$0xff] }
 0x647   : > { %v6313_v51 = vadd.f32 0.0036580483, %v6312_v47  ;;  %v6351_v22 = vadd.f32 0.00028619796, %v6350_v57  ;;  %v7211_v20 = vadd.f32 %v7210_v52, %v7122_v19  ;;  %8374 = vrcp.f32 %v15806_v54 }
 0x648   : > { %v6369_v6 = vmul.f32 %v6368_v24, %v15652_v1  ;;  %v6391_v29 = vadd.f32 0.00028619796, %v6390_v49  ;;  %v6733_v32 = vpack.c.bf16 %v16783_v10, %v16782_v40  ;;  %v15834_v59 = vadd.f32 1.0, %v6249_v21 }
 0x649   : > { %v6409_v45 = vmul.f32 %v6408_v7, %v15658_v43  ;;  %v7300_v37 = vadd.f32 %v7299_v25, %v7211_v20  ;;  %v7035_v53 = vadd.f32 %v15519_v8, %v7034_v4  ;;  %v6184_v47 = vsel %vm15786_vm9, %v15732_v28, %v6179_v38  ;;  %v8391_v7 = vld [vmem:[%s8816_s18 + $0x30] sm:$0xff] }
 0x64a   : > { %v6212_v57 = vmul.f32 %v15801_v36, %v15761_v3  ;;  %v6237_v56 = vadd.f32 0.18741608, %v6236_v42  ;;  %v6292_v24 = vmul.f32 %v15828_v44, %v15769_v2  ;;  %7165 = vmatmul.bf16.gmra.mxu1 %v6733_v32  ;;  %v6276_v49 = vmul.f32 %v6275_v13, %v15563_v60 }
 0x64b   : > { %v6314_v26 = vmul.f32 %v6313_v51, %v15602_v41  ;;  %v6352_v21 = vmul.f32 %v6351_v22, %v15652_v1  ;;  %v7370_v19 = vadd.f32 %v8391_v7, %v7300_v37  ;;  %v6199_v52 = vadd.f32 1.1283791, %v6198_v46  ;;  %v16785_v7 = vld [vmem:[#allocation17_spill] sm:$0xff] }
 0x64c   : > { %v6222_v28 = vand.u32 2147483648, %v15761_v3  ;;  %v15850_v9 = vadd.f32 1.0, %v6369_v6  ;;  %v6392_v38 = vmul.f32 %v6391_v29, %v15658_v43  ;;  %v6548_v42 = vadd.f32 1.0, %v7820_v11  ;;  %v7212_v6 = vpop.f32.mrf.mxu2  ;;  %v7301_v40 = vpop.f32.mrf.mxu3 }
 0x64d   : > { %8376 = vrcp.f32 %v15834_v59  ;;  %v15854_v25 = vadd.f32 1.0, %v6409_v45  ;;  %7402 = vst [vmem:[%s15621_s20 + $0x30] sm:$0xff] %v7370_v19  ;;  %v7124_v13 = vadd.f32 %v7123_v12, %v7035_v53  ;;  %v15857_v20 = vpop.eup %8374  ;;  %v15860_v51 = vmul.f32 %v6184_v47, %v15694_v0  ;;  %v7037_v37 = vpop.f32.mrf.mxu0  ;;  %v16784_v53 = vld [vmem:[#allocation16_spill] sm:$0xff]  ;;  %v16786_v0 = vld [vmem:[#allocation18_spill] sm:$0xff]  ;;  %v16787_v47 = vld [vmem:[#allocation19_spill] sm:$0xff] }
 0x64e   : > { %v6213_v22 = vsub.f32 1.0, %v6212_v57  ;;  %v6238_v46 = vmul.f32 %v6237_v56, %v15625_v50  ;;  %v6293_v4 = vsub.f32 1.0, %v6292_v24  ;;  %v6277_v10 = vadd.f32 0.18741608, %v6276_v49  ;;  %v7126_v45 = vpop.f32.mrf.mxu1 }
 0x64f   : > { %v6315_v29 = vadd.f32 0.05243302, %v6314_v26  ;;  %v6353_v11 = vadd.f32 0.0036580483, %v6352_v21  ;;  %v7213_v32 = vadd.f32 %v7212_v6, %v7124_v13  ;;  %8378 = vrcp.f32 %v15850_v9 }
 0x650   : > { %v6393_v12 = vadd.f32 0.0036580483, %v6392_v38  ;;  %v6734_v19 = vpack.c.bf16 %v16785_v7, %v16784_v53  ;;  %v6735_v57 = vpack.c.bf16 %v16787_v47, %v16786_v0  ;;  %v6332_v50 = vmul.f32 %v15857_v20, %v15806_v54  ;;  %v16788_v38 = vld [vmem:[#allocation21_spill] sm:$0xff] }
 0x651   : > { %8380 = vrcp.f32 %v15854_v25  ;;  %v7302_v56 = vadd.f32 %v7301_v40, %v7213_v32  ;;  %v7038_v24 = vadd.f32 %v15519_v8, %v7037_v37  ;;  %v15873_v49 = vmul.f32 %v6199_v52, %v15491_v33  ;;  %v8392_v37 = vld [vmem:[%s8816_s18 + $0x38] sm:$0xff] }
 0x652   : > { %v6239_v26 = vadd.f32 1.1283791, %v6238_v46  ;;  %v6294_v21 = vmul.f32 %v15828_v44, %v6293_v4  ;;  %7254 = vmatmul.bf16.gmra.mxu2 %v6734_v19  ;;  %7343 = vmatmul.bf16.gmra.mxu3 %v6735_v57  ;;  %v6736_v13 = vpack.c.bf16 %v15159_v17, %v16788_v38  ;;  %v6220_v53 = vand.u32 2147483647, %v15761_v3 }
 0x653   : > { %v15878_v6 = vpop.eup %8376  ;;  %v6278_v40 = vmul.f32 %v6277_v10, %v15563_v60  ;;  %v6316_v32 = vmul.f32 %v6315_v29, %v15602_v41  ;;  %v7371_v33 = vadd.f32 %v8392_v37, %v7302_v56  ;;  %v15885_v52 = vmul.f32 %v6548_v42, %v15497_v39 }
 0x654   : > { %v7821_v46 = vclamps-f32 %v15860_v51, 1.0  ;;  %v15888_v4 = vor.u32 1.1754944e-38, %v6222_v28  ;;  %v6354_v7 = vmul.f32 %v6353_v11, %v15652_v1  ;;  %7081 = vmatmul.bf16.gmra.mxu0 %v6736_v13  ;;  %v6214_v17 = vmul.f32 %v15801_v36, %v6213_v22  ;;  %v7215_v42 = vpop.f32.mrf.mxu2  ;;  %v7304_v11 = vpop.f32.mrf.mxu3 }
 0x655   : > { %v6333_v19 = vsub.f32 1.0, %v6332_v50  ;;  %v6394_v0 = vmul.f32 %v6393_v12, %v15658_v43  ;;  %7403 = vst [vmem:[%s15621_s20 + $0x38] sm:$0xff] %v7371_v33  ;;  %v7127_v60 = vadd.f32 %v7126_v45, %v7038_v24  ;;  %v15894_v10 = vpop.eup %8378  ;;  %v15897_v29 = vmul.f32 %v6239_v26, %v15577_v18  ;;  %v7039_v50 = vpop.f32.mrf.mxu0  ;;  %v16789_v26 = vld [vmem:[#allocation23_spill] sm:$0xff] }
 0x656   : > { %v6252_v39 = vmul.f32 %v15878_v6, %v15834_v59  ;;  %v6295_v28 = vadd.f32 %v15828_v44, %v6294_v21  ;;  %vm6297_vm11 = vweird.f32 %v15828_v44  ;;  %v6279_v47 = vadd.f32 1.1283791, %v6278_v40  ;;  %v7128_v56 = vpop.f32.mrf.mxu1 }
 0x657   : > { %v15903_v22 = vpop.eup %8380  ;;  %v6302_v12 = vand.u32 2147483648, %v15769_v2  ;;  %v6317_v45 = vadd.f32 0.18741608, %v6316_v32  ;;  %v7216_v57 = vadd.f32 %v7215_v42, %v7127_v60  ;;  %vm6296_vm12 = vweird.f32 %v15769_v2  ;;  %v8393_v42 = vld [vmem:[%s8816_s18 + $0x40] sm:$0xff] }
 0x658   : > { %v6300_v18 = vand.u32 2147483647, %v15769_v2  ;;  %v6355_v24 = vadd.f32 0.05243302, %v6354_v7  ;;  %v6737_v21 = vpack.c.bf16 %v15162_v16, %v16789_v26  ;;  %vm15910_vm13 = vmor %vm6296_vm12, %vm6297_vm11  ;;  %v6334_v13 = vmul.f32 %v15857_v20, %v6333_v19 }
 0x659   : > { %v6395_v40 = vadd.f32 0.05243302, %v6394_v0  ;;  %v7305_v32 = vadd.f32 %v7304_v11, %v7216_v57  ;;  %v7040_v37 = vadd.f32 %v15519_v8, %v7039_v50  ;;  %v6253_v33 = vsub.f32 1.0, %v6252_v39 }
 0x65a   : > { %v6299_v2 = vsel %vm15910_vm13, %v15828_v44, %v6295_v28  ;;  %v6372_v7 = vmul.f32 %v15894_v10, %v15850_v9  ;;  %v6412_v16 = vmul.f32 %v15903_v22, %v15854_v25  ;;  %7170 = vmatmul.bf16.gmra.mxu1 %v6737_v21  ;;  %v15924_v60 = vadd.f32 %v15801_v36, %v6214_v17 }
 0x65b   : > { %v6303_v19 = vor.u32 1.1754944e-38, %v6302_v12  ;;  %v6318_v0 = vmul.f32 %v6317_v45, %v15602_v41  ;;  %v7372_v39 = vadd.f32 %v8393_v42, %v7305_v32  ;;  %v6280_v11 = vmul.f32 %v6279_v47, %v15514_v14 }
 0x65c   : > { %vm6301_vm14 = vcmp.eq.f32.partialorder %v6300_v18, 8.507059e+37  ;;  %vm6337_vm15 = vweird.f32 %v15857_v20  ;;  %v6356_v44 = vmul.f32 %v6355_v24, %v15652_v1  ;;  %v6335_v57 = vadd.f32 %v15857_v20, %v6334_v13  ;;  %v7217_v21 = vpop.f32.mrf.mxu2  ;;  %v7306_v14 = vpop.f32.mrf.mxu3 }
 0x65d   : > { %v6304_v28 = vsel %vm6301_vm14, %v6303_v19, %v6299_v2  ;;  %v6396_v50 = vmul.f32 %v6395_v40, %v15658_v43  ;;  %7404 = vst [vmem:[%s15621_s20 + $0x40] sm:$0xff] %v7372_v39  ;;  %v7129_v17 = vadd.f32 %v7128_v56, %v7040_v37  ;;  %v6254_v12 = vmul.f32 %v15878_v6, %v6253_v33  ;;  %v7042_v38 = vpop.f32.mrf.mxu0 }
 0x65e   : > { %v6342_v41 = vand.u32 2147483648, %v15806_v54  ;;  %v6373_v45 = vsub.f32 1.0, %v6372_v7  ;;  %v6413_v26 = vsub.f32 1.0, %v6412_v16  ;;  %vm6217_vm0 = vweird.f32 %v15801_v36  ;;  %v7131_v13 = vpop.f32.mrf.mxu1 }
 0x65f   : > { %v6319_v47 = vadd.f32 1.1283791, %v6318_v0  ;;  %vm6336_vm1 = vweird.f32 %v15806_v54  ;;  %v6340_v18 = vand.u32 2147483647, %v15806_v54  ;;  %v7218_v24 = vadd.f32 %v7217_v21, %v7129_v17 }
 0x660   : > { %v6305_v40 = vmul.f32 %v6304_v28, %v6280_v11  ;;  %vm15941_vm2 = vmor %vm6336_vm1, %vm6337_vm15  ;;  %v6357_v32 = vadd.f32 0.18741608, %v6356_v44  ;;  %v6738_v37 = vpack.c.bf16 %v15199_v23, %v15116_v34  ;;  %v6739_v33 = vpack.c.bf16 %v15345_v61, %v15145_v63  ;;  %v8394_v61 = vld [vmem:[%s8816_s18 + $0x48] sm:$0xff] }
 0x661   : > { %vm6216_vm3 = vweird.f32 %v15761_v3  ;;  %v6339_v54 = vsel %vm15941_vm2, %v15857_v20, %v6335_v57  ;;  %v6397_v2 = vadd.f32 0.18741608, %v6396_v50  ;;  %v7307_v7 = vadd.f32 %v7306_v14, %v7218_v24 }
 0x662   : > { %v7043_v16 = vadd.f32 %v15519_v8, %v7042_v38  ;;  %vm6256_vm4 = vweird.f32 %v15834_v59  ;;  %v6343_v19 = vor.u32 1.1754944e-38, %v6342_v41  ;;  %v6374_v0 = vmul.f32 %v15894_v10, %v6373_v45  ;;  %7259 = vmatmul.bf16.gmra.mxu2 %v6738_v37  ;;  %7348 = vmatmul.bf16.gmra.mxu3 %v6739_v33  ;;  %vm16005_vm14 = vmor %vm6216_vm3, %vm6217_vm0 }
 0x663   : > { %v6414_v34 = vmul.f32 %v15903_v22, %v6413_v26  ;;  %v6740_v63 = vpack.c.bf16 %v15510_v58, %v15452_v5  ;;  %vm6257_vm5 = vweird.f32 %v15878_v6  ;;  %v6260_v23 = vand.u32 2147483647, %v15834_v59 }
 0x664   : > { %vm6341_vm6 = vcmp.eq.f32.partialorder %v6340_v18, 8.507059e+37  ;;  %v7373_v20 = vadd.f32 %v8394_v61, %v7307_v7  ;;  %v15963_v42 = vadd.f32 %v15878_v6, %v6254_v12  ;;  %v6320_v39 = vmul.f32 %v6319_v47, %v15552_v62  ;;  %v7220_v62 = vpop.f32.mrf.mxu2  ;;  %v7309_v17 = vpop.f32.mrf.mxu3  ;;  %vm16019_vm15 = vmor %vm6256_vm4, %vm6257_vm5 }
 0x665   : > { %v6344_v11 = vsel %vm6341_vm6, %v6343_v19, %v6339_v54  ;;  %v6358_v44 = vmul.f32 %v6357_v32, %v15652_v1  ;;  %7086 = vmatmul.bf16.gmra.mxu0 %v6740_v63  ;;  %v7824_v28 = vclamps-f32 %v6305_v40, 1.0  ;;  %vm6377_vm7 = vweird.f32 %v15894_v10  ;;  %v8395_v54 = vld [vmem:[%s8816_s18 + $0x50] sm:$0xff] }
 0x666   : > { %v6398_v5 = vmul.f32 %v6397_v2, %v15658_v43  ;;  %7405 = vst [vmem:[%s15621_s20 + $0x48] sm:$0xff] %v7373_v20  ;;  %v7132_v58 = vadd.f32 %v7131_v13, %v7043_v16  ;;  %vm15972_vm8 = vcmp.eq.f32.partialorder %v6220_v53, 8.507059e+37  ;;  %v6375_v50 = vadd.f32 %v15894_v10, %v6374_v0  ;;  %v7044_v53 = vpop.f32.mrf.mxu0  ;;  %v7133_v26 = vpop.f32.mrf.mxu1 }
 0x667   : > { %vm6376_vm9 = vweird.f32 %v15850_v9  ;;  %v6415_v1 = vadd.f32 %v15903_v22, %v6414_v34  ;;  %vm6417_vm10 = vweird.f32 %v15903_v22  ;;  %v6345_v12 = vmul.f32 %v6344_v11, %v6320_v39 }
 0x668   : > { %v6382_v43 = vand.u32 2147483648, %v15850_v9  ;;  %v6422_v41 = vand.u32 2147483648, %v15854_v25  ;;  %v7221_v45 = vadd.f32 %v7220_v62, %v7132_v58  ;;  %vm15984_vm11 = vmor %vm6376_vm9, %vm6377_vm7  ;;  %v6380_v14 = vand.u32 2147483647, %v15850_v9 }
 0x669   : > { %vm6416_vm12 = vweird.f32 %v15854_v25  ;;  %v6420_v47 = vand.u32 2147483647, %v15854_v25  ;;  %v6741_v18 = vpack.c.bf16 %v15525_v35, %v15459_v48  ;;  %v6262_v24 = vand.u32 2147483648, %v15834_v59 }
 0x66a   : > { %v6359_v38 = vadd.f32 1.1283791, %v6358_v44  ;;  %vm15996_vm13 = vmor %vm6416_vm12, %vm6417_vm10  ;;  %v7310_v40 = vadd.f32 %v7309_v17, %v7221_v45  ;;  %v7045_v9 = vadd.f32 %v15519_v8, %v7044_v53  ;;  %v6552_v48 = vadd.f32 1.0, %v7824_v28  ;;  %v8397_v17 = vld [vmem:[%s8816_s18 + $0x58] sm:$0xff] }
 0x66b   : > { %v6379_v35 = vsel %vm15984_vm11, %v15894_v10, %v6375_v50  ;;  %v6399_v56 = vadd.f32 1.1283791, %v6398_v5  ;;  %v6419_v32 = vsel %vm15996_vm13, %v15903_v22, %v6415_v1  ;;  %7175 = vmatmul.bf16.gmra.mxu1 %v6741_v18  ;;  %v7825_v3 = vclamps-f32 %v6345_v12, 1.0  ;;  %v16806_v5 = vld [vmem:[#allocation31_spill] sm:$0xff] }
 0x66c   : > { %v6383_v37 = vor.u32 1.1754944e-38, %v6382_v43  ;;  %v6423_v33 = vor.u32 1.1754944e-38, %v6422_v41  ;;  %v7374_v10 = vadd.f32 %v8395_v54, %v7310_v40  ;;  %v6219_v2 = vsel %vm16005_vm14, %v15801_v36, %v15924_v60  ;;  %v7222_v36 = vpop.f32.mrf.mxu2  ;;  %v7311_v60 = vpop.f32.mrf.mxu3  ;;  %v16807_v43 = vld [vmem:[#allocation25_spill] sm:$0xff] }
 0x66d   : > { %v6259_v22 = vsel %vm16019_vm15, %v15878_v6, %v15963_v42  ;;  %vm6381_vm0 = vcmp.eq.f32.partialorder %v6380_v14, 8.507059e+37  ;;  %vm6421_vm1 = vcmp.eq.f32.partialorder %v6420_v47, 8.507059e+37  ;;  %v6263_v59 = vor.u32 1.1754944e-38, %v6262_v24 }
 0x66e   : > { %v6384_v7 = vsel %vm6381_vm0, %v6383_v37, %v6379_v35  ;;  %v6424_v16 = vsel %vm6421_vm1, %v6423_v33, %v6419_v32  ;;  %7406 = vst [vmem:[%s15621_s20 + $0x50] sm:$0xff] %v7374_v10  ;;  %v7134_v19 = vadd.f32 %v7133_v26, %v7045_v9  ;;  %vm6261_vm2 = vcmp.eq.f32.partialorder %v6260_v23, 8.507059e+37  ;;  %v7047_v39 = vpop.f32.mrf.mxu0  ;;  %v7136_v11 = vpop.f32.mrf.mxu1  ;;  %v16808_v35 = vld [vmem:[#allocation37_spill] sm:$0xff]  ;;  %v16809_v32 = vld [vmem:[#allocation28_spill] sm:$0xff]  ;;  %v16810_v33 = vld [vmem:[#allocation30_spill] sm:$0xff] }
 0x66f   : > { %v6680_v0 = vmul.f32 %v6552_v48, %v15804_v55  ;;  %v6360_v34 = vmul.f32 %v6359_v38, %v15605_v30  ;;  %v6400_v63 = vmul.f32 %v6399_v56, %v15613_v27  ;;  %v6224_v6 = vsel %vm15972_vm8, %v15888_v4, %v6219_v2  ;;  %v16804_v55 = vld [vmem:[#allocation26_spill] sm:$0xff]  ;;  %v16805_v30 = vld [vmem:[#allocation27_spill] sm:$0xff]  ;;  %v16811_v10 = vld [vmem:[#allocation29_spill] sm:$0xff] }
 0x670   : > { %v6264_v61 = vsel %vm6261_vm2, %v6263_v59, %v6259_v22  ;;  %v6553_v20 = vadd.f32 1.0, %v7825_v3  ;;  %v7223_v42 = vadd.f32 %v7222_v36, %v7134_v19  ;;  %v6742_v28 = vpack.c.bf16 %v16804_v55, %v15474_v31  ;;  %v16047_v4 = vld [vmem:[%s16161_s6] ss:$0 sm:$0xff] }
 0x671   : > { %v6385_v44 = vmul.f32 %v6384_v7, %v6360_v34  ;;  %v6425_v23 = vmul.f32 %v6424_v16, %v6400_v63  ;;  %v6743_v27 = vpack.c.bf16 %v15811_v15, %v16805_v30  ;;  %v1177_v58 = vmul.f32 0.5, %v16806_v5  ;;  %v8398_v3 = vld [vmem:[%s8816_s18 + $0x60] sm:$0xff] }
 0x672   : > { %v7312_v50 = vadd.f32 %v7311_v60, %v7223_v42  ;;  %v7048_v57 = vadd.f32 %v16047_v4, %v7047_v39  ;;  %v6549_v1 = vadd.f32 1.0, %v7821_v46  ;;  %v6225_v62 = vmul.f32 %v6224_v6, %v15873_v49  ;;  %7264 = vmatmul.bf16.gmra.mxu2 %v6742_v28  ;;  %v8399_v39 = vld [vmem:[%s8816_s18 + $0x68] sm:$0xff] }
 0x673   : > { %v6265_v31 = vmul.f32 %v6264_v61, %v15897_v29  ;;  %7353 = vmatmul.bf16.gmra.mxu3 %v6743_v27  ;;  %v6744_v15 = vpack.c.bf16 %v6680_v0, %v15885_v52  ;;  %v1173_v41 = vmul.f32 0.5, %v16807_v43  ;;  %v6681_v45 = vmul.f32 %v6553_v20, %v1177_v58 }
 0x674   : > { %v7375_v12 = vadd.f32 %v8397_v17, %v7312_v50  ;;  %v7826_v53 = vclamps-f32 %v6385_v44, 1.0  ;;  %v7827_v26 = vclamps-f32 %v6425_v23, 1.0  ;;  %v7137_v21 = vadd.f32 %v7136_v11, %v7048_v57  ;;  %v7225_v49 = vpop.f32.mrf.mxu2  ;;  %v7314_v29 = vpop.f32.mrf.mxu3  ;;  %v8400_v50 = vld [vmem:[%s8816_s18 + $0x70] sm:$0xff] }
 0x675   : > { %7091 = vmatmul.bf16.gmra.mxu0 %v6744_v15  ;;  %v6677_v51 = vmul.f32 %v6549_v1, %v1173_v41  ;;  %v7822_v46 = vclamps-f32 %v6225_v62, 1.0  ;;  %v7823_v14 = vclamps-f32 %v6265_v31, 1.0  ;;  %v1178_v56 = vmul.f32 0.5, %v16808_v35 }
 0x676   : > { %7407 = vst [vmem:[%s15621_s20 + $0x58] sm:$0xff] %v7375_v12  ;;  %v7226_v47 = vadd.f32 %v7225_v49, %v7137_v21  ;;  %v7049_v18 = vpop.f32.mrf.mxu0  ;;  %v7138_v24 = vpop.f32.mrf.mxu1  ;;  %v6554_v52 = vadd.f32 1.0, %v7826_v53  ;;  %v6555_v38 = vadd.f32 1.0, %v7827_v26  ;;  %v1179_v8 = vmul.f32 0.5, %v16809_v32 }
 0x677   : > { %v6745_v13 = vpack.c.bf16 %v6681_v45, %v6677_v51  ;;  %v7050_v9 = vadd.f32 %v16047_v4, %v7049_v18  ;;  %v6550_v25 = vadd.f32 1.0, %v7822_v46  ;;  %v6551_v48 = vadd.f32 1.0, %v7823_v14  ;;  %v8401_v45 = vld [vmem:[%s8816_s18 + $0x78] sm:$0xff]  ;;  %v8402_v18 = vld [vmem:[%s8816_s18 + $0x80] sm:$0xff] }
 0x678   : > { %v7315_v40 = vadd.f32 %v7314_v29, %v7226_v47  ;;  %v1174_v54 = vmul.f32 0.5, %v16810_v33  ;;  %v1175_v2 = vmul.f32 0.5, %v16811_v10  ;;  %v6682_v22 = vmul.f32 %v6554_v52, %v1178_v56  ;;  %v8403_v56 = vld [vmem:[%s8816_s18 + $0x88] sm:$0xff] }
 0x679   : > { %v6683_v59 = vmul.f32 %v6555_v38, %v1179_v8  ;;  %v7139_v7 = vadd.f32 %v7138_v24, %v7050_v9 }
 0x67a   : > { %v7376_v37 = vadd.f32 %v8398_v3, %v7315_v40  ;;  %v6678_v16 = vmul.f32 %v6550_v25, %v1174_v54  ;;  %v6679_v19 = vmul.f32 %v6551_v48, %v1175_v2 }
 0x67b   : > { %7180 = vmatmul.bf16.gmra.mxu1 %v6745_v13 }
 0x67c   : > { %7408 = vst [vmem:[%s15621_s20 + $0x60] sm:$0xff] %v7376_v37  ;;  %v7227_v0 = vpop.f32.mrf.mxu2  ;;  %v7316_v34 = vpop.f32.mrf.mxu3  ;;  %v6746_v6 = vpack.c.bf16 %v6682_v22, %v6678_v16  ;;  %v6747_v61 = vpack.c.bf16 %v6683_v59, %v6679_v19  ;;  %v8404_v59 = vld [vmem:[%s8816_s18 + $0x90] sm:$0xff] }
 0x67d   : > { %v7228_v63 = vadd.f32 %v7227_v0, %v7139_v7 }
 0x67e   : > { %v7052_v36 = vpop.f32.mrf.mxu0  ;;  %v7141_v60 = vpop.f32.mrf.mxu1 }
 0x67f   : > { %v7317_v20 = vadd.f32 %v7316_v34, %v7228_v63  ;;  %v7053_v42 = vadd.f32 %v16047_v4, %v7052_v36 }
 0x681   : > { %v7377_v11 = vadd.f32 %v8399_v39, %v7317_v20  ;;  %v7142_v44 = vadd.f32 %v7141_v60, %v7053_v42 }
 0x682   : > { %7269 = vmatmul.bf16.gmra.mxu2 %v6746_v6 }
 0x683   : > { %7358 = vmatmul.bf16.gmra.mxu3 %v6747_v61  ;;  %7409 = vst [vmem:[%s15621_s20 + $0x68] sm:$0xff] %v7377_v11  ;;  %v8405_v61 = vld [vmem:[%s8816_s18 + $0x98] sm:$0xff] }
 0x684   : > { %v7230_v23 = vpop.f32.mrf.mxu2  ;;  %v7319_v55 = vpop.f32.mrf.mxu3 }
 0x685   : > { %v7231_v28 = vadd.f32 %v7230_v23, %v7142_v44 }
 0x686   : > { %v7054_v30 = vpop.f32.mrf.mxu0  ;;  %v7143_v27 = vpop.f32.mrf.mxu1 }
 0x687   : > { %v7320_v5 = vadd.f32 %v7319_v55, %v7231_v28  ;;  %v7055_v58 = vadd.f32 %v16047_v4, %v7054_v30 }
 0x689   : > { %v7378_v57 = vadd.f32 %v8400_v50, %v7320_v5  ;;  %v7144_v1 = vadd.f32 %v7143_v27, %v7055_v58  ;;  %v8406_v27 = vld [vmem:[%s8816_s18 + $0xa0] sm:$0xff] }
 0x68b   : > { %7410 = vst [vmem:[%s15621_s20 + $0x70] sm:$0xff] %v7378_v57 }
 0x68c   : > { %v7232_v62 = vpop.f32.mrf.mxu2  ;;  %v7321_v31 = vpop.f32.mrf.mxu3 }
 0x68d   : > { %v7233_v15 = vadd.f32 %v7232_v62, %v7144_v1 }
 0x68e   : > { %v7057_v17 = vpop.f32.mrf.mxu0  ;;  %v7146_v12 = vpop.f32.mrf.mxu1 }
 0x68f   : > { %v7322_v43 = vadd.f32 %v7321_v31, %v7233_v15  ;;  %v7058_v41 = vadd.f32 %v16047_v4, %v7057_v17 }
 0x691   : > { %v7379_v53 = vadd.f32 %v8401_v45, %v7322_v43  ;;  %v7147_v26 = vadd.f32 %v7146_v12, %v7058_v41  ;;  %v8407_v12 = vld [vmem:[%s8816_s18 + $0xa8] sm:$0xff] }
 0x693   : > { %7411 = vst [vmem:[%s15621_s20 + $0x78] sm:$0xff] %v7379_v53 }
 0x694   : > { %v7235_v21 = vpop.f32.mrf.mxu2  ;;  %v7324_v51 = vpop.f32.mrf.mxu3 }
 0x695   : > { %v7236_v46 = vadd.f32 %v7235_v21, %v7147_v26 }
 0x696   : > { %v7059_v14 = vpop.f32.mrf.mxu0  ;;  %v7148_v49 = vpop.f32.mrf.mxu1 }
 0x697   : > { %v7325_v29 = vadd.f32 %v7324_v51, %v7236_v46  ;;  %v7060_v47 = vadd.f32 %v16047_v4, %v7059_v14 }
 0x699   : > { %v7380_v24 = vadd.f32 %v8402_v18, %v7325_v29  ;;  %v7149_v52 = vadd.f32 %v7148_v49, %v7060_v47  ;;  %v8408_v49 = vld [vmem:[%s8816_s18 + $0xb0] sm:$0xff] }
 0x69b   : > { %7412 = vst [vmem:[%s15621_s20 + $0x80] sm:$0xff] %v7380_v24 }
 0x69c   : > { %v7237_v38 = vpop.f32.mrf.mxu2  ;;  %v7326_v13 = vpop.f32.mrf.mxu3 }
 0x69d   : > { %v7238_v40 = vadd.f32 %v7237_v38, %v7149_v52 }
 0x69e   : > { %v7062_v9 = vpop.f32.mrf.mxu0  ;;  %v7151_v25 = vpop.f32.mrf.mxu1 }
 0x69f   : > { %v7327_v48 = vadd.f32 %v7326_v13, %v7238_v40  ;;  %v7063_v35 = vadd.f32 %v16047_v4, %v7062_v9 }
 0x6a1   : > { %v7381_v32 = vadd.f32 %v8403_v56, %v7327_v48  ;;  %v7152_v8 = vadd.f32 %v7151_v25, %v7063_v35  ;;  %v8409_v25 = vld [vmem:[%s8816_s18 + $0xb8] sm:$0xff] }
 0x6a3   : > { %7413 = vst [vmem:[%s15621_s20 + $0x88] sm:$0xff] %v7381_v32 }
 0x6a4   : > { %v7240_v3 = vpop.f32.mrf.mxu2  ;;  %v7329_v37 = vpop.f32.mrf.mxu3 }
 0x6a5   : > { %v7241_v33 = vadd.f32 %v7240_v3, %v7152_v8 }
 0x6a6   : > { %v7064_v54 = vpop.f32.mrf.mxu0  ;;  %v7153_v10 = vpop.f32.mrf.mxu1 }
 0x6a7   : > { %v7330_v2 = vadd.f32 %v7329_v37, %v7241_v33  ;;  %v7065_v22 = vadd.f32 %v16047_v4, %v7064_v54 }
 0x6a9   : > { %v7382_v7 = vadd.f32 %v8404_v59, %v7330_v2  ;;  %v7154_v16 = vadd.f32 %v7153_v10, %v7065_v22  ;;  %v8410_v10 = vld [vmem:[%s8816_s18 + $0xc0] sm:$0xff] }
 0x6ab   : > { %7414 = vst [vmem:[%s15621_s20 + $0x90] sm:$0xff] %v7382_v7 }
 0x6ac   : > { %v7242_v19 = vpop.f32.mrf.mxu2  ;;  %v7331_v0 = vpop.f32.mrf.mxu3 }
 0x6ad   : > { %v7243_v34 = vadd.f32 %v7242_v19, %v7154_v16 }
 0x6ae   : > { %v7067_v63 = vpop.f32.mrf.mxu0  ;;  %v7156_v36 = vpop.f32.mrf.mxu1 }
 0x6af   : > { %v7332_v60 = vadd.f32 %v7331_v0, %v7243_v34  ;;  %v7068_v6 = vadd.f32 %v16047_v4, %v7067_v63 }
 0x6b1   : > { %v7383_v20 = vadd.f32 %v8405_v61, %v7332_v60  ;;  %v7157_v42 = vadd.f32 %v7156_v36, %v7068_v6  ;;  %v8411_v36 = vld [vmem:[%s8816_s18 + $0xc8] sm:$0xff] }
 0x6b3   : > { %7415 = vst [vmem:[%s15621_s20 + $0x98] sm:$0xff] %v7383_v20 }
 0x6b4   : > { %v7245_v39 = vpop.f32.mrf.mxu2  ;;  %v7334_v11 = vpop.f32.mrf.mxu3 }
 0x6b5   : > { %v7246_v44 = vadd.f32 %v7245_v39, %v7157_v42 }
 0x6b6   : > { %v7069_v23 = vpop.f32.mrf.mxu0  ;;  %v7158_v55 = vpop.f32.mrf.mxu1 }
 0x6b7   : > { %v7335_v28 = vadd.f32 %v7334_v11, %v7246_v44  ;;  %v7070_v30 = vadd.f32 %v16047_v4, %v7069_v23 }
 0x6b9   : > { %v7384_v5 = vadd.f32 %v8406_v27, %v7335_v28  ;;  %v7159_v58 = vadd.f32 %v7158_v55, %v7070_v30  ;;  %v8412_v55 = vld [vmem:[%s8816_s18 + $0xd0] sm:$0xff] }
 0x6bb   : > { %7416 = vst [vmem:[%s15621_s20 + $0xa0] sm:$0xff] %v7384_v5 }
 0x6bc   : > { %v7247_v50 = vpop.f32.mrf.mxu2  ;;  %v7336_v57 = vpop.f32.mrf.mxu3 }
 0x6bd   : > { %v7248_v1 = vadd.f32 %v7247_v50, %v7159_v58 }
 0x6be   : > { %v7072_v62 = vpop.f32.mrf.mxu0  ;;  %v7161_v31 = vpop.f32.mrf.mxu1 }
 0x6bf   : > { %v7337_v15 = vadd.f32 %v7336_v57, %v7248_v1  ;;  %v7073_v17 = vadd.f32 %v16047_v4, %v7072_v62 }
 0x6c1   : > { %v7385_v43 = vadd.f32 %v8407_v12, %v7337_v15  ;;  %v7162_v41 = vadd.f32 %v7161_v31, %v7073_v17  ;;  %v8413_v31 = vld [vmem:[%s8816_s18 + $0xd8] sm:$0xff] }
 0x6c3   : > { %7417 = vst [vmem:[%s15621_s20 + $0xa8] sm:$0xff] %v7385_v43 }
 0x6c4   : > { %v7250_v45 = vpop.f32.mrf.mxu2 }
 0x6c5   : > { %v7339_v53 = vpop.f32.mrf.mxu3  ;;  %v7251_v26 = vadd.f32 %v7250_v45, %v7162_v41 }
 0x6c6   : > { %v7074_v21 = vpop.f32.mrf.mxu0  ;;  %v7163_v51 = vpop.f32.mrf.mxu1 }
 0x6c7   : > { %v7340_v46 = vadd.f32 %v7339_v53, %v7251_v26  ;;  %v7075_v14 = vadd.f32 %v16047_v4, %v7074_v21 }
 0x6c9   : > { %v7386_v29 = vadd.f32 %v8408_v49, %v7340_v46  ;;  %v7164_v47 = vadd.f32 %v7163_v51, %v7075_v14  ;;  %v8414_v51 = vld [vmem:[%s8816_s18 + $0xe0] sm:$0xff] }
 0x6cb   : > { %7418 = vst [vmem:[%s15621_s20 + $0xb0] sm:$0xff] %v7386_v29 }
 0x6cc   : > { %v7252_v18 = vpop.f32.mrf.mxu2 }
 0x6cd   : > { %v7341_v24 = vpop.f32.mrf.mxu3  ;;  %v7253_v52 = vadd.f32 %v7252_v18, %v7164_v47 }
 0x6ce   : > { %v7077_v38 = vpop.f32.mrf.mxu0  ;;  %v7166_v13 = vpop.f32.mrf.mxu1 }
 0x6cf   : > { %v7342_v40 = vadd.f32 %v7341_v24, %v7253_v52  ;;  %v7078_v9 = vadd.f32 %v16047_v4, %v7077_v38 }
 0x6d1   : > { %v7387_v48 = vadd.f32 %v8409_v25, %v7342_v40  ;;  %v7167_v35 = vadd.f32 %v7166_v13, %v7078_v9  ;;  %v8415_v13 = vld [vmem:[%s8816_s18 + $0xe8] sm:$0xff] }
 0x6d3   : > { %7419 = vst [vmem:[%s15621_s20 + $0xb8] sm:$0xff] %v7387_v48 }
 0x6d5   : > { %v7255_v56 = vpop.f32.mrf.mxu2  ;;  %v7344_v32 = vpop.f32.mrf.mxu3 }
 0x6d6   : > { %v7256_v8 = vadd.f32 %v7255_v56, %v7167_v35  ;;  %v7079_v3 = vpop.f32.mrf.mxu0  ;;  %v7168_v37 = vpop.f32.mrf.mxu1 }
 0x6d7   : > { %v7080_v54 = vadd.f32 %v16047_v4, %v7079_v3  ;;  %v8416_v3 = vld [vmem:[%s8816_s18 + $0xf0] sm:$0xff] }
 0x6d8   : > { %v7345_v33 = vadd.f32 %v7344_v32, %v7256_v8 }
 0x6d9   : > { %v7169_v22 = vadd.f32 %v7168_v37, %v7080_v54 }
 0x6da   : > { %v7388_v2 = vadd.f32 %v8410_v10, %v7345_v33 }
 0x6dc   : > { %7420 = vst [vmem:[%s15621_s20 + $0xc0] sm:$0xff] %v7388_v2 }
 0x6dd   : > { %v7257_v59 = vpop.f32.mrf.mxu2  ;;  %v7346_v7 = vpop.f32.mrf.mxu3 }
 0x6de   : > { %v7258_v16 = vadd.f32 %v7257_v59, %v7169_v22  ;;  %v7082_v19 = vpop.f32.mrf.mxu0  ;;  %v7171_v0 = vpop.f32.mrf.mxu1  ;;  %v8417_v59 = vld [vmem:[%s8816_s18 + $0xf8] sm:$0xff] }
 0x6df   : > { %v7083_v63 = vadd.f32 %v16047_v4, %v7082_v19 }
 0x6e0   : > { %v7347_v34 = vadd.f32 %v7346_v7, %v7258_v16 }
 0x6e1   : > { %v7172_v6 = vadd.f32 %v7171_v0, %v7083_v63 }
 0x6e2   : > { %v7389_v60 = vadd.f32 %v8411_v36, %v7347_v34 }
 0x6e4   : > { %7421 = vst [vmem:[%s15621_s20 + $0xc8] sm:$0xff] %v7389_v60 }
 0x6e5   : > { %v7260_v61 = vpop.f32.mrf.mxu2  ;;  %v7349_v20 = vpop.f32.mrf.mxu3 }
 0x6e6   : > { %v7261_v42 = vadd.f32 %v7260_v61, %v7172_v6  ;;  %v7084_v39 = vpop.f32.mrf.mxu0  ;;  %v7173_v11 = vpop.f32.mrf.mxu1 }
 0x6e7   : > { %v7085_v23 = vadd.f32 %v16047_v4, %v7084_v39 }
 0x6e8   : > { %v7350_v44 = vadd.f32 %v7349_v20, %v7261_v42 }
 0x6e9   : > { %v7174_v30 = vadd.f32 %v7173_v11, %v7085_v23 }
 0x6ea   : > { %v7390_v28 = vadd.f32 %v8412_v55, %v7350_v44 }
 0x6ec   : > { %7422 = vst [vmem:[%s15621_s20 + $0xd0] sm:$0xff] %v7390_v28 }
 0x6ed   : > { %v7262_v27 = vpop.f32.mrf.mxu2  ;;  %v7351_v5 = vpop.f32.mrf.mxu3 }
 0x6ee   : > { %v7263_v58 = vadd.f32 %v7262_v27, %v7174_v30  ;;  %v7087_v50 = vpop.f32.mrf.mxu0  ;;  %v7176_v57 = vpop.f32.mrf.mxu1 }
 0x6ef   : > { %v7088_v62 = vadd.f32 %v16047_v4, %v7087_v50 }
 0x6f0   : > { %v7352_v1 = vadd.f32 %v7351_v5, %v7263_v58 }
 0x6f1   : > { %v7177_v17 = vadd.f32 %v7176_v57, %v7088_v62 }
 0x6f2   : > { %v7391_v15 = vadd.f32 %v8413_v31, %v7352_v1 }
 0x6f4   : > { %7423 = vst [vmem:[%s15621_s20 + $0xd8] sm:$0xff] %v7391_v15 }
 0x6f5   : > { %v7265_v12 = vpop.f32.mrf.mxu2 }
 0x6f6   : > { %v7354_v43 = vpop.f32.mrf.mxu3  ;;  %v7266_v41 = vadd.f32 %v7265_v12, %v7177_v17  ;;  %v7089_v45 = vpop.f32.mrf.mxu0 }
 0x6f7   : > { %v7178_v53 = vpop.f32.mrf.mxu1  ;;  %v7090_v21 = vadd.f32 %v16047_v4, %v7089_v45 }
 0x6f8   : > { %v7355_v26 = vadd.f32 %v7354_v43, %v7266_v41 }
 0x6f9   : > { %v7179_v14 = vadd.f32 %v7178_v53, %v7090_v21 }
 0x6fa   : > { %v7392_v46 = vadd.f32 %v8414_v51, %v7355_v26 }
 0x6fc   : > { %7424 = vst [vmem:[%s15621_s20 + $0xe0] sm:$0xff] %v7392_v46 }
 0x6fd   : > { %v7267_v49 = vpop.f32.mrf.mxu2 }
 0x6fe   : > { %v7356_v29 = vpop.f32.mrf.mxu3  ;;  %v7268_v47 = vadd.f32 %v7267_v49, %v7179_v14  ;;  %v7092_v18 = vpop.f32.mrf.mxu0 }
 0x6ff   : > { %v7093_v52 = vadd.f32 %v16047_v4, %v7092_v18  ;;  %v7181_v38 = vpop.f32.mrf.mxu1 }
 0x700   : > { %v7357_v24 = vadd.f32 %v7356_v29, %v7268_v47 }
 0x701   : > { %v7182_v9 = vadd.f32 %v7181_v38, %v7093_v52 }
 0x702   : > { %v7393_v40 = vadd.f32 %v8415_v13, %v7357_v24 }
 0x704   : > { %7425 = vst [vmem:[%s15621_s20 + $0xe8] sm:$0xff] %v7393_v40 }
 0x705   : > { %v7270_v25 = vpop.f32.mrf.mxu2 }
 0x706   : > { %v7359_v48 = vpop.f32.mrf.mxu3  ;;  %v7271_v35 = vadd.f32 %v7270_v25, %v7182_v9  ;;  %v7094_v56 = vpop.f32.mrf.mxu0 }
 0x707   : > { %v7095_v8 = vadd.f32 %v16047_v4, %v7094_v56  ;;  %v7183_v33 = vpop.f32.mrf.mxu1 }
 0x708   : > { %v7360_v32 = vadd.f32 %v7359_v48, %v7271_v35 }
 0x709   : > { %v7184_v54 = vadd.f32 %v7183_v33, %v7095_v8 }
 0x70a   : > { %v7394_v37 = vadd.f32 %v8416_v3, %v7360_v32 }
 0x70c   : > { %7426 = vst [vmem:[%s15621_s20 + $0xf0] sm:$0xff] %v7394_v37 }
 0x70d   : > { %v7272_v10 = vpop.f32.mrf.mxu2 }
 0x70e   : > { %v7273_v2 = vadd.f32 %v7272_v10, %v7184_v54  ;;  %v7361_v22 = vpop.f32.mrf.mxu3 }
 0x710   : > { %v7362_v4 = vadd.f32 %v7361_v22, %v7273_v2 }
 0x712   : > { %v7395_v7 = vadd.f32 %v8417_v59, %v7362_v4 }
 0x714   : > { %7427 = vst [vmem:[%s15621_s20 + $0xf8] sm:$0xff] %v7395_v7 }
 0x715   : > { %8595 = shalt.err (!%p8592_p11)
}
 0x716   : > { %s8654_s13 = smov 128   ;;  %s8655_s18 = smov 8  }
 0x717   : > { %8045 = dma.vmem_to_hbm [thread:$0]  (%p8783_p5), %s7442_s29, 4096, %s7444_s1, %s7429_s28, %s8654_s13, %s8654_s13, %s8655_s18  }
 0x718 PF: > { %s7458_s20 = sand.u32 1, %s8630_s24   ;;  %p16812_p12 = scmp.ge.s32.totalorder %s8642_s27, 2 }
 0x719   : > { %s7459_s11 = scalar_lea.sflag [#allocation4], %s7458_s20 }
 0x71a   : > { %p8065_p13 = pnand %p16812_p12, %p8731_p6 }
 0x71c   : > { %p8066_p0 = pneg %p8065_p13 }
 0x71e   : > { %8625 = dma.done.wait (%p8066_p0), %s7459_s11, 4096  }
 0x71f   : > { %8627 = vsyncadd (%p8066_p0), %s7459_s11, 4294963200  ;;  %p22_p3 = scmp.ge.s32.totalorder %s8770_s22, 4   ;;  %s16813_s24 = smov %s8634_s25 }
 0x720   : > { %s16814_s25 = smov %s8638_s26  ;;  %s16815_s26 = smov %s8779_s21 }
 0x721   : > { %s16816_s27 = smov %s8770_s22  ;;  %24 = sbr.rel (!%p22_p3) target bundleno = 9 (0x9), region = 109 }
 0x726   :  { %7465 = vsyncpa [#allocation3], 1 }
 0x727   :  { %7467 = vsyncpa [#allocation3 + $0x1], 1 }
 0x728   :  { %7468 = vsyncpa [#allocation6], 1 }
 0x729   :  { %7469 = vsyncpa [#allocation9], 1 }
 0x72a   :  { %7470 = vsyncpa [#allocation4], 1 }
 0x72b   :  { %7472 = vsyncpa [#allocation4 + $0x1], 1 }

</bundles_post_ra>
